<compile_context>
chip_gen: v6e
topology: v6e:2x2x1
jax: 0.10.0
libtpu: 0.0.40
codegen_flags: <defaults>
</compile_context>

<pallas_src>
import functools

import numpy as np
import jax
import jax.numpy as jnp
from jax import lax
from jax.experimental import pallas as pl
from jax.experimental.pallas import tpu as pltpu


# --------------------------------------------------------------------------
# Pallas kernel
# --------------------------------------------------------------------------
def _cost_volume_kernel(K, L, C, C1,
                        d1_ref, d2_ref, w1r_ref, b1_ref, weffb_ref,
                        out_ref, costp, patch):
    """Per-batch kernel.

    d1_ref    : [1, K, L, C]     Des1 (channels-last)
    d2_ref    : [1, K, L, C]     Des2 (channels-last)
    w1r_ref   : [9*C, C1]        conv1 weights, host-reshaped for im2col GEMM
    b1_ref    : [1, C1]          conv1 bias
    weffb_ref : [N*K*L, C1]      conv2 + mean-pool collapsed, tiled over shifts
    out_ref   : [1, 1, 1]        expected azimuth shift index for this batch
    costp     : VMEM [N, K+2, L+2, C]  zero-bordered cost stack (SAME padding)
    patch     : VMEM [N, K, L, 9*C]    im2col patch matrix
    """
    N = L  # number of azimuthal shifts == azi_n

    d1 = d1_ref[0]                                            # [K, L, C]
    d2 = d2_ref[0]                                            # [K, L, C]

    # ---- SAME-padding border (only the border; interior is overwritten) ----
    # Re-zeroed every step: megacore-safe (each core has its own scratch and
    # may never run program_id==0), and ~3x less vst than a full-buffer fill.
    costp[:, 0:1, :, :] = jnp.zeros((N, 1, L + 2, C), jnp.float32)
    costp[:, K + 1:K + 2, :, :] = jnp.zeros((N, 1, L + 2, C), jnp.float32)
    costp[:, 1:K + 1, 0:1, :] = jnp.zeros((N, K, 1, C), jnp.float32)
    costp[:, 1:K + 1, L + 1:L + 2, :] = jnp.zeros((N, K, 1, C), jnp.float32)

    # ---- cost stack: cost_n[k,l,c] = Des1[k,(l-n) mod L,c] - Des2[k,l,c] ----
    # Each shifted slab comes from two static slices (no doubled-Des1 scratch).
    # TODO(synk): for large azi_n move this unrolled loop onto a grid axis.
    costp[0, 1:K + 1, 1:L + 1, :] = d1 - d2
    for n in range(1, N):
        # l in [n, L): (l-n) mod L == l-n
        costp[n, 1:K + 1, 1 + n:L + 1, :] = d1[:, 0:L - n, :] - d2[:, n:L, :]
        # l in [0, n): (l-n) mod L == l-n+L  (wrap-around part)
        costp[n, 1:K + 1, 1:1 + n, :] = d1[:, L - n:L, :] - d2[:, 0:n, :]

    # ---- im2col: one patch row per (shift, k, l), 9*C columns (dk, dl, c) ---
    for dk in range(3):
        for dl in range(3):
            t = dk * 3 + dl
            patch[:, :, :, t * C:(t + 1) * C] = costp[:, dk:dk + K, dl:dl + L, :]

    # ---- conv1 as ONE GEMM (contraction 9*C), bias, ReLU --------------------
    P = patch[...].reshape(N * K * L, 9 * C)                  # layout-preserving
    hpre = jnp.dot(P, w1r_ref[...], preferred_element_type=jnp.float32)
    h = jnp.maximum(hpre + b1_ref[...], 0.0)                  # [N*K*L, C1]

    # ---- conv2 + global mean pool == weighted reduction with W_eff ----------
    # (b2 adds the same constant to every shift -> softmax-invariant, dropped)
    q = h * weffb_ref[...]                                    # [N*K*L, C1]
    qr = q.reshape(N, K * L, C1)                              # split leading dim
    costs = jnp.sum(jnp.sum(qr, axis=2), axis=1, keepdims=True)   # [N, 1]

    # ---- softmax over shifts + soft-argmax (expected index) ----------------
    mval = jnp.max(costs, axis=0, keepdims=True)
    e = jnp.exp(costs - mval)
    z = jnp.sum(e, axis=0, keepdims=True)
    idx = lax.broadcasted_iota(jnp.int32, (N, 1), 0).astype(jnp.float32)
    num = jnp.sum(e * idx, axis=0, keepdims=True)
    out_ref[0] = num * pl.reciprocal(z, approx=True)          # EUP reciprocal


# --------------------------------------------------------------------------
# Host-side helper: collapse conv2 (SAME) + global mean pool into W_eff
# --------------------------------------------------------------------------
def _make_weff(w2_np, K, L):
    """mean_{k,l} SAME-conv2(h) == sum_{k,l,c1} h * W_eff  (b2 excluded)."""
    C1 = w2_np.shape[2]
    ki = np.arange(K)[:, None, None]
    li = np.arange(L)[None, :, None]
    weff = np.zeros((K, L, C1), np.float32)
    for dk in range(3):
        for dl in range(3):
            valid = ((ki >= dk - 1) & (ki <= K - 2 + dk) &
                     (li >= dl - 1) & (li <= L - 2 + dl)).astype(np.float32)
            weff += valid * w2_np[dk, dl, :, 0][None, None, :]
    return weff / float(K * L)


# --------------------------------------------------------------------------
# Wrapper (layout change + pallas_call plumbing)
# --------------------------------------------------------------------------
def cost_volume_forward(Des1, Des2, params, azi_n):
    """Des1, Des2: [B, C, K, L] float32 (PyTorch NCHW-style). Returns ind: [B]."""
    B, C, K, L = Des1.shape
    assert L == azi_n  # TODO(synk): azi_n != L configurations are not handled.
    w1, b1, w2, b2 = params
    C1 = w1.shape[-1]
    N = azi_n

    d1 = jnp.transpose(Des1, (0, 2, 3, 1)).astype(jnp.float32)    # [B, K, L, C]
    d2 = jnp.transpose(Des2, (0, 2, 3, 1)).astype(jnp.float32)    # [B, K, L, C]
    w1r = jnp.asarray(w1, jnp.float32).reshape(9 * C, C1)         # (dk,dl,c) rows
    b1r = jnp.asarray(b1, jnp.float32).reshape(1, C1)
    weff = _make_weff(np.asarray(w2), K, L)                       # [K, L, C1]
    weffb = jnp.asarray(np.tile(weff.reshape(K * L, C1), (N, 1)), jnp.float32)
    # b2 is softmax-invariant -> intentionally not passed to the kernel.

    kernel = functools.partial(_cost_volume_kernel, K, L, C, C1)

    # TODO(synk): at realistic BUFFER azi_n/K, tile the shift axis (extra
    # "arbitrary" grid dim + chunked scratch) and set vmem_limit_bytes; at these
    # toy sizes the all-shifts scratch is ~1.4 MiB and fits everywhere.
    out = pl.pallas_call(
        kernel,
        out_shape=jax.ShapeDtypeStruct((B, 1, 1), jnp.float32),
        grid_spec=pltpu.PrefetchScalarGridSpec(
            num_scalar_prefetch=0,
            grid=(B,),
            in_specs=[
                pl.BlockSpec((1, K, L, C), lambda b: (b, 0, 0, 0)),
                pl.BlockSpec((1, K, L, C), lambda b: (b, 0, 0, 0)),
                pl.BlockSpec((9 * C, C1), lambda b: (0, 0)),
                pl.BlockSpec((1, C1), lambda b: (0, 0)),
                pl.BlockSpec((N * K * L, C1), lambda b: (0, 0)),
            ],
            out_specs=pl.BlockSpec((1, 1, 1), lambda b: (b, 0, 0)),
            scratch_shapes=[
                pltpu.VMEM((N, K + 2, L + 2, C), jnp.float32),
                pltpu.VMEM((N, K, L, 9 * C), jnp.float32),
            ],
        ),
        compiler_params=pltpu.CompilerParams(
            dimension_semantics=("parallel",)),
    )(d1, d2, w1r, b1r, weffb)

    return out.reshape(B)


# --------------------------------------------------------------------------
# Pure-JAX reference (mirrors the PyTorch forward, incl. the index_list gather)
# --------------------------------------------------------------------------
def reference_forward(Des1, Des2, params, azi_n):
    B, C, K, L = Des1.shape
    w1, b1, w2, b2 = params

    init_index = np.arange(azi_n)
    index_list = np.stack(
        [np.concatenate([init_index[azi_n - i:], init_index[:azi_n - i]])
         for i in range(azi_n)], axis=0)                          # [N, N]

    D1 = Des1[:, :, :, index_list.reshape(-1)]
    D1 = D1.reshape(B, C, K, azi_n, azi_n)
    D1 = jnp.transpose(D1, (0, 1, 3, 2, 4))                       # b c n k l
    cost = D1 - Des2[:, :, None, :, :]                            # [B, C, N, K, L]

    x = jnp.transpose(cost, (0, 2, 3, 4, 1)).reshape(B * azi_n, K, L, C)
    dn = ('NHWC', 'HWIO', 'NHWC')
    h = lax.conv_general_dilated(x, w1, (1, 1), 'SAME', dimension_numbers=dn,
                                 precision=lax.Precision.HIGHEST)
    h = jnp.maximum(h + b1.reshape(1, 1, 1, -1), 0.0)
    o = lax.conv_general_dilated(h, w2, (1, 1), 'SAME', dimension_numbers=dn,
                                 precision=lax.Precision.HIGHEST)
    o = o + b2.reshape(1, 1, 1, -1)
    c = jnp.mean(o, axis=(1, 2, 3)).reshape(B, azi_n)
    p = jax.nn.softmax(c, axis=-1)
    return jnp.sum(p * jnp.arange(azi_n, dtype=jnp.float32)[None], axis=-1)


# --------------------------------------------------------------------------
if __name__ == "__main__":
    azi_n = 8
    B, C, K, L = 2, 32, 8, azi_n      # Des: [B, C, K, L]; inchan=32 as in module
    C1 = C // 2

    key = jax.random.PRNGKey(0)
    kd1, kd2, kw1, kb1, kw2, kb2 = jax.random.split(key, 6)
    Des1 = jax.random.normal(kd1, (B, C, K, L), jnp.float32)
    Des2 = jax.random.normal(kd2, (B, C, K, L), jnp.float32)

    # deterministic synthetic CostNet parameters (HWIO conv weights)
    w1 = 0.2 * jax.random.normal(kw1, (3, 3, C, C1), jnp.float32)
    b1 = 0.1 * jax.random.normal(kb1, (1, C1), jnp.float32)
    w2 = 0.2 * jax.random.normal(kw2, (3, 3, C1, 1), jnp.float32)
    b2 = 0.1 * jax.random.normal(kb2, (1, 1), jnp.float32)
    params = (w1, b1, w2, b2)

    ind = cost_volume_forward(Des1, Des2, params, azi_n)
    jax.block_until_ready(ind)

    ref = reference_forward(Des1, Des2, params, azi_n)
    if not np.allclose(np.asarray(ind), np.asarray(ref), atol=5e-2, rtol=1e-2):
        raise AssertionError(
            f"mismatch: kernel={np.asarray(ind)} ref={np.asarray(ref)}")

    print("KERNEL_OK")
</pallas_src>

<mosaic_0001>
module attributes {stable_mosaic.version = 11 : i64} {
  func.func @_cost_volume_kernel(%arg0: i32, %arg1: memref<1x8x8x32xf32, #tpu.memory_space<vmem>>, %arg2: memref<1x8x8x32xf32, #tpu.memory_space<vmem>>, %arg3: memref<288x16xf32, #tpu.memory_space<vmem>>, %arg4: memref<1x16xf32, #tpu.memory_space<vmem>>, %arg5: memref<512x16xf32, #tpu.memory_space<vmem>>, %arg6: memref<1x1x1xf32, #tpu.memory_space<vmem>>, %arg7: memref<8x10x10x32xf32, #tpu.memory_space<vmem>>, %arg8: memref<8x8x8x288xf32, #tpu.memory_space<vmem>>) attributes {dimension_semantics = [#tpu.dimension_semantics<parallel>], iteration_bounds = array<i64: 2>, scalar_prefetch = 0 : i64, scratch_operands = 2 : i64, tpu.core_type = #tpu.core_type<tc>, window_params = [{transform_indices = @transform_0, window_bounds = array<i64: 1, 8, 8, 32>}, {transform_indices = @transform_1, window_bounds = array<i64: 1, 8, 8, 32>}, {pipeline_mode = #tpu.pipeline_mode<synchronous>, transform_indices = @transform_2, window_bounds = array<i64: 288, 16>}, {pipeline_mode = #tpu.pipeline_mode<synchronous>, transform_indices = @transform_3, window_bounds = array<i64: 1, 16>}, {pipeline_mode = #tpu.pipeline_mode<synchronous>, transform_indices = @transform_4, window_bounds = array<i64: 512, 16>}, {transform_indices = @transform_5, window_bounds = array<i64: 1, 1, 1>}]} {
    %c0 = arith.constant 0 : index
    %c0_0 = arith.constant 0 : index
    %c0_1 = arith.constant 0 : index
    %c0_2 = arith.constant 0 : index
    %0 = vector.load %arg1[%c0, %c0_0, %c0_1, %c0_2] : memref<1x8x8x32xf32, #tpu.memory_space<vmem>>, vector<1x8x8x32xf32>
    %1 = vector.shape_cast %0 : vector<1x8x8x32xf32> to vector<8x8x32xf32>
    %c0_3 = arith.constant 0 : index
    %c0_4 = arith.constant 0 : index
    %c0_5 = arith.constant 0 : index
    %c0_6 = arith.constant 0 : index
    %2 = vector.load %arg2[%c0_3, %c0_4, %c0_5, %c0_6] : memref<1x8x8x32xf32, #tpu.memory_space<vmem>>, vector<1x8x8x32xf32>
    %3 = vector.shape_cast %2 : vector<1x8x8x32xf32> to vector<8x8x32xf32>
    %cst = arith.constant 0.000000e+00 : f32
    %4 = vector.broadcast %cst : f32 to vector<8x1x10x32xf32>
    %c0_7 = arith.constant 0 : index
    %c0_8 = arith.constant 0 : index
    %c0_9 = arith.constant 0 : index
    %c0_10 = arith.constant 0 : index
    %5 = vector.load %arg7[%c0_7, %c0_8, %c0_9, %c0_10] : memref<8x10x10x32xf32, #tpu.memory_space<vmem>>, vector<8x1x10x32xf32>
    tpu.vector_store %arg7[%c0_7, %c0_8, %c0_9, %c0_10], %4 {strides = array<i32>} : memref<8x10x10x32xf32, #tpu.memory_space<vmem>>, vector<8x1x10x32xf32>,
    %cst_11 = arith.constant 0.000000e+00 : f32
    %6 = vector.broadcast %cst_11 : f32 to vector<8x1x10x32xf32>
    %c0_12 = arith.constant 0 : index
    %c9 = arith.constant 9 : index
    %c0_13 = arith.constant 0 : index
    %c0_14 = arith.constant 0 : index
    %7 = vector.load %arg7[%c0_12, %c9, %c0_13, %c0_14] : memref<8x10x10x32xf32, #tpu.memory_space<vmem>>, vector<8x1x10x32xf32>
    tpu.vector_store %arg7[%c0_12, %c9, %c0_13, %c0_14], %6 {strides = array<i32>} : memref<8x10x10x32xf32, #tpu.memory_space<vmem>>, vector<8x1x10x32xf32>,
    %cst_15 = arith.constant 0.000000e+00 : f32
    %8 = vector.broadcast %cst_15 : f32 to vector<8x8x1x32xf32>
    %c0_16 = arith.constant 0 : index
    %c1 = arith.constant 1 : index
    %c0_17 = arith.constant 0 : index
    %c0_18 = arith.constant 0 : index
    %9 = vector.load %arg7[%c0_16, %c1, %c0_17, %c0_18] : memref<8x10x10x32xf32, #tpu.memory_space<vmem>>, vector<8x8x1x32xf32>
    tpu.vector_store %arg7[%c0_16, %c1, %c0_17, %c0_18], %8 {strides = array<i32>} : memref<8x10x10x32xf32, #tpu.memory_space<vmem>>, vector<8x8x1x32xf32>,
    %cst_19 = arith.constant 0.000000e+00 : f32
    %10 = vector.broadcast %cst_19 : f32 to vector<8x8x1x32xf32>
    %c0_20 = arith.constant 0 : index
    %c1_21 = arith.constant 1 : index
    %c9_22 = arith.constant 9 : index
    %c0_23 = arith.constant 0 : index
    %11 = vector.load %arg7[%c0_20, %c1_21, %c9_22, %c0_23] : memref<8x10x10x32xf32, #tpu.memory_space<vmem>>, vector<8x8x1x32xf32>
    tpu.vector_store %arg7[%c0_20, %c1_21, %c9_22, %c0_23], %10 {strides = array<i32>} : memref<8x10x10x32xf32, #tpu.memory_space<vmem>>, vector<8x8x1x32xf32>,
    %12 = arith.subf %1, %3 : vector<8x8x32xf32>
    %c0_24 = arith.constant 0 : index
    %c1_25 = arith.constant 1 : index
    %c1_26 = arith.constant 1 : index
    %c0_27 = arith.constant 0 : index
    %13 = vector.load %arg7[%c0_24, %c1_25, %c1_26, %c0_27] : memref<8x10x10x32xf32, #tpu.memory_space<vmem>>, vector<1x8x8x32xf32>
    %14 = vector.shape_cast %13 : vector<1x8x8x32xf32> to vector<8x8x32xf32>
    %15 = vector.shape_cast %12 : vector<8x8x32xf32> to vector<1x8x8x32xf32>
    tpu.vector_store %arg7[%c0_24, %c1_25, %c1_26, %c0_27], %15 {strides = array<i32>} : memref<8x10x10x32xf32, #tpu.memory_space<vmem>>, vector<1x8x8x32xf32>,
    %16 = vector.extract_strided_slice %1 {offsets = [0, 0, 0], sizes = [8, 7, 32], strides = [1, 1, 1]} : vector<8x8x32xf32> to vector<8x7x32xf32>
    %17 = vector.extract_strided_slice %3 {offsets = [0, 1, 0], sizes = [8, 7, 32], strides = [1, 1, 1]} : vector<8x8x32xf32> to vector<8x7x32xf32>
    %18 = arith.subf %16, %17 : vector<8x7x32xf32>
    %c1_28 = arith.constant 1 : index
    %c1_29 = arith.constant 1 : index
    %c2 = arith.constant 2 : index
    %c0_30 = arith.constant 0 : index
    %19 = vector.load %arg7[%c1_28, %c1_29, %c2, %c0_30] : memref<8x10x10x32xf32, #tpu.memory_space<vmem>>, vector<1x8x7x32xf32>
    %20 = vector.shape_cast %19 : vector<1x8x7x32xf32> to vector<8x7x32xf32>
    %21 = vector.shape_cast %18 : vector<8x7x32xf32> to vector<1x8x7x32xf32>
    tpu.vector_store %arg7[%c1_28, %c1_29, %c2, %c0_30], %21 {strides = array<i32>} : memref<8x10x10x32xf32, #tpu.memory_space<vmem>>, vector<1x8x7x32xf32>,
    %22 = vector.extract_strided_slice %1 {offsets = [0, 7, 0], sizes = [8, 1, 32], strides = [1, 1, 1]} : vector<8x8x32xf32> to vector<8x1x32xf32>
    %23 = vector.extract_strided_slice %3 {offsets = [0, 0, 0], sizes = [8, 1, 32], strides = [1, 1, 1]} : vector<8x8x32xf32> to vector<8x1x32xf32>
    %24 = arith.subf %22, %23 : vector<8x1x32xf32>
    %c1_31 = arith.constant 1 : index
    %c1_32 = arith.constant 1 : index
    %c1_33 = arith.constant 1 : index
    %c0_34 = arith.constant 0 : index
    %25 = vector.load %arg7[%c1_31, %c1_32, %c1_33, %c0_34] : memref<8x10x10x32xf32, #tpu.memory_space<vmem>>, vector<1x8x1x32xf32>
    %26 = vector.shape_cast %25 : vector<1x8x1x32xf32> to vector<8x1x32xf32>
    %27 = vector.shape_cast %24 : vector<8x1x32xf32> to vector<1x8x1x32xf32>
    tpu.vector_store %arg7[%c1_31, %c1_32, %c1_33, %c0_34], %27 {strides = array<i32>} : memref<8x10x10x32xf32, #tpu.memory_space<vmem>>, vector<1x8x1x32xf32>,
    %28 = vector.extract_strided_slice %1 {offsets = [0, 0, 0], sizes = [8, 6, 32], strides = [1, 1, 1]} : vector<8x8x32xf32> to vector<8x6x32xf32>
    %29 = vector.extract_strided_slice %3 {offsets = [0, 2, 0], sizes = [8, 6, 32], strides = [1, 1, 1]} : vector<8x8x32xf32> to vector<8x6x32xf32>
    %30 = arith.subf %28, %29 : vector<8x6x32xf32>
    %c2_35 = arith.constant 2 : index
    %c1_36 = arith.constant 1 : index
    %c3 = arith.constant 3 : index
    %c0_37 = arith.constant 0 : index
    %31 = vector.load %arg7[%c2_35, %c1_36, %c3, %c0_37] : memref<8x10x10x32xf32, #tpu.memory_space<vmem>>, vector<1x8x6x32xf32>
    %32 = vector.shape_cast %31 : vector<1x8x6x32xf32> to vector<8x6x32xf32>
    %33 = vector.shape_cast %30 : vector<8x6x32xf32> to vector<1x8x6x32xf32>
    tpu.vector_store %arg7[%c2_35, %c1_36, %c3, %c0_37], %33 {strides = array<i32>} : memref<8x10x10x32xf32, #tpu.memory_space<vmem>>, vector<1x8x6x32xf32>,
    %34 = vector.extract_strided_slice %1 {offsets = [0, 6, 0], sizes = [8, 2, 32], strides = [1, 1, 1]} : vector<8x8x32xf32> to vector<8x2x32xf32>
    %35 = vector.extract_strided_slice %3 {offsets = [0, 0, 0], sizes = [8, 2, 32], strides = [1, 1, 1]} : vector<8x8x32xf32> to vector<8x2x32xf32>
    %36 = arith.subf %34, %35 : vector<8x2x32xf32>
    %c2_38 = arith.constant 2 : index
    %c1_39 = arith.constant 1 : index
    %c1_40 = arith.constant 1 : index
    %c0_41 = arith.constant 0 : index
    %37 = vector.load %arg7[%c2_38, %c1_39, %c1_40, %c0_41] : memref<8x10x10x32xf32, #tpu.memory_space<vmem>>, vector<1x8x2x32xf32>
    %38 = vector.shape_cast %37 : vector<1x8x2x32xf32> to vector<8x2x32xf32>
    %39 = vector.shape_cast %36 : vector<8x2x32xf32> to vector<1x8x2x32xf32>
    tpu.vector_store %arg7[%c2_38, %c1_39, %c1_40, %c0_41], %39 {strides = array<i32>} : memref<8x10x10x32xf32, #tpu.memory_space<vmem>>, vector<1x8x2x32xf32>,
    %40 = vector.extract_strided_slice %1 {offsets = [0, 0, 0], sizes = [8, 5, 32], strides = [1, 1, 1]} : vector<8x8x32xf32> to vector<8x5x32xf32>
    %41 = vector.extract_strided_slice %3 {offsets = [0, 3, 0], sizes = [8, 5, 32], strides = [1, 1, 1]} : vector<8x8x32xf32> to vector<8x5x32xf32>
    %42 = arith.subf %40, %41 : vector<8x5x32xf32>
    %c3_42 = arith.constant 3 : index
    %c1_43 = arith.constant 1 : index
    %c4 = arith.constant 4 : index
    %c0_44 = arith.constant 0 : index
    %43 = vector.load %arg7[%c3_42, %c1_43, %c4, %c0_44] : memref<8x10x10x32xf32, #tpu.memory_space<vmem>>, vector<1x8x5x32xf32>
    %44 = vector.shape_cast %43 : vector<1x8x5x32xf32> to vector<8x5x32xf32>
    %45 = vector.shape_cast %42 : vector<8x5x32xf32> to vector<1x8x5x32xf32>
    tpu.vector_store %arg7[%c3_42, %c1_43, %c4, %c0_44], %45 {strides = array<i32>} : memref<8x10x10x32xf32, #tpu.memory_space<vmem>>, vector<1x8x5x32xf32>,
    %46 = vector.extract_strided_slice %1 {offsets = [0, 5, 0], sizes = [8, 3, 32], strides = [1, 1, 1]} : vector<8x8x32xf32> to vector<8x3x32xf32>
    %47 = vector.extract_strided_slice %3 {offsets = [0, 0, 0], sizes = [8, 3, 32], strides = [1, 1, 1]} : vector<8x8x32xf32> to vector<8x3x32xf32>
    %48 = arith.subf %46, %47 : vector<8x3x32xf32>
    %c3_45 = arith.constant 3 : index
    %c1_46 = arith.constant 1 : index
    %c1_47 = arith.constant 1 : index
    %c0_48 = arith.constant 0 : index
    %49 = vector.load %arg7[%c3_45, %c1_46, %c1_47, %c0_48] : memref<8x10x10x32xf32, #tpu.memory_space<vmem>>, vector<1x8x3x32xf32>
    %50 = vector.shape_cast %49 : vector<1x8x3x32xf32> to vector<8x3x32xf32>
    %51 = vector.shape_cast %48 : vector<8x3x32xf32> to vector<1x8x3x32xf32>
    tpu.vector_store %arg7[%c3_45, %c1_46, %c1_47, %c0_48], %51 {strides = array<i32>} : memref<8x10x10x32xf32, #tpu.memory_space<vmem>>, vector<1x8x3x32xf32>,
    %52 = vector.extract_strided_slice %1 {offsets = [0, 0, 0], sizes = [8, 4, 32], strides = [1, 1, 1]} : vector<8x8x32xf32> to vector<8x4x32xf32>
    %53 = vector.extract_strided_slice %3 {offsets = [0, 4, 0], sizes = [8, 4, 32], strides = [1, 1, 1]} : vector<8x8x32xf32> to vector<8x4x32xf32>
    %54 = arith.subf %52, %53 : vector<8x4x32xf32>
    %c4_49 = arith.constant 4 : index
    %c1_50 = arith.constant 1 : index
    %c5 = arith.constant 5 : index
    %c0_51 = arith.constant 0 : index
    %55 = vector.load %arg7[%c4_49, %c1_50, %c5, %c0_51] : memref<8x10x10x32xf32, #tpu.memory_space<vmem>>, vector<1x8x4x32xf32>
    %56 = vector.shape_cast %55 : vector<1x8x4x32xf32> to vector<8x4x32xf32>
    %57 = vector.shape_cast %54 : vector<8x4x32xf32> to vector<1x8x4x32xf32>
    tpu.vector_store %arg7[%c4_49, %c1_50, %c5, %c0_51], %57 {strides = array<i32>} : memref<8x10x10x32xf32, #tpu.memory_space<vmem>>, vector<1x8x4x32xf32>,
    %58 = vector.extract_strided_slice %1 {offsets = [0, 4, 0], sizes = [8, 4, 32], strides = [1, 1, 1]} : vector<8x8x32xf32> to vector<8x4x32xf32>
    %59 = vector.extract_strided_slice %3 {offsets = [0, 0, 0], sizes = [8, 4, 32], strides = [1, 1, 1]} : vector<8x8x32xf32> to vector<8x4x32xf32>
    %60 = arith.subf %58, %59 : vector<8x4x32xf32>
    %c4_52 = arith.constant 4 : index
    %c1_53 = arith.constant 1 : index
    %c1_54 = arith.constant 1 : index
    %c0_55 = arith.constant 0 : index
    %61 = vector.load %arg7[%c4_52, %c1_53, %c1_54, %c0_55] : memref<8x10x10x32xf32, #tpu.memory_space<vmem>>, vector<1x8x4x32xf32>
    %62 = vector.shape_cast %61 : vector<1x8x4x32xf32> to vector<8x4x32xf32>
    %63 = vector.shape_cast %60 : vector<8x4x32xf32> to vector<1x8x4x32xf32>
    tpu.vector_store %arg7[%c4_52, %c1_53, %c1_54, %c0_55], %63 {strides = array<i32>} : memref<8x10x10x32xf32, #tpu.memory_space<vmem>>, vector<1x8x4x32xf32>,
    %64 = vector.extract_strided_slice %1 {offsets = [0, 0, 0], sizes = [8, 3, 32], strides = [1, 1, 1]} : vector<8x8x32xf32> to vector<8x3x32xf32>
    %65 = vector.extract_strided_slice %3 {offsets = [0, 5, 0], sizes = [8, 3, 32], strides = [1, 1, 1]} : vector<8x8x32xf32> to vector<8x3x32xf32>
    %66 = arith.subf %64, %65 : vector<8x3x32xf32>
    %c5_56 = arith.constant 5 : index
    %c1_57 = arith.constant 1 : index
    %c6 = arith.constant 6 : index
    %c0_58 = arith.constant 0 : index
    %67 = vector.load %arg7[%c5_56, %c1_57, %c6, %c0_58] : memref<8x10x10x32xf32, #tpu.memory_space<vmem>>, vector<1x8x3x32xf32>
    %68 = vector.shape_cast %67 : vector<1x8x3x32xf32> to vector<8x3x32xf32>
    %69 = vector.shape_cast %66 : vector<8x3x32xf32> to vector<1x8x3x32xf32>
    tpu.vector_store %arg7[%c5_56, %c1_57, %c6, %c0_58], %69 {strides = array<i32>} : memref<8x10x10x32xf32, #tpu.memory_space<vmem>>, vector<1x8x3x32xf32>,
    %70 = vector.extract_strided_slice %1 {offsets = [0, 3, 0], sizes = [8, 5, 32], strides = [1, 1, 1]} : vector<8x8x32xf32> to vector<8x5x32xf32>
    %71 = vector.extract_strided_slice %3 {offsets = [0, 0, 0], sizes = [8, 5, 32], strides = [1, 1, 1]} : vector<8x8x32xf32> to vector<8x5x32xf32>
    %72 = arith.subf %70, %71 : vector<8x5x32xf32>
    %c5_59 = arith.constant 5 : index
    %c1_60 = arith.constant 1 : index
    %c1_61 = arith.constant 1 : index
    %c0_62 = arith.constant 0 : index
    %73 = vector.load %arg7[%c5_59, %c1_60, %c1_61, %c0_62] : memref<8x10x10x32xf32, #tpu.memory_space<vmem>>, vector<1x8x5x32xf32>
    %74 = vector.shape_cast %73 : vector<1x8x5x32xf32> to vector<8x5x32xf32>
    %75 = vector.shape_cast %72 : vector<8x5x32xf32> to vector<1x8x5x32xf32>
    tpu.vector_store %arg7[%c5_59, %c1_60, %c1_61, %c0_62], %75 {strides = array<i32>} : memref<8x10x10x32xf32, #tpu.memory_space<vmem>>, vector<1x8x5x32xf32>,
    %76 = vector.extract_strided_slice %1 {offsets = [0, 0, 0], sizes = [8, 2, 32], strides = [1, 1, 1]} : vector<8x8x32xf32> to vector<8x2x32xf32>
    %77 = vector.extract_strided_slice %3 {offsets = [0, 6, 0], sizes = [8, 2, 32], strides = [1, 1, 1]} : vector<8x8x32xf32> to vector<8x2x32xf32>
    %78 = arith.subf %76, %77 : vector<8x2x32xf32>
    %c6_63 = arith.constant 6 : index
    %c1_64 = arith.constant 1 : index
    %c7 = arith.constant 7 : index
    %c0_65 = arith.constant 0 : index
    %79 = vector.load %arg7[%c6_63, %c1_64, %c7, %c0_65] : memref<8x10x10x32xf32, #tpu.memory_space<vmem>>, vector<1x8x2x32xf32>
    %80 = vector.shape_cast %79 : vector<1x8x2x32xf32> to vector<8x2x32xf32>
    %81 = vector.shape_cast %78 : vector<8x2x32xf32> to vector<1x8x2x32xf32>
    tpu.vector_store %arg7[%c6_63, %c1_64, %c7, %c0_65], %81 {strides = array<i32>} : memref<8x10x10x32xf32, #tpu.memory_space<vmem>>, vector<1x8x2x32xf32>,
    %82 = vector.extract_strided_slice %1 {offsets = [0, 2, 0], sizes = [8, 6, 32], strides = [1, 1, 1]} : vector<8x8x32xf32> to vector<8x6x32xf32>
    %83 = vector.extract_strided_slice %3 {offsets = [0, 0, 0], sizes = [8, 6, 32], strides = [1, 1, 1]} : vector<8x8x32xf32> to vector<8x6x32xf32>
    %84 = arith.subf %82, %83 : vector<8x6x32xf32>
    %c6_66 = arith.constant 6 : index
    %c1_67 = arith.constant 1 : index
    %c1_68 = arith.constant 1 : index
    %c0_69 = arith.constant 0 : index
    %85 = vector.load %arg7[%c6_66, %c1_67, %c1_68, %c0_69] : memref<8x10x10x32xf32, #tpu.memory_space<vmem>>, vector<1x8x6x32xf32>
    %86 = vector.shape_cast %85 : vector<1x8x6x32xf32> to vector<8x6x32xf32>
    %87 = vector.shape_cast %84 : vector<8x6x32xf32> to vector<1x8x6x32xf32>
    tpu.vector_store %arg7[%c6_66, %c1_67, %c1_68, %c0_69], %87 {strides = array<i32>} : memref<8x10x10x32xf32, #tpu.memory_space<vmem>>, vector<1x8x6x32xf32>,
    %88 = vector.extract_strided_slice %1 {offsets = [0, 0, 0], sizes = [8, 1, 32], strides = [1, 1, 1]} : vector<8x8x32xf32> to vector<8x1x32xf32>
    %89 = vector.extract_strided_slice %3 {offsets = [0, 7, 0], sizes = [8, 1, 32], strides = [1, 1, 1]} : vector<8x8x32xf32> to vector<8x1x32xf32>
    %90 = arith.subf %88, %89 : vector<8x1x32xf32>
    %c7_70 = arith.constant 7 : index
    %c1_71 = arith.constant 1 : index
    %c8 = arith.constant 8 : index
    %c0_72 = arith.constant 0 : index
    %91 = vector.load %arg7[%c7_70, %c1_71, %c8, %c0_72] : memref<8x10x10x32xf32, #tpu.memory_space<vmem>>, vector<1x8x1x32xf32>
    %92 = vector.shape_cast %91 : vector<1x8x1x32xf32> to vector<8x1x32xf32>
    %93 = vector.shape_cast %90 : vector<8x1x32xf32> to vector<1x8x1x32xf32>
    tpu.vector_store %arg7[%c7_70, %c1_71, %c8, %c0_72], %93 {strides = array<i32>} : memref<8x10x10x32xf32, #tpu.memory_space<vmem>>, vector<1x8x1x32xf32>,
    %94 = vector.extract_strided_slice %1 {offsets = [0, 1, 0], sizes = [8, 7, 32], strides = [1, 1, 1]} : vector<8x8x32xf32> to vector<8x7x32xf32>
    %95 = vector.extract_strided_slice %3 {offsets = [0, 0, 0], sizes = [8, 7, 32], strides = [1, 1, 1]} : vector<8x8x32xf32> to vector<8x7x32xf32>
    %96 = arith.subf %94, %95 : vector<8x7x32xf32>
    %c7_73 = arith.constant 7 : index
    %c1_74 = arith.constant 1 : index
    %c1_75 = arith.constant 1 : index
    %c0_76 = arith.constant 0 : index
    %97 = vector.load %arg7[%c7_73, %c1_74, %c1_75, %c0_76] : memref<8x10x10x32xf32, #tpu.memory_space<vmem>>, vector<1x8x7x32xf32>
    %98 = vector.shape_cast %97 : vector<1x8x7x32xf32> to vector<8x7x32xf32>
    %99 = vector.shape_cast %96 : vector<8x7x32xf32> to vector<1x8x7x32xf32>
    tpu.vector_store %arg7[%c7_73, %c1_74, %c1_75, %c0_76], %99 {strides = array<i32>} : memref<8x10x10x32xf32, #tpu.memory_space<vmem>>, vector<1x8x7x32xf32>,
    %c0_77 = arith.constant 0 : index
    %c0_78 = arith.constant 0 : index
    %c0_79 = arith.constant 0 : index
    %c0_80 = arith.constant 0 : index
    %100 = vector.load %arg7[%c0_77, %c0_78, %c0_79, %c0_80] : memref<8x10x10x32xf32, #tpu.memory_space<vmem>>, vector<8x8x8x32xf32>
    %c0_81 = arith.constant 0 : index
    %c0_82 = arith.constant 0 : index
    %c0_83 = arith.constant 0 : index
    %c0_84 = arith.constant 0 : index
    %101 = vector.load %arg8[%c0_81, %c0_82, %c0_83, %c0_84] : memref<8x8x8x288xf32, #tpu.memory_space<vmem>>, vector<8x8x8x32xf32>
    tpu.vector_store %arg8[%c0_81, %c0_82, %c0_83, %c0_84], %100 {strides = array<i32>} : memref<8x8x8x288xf32, #tpu.memory_space<vmem>>, vector<8x8x8x32xf32>,
    %c0_85 = arith.constant 0 : index
    %c0_86 = arith.constant 0 : index
    %c1_87 = arith.constant 1 : index
    %c0_88 = arith.constant 0 : index
    %102 = vector.load %arg7[%c0_85, %c0_86, %c1_87, %c0_88] : memref<8x10x10x32xf32, #tpu.memory_space<vmem>>, vector<8x8x8x32xf32>
    %c0_89 = arith.constant 0 : index
    %c0_90 = arith.constant 0 : index
    %c0_91 = arith.constant 0 : index
    %c32 = arith.constant 32 : index
    %103 = vector.load %arg8[%c0_89, %c0_90, %c0_91, %c32] : memref<8x8x8x288xf32, #tpu.memory_space<vmem>>, vector<8x8x8x32xf32>
    tpu.vector_store %arg8[%c0_89, %c0_90, %c0_91, %c32], %102 {strides = array<i32>} : memref<8x8x8x288xf32, #tpu.memory_space<vmem>>, vector<8x8x8x32xf32>,
    %c0_92 = arith.constant 0 : index
    %c0_93 = arith.constant 0 : index
    %c2_94 = arith.constant 2 : index
    %c0_95 = arith.constant 0 : index
    %104 = vector.load %arg7[%c0_92, %c0_93, %c2_94, %c0_95] : memref<8x10x10x32xf32, #tpu.memory_space<vmem>>, vector<8x8x8x32xf32>
    %c0_96 = arith.constant 0 : index
    %c0_97 = arith.constant 0 : index
    %c0_98 = arith.constant 0 : index
    %c64 = arith.constant 64 : index
    %105 = vector.load %arg8[%c0_96, %c0_97, %c0_98, %c64] : memref<8x8x8x288xf32, #tpu.memory_space<vmem>>, vector<8x8x8x32xf32>
    tpu.vector_store %arg8[%c0_96, %c0_97, %c0_98, %c64], %104 {strides = array<i32>} : memref<8x8x8x288xf32, #tpu.memory_space<vmem>>, vector<8x8x8x32xf32>,
    %c0_99 = arith.constant 0 : index
    %c1_100 = arith.constant 1 : index
    %c0_101 = arith.constant 0 : index
    %c0_102 = arith.constant 0 : index
    %106 = vector.load %arg7[%c0_99, %c1_100, %c0_101, %c0_102] : memref<8x10x10x32xf32, #tpu.memory_space<vmem>>, vector<8x8x8x32xf32>
    %c0_103 = arith.constant 0 : index
    %c0_104 = arith.constant 0 : index
    %c0_105 = arith.constant 0 : index
    %c96 = arith.constant 96 : index
    %107 = vector.load %arg8[%c0_103, %c0_104, %c0_105, %c96] : memref<8x8x8x288xf32, #tpu.memory_space<vmem>>, vector<8x8x8x32xf32>
    tpu.vector_store %arg8[%c0_103, %c0_104, %c0_105, %c96], %106 {strides = array<i32>} : memref<8x8x8x288xf32, #tpu.memory_space<vmem>>, vector<8x8x8x32xf32>,
    %c0_106 = arith.constant 0 : index
    %c1_107 = arith.constant 1 : index
    %c1_108 = arith.constant 1 : index
    %c0_109 = arith.constant 0 : index
    %108 = vector.load %arg7[%c0_106, %c1_107, %c1_108, %c0_109] : memref<8x10x10x32xf32, #tpu.memory_space<vmem>>, vector<8x8x8x32xf32>
    %c0_110 = arith.constant 0 : index
    %c0_111 = arith.constant 0 : index
    %c0_112 = arith.constant 0 : index
    %c128 = arith.constant 128 : index
    %109 = vector.load %arg8[%c0_110, %c0_111, %c0_112, %c128] : memref<8x8x8x288xf32, #tpu.memory_space<vmem>>, vector<8x8x8x32xf32>
    tpu.vector_store %arg8[%c0_110, %c0_111, %c0_112, %c128], %108 {strides = array<i32>} : memref<8x8x8x288xf32, #tpu.memory_space<vmem>>, vector<8x8x8x32xf32>,
    %c0_113 = arith.constant 0 : index
    %c1_114 = arith.constant 1 : index
    %c2_115 = arith.constant 2 : index
    %c0_116 = arith.constant 0 : index
    %110 = vector.load %arg7[%c0_113, %c1_114, %c2_115, %c0_116] : memref<8x10x10x32xf32, #tpu.memory_space<vmem>>, vector<8x8x8x32xf32>
    %c0_117 = arith.constant 0 : index
    %c0_118 = arith.constant 0 : index
    %c0_119 = arith.constant 0 : index
    %c160 = arith.constant 160 : index
    %111 = vector.load %arg8[%c0_117, %c0_118, %c0_119, %c160] : memref<8x8x8x288xf32, #tpu.memory_space<vmem>>, vector<8x8x8x32xf32>
    tpu.vector_store %arg8[%c0_117, %c0_118, %c0_119, %c160], %110 {strides = array<i32>} : memref<8x8x8x288xf32, #tpu.memory_space<vmem>>, vector<8x8x8x32xf32>,
    %c0_120 = arith.constant 0 : index
    %c2_121 = arith.constant 2 : index
    %c0_122 = arith.constant 0 : index
    %c0_123 = arith.constant 0 : index
    %112 = vector.load %arg7[%c0_120, %c2_121, %c0_122, %c0_123] : memref<8x10x10x32xf32, #tpu.memory_space<vmem>>, vector<8x8x8x32xf32>
    %c0_124 = arith.constant 0 : index
    %c0_125 = arith.constant 0 : index
    %c0_126 = arith.constant 0 : index
    %c192 = arith.constant 192 : index
    %113 = vector.load %arg8[%c0_124, %c0_125, %c0_126, %c192] : memref<8x8x8x288xf32, #tpu.memory_space<vmem>>, vector<8x8x8x32xf32>
    tpu.vector_store %arg8[%c0_124, %c0_125, %c0_126, %c192], %112 {strides = array<i32>} : memref<8x8x8x288xf32, #tpu.memory_space<vmem>>, vector<8x8x8x32xf32>,
    %c0_127 = arith.constant 0 : index
    %c2_128 = arith.constant 2 : index
    %c1_129 = arith.constant 1 : index
    %c0_130 = arith.constant 0 : index
    %114 = vector.load %arg7[%c0_127, %c2_128, %c1_129, %c0_130] : memref<8x10x10x32xf32, #tpu.memory_space<vmem>>, vector<8x8x8x32xf32>
    %c0_131 = arith.constant 0 : index
    %c0_132 = arith.constant 0 : index
    %c0_133 = arith.constant 0 : index
    %c224 = arith.constant 224 : index
    %115 = vector.load %arg8[%c0_131, %c0_132, %c0_133, %c224] : memref<8x8x8x288xf32, #tpu.memory_space<vmem>>, vector<8x8x8x32xf32>
    tpu.vector_store %arg8[%c0_131, %c0_132, %c0_133, %c224], %114 {strides = array<i32>} : memref<8x8x8x288xf32, #tpu.memory_space<vmem>>, vector<8x8x8x32xf32>,
    %c0_134 = arith.constant 0 : index
    %c2_135 = arith.constant 2 : index
    %c2_136 = arith.constant 2 : index
    %c0_137 = arith.constant 0 : index
    %116 = vector.load %arg7[%c0_134, %c2_135, %c2_136, %c0_137] : memref<8x10x10x32xf32, #tpu.memory_space<vmem>>, vector<8x8x8x32xf32>
    %c0_138 = arith.constant 0 : index
    %c0_139 = arith.constant 0 : index
    %c0_140 = arith.constant 0 : index
    %c256 = arith.constant 256 : index
    %117 = vector.load %arg8[%c0_138, %c0_139, %c0_140, %c256] : memref<8x8x8x288xf32, #tpu.memory_space<vmem>>, vector<8x8x8x32xf32>
    tpu.vector_store %arg8[%c0_138, %c0_139, %c0_140, %c256], %116 {strides = array<i32>} : memref<8x8x8x288xf32, #tpu.memory_space<vmem>>, vector<8x8x8x32xf32>,
    %c0_141 = arith.constant 0 : index
    %c0_142 = arith.constant 0 : index
    %c0_143 = arith.constant 0 : index
    %c0_144 = arith.constant 0 : index
    %118 = vector.load %arg8[%c0_141, %c0_142, %c0_143, %c0_144] : memref<8x8x8x288xf32, #tpu.memory_space<vmem>>, vector<8x8x8x288xf32>
    %119 = vector.shape_cast %118 : vector<8x8x8x288xf32> to vector<512x288xf32>
    %c0_145 = arith.constant 0 : index
    %c0_146 = arith.constant 0 : index
    %120 = vector.load %arg3[%c0_145, %c0_146] : memref<288x16xf32, #tpu.memory_space<vmem>>, vector<288x16xf32>
    %cst_147 = arith.constant dense<0.000000e+00> : vector<512x16xf32>
    %121 = tpu.matmul %119, %120, %cst_147 {dimension_numbers = #tpu.dot_dimension_numbers<[1], [0], [0], [1], [0, 0, 1, 1], [], []>} : vector<512x288xf32>, vector<288x16xf32>, vector<512x16xf32> -> vector<512x16xf32>
    %c0_148 = arith.constant 0 : index
    %c0_149 = arith.constant 0 : index
    %122 = vector.load %arg4[%c0_148, %c0_149] : memref<1x16xf32, #tpu.memory_space<vmem>>, vector<1x16xf32>
    %123 = vector.broadcast %122 : vector<1x16xf32> to vector<512x16xf32>
    %124 = arith.addf %121, %123 : vector<512x16xf32>
    %cst_150 = arith.constant 0.000000e+00 : f32
    %125 = vector.broadcast %cst_150 : f32 to vector<512x16xf32>
    %126 = arith.maximumf %124, %125 : vector<512x16xf32>
    %c0_151 = arith.constant 0 : index
    %c0_152 = arith.constant 0 : index
    %127 = vector.load %arg5[%c0_151, %c0_152] : memref<512x16xf32, #tpu.memory_space<vmem>>, vector<512x16xf32>
    %128 = arith.mulf %126, %127 : vector<512x16xf32>
    %129 = vector.shape_cast %128 : vector<512x16xf32> to vector<8x64x16xf32>
    %cst_153 = arith.constant dense<0.000000e+00> : vector<8x64xf32>
    %130 = vector.multi_reduction <add>, %129, %cst_153 [2] : vector<8x64x16xf32> to vector<8x64xf32>
    %cst_154 = arith.constant dense<0.000000e+00> : vector<8xf32>
    %131 = vector.multi_reduction <add>, %130, %cst_154 [1] : vector<8x64xf32> to vector<8xf32>
    %132 = vector.shape_cast %131 : vector<8xf32> to vector<8x1xf32>
    %cst_155 = arith.constant dense<0xFF800000> : vector<1xf32>
    %133 = vector.multi_reduction <maximumf>, %132, %cst_155 [0] : vector<8x1xf32> to vector<1xf32>
    %134 = vector.shape_cast %133 : vector<1xf32> to vector<1x1xf32>
    %135 = vector.broadcast %134 : vector<1x1xf32> to vector<8x1xf32>
    %136 = arith.subf %132, %135 : vector<8x1xf32>
    %137 = math.exp %136 : vector<8x1xf32>
    %cst_156 = arith.constant dense<0.000000e+00> : vector<1xf32>
    %138 = vector.multi_reduction <add>, %137, %cst_156 [0] : vector<8x1xf32> to vector<1xf32>
    %139 = vector.shape_cast %138 : vector<1xf32> to vector<1x1xf32>
    %140 = tpu.iota {dimensions = array<i32: 0>} : vector<8x1xi32>
    %141 = arith.sitofp %140 : vector<8x1xi32> to vector<8x1xf32>
    %142 = arith.mulf %137, %141 : vector<8x1xf32>
    %cst_157 = arith.constant dense<0.000000e+00> : vector<1xf32>
    %143 = vector.multi_reduction <add>, %142, %cst_157 [0] : vector<8x1xf32> to vector<1xf32>
    %144 = vector.shape_cast %143 : vector<1xf32> to vector<1x1xf32>
    %145 = tpu.reciprocal %139 {approx = true} : vector<1x1xf32> -> vector<1x1xf32>
    %146 = arith.mulf %144, %145 : vector<1x1xf32>
    %c0_158 = arith.constant 0 : index
    %c0_159 = arith.constant 0 : index
    %c0_160 = arith.constant 0 : index
    %147 = vector.load %arg6[%c0_158, %c0_159, %c0_160] : memref<1x1x1xf32, #tpu.memory_space<vmem>>, vector<1x1x1xf32>
    %148 = vector.shape_cast %147 : vector<1x1x1xf32> to vector<1x1xf32>
    %149 = vector.shape_cast %146 : vector<1x1xf32> to vector<1x1x1xf32>
    tpu.vector_store %arg6[%c0_158, %c0_159, %c0_160], %149 {strides = array<i32>} : memref<1x1x1xf32, #tpu.memory_space<vmem>>, vector<1x1x1xf32>,
    return
  }
  func.func @transform_0(%arg0: i32) -> (i32, i32, i32, i32) {
    %c0_i32 = arith.constant 0 : i32
    %c0_i32_0 = arith.constant 0 : i32
    %c0_i32_1 = arith.constant 0 : i32
    %c0_i32_2 = arith.constant 0 : i32
    return %arg0, %c0_i32, %c0_i32_0, %c0_i32_1 : i32, i32, i32, i32
  }
  func.func @transform_1(%arg0: i32) -> (i32, i32, i32, i32) {
    %c0_i32 = arith.constant 0 : i32
    %c0_i32_0 = arith.constant 0 : i32
    %c0_i32_1 = arith.constant 0 : i32
    %c0_i32_2 = arith.constant 0 : i32
    return %arg0, %c0_i32, %c0_i32_0, %c0_i32_1 : i32, i32, i32, i32
  }
  func.func @transform_2(%arg0: i32) -> (i32, i32) {
    %c0_i32 = arith.constant 0 : i32
    %c0_i32_0 = arith.constant 0 : i32
    %c0_i32_1 = arith.constant 0 : i32
    return %c0_i32, %c0_i32_0 : i32, i32
  }
  func.func @transform_3(%arg0: i32) -> (i32, i32) {
    %c0_i32 = arith.constant 0 : i32
    %c0_i32_0 = arith.constant 0 : i32
    %c0_i32_1 = arith.constant 0 : i32
    return %c0_i32, %c0_i32_0 : i32, i32
  }
  func.func @transform_4(%arg0: i32) -> (i32, i32) {
    %c0_i32 = arith.constant 0 : i32
    %c0_i32_0 = arith.constant 0 : i32
    %c0_i32_1 = arith.constant 0 : i32
    return %c0_i32, %c0_i32_0 : i32, i32
  }
  func.func @transform_5(%arg0: i32) -> (i32, i32, i32) {
    %c0_i32 = arith.constant 0 : i32
    %c0_i32_0 = arith.constant 0 : i32
    %c0_i32_1 = arith.constant 0 : i32
    return %arg0, %c0_i32, %c0_i32_0 : i32, i32, i32
  }
}

</mosaic_0001>

<bundles_post_ra>
// kernel: tpu_custom_call.1
= control target key start
LH: loop header
LB: loop body
LE: loop exit
PB: predicated region body
PF: predicated region fallthrough
CT: control target
= control target key end

     0   :  { %s5896_s18 = smov 0   ;;  %s8998_s0 = inlined_call_operand.vmem [shape: f32[2,8,8,32], index: 0, kind: input, shape index: {}]   ;;  %s8999_s1 = inlined_call_operand.vmem [shape: f32[2,8,8,32], index: 1, kind: input, shape index: {}]   ;;  %s9000_s2 = inlined_call_operand.vmem [shape: f32[288,16], index: 2, kind: input, shape index: {}]   ;;  %s9001_s3 = inlined_call_operand.vmem [shape: f32[1,16], index: 3, kind: input, shape index: {}]   ;;  %s9002_s4 = inlined_call_operand.vmem [shape: f32[512,16], index: 4, kind: input, shape index: {}]   ;;  %s9003_s5 = inlined_call_operand.vmem [shape: f32[2,1,1], index: 5, kind: output, shape index: {}]  }
   0x1 LB: > { %s5518_s19 = sadd.s32 4294967295, %s5860_s18   ;;  %p5522_p0 = scmp.ge.s32.totalorder %s5860_s18, 1  ;;  %s5860_s18 = sphi %s5896_s18, %s15_s18  }
   0x2   : > { %p197_p1 = scmp.lt.s32.totalorder %s5860_s18, 3 }
   0x4   : > { %p198_p2 = pnand %p5522_p0, %p197_p1 }
   0x6   : > { %201 = sbr.rel (%p198_p2) target bundleno = 1568 (0x620), region = 40 }
   0xb   : > { %vm257_vm0 = vcmask 261120   ;;  %vm259_vm1 = vcmask 254976   ;;  %p5906_p3 = scmp.lt.s32.totalorder %s5518_s19, 1  ;;  %v5862_v0 = vmov 0.0   ;;  %vm293_vm2 = vcmask 253952   ;;  %s5863_s28 = smov 32  }
   0xc   : > { %258 = vst.msk [vmem:[#allocation2] sm:$0xff] %vm257_vm0, %v5862_v0  ;;  %261 = vst.msk [vmem:[#allocation2 + $0xa0] sm:$0xff] %vm257_vm0, %v5862_v0  ;;  %3864 = vmatprep.subr.mxu0 %v5862_v0  ;;  %5768 = vmatprep.subr.mxu1 %v5862_v0  ;;  %vm471_vm3 = vcmask 260096   ;;  %vm480_vm4 = vcmask 261127   ;;  %vm514_vm5 = vcmask 259072   ;;  %vm523_vm6 = vcmask 261126  }
   0xd   : > { %260 = vst.msk [vmem:[#allocation2 + $0x8] sm:$0x3] %vm259_vm1, %v5862_v0  ;;  %262 = vst.msk [vmem:[#allocation2 + $0xa8] sm:$0x3] %vm259_vm1, %v5862_v0  ;;  %s9020_s19 = smov (!%p5906_p3, %s5518_s19), 1  ;;  %vm557_vm7 = vcmask 258048  }
   0xe   : > { %263 = vst.msk [vmem:[#allocation2 + $0x140] sm:$0xff] %vm257_vm0, %v5862_v0  ;;  %265 = vst.msk [vmem:[#allocation2 + $0x1e0] sm:$0xff] %vm257_vm0, %v5862_v0  ;;  %s5594_s21 = sshll.u32 %s9020_s19, 6  ;;  %vm566_vm8 = vcmask 261125   ;;  %vm600_vm9 = vcmask 257024   ;;  %vm609_vm10 = vcmask 261124   ;;  %s240_s15 = scalar_lea.vmem %s9003_s5, %s9020_s19 }
   0xf   : > { %264 = vst.msk [vmem:[#allocation2 + $0x148] sm:$0x3] %vm259_vm1, %v5862_v0  ;;  %266 = vst.msk [vmem:[#allocation2 + $0x1e8] sm:$0x3] %vm259_vm1, %v5862_v0  ;;  %s6244_s24 = scalar_lea.vmem %s8998_s0, %s5594_s21  ;;  %s6251_s27 = scalar_lea.vmem %s8999_s1, %s5594_s21  ;;  %vm643_vm11 = vcmask 256000   ;;  %vm652_vm12 = vcmask 261123  }
  0x10   : > { %267 = vst.msk [vmem:[#allocation2 + $0x280] sm:$0xff] %vm257_vm0, %v5862_v0  ;;  %269 = vst.msk [vmem:[#allocation2 + $0x320] sm:$0xff] %vm257_vm0, %v5862_v0  ;;  %v6254_v1 = vld [vmem:[%s6244_s24 + $0x8] sm:$0xff]  ;;  %v6260_v3 = vld [vmem:[%s6244_s24 + $0x10] sm:$0xff]  ;;  %vm694_vm13 = vcmask 261122   ;;  %vm736_vm14 = vcmask 261121  }
  0x11   : > { %268 = vst.msk [vmem:[#allocation2 + $0x288] sm:$0x3] %vm259_vm1, %v5862_v0  ;;  %270 = vst.msk [vmem:[#allocation2 + $0x328] sm:$0x3] %vm259_vm1, %v5862_v0  ;;  %v6257_v2 = vld [vmem:[%s6251_s27 + $0x8] sm:$0xff]  ;;  %v6265_v5 = vld [vmem:[%s6251_s27 + $0x10] sm:$0xff] }
  0x12   : > { %271 = vst.msk [vmem:[#allocation2 + $0x3c0] sm:$0xff] %vm257_vm0, %v5862_v0  ;;  %273 = vst.msk [vmem:[#allocation2 + $0x460] sm:$0xff] %vm257_vm0, %v5862_v0  ;;  %v423_v4 = vsub.f32 %v6254_v1, %v6257_v2  ;;  %v6268_v6 = vld [vmem:[%s6244_s24] sm:$0xff]  ;;  %v447_v8 = vrot.slane %v6257_v2, 1  ;;  %v490_v9 = vrot.slane %v6257_v2, 2  ;;  %v533_v10 = vrot.slane %v6257_v2, 3 }
  0x13   : > { %272 = vst.msk [vmem:[#allocation2 + $0x3c8] sm:$0x3] %vm259_vm1, %v5862_v0  ;;  %274 = vst.msk [vmem:[#allocation2 + $0x468] sm:$0x3] %vm259_vm1, %v5862_v0  ;;  %v6271_v7 = vld [vmem:[%s6251_s27] sm:$0xff]  ;;  %v424_v13 = vsub.f32 %v6260_v3, %v6265_v5  ;;  %v448_v17 = vrot.slane %v6265_v5, 1 }
  0x14   : > { %276 = vst.msk [vmem:[#allocation2 + $0x90] sm:$0xff] %vm257_vm0, %v5862_v0  ;;  %278 = vst.msk [vmem:[#allocation2 + $0x130] sm:$0xff] %vm257_vm0, %v5862_v0  ;;  %v873_v11 = vld [vmem:[#allocation2 + $0x1] sm:$0xff]  ;;  %v422_v14 = vsub.f32 %v6268_v6, %v6271_v7  ;;  %v446_v16 = vrot.slane %v6271_v7, 1  ;;  %v6291_v19 = vld [vmem:[%s6244_s24 + $0x18] sm:$0xff]  ;;  %v463_v21 = vsub.f32 %v6254_v1, %v447_v8  ;;  %v489_v22 = vrot.slane %v6271_v7, 2 }
  0x15   : > { %277 = vst.msk [vmem:[#allocation2 + $0x98] sm:$0x3] %vm259_vm1, %v5862_v0  ;;  %279 = vst.msk [vmem:[#allocation2 + $0x138] sm:$0x3] %vm259_vm1, %v5862_v0  ;;  %v881_v12 = vld [vmem:[#allocation2 + $0xa1] sm:$0xff]  ;;  %1001 = vrot.lane.b32.xlu0 %v873_v11, %s5863_s28  ;;  %v6294_v20 = vld [vmem:[%s6251_s27 + $0x18] sm:$0xff]  ;;  %v506_v23 = vsub.f32 %v6254_v1, %v490_v9  ;;  %v464_v31 = vsub.f32 %v6260_v3, %v448_v17  ;;  %v549_v53 = vsub.f32 %v6254_v1, %v533_v10 }
  0x16   : > { %280 = vst.msk [vmem:[#allocation2 + $0x1d0] sm:$0xff] %vm257_vm0, %v5862_v0  ;;  %282 = vst.msk [vmem:[#allocation2 + $0x270] sm:$0xff] %vm257_vm0, %v5862_v0  ;;  %v6281_v15 = vld [vmem:[%s6244_s24 + $0x20] sm:$0xff]  ;;  %v491_v24 = vrot.slane %v6265_v5, 2  ;;  %v425_v26 = vsub.f32 %v6291_v19, %v6294_v20  ;;  %v6307_v27 = vld [vmem:[%s6244_s24 + $0x30] sm:$0xff]  ;;  %v462_v30 = vsub.f32 %v6268_v6, %v446_v16  ;;  %v449_v34 = vrot.slane %v6294_v20, 1 }
  0x17   : > { %281 = vst.msk [vmem:[#allocation2 + $0x1d8] sm:$0x3] %vm259_vm1, %v5862_v0  ;;  %283 = vst.msk [vmem:[#allocation2 + $0x278] sm:$0x3] %vm259_vm1, %v5862_v0  ;;  %v6288_v18 = vld [vmem:[%s6251_s27 + $0x20] sm:$0xff]  ;;  %v6310_v28 = vld [vmem:[%s6251_s27 + $0x30] sm:$0xff]  ;;  %v505_v39 = vsub.f32 %v6268_v6, %v489_v22 }
  0x18   : > { %284 = vst.msk [vmem:[#allocation2 + $0x310] sm:$0xff] %vm257_vm0, %v5862_v0  ;;  %286 = vst.msk [vmem:[#allocation2 + $0x3b0] sm:$0xff] %vm257_vm0, %v5862_v0  ;;  %v426_v25 = vsub.f32 %v6281_v15, %v6288_v18  ;;  %v6313_v29 = vld [vmem:[%s6244_s24 + $0x28] sm:$0xff]  ;;  %v428_v32 = vsub.f32 %v6307_v27, %v6310_v28  ;;  %v450_v35 = vrot.slane %v6288_v18, 1  ;;  %v452_v36 = vrot.slane %v6310_v28, 1  ;;  %v745_v45 = vld [vmem:[#allocation2] sm:$0xff] }
  0x19   : > { %285 = vst.msk [vmem:[#allocation2 + $0x318] sm:$0x3] %vm259_vm1, %v5862_v0  ;;  %287 = vst.msk [vmem:[#allocation2 + $0x3b8] sm:$0x3] %vm259_vm1, %v5862_v0  ;;  %v6320_v33 = vld [vmem:[%s6251_s27 + $0x28] sm:$0xff]  ;;  %v507_v40 = vsub.f32 %v6260_v3, %v491_v24  ;;  %1017 = vrot.lane.b32.xlu0 %v881_v12, %s5863_s28  ;;  %v465_v41 = vsub.f32 %v6291_v19, %v449_v34  ;;  %v492_v44 = vrot.slane %v6294_v20, 2 }
  0x1a   : > { %288 = vst.msk [vmem:[#allocation2 + $0x450] sm:$0xff] %vm257_vm0, %v5862_v0  ;;  %290 = vst.msk [vmem:[#allocation2 + $0x4f0] sm:$0xff] %vm257_vm0, %v5862_v0  ;;  %v427_v37 = vsub.f32 %v6313_v29, %v6320_v33  ;;  %v451_v38 = vrot.slane %v6320_v33, 1  ;;  %v466_v42 = vsub.f32 %v6281_v15, %v450_v35  ;;  %v468_v43 = vsub.f32 %v6307_v27, %v452_v36  ;;  %v753_v46 = vld [vmem:[#allocation2 + $0xa0] sm:$0xff]  ;;  %s5864_s29 = smov 64   ;;  %s5865_s17 = smov 96  }
  0x1b   : > { %289 = vst.msk [vmem:[#allocation2 + $0x458] sm:$0x3] %vm259_vm1, %v5862_v0  ;;  %291 = vst.msk [vmem:[#allocation2 + $0x4f8] sm:$0x3] %vm259_vm1, %v5862_v0  ;;  %v493_v48 = vrot.slane %v6288_v18, 2  ;;  %v494_v49 = vrot.slane %v6320_v33, 2  ;;  %v508_v51 = vsub.f32 %v6291_v19, %v492_v44 }
  0x1c   : > { %294 = vst.msk [vmem:[#allocation2 + $0x10] sm:$0x1] %vm293_vm2, %v5862_v0  ;;  %295 = vst.msk [vmem:[#allocation2 + $0x20] sm:$0x1] %vm293_vm2, %v5862_v0  ;;  %v467_v47 = vsub.f32 %v6313_v29, %v451_v38  ;;  %v495_v50 = vrot.slane %v6310_v28, 2  ;;  %v532_v52 = vrot.slane %v6271_v7, 3 }
  0x1d   : > { %296 = vst.msk [vmem:[#allocation2 + $0x30] sm:$0x1] %vm293_vm2, %v5862_v0  ;;  %297 = vst.msk [vmem:[#allocation2 + $0x40] sm:$0x1] %vm293_vm2, %v5862_v0  ;;  %v534_v54 = vrot.slane %v6265_v5, 3  ;;  %v509_v56 = vsub.f32 %v6281_v15, %v493_v48  ;;  %v510_v57 = vsub.f32 %v6313_v29, %v494_v49  ;;  %v535_v59 = vrot.slane %v6294_v20, 3 }
  0x1e   : > { %298 = vst.msk [vmem:[#allocation2 + $0x50] sm:$0x1] %vm293_vm2, %v5862_v0  ;;  %299 = vst.msk [vmem:[#allocation2 + $0x60] sm:$0x1] %vm293_vm2, %v5862_v0  ;;  %v511_v58 = vsub.f32 %v6307_v27, %v495_v50  ;;  %v548_v62 = vsub.f32 %v6268_v6, %v532_v52  ;;  %v537_v8 = vrot.slane %v6320_v33, 3  ;;  %v538_v12 = vrot.slane %v6310_v28, 3 }
  0x1f   : > { %300 = vst.msk [vmem:[#allocation2 + $0x70] sm:$0x1] %vm293_vm2, %v5862_v0  ;;  %301 = vst.msk [vmem:[#allocation2 + $0x80] sm:$0x1] %vm293_vm2, %v5862_v0  ;;  %v550_v63 = vsub.f32 %v6260_v3, %v534_v54  ;;  %v551_v11 = vsub.f32 %v6291_v19, %v535_v59  ;;  %v578_v24 = vrot.slane %v6294_v20, 4  ;;  %v580_v36 = vrot.slane %v6320_v33, 4 }
  0x20   : > { %302 = vst.msk [vmem:[#allocation2 + $0xb0] sm:$0x1] %vm293_vm2, %v5862_v0  ;;  %303 = vst.msk [vmem:[#allocation2 + $0xc0] sm:$0x1] %vm293_vm2, %v5862_v0  ;;  %v553_v22 = vsub.f32 %v6313_v29, %v537_v8  ;;  %vm1193_vm15 = vcmask 523520  }
  0x21   : > { %304 = vst.msk [vmem:[#allocation2 + $0xd0] sm:$0x1] %vm293_vm2, %v5862_v0  ;;  %305 = vst.msk [vmem:[#allocation2 + $0xe0] sm:$0x1] %vm293_vm2, %v5862_v0  ;;  %v594_v35 = vsub.f32 %v6291_v19, %v578_v24  ;;  %v596_v44 = vsub.f32 %v6313_v29, %v580_v36  ;;  %v707_v36 = vrot.slane %v6288_v18, 7 }
  0x22   : > { %306 = vst.msk [vmem:[#allocation2 + $0xf0] sm:$0x1] %vm293_vm2, %v5862_v0  ;;  %307 = vst.msk [vmem:[#allocation2 + $0x100] sm:$0x1] %vm293_vm2, %v5862_v0 }
  0x23   : > { %308 = vst.msk [vmem:[#allocation2 + $0x110] sm:$0x1] %vm293_vm2, %v5862_v0  ;;  %309 = vst.msk [vmem:[#allocation2 + $0x120] sm:$0x1] %vm293_vm2, %v5862_v0 }
  0x24   : > { %310 = vst.msk [vmem:[#allocation2 + $0x150] sm:$0x1] %vm293_vm2, %v5862_v0  ;;  %311 = vst.msk [vmem:[#allocation2 + $0x160] sm:$0x1] %vm293_vm2, %v5862_v0 }
  0x25   : > { %312 = vst.msk [vmem:[#allocation2 + $0x170] sm:$0x1] %vm293_vm2, %v5862_v0  ;;  %313 = vst.msk [vmem:[#allocation2 + $0x180] sm:$0x1] %vm293_vm2, %v5862_v0 }
  0x26   : > { %314 = vst.msk [vmem:[#allocation2 + $0x190] sm:$0x1] %vm293_vm2, %v5862_v0  ;;  %315 = vst.msk [vmem:[#allocation2 + $0x1a0] sm:$0x1] %vm293_vm2, %v5862_v0 }
  0x27   : > { %316 = vst.msk [vmem:[#allocation2 + $0x1b0] sm:$0x1] %vm293_vm2, %v5862_v0  ;;  %317 = vst.msk [vmem:[#allocation2 + $0x1c0] sm:$0x1] %vm293_vm2, %v5862_v0 }
  0x28   : > { %318 = vst.msk [vmem:[#allocation2 + $0x1f0] sm:$0x1] %vm293_vm2, %v5862_v0  ;;  %319 = vst.msk [vmem:[#allocation2 + $0x200] sm:$0x1] %vm293_vm2, %v5862_v0 }
  0x29   : > { %320 = vst.msk [vmem:[#allocation2 + $0x210] sm:$0x1] %vm293_vm2, %v5862_v0  ;;  %321 = vst.msk [vmem:[#allocation2 + $0x220] sm:$0x1] %vm293_vm2, %v5862_v0 }
  0x2a   : > { %322 = vst.msk [vmem:[#allocation2 + $0x230] sm:$0x1] %vm293_vm2, %v5862_v0  ;;  %323 = vst.msk [vmem:[#allocation2 + $0x240] sm:$0x1] %vm293_vm2, %v5862_v0 }
  0x2b   : > { %324 = vst.msk [vmem:[#allocation2 + $0x250] sm:$0x1] %vm293_vm2, %v5862_v0  ;;  %325 = vst.msk [vmem:[#allocation2 + $0x260] sm:$0x1] %vm293_vm2, %v5862_v0 }
  0x2c   : > { %326 = vst.msk [vmem:[#allocation2 + $0x290] sm:$0x1] %vm293_vm2, %v5862_v0  ;;  %327 = vst.msk [vmem:[#allocation2 + $0x2a0] sm:$0x1] %vm293_vm2, %v5862_v0 }
  0x2d   : > { %328 = vst.msk [vmem:[#allocation2 + $0x2b0] sm:$0x1] %vm293_vm2, %v5862_v0  ;;  %329 = vst.msk [vmem:[#allocation2 + $0x2c0] sm:$0x1] %vm293_vm2, %v5862_v0 }
  0x2e   : > { %330 = vst.msk [vmem:[#allocation2 + $0x2d0] sm:$0x1] %vm293_vm2, %v5862_v0  ;;  %331 = vst.msk [vmem:[#allocation2 + $0x2e0] sm:$0x1] %vm293_vm2, %v5862_v0 }
  0x2f   : > { %332 = vst.msk [vmem:[#allocation2 + $0x2f0] sm:$0x1] %vm293_vm2, %v5862_v0  ;;  %333 = vst.msk [vmem:[#allocation2 + $0x300] sm:$0x1] %vm293_vm2, %v5862_v0 }
  0x30   : > { %334 = vst.msk [vmem:[#allocation2 + $0x330] sm:$0x1] %vm293_vm2, %v5862_v0  ;;  %335 = vst.msk [vmem:[#allocation2 + $0x340] sm:$0x1] %vm293_vm2, %v5862_v0 }
  0x31   : > { %336 = vst.msk [vmem:[#allocation2 + $0x350] sm:$0x1] %vm293_vm2, %v5862_v0  ;;  %337 = vst.msk [vmem:[#allocation2 + $0x360] sm:$0x1] %vm293_vm2, %v5862_v0 }
  0x32   : > { %338 = vst.msk [vmem:[#allocation2 + $0x370] sm:$0x1] %vm293_vm2, %v5862_v0  ;;  %339 = vst.msk [vmem:[#allocation2 + $0x380] sm:$0x1] %vm293_vm2, %v5862_v0 }
  0x33   : > { %340 = vst.msk [vmem:[#allocation2 + $0x390] sm:$0x1] %vm293_vm2, %v5862_v0  ;;  %341 = vst.msk [vmem:[#allocation2 + $0x3a0] sm:$0x1] %vm293_vm2, %v5862_v0 }
  0x34   : > { %342 = vst.msk [vmem:[#allocation2 + $0x3d0] sm:$0x1] %vm293_vm2, %v5862_v0  ;;  %343 = vst.msk [vmem:[#allocation2 + $0x3e0] sm:$0x1] %vm293_vm2, %v5862_v0 }
  0x35   : > { %344 = vst.msk [vmem:[#allocation2 + $0x3f0] sm:$0x1] %vm293_vm2, %v5862_v0  ;;  %345 = vst.msk [vmem:[#allocation2 + $0x400] sm:$0x1] %vm293_vm2, %v5862_v0 }
  0x36   : > { %346 = vst.msk [vmem:[#allocation2 + $0x410] sm:$0x1] %vm293_vm2, %v5862_v0  ;;  %347 = vst.msk [vmem:[#allocation2 + $0x420] sm:$0x1] %vm293_vm2, %v5862_v0 }
  0x37   : > { %348 = vst.msk [vmem:[#allocation2 + $0x430] sm:$0x1] %vm293_vm2, %v5862_v0  ;;  %349 = vst.msk [vmem:[#allocation2 + $0x440] sm:$0x1] %vm293_vm2, %v5862_v0 }
  0x38   : > { %350 = vst.msk [vmem:[#allocation2 + $0x470] sm:$0x1] %vm293_vm2, %v5862_v0  ;;  %351 = vst.msk [vmem:[#allocation2 + $0x480] sm:$0x1] %vm293_vm2, %v5862_v0 }
  0x39   : > { %352 = vst.msk [vmem:[#allocation2 + $0x490] sm:$0x1] %vm293_vm2, %v5862_v0  ;;  %353 = vst.msk [vmem:[#allocation2 + $0x4a0] sm:$0x1] %vm293_vm2, %v5862_v0 }
  0x3a   : > { %354 = vst.msk [vmem:[#allocation2 + $0x4b0] sm:$0x1] %vm293_vm2, %v5862_v0  ;;  %355 = vst.msk [vmem:[#allocation2 + $0x4c0] sm:$0x1] %vm293_vm2, %v5862_v0 }
  0x3b   : > { %356 = vst.msk [vmem:[#allocation2 + $0x4d0] sm:$0x1] %vm293_vm2, %v5862_v0  ;;  %357 = vst.msk [vmem:[#allocation2 + $0x4e0] sm:$0x1] %vm293_vm2, %v5862_v0 }
  0x3c   : > { %358 = vst.msk [vmem:[#allocation2 + $0x19] sm:$0x1] %vm293_vm2, %v5862_v0  ;;  %359 = vst.msk [vmem:[#allocation2 + $0x29] sm:$0x1] %vm293_vm2, %v5862_v0 }
  0x3d   : > { %360 = vst.msk [vmem:[#allocation2 + $0x39] sm:$0x1] %vm293_vm2, %v5862_v0  ;;  %361 = vst.msk [vmem:[#allocation2 + $0x49] sm:$0x1] %vm293_vm2, %v5862_v0 }
  0x3e   : > { %362 = vst.msk [vmem:[#allocation2 + $0x59] sm:$0x1] %vm293_vm2, %v5862_v0  ;;  %363 = vst.msk [vmem:[#allocation2 + $0x69] sm:$0x1] %vm293_vm2, %v5862_v0 }
  0x3f   : > { %364 = vst.msk [vmem:[#allocation2 + $0x79] sm:$0x1] %vm293_vm2, %v5862_v0  ;;  %365 = vst.msk [vmem:[#allocation2 + $0x89] sm:$0x1] %vm293_vm2, %v5862_v0 }
  0x40   : > { %366 = vst.msk [vmem:[#allocation2 + $0xb9] sm:$0x1] %vm293_vm2, %v5862_v0  ;;  %367 = vst.msk [vmem:[#allocation2 + $0xc9] sm:$0x1] %vm293_vm2, %v5862_v0 }
  0x41   : > { %368 = vst.msk [vmem:[#allocation2 + $0xd9] sm:$0x1] %vm293_vm2, %v5862_v0  ;;  %369 = vst.msk [vmem:[#allocation2 + $0xe9] sm:$0x1] %vm293_vm2, %v5862_v0 }
  0x42   : > { %370 = vst.msk [vmem:[#allocation2 + $0xf9] sm:$0x1] %vm293_vm2, %v5862_v0  ;;  %371 = vst.msk [vmem:[#allocation2 + $0x109] sm:$0x1] %vm293_vm2, %v5862_v0 }
  0x43   : > { %372 = vst.msk [vmem:[#allocation2 + $0x119] sm:$0x1] %vm293_vm2, %v5862_v0  ;;  %373 = vst.msk [vmem:[#allocation2 + $0x129] sm:$0x1] %vm293_vm2, %v5862_v0 }
  0x44   : > { %374 = vst.msk [vmem:[#allocation2 + $0x159] sm:$0x1] %vm293_vm2, %v5862_v0  ;;  %375 = vst.msk [vmem:[#allocation2 + $0x169] sm:$0x1] %vm293_vm2, %v5862_v0 }
  0x45   : > { %376 = vst.msk [vmem:[#allocation2 + $0x179] sm:$0x1] %vm293_vm2, %v5862_v0  ;;  %377 = vst.msk [vmem:[#allocation2 + $0x189] sm:$0x1] %vm293_vm2, %v5862_v0 }
  0x46   : > { %378 = vst.msk [vmem:[#allocation2 + $0x199] sm:$0x1] %vm293_vm2, %v5862_v0  ;;  %379 = vst.msk [vmem:[#allocation2 + $0x1a9] sm:$0x1] %vm293_vm2, %v5862_v0 }
  0x47   : > { %380 = vst.msk [vmem:[#allocation2 + $0x1b9] sm:$0x1] %vm293_vm2, %v5862_v0  ;;  %381 = vst.msk [vmem:[#allocation2 + $0x1c9] sm:$0x1] %vm293_vm2, %v5862_v0 }
  0x48   : > { %382 = vst.msk [vmem:[#allocation2 + $0x1f9] sm:$0x1] %vm293_vm2, %v5862_v0  ;;  %383 = vst.msk [vmem:[#allocation2 + $0x209] sm:$0x1] %vm293_vm2, %v5862_v0 }
  0x49   : > { %384 = vst.msk [vmem:[#allocation2 + $0x219] sm:$0x1] %vm293_vm2, %v5862_v0  ;;  %385 = vst.msk [vmem:[#allocation2 + $0x229] sm:$0x1] %vm293_vm2, %v5862_v0 }
  0x4a   : > { %386 = vst.msk [vmem:[#allocation2 + $0x239] sm:$0x1] %vm293_vm2, %v5862_v0  ;;  %387 = vst.msk [vmem:[#allocation2 + $0x249] sm:$0x1] %vm293_vm2, %v5862_v0 }
  0x4b   : > { %388 = vst.msk [vmem:[#allocation2 + $0x259] sm:$0x1] %vm293_vm2, %v5862_v0  ;;  %389 = vst.msk [vmem:[#allocation2 + $0x269] sm:$0x1] %vm293_vm2, %v5862_v0 }
  0x4c   : > { %390 = vst.msk [vmem:[#allocation2 + $0x299] sm:$0x1] %vm293_vm2, %v5862_v0  ;;  %391 = vst.msk [vmem:[#allocation2 + $0x2a9] sm:$0x1] %vm293_vm2, %v5862_v0 }
  0x4d   : > { %392 = vst.msk [vmem:[#allocation2 + $0x2b9] sm:$0x1] %vm293_vm2, %v5862_v0  ;;  %393 = vst.msk [vmem:[#allocation2 + $0x2c9] sm:$0x1] %vm293_vm2, %v5862_v0 }
  0x4e   : > { %394 = vst.msk [vmem:[#allocation2 + $0x2d9] sm:$0x1] %vm293_vm2, %v5862_v0  ;;  %395 = vst.msk [vmem:[#allocation2 + $0x2e9] sm:$0x1] %vm293_vm2, %v5862_v0 }
  0x4f   : > { %396 = vst.msk [vmem:[#allocation2 + $0x2f9] sm:$0x1] %vm293_vm2, %v5862_v0  ;;  %397 = vst.msk [vmem:[#allocation2 + $0x309] sm:$0x1] %vm293_vm2, %v5862_v0 }
  0x50   : > { %398 = vst.msk [vmem:[#allocation2 + $0x339] sm:$0x1] %vm293_vm2, %v5862_v0  ;;  %399 = vst.msk [vmem:[#allocation2 + $0x349] sm:$0x1] %vm293_vm2, %v5862_v0 }
  0x51   : > { %400 = vst.msk [vmem:[#allocation2 + $0x359] sm:$0x1] %vm293_vm2, %v5862_v0  ;;  %401 = vst.msk [vmem:[#allocation2 + $0x369] sm:$0x1] %vm293_vm2, %v5862_v0 }
  0x52   : > { %402 = vst.msk [vmem:[#allocation2 + $0x379] sm:$0x1] %vm293_vm2, %v5862_v0  ;;  %403 = vst.msk [vmem:[#allocation2 + $0x389] sm:$0x1] %vm293_vm2, %v5862_v0 }
  0x53   : > { %404 = vst.msk [vmem:[#allocation2 + $0x399] sm:$0x1] %vm293_vm2, %v5862_v0  ;;  %405 = vst.msk [vmem:[#allocation2 + $0x3a9] sm:$0x1] %vm293_vm2, %v5862_v0 }
  0x54   : > { %406 = vst.msk [vmem:[#allocation2 + $0x3d9] sm:$0x1] %vm293_vm2, %v5862_v0  ;;  %407 = vst.msk [vmem:[#allocation2 + $0x3e9] sm:$0x1] %vm293_vm2, %v5862_v0 }
  0x55   : > { %408 = vst.msk [vmem:[#allocation2 + $0x3f9] sm:$0x1] %vm293_vm2, %v5862_v0  ;;  %409 = vst.msk [vmem:[#allocation2 + $0x409] sm:$0x1] %vm293_vm2, %v5862_v0 }
  0x56   : > { %410 = vst.msk [vmem:[#allocation2 + $0x419] sm:$0x1] %vm293_vm2, %v5862_v0  ;;  %411 = vst.msk [vmem:[#allocation2 + $0x429] sm:$0x1] %vm293_vm2, %v5862_v0 }
  0x57   : > { %412 = vst.msk [vmem:[#allocation2 + $0x439] sm:$0x1] %vm293_vm2, %v5862_v0  ;;  %413 = vst.msk [vmem:[#allocation2 + $0x449] sm:$0x1] %vm293_vm2, %v5862_v0 }
  0x58   : > { %414 = vst.msk [vmem:[#allocation2 + $0x479] sm:$0x1] %vm293_vm2, %v5862_v0  ;;  %415 = vst.msk [vmem:[#allocation2 + $0x489] sm:$0x1] %vm293_vm2, %v5862_v0 }
  0x59   : > { %416 = vst.msk [vmem:[#allocation2 + $0x499] sm:$0x1] %vm293_vm2, %v5862_v0  ;;  %417 = vst.msk [vmem:[#allocation2 + $0x4a9] sm:$0x1] %vm293_vm2, %v5862_v0 }
  0x5a   : > { %418 = vst.msk [vmem:[#allocation2 + $0x4b9] sm:$0x1] %vm293_vm2, %v5862_v0  ;;  %419 = vst.msk [vmem:[#allocation2 + $0x4c9] sm:$0x1] %vm293_vm2, %v5862_v0 }
  0x5b   : > { %420 = vst.msk [vmem:[#allocation2 + $0x4d9] sm:$0x1] %vm293_vm2, %v5862_v0  ;;  %421 = vst.msk [vmem:[#allocation2 + $0x4e9] sm:$0x1] %vm293_vm2, %v5862_v0 }
  0x5c   : > { %431 = vst.msk [vmem:[#allocation2 + $0x21] sm:$0xff] %vm257_vm0, %v423_v4  ;;  %432 = vst.msk [vmem:[#allocation2 + $0x31] sm:$0xff] %vm257_vm0, %v424_v13  ;;  %v536_v4 = vrot.slane %v6288_v18, 3  ;;  %v575_v13 = vrot.slane %v6271_v7, 4 }
  0x5d   : > { %430 = vst.msk [vmem:[#allocation2 + $0x11] sm:$0xff] %vm257_vm0, %v422_v14  ;;  %434 = vst.msk [vmem:[#allocation2 + $0x51] sm:$0xff] %vm257_vm0, %v426_v25  ;;  %v576_v14 = vrot.slane %v6257_v2, 4  ;;  %v554_v25 = vsub.f32 %v6307_v27, %v538_v12  ;;  %v665_v12 = vrot.slane %v6288_v18, 6 }
  0x5e   : > { %473 = vst.msk [vmem:[#allocation2 + $0xc2] sm:$0x7f] %vm471_vm3, %v463_v21  ;;  %472 = vst.msk [vmem:[#allocation2 + $0xb2] sm:$0x7f] %vm471_vm3, %v462_v30 }
  0x5f   : > { %482 = vst.msk [vmem:[#allocation2 + $0xba] sm:$0x80] %vm480_vm4, %v463_v21  ;;  %481 = vst.msk [vmem:[#allocation2 + $0xaa] sm:$0x80] %vm480_vm4, %v462_v30  ;;  %v552_v21 = vsub.f32 %v6281_v15, %v536_v4  ;;  %v592_v30 = vsub.f32 %v6254_v1, %v576_v14  ;;  %v664_v4 = vrot.slane %v6294_v20, 6 }
  0x60   : > { %516 = vst.msk [vmem:[#allocation2 + $0x163] sm:$0x3f] %vm514_vm5, %v506_v23  ;;  %515 = vst.msk [vmem:[#allocation2 + $0x153] sm:$0x3f] %vm514_vm5, %v505_v39 }
  0x61   : > { %525 = vst.msk [vmem:[#allocation2 + $0x15b] sm:$0xc0] %vm523_vm6, %v506_v23  ;;  %524 = vst.msk [vmem:[#allocation2 + $0x14b] sm:$0xc0] %vm523_vm6, %v505_v39  ;;  %v577_v23 = vrot.slane %v6265_v5, 4 }
  0x62   : > { %433 = vst.msk [vmem:[#allocation2 + $0x41] sm:$0xff] %vm257_vm0, %v425_v26  ;;  %436 = vst.msk [vmem:[#allocation2 + $0x71] sm:$0xff] %vm257_vm0, %v428_v32  ;;  %v591_v26 = vsub.f32 %v6268_v6, %v575_v13  ;;  %v666_v13 = vrot.slane %v6320_v33, 6 }
  0x63   : > { %474 = vst.msk [vmem:[#allocation2 + $0xd2] sm:$0x7f] %vm471_vm3, %v464_v31  ;;  %475 = vst.msk [vmem:[#allocation2 + $0xe2] sm:$0x7f] %vm471_vm3, %v465_v41  ;;  %v875_v55 = vld [vmem:[#allocation2 + $0x21] sm:$0xff]  ;;  %v6388_v9 = vld [vmem:[#allocation2 + $0x30] sm:$0xff]  ;;  %v593_v34 = vsub.f32 %v6260_v3, %v577_v23 }
  0x64   : > { %483 = vst.msk [vmem:[#allocation2 + $0xca] sm:$0x80] %vm480_vm4, %v464_v31  ;;  %484 = vst.msk [vmem:[#allocation2 + $0xda] sm:$0x80] %vm480_vm4, %v465_v41  ;;  %v6375_v60 = vld [vmem:[#allocation2 + $0x20] sm:$0xff]  ;;  %1005 = vrot.lane.b32.xlu1 %v875_v55, %s5863_s28  ;;  %v874_v61 = vld [vmem:[#allocation2 + $0x11] sm:$0xff] }
  0x65   : > { %435 = vst.msk [vmem:[#allocation2 + $0x61] sm:$0xff] %vm257_vm0, %v427_v37  ;;  %809 = vst.msk [vmem:[#allocation3] sm:$0xff] %vm257_vm0, %v745_v45  ;;  %v876_v10 = vld [vmem:[#allocation2 + $0x31] sm:$0xff]  ;;  %1003 = vrot.lane.b32.xlu0 %v874_v61, %s5863_s28  ;;  %v579_v31 = vrot.slane %v6288_v18, 4  ;;  %v581_v37 = vrot.slane %v6310_v28, 4  ;;  %v619_v41 = vrot.slane %v6257_v2, 5 }
  0x66   : > { %517 = vst.msk [vmem:[#allocation2 + $0x173] sm:$0x3f] %vm514_vm5, %v507_v40  ;;  %518 = vst.msk [vmem:[#allocation2 + $0x183] sm:$0x3f] %vm514_vm5, %v508_v51  ;;  %v6403_v16 = vld [vmem:[#allocation2 + $0x10] sm:$0xff]  ;;  %v883_v8 = vld [vmem:[#allocation2 + $0xc1] sm:$0xff] }
  0x67   : > { %526 = vst.msk [vmem:[#allocation2 + $0x16b] sm:$0xc0] %vm523_vm6, %v507_v40  ;;  %527 = vst.msk [vmem:[#allocation2 + $0x17b] sm:$0xc0] %vm523_vm6, %v508_v51  ;;  %v6421_v32 = vld [vmem:[#allocation2 + $0x50] sm:$0xff]  ;;  %v595_v39 = vsub.f32 %v6281_v15, %v579_v31  ;;  %v618_v40 = vrot.slane %v6271_v7, 5  ;;  %v597_v45 = vsub.f32 %v6307_v27, %v581_v37  ;;  %v635_v51 = vsub.f32 %v6254_v1, %v619_v41 }
  0x68   : > { %817 = vst.msk [vmem:[#allocation3 + $0xc0] sm:$0xff] %vm257_vm0, %v753_v46  ;;  %811 = vst.msk [vmem:[#allocation3 + $0x30] sm:$0xff] %vm257_vm0, %v6375_v60  ;;  %1007 = vrot.lane.b32.xlu1 %v876_v10, %s5863_s28  ;;  %v878_v38 = vld [vmem:[#allocation2 + $0x51] sm:$0xff]  ;;  %v621_v46 = vrot.slane %v6294_v20, 5  ;;  %v667_v23 = vrot.slane %v6310_v28, 6  ;;  %v755_v24 = vld [vmem:[#allocation2 + $0xc0] sm:$0xff] }
  0x69   : > { %476 = vst.msk [vmem:[#allocation2 + $0xf2] sm:$0x7f] %vm471_vm3, %v466_v42  ;;  %478 = vst.msk [vmem:[#allocation2 + $0x112] sm:$0x7f] %vm471_vm3, %v468_v43  ;;  %v877_v17 = vld [vmem:[#allocation2 + $0x41] sm:$0xff]  ;;  %v752_v49 = vld [vmem:[#allocation2 + $0x70] sm:$0xff]  ;;  %v634_v50 = vsub.f32 %v6268_v6, %v618_v40 }
  0x6a   : > { %485 = vst.msk [vmem:[#allocation2 + $0xea] sm:$0x80] %vm480_vm4, %v466_v42  ;;  %487 = vst.msk [vmem:[#allocation2 + $0x10a] sm:$0x80] %vm480_vm4, %v468_v43  ;;  %1009 = vrot.lane.b32.xlu0 %v877_v17, %s5863_s28  ;;  %v620_v42 = vrot.slane %v6265_v5, 5  ;;  %v6453_v48 = vld [vmem:[#allocation2 + $0x40] sm:$0xff]  ;;  %v637_v55 = vsub.f32 %v6291_v19, %v621_v46 }
  0x6b   : > { %477 = vst.msk [vmem:[#allocation2 + $0x102] sm:$0x7f] %vm471_vm3, %v467_v47  ;;  %v880_v59 = vld [vmem:[#allocation2 + $0x71] sm:$0xff]  ;;  %v704_v31 = vrot.slane %v6257_v2, 7  ;;  %v885_v37 = vld [vmem:[#allocation2 + $0xe1] sm:$0xff]  ;;  %v708_v40 = vrot.slane %v6320_v33, 7 }
  0x6c   : > { %486 = vst.msk [vmem:[#allocation2 + $0xfa] sm:$0x80] %vm480_vm4, %v467_v47  ;;  %v879_v43 = vld [vmem:[#allocation2 + $0x61] sm:$0xff]  ;;  %v622_v47 = vrot.slane %v6288_v18, 5  ;;  %v636_v52 = vsub.f32 %v6260_v3, %v620_v42  ;;  %1011 = vrot.lane.b32.xlu1 %v878_v38, %s5863_s28  ;;  %v754_v14 = vld [vmem:[#allocation2 + $0xb0] sm:$0xff]  ;;  %v723_v42 = vsub.f32 %v6281_v15, %v707_v36 }
  0x6d   : > { %559 = vst.msk [vmem:[#allocation2 + $0x204] sm:$0x1f] %vm557_vm7, %v549_v53  ;;  %558 = vst.msk [vmem:[#allocation2 + $0x1f4] sm:$0x1f] %vm557_vm7, %v548_v62  ;;  %v6464_v54 = vld [vmem:[#allocation2 + $0x60] sm:$0xff] }
  0x6e   : > { %568 = vst.msk [vmem:[#allocation2 + $0x1fc] sm:$0xe0] %vm566_vm8, %v549_v53  ;;  %567 = vst.msk [vmem:[#allocation2 + $0x1ec] sm:$0xe0] %vm566_vm8, %v548_v62  ;;  %v623_v53 = vrot.slane %v6320_v33, 5  ;;  %1013 = vrot.lane.b32.xlu0 %v879_v43, %s5863_s28  ;;  %v662_v62 = vrot.slane %v6257_v2, 6 }
  0x6f   : > { %519 = vst.msk [vmem:[#allocation2 + $0x193] sm:$0x3f] %vm514_vm5, %v509_v56  ;;  %520 = vst.msk [vmem:[#allocation2 + $0x1a3] sm:$0x3f] %vm514_vm5, %v510_v57  ;;  %v705_v2 = vrot.slane %v6265_v5, 7  ;;  %v889_v33 = vld [vmem:[#allocation2 + $0x141] sm:$0xff] }
  0x70   : > { %528 = vst.msk [vmem:[#allocation2 + $0x18b] sm:$0xc0] %vm523_vm6, %v509_v56  ;;  %529 = vst.msk [vmem:[#allocation2 + $0x19b] sm:$0xc0] %vm523_vm6, %v510_v57  ;;  %v638_v56 = vsub.f32 %v6281_v15, %v622_v47  ;;  %v624_v57 = vrot.slane %v6310_v28, 5  ;;  %v639_v61 = vsub.f32 %v6313_v29, %v623_v53  ;;  %v678_v17 = vsub.f32 %v6254_v1, %v662_v62  ;;  %v891_v46 = vld [vmem:[#allocation2 + $0x161] sm:$0xff] }
  0x71   : > { %521 = vst.msk [vmem:[#allocation2 + $0x1b3] sm:$0x3f] %vm514_vm5, %v511_v58  ;;  %1015 = vrot.lane.b32.xlu1 %v880_v59, %s5863_s28  ;;  %v721_v18 = vsub.f32 %v6260_v3, %v705_v2  ;;  %v760_v43 = vld [vmem:[#allocation2 + $0x110] sm:$0xff]  ;;  %v905_v2 = vld [vmem:[#allocation2 + $0x281] sm:$0xff] }
  0x72   : > { %530 = vst.msk [vmem:[#allocation2 + $0x1ab] sm:$0xc0] %vm523_vm6, %v511_v58  ;;  %v661_v58 = vrot.slane %v6271_v7, 6  ;;  %v640_v10 = vsub.f32 %v6307_v27, %v624_v57  ;;  %1021 = vrot.lane.b32.xlu0 %v883_v8, %s5863_s28  ;;  %v762_v47 = vld [vmem:[#allocation2 + $0x150] sm:$0xff] }
  0x73   : > { %812 = vst.msk [vmem:[#allocation3 + $0x48] sm:$0xff] %vm257_vm0, %v6388_v9  ;;  %810 = vst.msk [vmem:[#allocation3 + $0x18] sm:$0xff] %vm257_vm0, %v6403_v16 }
  0x74   : > { %560 = vst.msk [vmem:[#allocation2 + $0x214] sm:$0x1f] %vm557_vm7, %v550_v63  ;;  %561 = vst.msk [vmem:[#allocation2 + $0x224] sm:$0x1f] %vm557_vm7, %v551_v11 }
  0x75   : > { %569 = vst.msk [vmem:[#allocation2 + $0x20c] sm:$0xe0] %vm566_vm8, %v550_v63  ;;  %570 = vst.msk [vmem:[#allocation2 + $0x21c] sm:$0xe0] %vm566_vm8, %v551_v11  ;;  %v663_v63 = vrot.slane %v6265_v5, 6  ;;  %v677_v11 = vsub.f32 %v6268_v6, %v661_v58  ;;  %v709_v5 = vrot.slane %v6310_v28, 7 }
  0x76   : > { %562 = vst.msk [vmem:[#allocation2 + $0x234] sm:$0x1f] %vm557_vm7, %v552_v21  ;;  %563 = vst.msk [vmem:[#allocation2 + $0x244] sm:$0x1f] %vm557_vm7, %v553_v22  ;;  %1025 = vrot.lane.b32.xlu0 %v885_v37, %s5863_s28  ;;  %v759_v28 = vld [vmem:[#allocation2 + $0x100] sm:$0xff]  ;;  %v770_v59 = vld [vmem:[#allocation2 + $0x1f0] sm:$0xff] }
  0x77   : > { %571 = vst.msk [vmem:[#allocation2 + $0x22c] sm:$0xe0] %vm566_vm8, %v552_v21  ;;  %572 = vst.msk [vmem:[#allocation2 + $0x23c] sm:$0xe0] %vm566_vm8, %v553_v22  ;;  %v679_v21 = vsub.f32 %v6260_v3, %v663_v63  ;;  %v680_v22 = vsub.f32 %v6291_v19, %v664_v4  ;;  %v725_v3 = vsub.f32 %v6307_v27, %v709_v5  ;;  %v766_v53 = vld [vmem:[#allocation2 + $0x190] sm:$0xff]  ;;  %v769_v58 = vld [vmem:[#allocation2 + $0x1e0] sm:$0xff] }
  0x78   : > { %814 = vst.msk [vmem:[#allocation3 + $0x78] sm:$0xff] %vm257_vm0, %v6421_v32  ;;  %813 = vst.msk [vmem:[#allocation3 + $0x60] sm:$0xff] %vm257_vm0, %v6453_v48  ;;  %v895_v62 = vld [vmem:[#allocation2 + $0x1a1] sm:$0xff]  ;;  %v894_v8 = vld [vmem:[#allocation2 + $0x191] sm:$0xff] }
  0x79   : > { %564 = vst.msk [vmem:[#allocation2 + $0x254] sm:$0x1f] %vm557_vm7, %v554_v25  ;;  %v768_v57 = vld [vmem:[#allocation2 + $0x1b0] sm:$0xff]  ;;  %v771_v63 = vld [vmem:[#allocation2 + $0x200] sm:$0xff] }
  0x7a   : > { %573 = vst.msk [vmem:[#allocation2 + $0x24c] sm:$0xe0] %vm566_vm8, %v554_v25  ;;  %v681_v25 = vsub.f32 %v6281_v15, %v665_v12  ;;  %v884_v15 = vld [vmem:[#allocation2 + $0xd1] sm:$0xff] }
  0x7b   : > { %601 = vst.msk [vmem:[#allocation2 + $0x295] sm:$0xf] %vm600_vm9, %v591_v26  ;;  %602 = vst.msk [vmem:[#allocation2 + $0x2a5] sm:$0xf] %vm600_vm9, %v592_v30 }
  0x7c   : > { %610 = vst.msk [vmem:[#allocation2 + $0x28d] sm:$0xf0] %vm609_vm10, %v591_v26  ;;  %611 = vst.msk [vmem:[#allocation2 + $0x29d] sm:$0xf0] %vm609_vm10, %v592_v30  ;;  %v682_v26 = vsub.f32 %v6313_v29, %v666_v13  ;;  %v703_v30 = vrot.slane %v6271_v7, 7  ;;  %v683_v7 = vsub.f32 %v6307_v27, %v667_v23  ;;  %v758_v27 = vld [vmem:[#allocation2 + $0xf0] sm:$0xff] }
  0x7d   : > { %603 = vst.msk [vmem:[#allocation2 + $0x2b5] sm:$0xf] %vm600_vm9, %v593_v34  ;;  %604 = vst.msk [vmem:[#allocation2 + $0x2c5] sm:$0xf] %vm600_vm9, %v594_v35  ;;  %v772_v4 = vld [vmem:[#allocation2 + $0x210] sm:$0xff]  ;;  %v901_v23 = vld [vmem:[#allocation2 + $0x221] sm:$0xff] }
  0x7e   : > { %612 = vst.msk [vmem:[#allocation2 + $0x2ad] sm:$0xf0] %vm609_vm10, %v593_v34  ;;  %613 = vst.msk [vmem:[#allocation2 + $0x2bd] sm:$0xf0] %vm609_vm10, %v594_v35  ;;  %v882_v34 = vld [vmem:[#allocation2 + $0xb1] sm:$0xff]  ;;  %v706_v35 = vrot.slane %v6294_v20, 7  ;;  %v719_v38 = vsub.f32 %v6268_v6, %v703_v30 }
  0x7f   : > { %605 = vst.msk [vmem:[#allocation2 + $0x2d5] sm:$0xf] %vm600_vm9, %v595_v39  ;;  %606 = vst.msk [vmem:[#allocation2 + $0x2e5] sm:$0xf] %vm600_vm9, %v596_v44  ;;  %v756_v20 = vld [vmem:[#allocation2 + $0xd0] sm:$0xff]  ;;  %v757_v6 = vld [vmem:[#allocation2 + $0xe0] sm:$0xff]  ;;  %1019 = vrot.lane.b32.xlu1 %v882_v34, %s5863_s28 }
  0x80   : > { %614 = vst.msk [vmem:[#allocation2 + $0x2cd] sm:$0xf0] %vm609_vm10, %v595_v39  ;;  %615 = vst.msk [vmem:[#allocation2 + $0x2dd] sm:$0xf0] %vm609_vm10, %v596_v44  ;;  %v720_v39 = vsub.f32 %v6254_v1, %v704_v31  ;;  %v722_v41 = vsub.f32 %v6291_v19, %v706_v35  ;;  %v724_v1 = vsub.f32 %v6313_v29, %v708_v40  ;;  %v887_v19 = vld [vmem:[#allocation2 + $0x101] sm:$0xff]  ;;  %v886_v29 = vld [vmem:[#allocation2 + $0xf1] sm:$0xff] }
  0x81   : > { %816 = vst.msk [vmem:[#allocation3 + $0xa8] sm:$0xff] %vm257_vm0, %v752_v49  ;;  %815 = vst.msk [vmem:[#allocation3 + $0x90] sm:$0xff] %vm257_vm0, %v6464_v54  ;;  %1029 = vrot.lane.b32.xlu0 %v887_v19, %s5863_s28  ;;  %v761_v44 = vld [vmem:[#allocation2 + $0x140] sm:$0xff]  ;;  %v774_v12 = vld [vmem:[#allocation2 + $0x230] sm:$0xff] }
  0x82   : > { %607 = vst.msk [vmem:[#allocation2 + $0x2f5] sm:$0xf] %vm600_vm9, %v597_v45  ;;  %v763_v49 = vld [vmem:[#allocation2 + $0x160] sm:$0xff]  ;;  %v896_v13 = vld [vmem:[#allocation2 + $0x1b1] sm:$0xff] }
  0x83   : > { %616 = vst.msk [vmem:[#allocation2 + $0x2ed] sm:$0xf0] %vm609_vm10, %v597_v45  ;;  %1023 = vrot.lane.b32.xlu1 %v884_v15, %s5863_s28  ;;  %v888_v45 = vld [vmem:[#allocation2 + $0x111] sm:$0xff]  ;;  %v903_v30 = vld [vmem:[#allocation2 + $0x241] sm:$0xff] }
  0x84   : > { %644 = vst.msk [vmem:[#allocation2 + $0x336] sm:$0x7] %vm643_vm11, %v634_v50  ;;  %645 = vst.msk [vmem:[#allocation2 + $0x346] sm:$0x7] %vm643_vm11, %v635_v51  ;;  %v779_v31 = vld [vmem:[#allocation2 + $0x2a0] sm:$0xff]  ;;  %v904_v37 = vld [vmem:[#allocation2 + $0x251] sm:$0xff] }
  0x85   : > { %653 = vst.msk [vmem:[#allocation2 + $0x32e] sm:$0xf8] %vm652_vm12, %v634_v50  ;;  %654 = vst.msk [vmem:[#allocation2 + $0x33e] sm:$0xf8] %vm652_vm12, %v635_v51  ;;  %1033 = vrot.lane.b32.xlu0 %v889_v33, %s5863_s28  ;;  %v764_v50 = vld [vmem:[#allocation2 + $0x170] sm:$0xff]  ;;  %v765_v51 = vld [vmem:[#allocation2 + $0x180] sm:$0xff] }
  0x86   : > { %646 = vst.msk [vmem:[#allocation2 + $0x356] sm:$0x7] %vm643_vm11, %v636_v52  ;;  %647 = vst.msk [vmem:[#allocation2 + $0x366] sm:$0x7] %vm643_vm11, %v637_v55  ;;  %v780_v34 = vld [vmem:[#allocation2 + $0x2b0] sm:$0xff]  ;;  %v781_v35 = vld [vmem:[#allocation2 + $0x2c0] sm:$0xff] }
  0x87   : > { %655 = vst.msk [vmem:[#allocation2 + $0x34e] sm:$0xf8] %vm652_vm12, %v636_v52  ;;  %656 = vst.msk [vmem:[#allocation2 + $0x35e] sm:$0xf8] %vm652_vm12, %v637_v55  ;;  %1027 = vrot.lane.b32.xlu1 %v886_v29, %s5863_s28  ;;  %v890_v52 = vld [vmem:[#allocation2 + $0x151] sm:$0xff]  ;;  %v767_v55 = vld [vmem:[#allocation2 + $0x1a0] sm:$0xff] }
  0x88   : > { %648 = vst.msk [vmem:[#allocation2 + $0x376] sm:$0x7] %vm643_vm11, %v638_v56  ;;  %649 = vst.msk [vmem:[#allocation2 + $0x386] sm:$0x7] %vm643_vm11, %v639_v61  ;;  %v782_v36 = vld [vmem:[#allocation2 + $0x2d0] sm:$0xff]  ;;  %v913_v19 = vld [vmem:[#allocation2 + $0x321] sm:$0xff] }
  0x89   : > { %657 = vst.msk [vmem:[#allocation2 + $0x36e] sm:$0xf8] %vm652_vm12, %v638_v56  ;;  %658 = vst.msk [vmem:[#allocation2 + $0x37e] sm:$0xf8] %vm652_vm12, %v639_v61  ;;  %1037 = vrot.lane.b32.xlu0 %v891_v46, %s5863_s28  ;;  %v893_v56 = vld [vmem:[#allocation2 + $0x181] sm:$0xff]  ;;  %v892_v61 = vld [vmem:[#allocation2 + $0x171] sm:$0xff] }
  0x8a   : > { %818 = vst.msk [vmem:[#allocation3 + $0xd8] sm:$0xff] %vm257_vm0, %v754_v14  ;;  %819 = vst.msk [vmem:[#allocation3 + $0xf0] sm:$0xff] %vm257_vm0, %v755_v24  ;;  %v899_v14 = vld [vmem:[#allocation2 + $0x201] sm:$0xff]  ;;  %v784_v40 = vld [vmem:[#allocation2 + $0x2f0] sm:$0xff] }
  0x8b   : > { %650 = vst.msk [vmem:[#allocation2 + $0x396] sm:$0x7] %vm643_vm11, %v640_v10  ;;  %1031 = vrot.lane.b32.xlu1 %v888_v45, %s5863_s28  ;;  %v777_v24 = vld [vmem:[#allocation2 + $0x280] sm:$0xff]  ;;  %v906_v5 = vld [vmem:[#allocation2 + $0x291] sm:$0xff] }
  0x8c   : > { %659 = vst.msk [vmem:[#allocation2 + $0x38e] sm:$0xf8] %vm652_vm12, %v640_v10  ;;  %v897_v10 = vld [vmem:[#allocation2 + $0x1e1] sm:$0xff]  ;;  %v910_v15 = vld [vmem:[#allocation2 + $0x2d1] sm:$0xff] }
  0x8d   : > { %686 = vst.msk [vmem:[#allocation2 + $0x3d7] sm:$0x3] %vm259_vm1, %v677_v11  ;;  %687 = vst.msk [vmem:[#allocation2 + $0x3e7] sm:$0x3] %vm259_vm1, %v678_v17  ;;  %1041 = vrot.lane.b32.xlu0 %v893_v56, %s5863_s28  ;;  %v912_v29 = vld [vmem:[#allocation2 + $0x2f1] sm:$0xff]  ;;  %v915_v33 = vld [vmem:[#allocation2 + $0x341] sm:$0xff] }
  0x8e   : > { %695 = vst.msk [vmem:[#allocation2 + $0x3cf] sm:$0xfc] %vm694_vm13, %v677_v11  ;;  %696 = vst.msk [vmem:[#allocation2 + $0x3df] sm:$0xfc] %vm694_vm13, %v678_v17  ;;  %v773_v11 = vld [vmem:[#allocation2 + $0x220] sm:$0xff]  ;;  %v914_v45 = vld [vmem:[#allocation2 + $0x331] sm:$0xff] }
  0x8f   : > { %688 = vst.msk [vmem:[#allocation2 + $0x3f7] sm:$0x3] %vm259_vm1, %v679_v21  ;;  %689 = vst.msk [vmem:[#allocation2 + $0x407] sm:$0x3] %vm259_vm1, %v680_v22  ;;  %1035 = vrot.lane.b32.xlu1 %v890_v52, %s5863_s28  ;;  %v775_v17 = vld [vmem:[#allocation2 + $0x240] sm:$0xff] }
  0x90   : > { %697 = vst.msk [vmem:[#allocation2 + $0x3ef] sm:$0xfc] %vm694_vm13, %v679_v21  ;;  %698 = vst.msk [vmem:[#allocation2 + $0x3ff] sm:$0xfc] %vm694_vm13, %v680_v22  ;;  %v776_v21 = vld [vmem:[#allocation2 + $0x250] sm:$0xff]  ;;  %v917_v46 = vld [vmem:[#allocation2 + $0x361] sm:$0xff] }
  0x91   : > { %690 = vst.msk [vmem:[#allocation2 + $0x417] sm:$0x3] %vm259_vm1, %v681_v25  ;;  %691 = vst.msk [vmem:[#allocation2 + $0x427] sm:$0x3] %vm259_vm1, %v682_v26  ;;  %1045 = vrot.lane.b32.xlu0 %v895_v62, %s5863_s28  ;;  %v898_v22 = vld [vmem:[#allocation2 + $0x1f1] sm:$0xff]  ;;  %v921_v56 = vld [vmem:[#allocation2 + $0x3c1] sm:$0xff] }
  0x92   : > { %699 = vst.msk [vmem:[#allocation2 + $0x40f] sm:$0xfc] %vm694_vm13, %v681_v25  ;;  %700 = vst.msk [vmem:[#allocation2 + $0x41f] sm:$0xfc] %vm694_vm13, %v682_v26  ;;  %v778_v25 = vld [vmem:[#allocation2 + $0x290] sm:$0xff] }
  0x93   : > { %692 = vst.msk [vmem:[#allocation2 + $0x437] sm:$0x3] %vm259_vm1, %v683_v7  ;;  %1039 = vrot.lane.b32.xlu1 %v892_v61, %s5863_s28  ;;  %v900_v26 = vld [vmem:[#allocation2 + $0x211] sm:$0xff] }
  0x94   : > { %701 = vst.msk [vmem:[#allocation2 + $0x42f] sm:$0xfc] %vm694_vm13, %v683_v7  ;;  %v902_v7 = vld [vmem:[#allocation2 + $0x231] sm:$0xff] }
  0x95   : > { %820 = vst.msk [vmem:[#allocation3 + $0x108] sm:$0xff] %vm257_vm0, %v756_v20  ;;  %821 = vst.msk [vmem:[#allocation3 + $0x120] sm:$0xff] %vm257_vm0, %v757_v6  ;;  %1049 = vrot.lane.b32.xlu0 %v897_v10, %s5863_s28  ;;  %v909_v20 = vld [vmem:[#allocation2 + $0x2c1] sm:$0xff] }
  0x96   : > { %728 = vst.msk [vmem:[#allocation2 + $0x478] sm:$0x1] %vm293_vm2, %v719_v38  ;;  %729 = vst.msk [vmem:[#allocation2 + $0x488] sm:$0x1] %vm293_vm2, %v720_v39  ;;  %v911_v6 = vld [vmem:[#allocation2 + $0x2e1] sm:$0xff] }
  0x97   : > { %737 = vst.msk [vmem:[#allocation2 + $0x470] sm:$0xfe] %vm736_vm14, %v719_v38  ;;  %738 = vst.msk [vmem:[#allocation2 + $0x480] sm:$0xfe] %vm736_vm14, %v720_v39  ;;  %1043 = vrot.lane.b32.xlu1 %v894_v8, %s5863_s28  ;;  %v907_v38 = vld [vmem:[#allocation2 + $0x2a1] sm:$0xff] }
  0x98   : > { %730 = vst.msk [vmem:[#allocation2 + $0x498] sm:$0x1] %vm293_vm2, %v721_v18  ;;  %731 = vst.msk [vmem:[#allocation2 + $0x4a8] sm:$0x1] %vm293_vm2, %v722_v41  ;;  %v783_v39 = vld [vmem:[#allocation2 + $0x2e0] sm:$0xff] }
  0x99   : > { %739 = vst.msk [vmem:[#allocation2 + $0x490] sm:$0xfe] %vm736_vm14, %v721_v18  ;;  %740 = vst.msk [vmem:[#allocation2 + $0x4a0] sm:$0xfe] %vm736_vm14, %v722_v41  ;;  %1053 = vrot.lane.b32.xlu0 %v899_v14, %s5863_s28  ;;  %v785_v18 = vld [vmem:[#allocation2 + $0x320] sm:$0xff]  ;;  %v786_v41 = vld [vmem:[#allocation2 + $0x330] sm:$0xff] }
  0x9a   : > { %732 = vst.msk [vmem:[#allocation2 + $0x4b8] sm:$0x1] %vm293_vm2, %v723_v42  ;;  %733 = vst.msk [vmem:[#allocation2 + $0x4c8] sm:$0x1] %vm293_vm2, %v724_v1  ;;  %v6629_v52 = vld [vmem:[#allocation2 + $0x3e0] sm:$0xff] }
  0x9b   : > { %741 = vst.msk [vmem:[#allocation2 + $0x4b0] sm:$0xfe] %vm736_vm14, %v723_v42  ;;  %742 = vst.msk [vmem:[#allocation2 + $0x4c0] sm:$0xfe] %vm736_vm14, %v724_v1  ;;  %1047 = vrot.lane.b32.xlu1 %v896_v13, %s5863_s28  ;;  %v908_v42 = vld [vmem:[#allocation2 + $0x2b1] sm:$0xff]  ;;  %v787_v1 = vld [vmem:[#allocation2 + $0x340] sm:$0xff] }
  0x9c   : > { %734 = vst.msk [vmem:[#allocation2 + $0x4d8] sm:$0x1] %vm293_vm2, %v725_v3  ;;  %v923_v61 = vld [vmem:[#allocation2 + $0x3e1] sm:$0xff] }
  0x9d   : > { %743 = vst.msk [vmem:[#allocation2 + $0x4d0] sm:$0xfe] %vm736_vm14, %v725_v3  ;;  %1057 = vrot.lane.b32.xlu0 %v901_v23, %s5863_s28  ;;  %v788_v3 = vld [vmem:[#allocation2 + $0x350] sm:$0xff]  ;;  %v6649_v62 = vld [vmem:[#allocation2 + $0x420] sm:$0xff] }
  0x9e   : > { %822 = vst.msk [vmem:[#allocation3 + $0x138] sm:$0xff] %vm257_vm0, %v758_v27  ;;  %823 = vst.msk [vmem:[#allocation3 + $0x150] sm:$0xff] %vm257_vm0, %v759_v28  ;;  %v789_v27 = vld [vmem:[#allocation2 + $0x360] sm:$0xff]  ;;  %v790_v28 = vld [vmem:[#allocation2 + $0x370] sm:$0xff] }
  0x9f   : > { %824 = vst.msk [vmem:[#allocation3 + $0x168] sm:$0xff] %vm257_vm0, %v760_v43  ;;  %825 = vst.msk [vmem:[#allocation3 + $0x180] sm:$0xff] %vm257_vm0, %v761_v44  ;;  %1051 = vrot.lane.b32.xlu1 %v898_v22, %s5863_s28  ;;  %v791_v43 = vld [vmem:[#allocation2 + $0x380] sm:$0xff]  ;;  %v792_v44 = vld [vmem:[#allocation2 + $0x390] sm:$0xff] }
  0xa0   : > { %826 = vst.msk [vmem:[#allocation3 + $0x198] sm:$0xff] %vm257_vm0, %v762_v47  ;;  %827 = vst.msk [vmem:[#allocation3 + $0x1b0] sm:$0xff] %vm257_vm0, %v763_v49  ;;  %v793_v47 = vld [vmem:[#allocation2 + $0x3c0] sm:$0xff]  ;;  %v6624_v49 = vld [vmem:[#allocation2 + $0x3d0] sm:$0xff] }
  0xa1   : > { %828 = vst.msk [vmem:[#allocation3 + $0x1c8] sm:$0xff] %vm257_vm0, %v764_v50  ;;  %829 = vst.msk [vmem:[#allocation3 + $0x1e0] sm:$0xff] %vm257_vm0, %v765_v51  ;;  %1061 = vrot.lane.b32.xlu0 %v903_v30, %s5863_s28  ;;  %v916_v50 = vld [vmem:[#allocation2 + $0x351] sm:$0xff]  ;;  %v919_v51 = vld [vmem:[#allocation2 + $0x381] sm:$0xff] }
  0xa2   : > { %830 = vst.msk [vmem:[#allocation3 + $0x1f8] sm:$0xff] %vm257_vm0, %v766_v53  ;;  %831 = vst.msk [vmem:[#allocation3 + $0x210] sm:$0xff] %vm257_vm0, %v767_v55  ;;  %v6634_v53 = vld [vmem:[#allocation2 + $0x3f0] sm:$0xff]  ;;  %v925_v8 = vld [vmem:[#allocation2 + $0x401] sm:$0xff] }
  0xa3   : > { %832 = vst.msk [vmem:[#allocation3 + $0x228] sm:$0xff] %vm257_vm0, %v768_v57  ;;  %833 = vst.msk [vmem:[#allocation3 + $0x240] sm:$0xff] %vm257_vm0, %v769_v58  ;;  %1055 = vrot.lane.b32.xlu1 %v900_v26, %s5863_s28  ;;  %v918_v55 = vld [vmem:[#allocation2 + $0x371] sm:$0xff]  ;;  %v6639_v57 = vld [vmem:[#allocation2 + $0x400] sm:$0xff]  ;;  %v1002_v26 = vpop.permute.xlu0 %1001 }
  0xa4   : > { %834 = vst.msk [vmem:[#allocation3 + $0x258] sm:$0xff] %vm257_vm0, %v770_v59  ;;  %835 = vst.msk [vmem:[#allocation3 + $0x270] sm:$0xff] %vm257_vm0, %v771_v63  ;;  %v6644_v58 = vld [vmem:[#allocation2 + $0x410] sm:$0xff]  ;;  %v801_v10 = vld [vmem:[#allocation2 + $0x460] sm:$0xff] }
  0xa5   : > { %836 = vst.msk [vmem:[#allocation3 + $0x288] sm:$0xff] %vm257_vm0, %v772_v4  ;;  %837 = vst.msk [vmem:[#allocation3 + $0x2a0] sm:$0xff] %vm257_vm0, %v773_v11  ;;  %1065 = vrot.lane.b32.xlu0 %v905_v2, %s5863_s28  ;;  %v920_v59 = vld [vmem:[#allocation2 + $0x391] sm:$0xff]  ;;  %v927_v13 = vld [vmem:[#allocation2 + $0x421] sm:$0xff] }
  0xa6   : > { %838 = vst.msk [vmem:[#allocation3 + $0x2b8] sm:$0xff] %vm257_vm0, %v774_v12  ;;  %839 = vst.msk [vmem:[#allocation3 + $0x2d0] sm:$0xff] %vm257_vm0, %v775_v17  ;;  %v6654_v63 = vld [vmem:[#allocation2 + $0x430] sm:$0xff]  ;;  %v6663_v14 = vld [vmem:[#allocation2 + $0x480] sm:$0xff] }
  0xa7   : > { %840 = vst.msk [vmem:[#allocation3 + $0x2e8] sm:$0xff] %vm257_vm0, %v776_v21  ;;  %841 = vst.msk [vmem:[#allocation3 + $0x300] sm:$0xff] %vm257_vm0, %v777_v24  ;;  %1059 = vrot.lane.b32.xlu1 %v902_v7, %s5863_s28  ;;  %v922_v4 = vld [vmem:[#allocation2 + $0x3d1] sm:$0xff]  ;;  %v929_v22 = vld [vmem:[#allocation2 + $0x461] sm:$0xff]  ;;  %v1018_v2 = vpop.permute.xlu0 %1017 }
  0xa8   : > { %842 = vst.msk [vmem:[#allocation3 + $0x318] sm:$0xff] %vm257_vm0, %v778_v25  ;;  %843 = vst.msk [vmem:[#allocation3 + $0x330] sm:$0xff] %vm257_vm0, %v779_v31  ;;  %v802_v11 = vld [vmem:[#allocation2 + $0x470] sm:$0xff]  ;;  %v805_v23 = vld [vmem:[#allocation2 + $0x4a0] sm:$0xff] }
  0xa9   : > { %844 = vst.msk [vmem:[#allocation3 + $0x348] sm:$0xff] %vm257_vm0, %v780_v34  ;;  %845 = vst.msk [vmem:[#allocation3 + $0x360] sm:$0xff] %vm257_vm0, %v781_v35  ;;  %1069 = vrot.lane.b32.xlu0 %v907_v38, %s5863_s28  ;;  %v924_v12 = vld [vmem:[#allocation2 + $0x3f1] sm:$0xff]  ;;  %v931_v30 = vld [vmem:[#allocation2 + $0x481] sm:$0xff] }
  0xaa   : > { %846 = vst.msk [vmem:[#allocation3 + $0x378] sm:$0xff] %vm257_vm0, %v782_v36  ;;  %847 = vst.msk [vmem:[#allocation3 + $0x390] sm:$0xff] %vm257_vm0, %v783_v39  ;;  %v804_v17 = vld [vmem:[#allocation2 + $0x490] sm:$0xff]  ;;  %v807_v31 = vld [vmem:[#allocation2 + $0x4c0] sm:$0xff] }
  0xab   : > { %1063 = vrot.lane.b32.xlu1 %v904_v37, %s5863_s28  ;;  %848 = vst.msk [vmem:[#allocation3 + $0x3a8] sm:$0xff] %vm257_vm0, %v784_v40  ;;  %849 = vst.msk [vmem:[#allocation3 + $0x3c0] sm:$0xff] %vm257_vm0, %v785_v18  ;;  %v926_v21 = vld [vmem:[#allocation2 + $0x411] sm:$0xff]  ;;  %v933_v35 = vld [vmem:[#allocation2 + $0x4a1] sm:$0xff] }
  0xac   : > { %850 = vst.msk [vmem:[#allocation3 + $0x3d8] sm:$0xff] %vm257_vm0, %v786_v41  ;;  %851 = vst.msk [vmem:[#allocation3 + $0x3f0] sm:$0xff] %vm257_vm0, %v787_v1  ;;  %v806_v24 = vld [vmem:[#allocation2 + $0x4b0] sm:$0xff]  ;;  %v935_v38 = vld [vmem:[#allocation2 + $0x4c1] sm:$0xff] }
  0xad   : > { %1073 = vrot.lane.b32.xlu0 %v909_v20, %s5863_s28  ;;  %852 = vst.msk [vmem:[#allocation3 + $0x408] sm:$0xff] %vm257_vm0, %v788_v3  ;;  %853 = vst.msk [vmem:[#allocation3 + $0x420] sm:$0xff] %vm257_vm0, %v789_v27  ;;  %v928_v25 = vld [vmem:[#allocation2 + $0x431] sm:$0xff]  ;;  %v1258_v20 = vld [vmem:[#allocation2 + $0x2] sm:$0xff] }
  0xae   : > { %854 = vst.msk [vmem:[#allocation3 + $0x438] sm:$0xff] %vm257_vm0, %v790_v28  ;;  %855 = vst.msk [vmem:[#allocation3 + $0x450] sm:$0xff] %vm257_vm0, %v791_v43  ;;  %v808_v34 = vld [vmem:[#allocation2 + $0x4d0] sm:$0xff]  ;;  %v6695_v3 = vld [vmem:[#allocation2 + $0x21] sm:$0xff] }
  0xaf   : > { %1067 = vrot.lane.b32.xlu1 %v906_v5, %s5863_s28  ;;  %856 = vst.msk [vmem:[#allocation3 + $0x468] sm:$0xff] %vm257_vm0, %v792_v44  ;;  %857 = vst.msk [vmem:[#allocation3 + $0x480] sm:$0xff] %vm257_vm0, %v793_v47  ;;  %v930_v7 = vld [vmem:[#allocation2 + $0x471] sm:$0xff]  ;;  %v1262_v27 = vld [vmem:[#allocation2 + $0x42] sm:$0xff] }
  0xb0   : > { %858 = vst.msk [vmem:[#allocation3 + $0x498] sm:$0xff] %vm257_vm0, %v6624_v49  ;;  %859 = vst.msk [vmem:[#allocation3 + $0x4b0] sm:$0xff] %vm257_vm0, %v6629_v52  ;;  %v932_v36 = vld [vmem:[#allocation2 + $0x491] sm:$0xff]  ;;  %v1264_v44 = vld [vmem:[#allocation2 + $0x62] sm:$0xff] }
  0xb1   : > { %1077 = vrot.lane.b32.xlu0 %v911_v6, %s5863_s28  ;;  %860 = vst.msk [vmem:[#allocation3 + $0x4c8] sm:$0xff] %vm257_vm0, %v6634_v53  ;;  %861 = vst.msk [vmem:[#allocation3 + $0x4e0] sm:$0xff] %vm257_vm0, %v6639_v57  ;;  %v934_v40 = vld [vmem:[#allocation2 + $0x4b1] sm:$0xff]  ;;  %v6690_v6 = vld [vmem:[#allocation2 + $0x22] sm:$0xff] }
  0xb2   : > { %862 = vst.msk [vmem:[#allocation3 + $0x4f8] sm:$0xff] %vm257_vm0, %v6644_v58  ;;  %863 = vst.msk [vmem:[#allocation3 + $0x510] sm:$0xff] %vm257_vm0, %v6649_v62  ;;  %v936_v41 = vld [vmem:[#allocation2 + $0x4d1] sm:$0xff] }
  0xb3   : > { %1071 = vrot.lane.b32.xlu1 %v908_v42, %s5863_s28  ;;  %864 = vst.msk [vmem:[#allocation3 + $0x528] sm:$0xff] %vm257_vm0, %v6654_v63  ;;  %865 = vst.msk [vmem:[#allocation3 + $0x540] sm:$0xff] %vm257_vm0, %v801_v10 }
  0xb4   : > { %866 = vst.msk [vmem:[#allocation3 + $0x558] sm:$0xff] %vm257_vm0, %v802_v11  ;;  %867 = vst.msk [vmem:[#allocation3 + $0x570] sm:$0xff] %vm257_vm0, %v6663_v14  ;;  %v1270_v11 = vld [vmem:[#allocation2 + $0xe2] sm:$0xff] }
  0xb5   : > { %1081 = vrot.lane.b32.xlu0 %v913_v19, %s5863_s28  ;;  %868 = vst.msk [vmem:[#allocation3 + $0x588] sm:$0xff] %vm257_vm0, %v804_v17  ;;  %869 = vst.msk [vmem:[#allocation3 + $0x5a0] sm:$0xff] %vm257_vm0, %v805_v23  ;;  %v1269_v17 = vld [vmem:[#allocation2 + $0xd2] sm:$0xff] }
  0xb6   : > { %870 = vst.msk [vmem:[#allocation3 + $0x5b8] sm:$0xff] %vm257_vm0, %v806_v24  ;;  %871 = vst.msk [vmem:[#allocation3 + $0x5d0] sm:$0xff] %vm257_vm0, %v807_v31  ;;  %v1271_v24 = vld [vmem:[#allocation2 + $0xf2] sm:$0xff] }
  0xb7   : > { %1075 = vrot.lane.b32.xlu1 %v910_v15, %s5863_s28  ;;  %1194 = vst.msk [vmem:[#allocation3] sm:$0xff] %vm1193_vm15, %v1002_v26  ;;  %1202 = vst.msk [vmem:[#allocation3 + $0xc0] sm:$0xff] %vm1193_vm15, %v1018_v2  ;;  %v6697_v15 = vld [vmem:[#allocation2 + $0x12] sm:$0xff]  ;;  %v1274_v26 = vld [vmem:[#allocation2 + $0x142] sm:$0xff] }
  0xb8   : > { %872 = vst.msk [vmem:[#allocation3 + $0x5e8] sm:$0xff] %vm257_vm0, %v808_v34  ;;  %2093 = vst.msk [vmem:[#allocation3 + $0x20] sm:$0xff] %vm257_vm0, %v6695_v3  ;;  %v1273_v31 = vld [vmem:[#allocation2 + $0x112] sm:$0xff] }
  0xb9   : > { %1085 = vrot.lane.b32.xlu0 %v915_v33, %s5863_s28  ;;  %v6709_v33 = vld [vmem:[#allocation2 + $0x32] sm:$0xff] }
  0xbb   : > { %1079 = vrot.lane.b32.xlu1 %v912_v29, %s5863_s28  ;;  %v6707_v29 = vld [vmem:[#allocation2 + $0x3e1] sm:$0xff] }
  0xbc   : > { %2141 = vst.msk [vmem:[#allocation3 + $0x4a0] sm:$0xff] %vm257_vm0, %v6707_v29 }
  0xbd   : > { %1089 = vrot.lane.b32.xlu0 %v917_v46, %s5863_s28  ;;  %v1263_v46 = vld [vmem:[#allocation2 + $0x52] sm:$0xff] }
  0xbf   : > { %1083 = vrot.lane.b32.xlu1 %v914_v45, %s5863_s28 }
  0xc1   : > { %1093 = vrot.lane.b32.xlu0 %v919_v51, %s5863_s28 }
  0xc3   : > { %1087 = vrot.lane.b32.xlu1 %v916_v50, %s5863_s28  ;;  %v1266_v50 = vld [vmem:[#allocation2 + $0xa2] sm:$0xff] }
  0xc5   : > { %1097 = vrot.lane.b32.xlu0 %v921_v56, %s5863_s28 }
  0xc7   : > { %1091 = vrot.lane.b32.xlu1 %v918_v55, %s5863_s28  ;;  %v1265_v55 = vld [vmem:[#allocation2 + $0x72] sm:$0xff] }
  0xc9   : > { %1101 = vrot.lane.b32.xlu0 %v923_v61, %s5863_s28 }
  0xcb   : > { %1095 = vrot.lane.b32.xlu1 %v920_v59, %s5863_s28  ;;  %v1268_v59 = vld [vmem:[#allocation2 + $0xc2] sm:$0xff] }
  0xcd   : > { %1105 = vrot.lane.b32.xlu0 %v925_v8, %s5863_s28  ;;  %v1267_v8 = vld [vmem:[#allocation2 + $0xb2] sm:$0xff] }
  0xcf   : > { %1099 = vrot.lane.b32.xlu1 %v922_v4, %s5863_s28  ;;  %v6726_v4 = vld [vmem:[#allocation2 + $0x31] sm:$0xff] }
  0xd0   : > { %2094 = vst.msk [vmem:[#allocation3 + $0x38] sm:$0xff] %vm257_vm0, %v6726_v4 }
  0xd1   : > { %1109 = vrot.lane.b32.xlu0 %v927_v13, %s5863_s28  ;;  %v6734_v13 = vld [vmem:[#allocation2 + $0x3f1] sm:$0xff] }
  0xd2   : > { %2142 = vst.msk [vmem:[#allocation3 + $0x4b8] sm:$0xff] %vm257_vm0, %v6734_v13 }
  0xd3   : > { %1103 = vrot.lane.b32.xlu1 %v924_v12, %s5863_s28 }
  0xd5   : > { %1113 = vrot.lane.b32.xlu0 %v929_v22, %s5863_s28  ;;  %v1272_v22 = vld [vmem:[#allocation2 + $0x102] sm:$0xff] }
  0xd6   : > { %v1006_v37 = vpop.permute.xlu1 %1005 }
  0xd7   : > { %1107 = vrot.lane.b32.xlu1 %v926_v21, %s5863_s28  ;;  %1196 = vst.msk [vmem:[#allocation3 + $0x30] sm:$0xff] %vm1193_vm15, %v1006_v37  ;;  %v1004_v39 = vpop.permute.xlu0 %1003 }
  0xd8   : > { %1195 = vst.msk [vmem:[#allocation3 + $0x18] sm:$0xff] %vm1193_vm15, %v1004_v39 }
  0xd9   : > { %1117 = vrot.lane.b32.xlu0 %v931_v30, %s5863_s28 }
  0xda   : > { %v1008_v5 = vpop.permute.xlu1 %1007 }
  0xdb   : > { %1111 = vrot.lane.b32.xlu1 %v928_v25, %s5863_s28  ;;  %1197 = vst.msk [vmem:[#allocation3 + $0x48] sm:$0xff] %vm1193_vm15, %v1008_v5  ;;  %v1277_v5 = vld [vmem:[#allocation2 + $0x172] sm:$0xff] }
  0xdc   : > { %v1010_v18 = vpop.permute.xlu0 %1009 }
  0xdd   : > { %1121 = vrot.lane.b32.xlu0 %v933_v35, %s5863_s28  ;;  %1198 = vst.msk [vmem:[#allocation3 + $0x60] sm:$0xff] %vm1193_vm15, %v1010_v18  ;;  %v6750_v35 = vld [vmem:[#allocation2 + $0x41] sm:$0xff] }
  0xde   : > { %v1012_v42 = vpop.permute.xlu1 %1011  ;;  %2095 = vst.msk [vmem:[#allocation3 + $0x50] sm:$0xff] %vm257_vm0, %v6750_v35  ;;  %v1280_v18 = vld [vmem:[#allocation2 + $0x1a2] sm:$0xff] }
  0xdf   : > { %1115 = vrot.lane.b32.xlu1 %v930_v7, %s5863_s28  ;;  %1199 = vst.msk [vmem:[#allocation3 + $0x78] sm:$0xff] %vm1193_vm15, %v1012_v42  ;;  %v1276_v7 = vld [vmem:[#allocation2 + $0x162] sm:$0xff]  ;;  %v1279_v42 = vld [vmem:[#allocation2 + $0x192] sm:$0xff] }
  0xe0   : > { %v1014_v1 = vpop.permute.xlu0 %1013 }
  0xe1   : > { %1125 = vrot.lane.b32.xlu0 %v935_v38, %s5863_s28  ;;  %1200 = vst.msk [vmem:[#allocation3 + $0x90] sm:$0xff] %vm1193_vm15, %v1014_v1  ;;  %v1278_v38 = vld [vmem:[#allocation2 + $0x182] sm:$0xff] }
  0xe3   : > { %1119 = vrot.lane.b32.xlu1 %v932_v36, %s5863_s28  ;;  %v1016_v19 = vpop.permute.xlu1 %1015  ;;  %v1275_v36 = vld [vmem:[#allocation2 + $0x152] sm:$0xff] }
  0xe4   : > { %1201 = vst.msk [vmem:[#allocation3 + $0xa8] sm:$0xff] %vm1193_vm15, %v1016_v19  ;;  %v1022_v28 = vpop.permute.xlu0 %1021  ;;  %v1282_v19 = vld [vmem:[#allocation2 + $0x1e2] sm:$0xff] }
  0xe5   : > { %1386 = vrot.lane.b32.xlu0 %v1258_v20, %s5864_s29  ;;  %1204 = vst.msk [vmem:[#allocation3 + $0xf0] sm:$0xff] %vm1193_vm15, %v1022_v28  ;;  %v1281_v28 = vld [vmem:[#allocation2 + $0x1b2] sm:$0xff] }
  0xe7   : > { %1123 = vrot.lane.b32.xlu1 %v934_v40, %s5863_s28  ;;  %v6758_v40 = vld [vmem:[#allocation2 + $0x401] sm:$0xff] }
  0xe8   : > { %v1026_v45 = vpop.permute.xlu0 %1025  ;;  %2143 = vst.msk [vmem:[#allocation3 + $0x4d0] sm:$0xff] %vm257_vm0, %v6758_v40 }
  0xe9   : > { %1390 = vrot.lane.b32.xlu0 %v6690_v6, %s5864_s29  ;;  %1206 = vst.msk [vmem:[#allocation3 + $0x120] sm:$0xff] %vm1193_vm15, %v1026_v45 }
  0xeb   : > { %1127 = vrot.lane.b32.xlu1 %v936_v41, %s5863_s28 }
  0xed   : > { %1394 = vrot.lane.b32.xlu0 %v1262_v27, %s5864_s29 }
  0xef   : > { %1388 = vrot.lane.b32.xlu1 %v6697_v15, %s5864_s29 }
  0xf1   : > { %v1020_v43 = vpop.permute.xlu1 %1019  ;;  %1398 = vrot.lane.b32.xlu0 %v1264_v44, %s5864_s29  ;;  %v1284_v44 = vld [vmem:[#allocation2 + $0x202] sm:$0xff] }
  0xf2   : > { %1203 = vst.msk [vmem:[#allocation3 + $0xd8] sm:$0xff] %vm1193_vm15, %v1020_v43 }
  0xf3   : > { %1392 = vrot.lane.b32.xlu1 %v6709_v33, %s5864_s29  ;;  %v1030_v51 = vpop.permute.xlu0 %1029 }
  0xf4   : > { %1208 = vst.msk [vmem:[#allocation3 + $0x150] sm:$0xff] %vm1193_vm15, %v1030_v51  ;;  %v1286_v51 = vld [vmem:[#allocation2 + $0x222] sm:$0xff] }
  0xf5   : > { %v1024_v47 = vpop.permute.xlu1 %1023  ;;  %1402 = vrot.lane.b32.xlu0 %v1266_v50, %s5864_s29 }
  0xf6   : > { %1205 = vst.msk [vmem:[#allocation3 + $0x108] sm:$0xff] %vm1193_vm15, %v1024_v47  ;;  %v1283_v47 = vld [vmem:[#allocation2 + $0x1f2] sm:$0xff] }
  0xf7   : > { %1396 = vrot.lane.b32.xlu1 %v1263_v46, %s5864_s29  ;;  %v1034_v61 = vpop.permute.xlu0 %1033  ;;  %v6774_v46 = vld [vmem:[#allocation2 + $0x51] sm:$0xff] }
  0xf8   : > { %1210 = vst.msk [vmem:[#allocation3 + $0x180] sm:$0xff] %vm1193_vm15, %v1034_v61 }
  0xf9   : > { %v1028_v56 = vpop.permute.xlu1 %1027  ;;  %1406 = vrot.lane.b32.xlu0 %v1268_v59, %s5864_s29  ;;  %2096 = vst.msk [vmem:[#allocation3 + $0x68] sm:$0xff] %vm257_vm0, %v6774_v46  ;;  %v1285_v59 = vld [vmem:[#allocation2 + $0x212] sm:$0xff] }
  0xfa   : > { %1207 = vst.msk [vmem:[#allocation3 + $0x138] sm:$0xff] %vm1193_vm15, %v1028_v56  ;;  %v6782_v56 = vld [vmem:[#allocation2 + $0x411] sm:$0xff] }
  0xfb   : > { %1400 = vrot.lane.b32.xlu1 %v1265_v55, %s5864_s29  ;;  %v1038_v12 = vpop.permute.xlu0 %1037  ;;  %2144 = vst.msk [vmem:[#allocation3 + $0x4e8] sm:$0xff] %vm257_vm0, %v6782_v56 }
  0xfc   : > { %1212 = vst.msk [vmem:[#allocation3 + $0x1b0] sm:$0xff] %vm1193_vm15, %v1038_v12 }
  0xfd   : > { %v1032_v10 = vpop.permute.xlu1 %1031  ;;  %1410 = vrot.lane.b32.xlu0 %v1270_v11, %s5864_s29  ;;  %v1287_v11 = vld [vmem:[#allocation2 + $0x232] sm:$0xff] }
  0xfe   : > { %1209 = vst.msk [vmem:[#allocation3 + $0x168] sm:$0xff] %vm1193_vm15, %v1032_v10 }
  0xff   : > { %1404 = vrot.lane.b32.xlu1 %v1267_v8, %s5864_s29  ;;  %v1042_v23 = vpop.permute.xlu0 %1041  ;;  %v1288_v8 = vld [vmem:[#allocation2 + $0x242] sm:$0xff] }
 0x100   : > { %1214 = vst.msk [vmem:[#allocation3 + $0x1e0] sm:$0xff] %vm1193_vm15, %v1042_v23 }
 0x101   : > { %v1036_v21 = vpop.permute.xlu1 %1035  ;;  %1414 = vrot.lane.b32.xlu0 %v1272_v22, %s5864_s29  ;;  %v1289_v22 = vld [vmem:[#allocation2 + $0x252] sm:$0xff] }
 0x102   : > { %1211 = vst.msk [vmem:[#allocation3 + $0x198] sm:$0xff] %vm1193_vm15, %v1036_v21 }
 0x103   : > { %1408 = vrot.lane.b32.xlu1 %v1269_v17, %s5864_s29  ;;  %v1046_v30 = vpop.permute.xlu0 %1045  ;;  %v1290_v17 = vld [vmem:[#allocation2 + $0x282] sm:$0xff] }
 0x104   : > { %1216 = vst.msk [vmem:[#allocation3 + $0x210] sm:$0xff] %vm1193_vm15, %v1046_v30  ;;  %v6801_v30 = vld [vmem:[#allocation2 + $0x61] sm:$0xff] }
 0x105   : > { %v1040_v25 = vpop.permute.xlu1 %1039  ;;  %1418 = vrot.lane.b32.xlu0 %v1274_v26, %s5864_s29  ;;  %v3644_v26 = vld [vmem:[%s9000_s2 + $0x78] sm:$0xff]  ;;  %2097 = vst.msk [vmem:[#allocation3 + $0x80] sm:$0xff] %vm257_vm0, %v6801_v30 }
 0x106   : > { %1213 = vst.msk [vmem:[#allocation3 + $0x1c8] sm:$0xff] %vm1193_vm15, %v1040_v25  ;;  %3865 = vmatpush1.msra.mxu0 %v3644_v26  ;;  %5800 = vmatpush1.msra.mxu1 %v3644_v26  ;;  %v1301_v26 = vld [vmem:[#allocation2 + $0x352] sm:$0xff] }
 0x107   : > { %1412 = vrot.lane.b32.xlu1 %v1271_v24, %s5864_s29  ;;  %v1050_v2 = vpop.permute.xlu0 %1049  ;;  %v1292_v24 = vld [vmem:[#allocation2 + $0x2a2] sm:$0xff]  ;;  %3866 = vmatprep.subr.mxu0 %v5862_v0 }
 0x108   : > { %1218 = vst.msk [vmem:[#allocation3 + $0x240] sm:$0xff] %vm1193_vm15, %v1050_v2  ;;  %v1294_v2 = vld [vmem:[#allocation2 + $0x2c2] sm:$0xff]  ;;  %5769 = vmatprep.subr.mxu1 %v5862_v0 }
 0x109   : > { %v1044_v34 = vpop.permute.xlu1 %1043  ;;  %1422 = vrot.lane.b32.xlu0 %v1276_v7, %s5864_s29 }
 0x10a   : > { %1215 = vst.msk [vmem:[#allocation3 + $0x1f8] sm:$0xff] %vm1193_vm15, %v1044_v34  ;;  %v1291_v34 = vld [vmem:[#allocation2 + $0x292] sm:$0xff] }
 0x10b   : > { %1416 = vrot.lane.b32.xlu1 %v1273_v31, %s5864_s29  ;;  %v1054_v39 = vpop.permute.xlu0 %1053  ;;  %v3643_v31 = vld [vmem:[%s9000_s2 + $0x70] sm:$0xff] }
 0x10c   : > { %1220 = vst.msk [vmem:[#allocation3 + $0x270] sm:$0xff] %vm1193_vm15, %v1054_v39  ;;  %3867 = vmatpush1.msra.mxu0 %v3643_v31  ;;  %v3641_v39 = vld [vmem:[%s9000_s2 + $0x60] sm:$0xff]  ;;  %5801 = vmatpush1.msra.mxu1 %v3643_v31 }
 0x10d   : > { %v1048_v37 = vpop.permute.xlu1 %1047  ;;  %1426 = vrot.lane.b32.xlu0 %v1278_v38, %s5864_s29  ;;  %3868 = vmatprep.subr.mxu0 %v5862_v0  ;;  %v6818_v38 = vld [vmem:[#allocation2 + $0x421] sm:$0xff] }
 0x10e   : > { %1217 = vst.msk [vmem:[#allocation3 + $0x228] sm:$0xff] %vm1193_vm15, %v1048_v37  ;;  %v3642_v37 = vld [vmem:[%s9000_s2 + $0x68] sm:$0xff]  ;;  %5770 = vmatprep.subr.mxu1 %v5862_v0 }
 0x10f   : > { %1420 = vrot.lane.b32.xlu1 %v1275_v36, %s5864_s29  ;;  %v1058_v41 = vpop.permute.xlu0 %1057  ;;  %3869 = vmatpush1.msra.mxu0 %v3642_v37  ;;  %2145 = vst.msk [vmem:[#allocation3 + $0x500] sm:$0xff] %vm257_vm0, %v6818_v38 }
 0x110   : > { %1222 = vst.msk [vmem:[#allocation3 + $0x2a0] sm:$0xff] %vm1193_vm15, %v1058_v41  ;;  %3870 = vmatprep.subr.mxu0 %v5862_v0  ;;  %5802 = vmatpush1.msra.mxu1 %v3642_v37  ;;  %v3633_v37 = vld [vmem:[%s9000_s2 + $0x20] sm:$0xff] }
 0x111   : > { %v1052_v20 = vpop.permute.xlu1 %1051  ;;  %1430 = vrot.lane.b32.xlu0 %v1280_v18, %s5864_s29  ;;  %v1296_v18 = vld [vmem:[#allocation2 + $0x2e2] sm:$0xff]  ;;  %3871 = vmatpush1.msra.mxu0 %v3641_v39 }
 0x112   : > { %1219 = vst.msk [vmem:[#allocation3 + $0x258] sm:$0xff] %vm1193_vm15, %v1052_v20  ;;  %3872 = vmatprep.subr.mxu0 %v5862_v0  ;;  %5771 = vmatprep.subr.mxu1 %v5862_v0 }
 0x113   : > { %1424 = vrot.lane.b32.xlu1 %v1277_v5, %s5864_s29  ;;  %v1062_v27 = vpop.permute.xlu0 %1061  ;;  %v1293_v5 = vld [vmem:[#allocation2 + $0x2b2] sm:$0xff]  ;;  %5803 = vmatpush1.msra.mxu1 %v3641_v39 }
 0x114   : > { %1224 = vst.msk [vmem:[#allocation3 + $0x2d0] sm:$0xff] %vm1193_vm15, %v1062_v27  ;;  %5772 = vmatprep.subr.mxu1 %v5862_v0  ;;  %v1303_v39 = vld [vmem:[#allocation2 + $0x372] sm:$0xff] }
 0x115   : > { %v1056_v1 = vpop.permute.xlu1 %1055  ;;  %1434 = vrot.lane.b32.xlu0 %v1282_v19, %s5864_s29  ;;  %v1295_v19 = vld [vmem:[#allocation2 + $0x2d2] sm:$0xff] }
 0x116   : > { %1221 = vst.msk [vmem:[#allocation3 + $0x288] sm:$0xff] %vm1193_vm15, %v1056_v1  ;;  %v3639_v1 = vld [vmem:[%s9000_s2 + $0x50] sm:$0xff] }
 0x117   : > { %1428 = vrot.lane.b32.xlu1 %v1279_v42, %s5864_s29  ;;  %v1066_v45 = vpop.permute.xlu0 %1065  ;;  %v3640_v42 = vld [vmem:[%s9000_s2 + $0x58] sm:$0xff] }
 0x118   : > { %1226 = vst.msk [vmem:[#allocation3 + $0x300] sm:$0xff] %vm1193_vm15, %v1066_v45  ;;  %3873 = vmatpush1.msra.mxu0 %v3640_v42  ;;  %v1297_v45 = vld [vmem:[#allocation2 + $0x2f2] sm:$0xff]  ;;  %5804 = vmatpush1.msra.mxu1 %v3640_v42 }
 0x119   : > { %v1060_v43 = vpop.permute.xlu1 %1059  ;;  %1438 = vrot.lane.b32.xlu0 %v1284_v44, %s5864_s29  ;;  %3874 = vmatprep.subr.mxu0 %v5862_v0  ;;  %v3638_v44 = vld [vmem:[%s9000_s2 + $0x48] sm:$0xff] }
 0x11a   : > { %1223 = vst.msk [vmem:[#allocation3 + $0x2b8] sm:$0xff] %vm1193_vm15, %v1060_v43  ;;  %3875 = vmatpush1.msra.mxu0 %v3639_v1  ;;  %5773 = vmatprep.subr.mxu1 %v5862_v0 }
 0x11b   : > { %1432 = vrot.lane.b32.xlu1 %v1281_v28, %s5864_s29  ;;  %v1070_v55 = vpop.permute.xlu0 %1069  ;;  %v1298_v28 = vld [vmem:[#allocation2 + $0x322] sm:$0xff]  ;;  %3876 = vmatprep.subr.mxu0 %v5862_v0 }
 0x11c   : > { %1228 = vst.msk [vmem:[#allocation3 + $0x330] sm:$0xff] %vm1193_vm15, %v1070_v55  ;;  %3877 = vmatpush1.msra.mxu0 %v3638_v44  ;;  %5805 = vmatpush1.msra.mxu1 %v3639_v1  ;;  %v1305_v1 = vld [vmem:[#allocation2 + $0x392] sm:$0xff] }
 0x11d   : > { %v1064_v50 = vpop.permute.xlu1 %1063  ;;  %1442 = vrot.lane.b32.xlu0 %v1286_v51, %s5864_s29  ;;  %v3637_v51 = vld [vmem:[%s9000_s2 + $0x40] sm:$0xff]  ;;  %3878 = vmatprep.subr.mxu0 %v5862_v0 }
 0x11e   : > { %1225 = vst.msk [vmem:[#allocation3 + $0x2e8] sm:$0xff] %vm1193_vm15, %v1064_v50  ;;  %v1300_v50 = vld [vmem:[#allocation2 + $0x342] sm:$0xff]  ;;  %3879 = vmatpush1.msra.mxu0 %v3637_v51  ;;  %5774 = vmatprep.subr.mxu1 %v5862_v0 }
 0x11f   : > { %1436 = vrot.lane.b32.xlu1 %v1283_v47, %s5864_s29  ;;  %v1074_v10 = vpop.permute.xlu0 %1073  ;;  %3880 = vmatprep.subr.mxu0 %v5862_v0 }
 0x120   : > { %1230 = vst.msk [vmem:[#allocation3 + $0x360] sm:$0xff] %vm1193_vm15, %v1074_v10  ;;  %5806 = vmatpush1.msra.mxu1 %v3638_v44 }
 0x121   : > { %v1068_v61 = vpop.permute.xlu1 %1067  ;;  %1446 = vrot.lane.b32.xlu0 %v1288_v8, %s5864_s29  ;;  %v1299_v8 = vld [vmem:[#allocation2 + $0x332] sm:$0xff]  ;;  %5775 = vmatprep.subr.mxu1 %v5862_v0 }
 0x122   : > { %1227 = vst.msk [vmem:[#allocation3 + $0x318] sm:$0xff] %vm1193_vm15, %v1068_v61  ;;  %v6861_v61 = vld [vmem:[#allocation2 + $0x71] sm:$0xff]  ;;  %5807 = vmatpush1.msra.mxu1 %v3637_v51 }
 0x123   : > { %1440 = vrot.lane.b32.xlu1 %v1285_v59, %s5864_s29  ;;  %v1078_v21 = vpop.permute.xlu0 %1077  ;;  %v3636_v59 = vld [vmem:[%s9000_s2 + $0x38] sm:$0xff]  ;;  %2098 = vst.msk [vmem:[#allocation3 + $0x98] sm:$0xff] %vm257_vm0, %v6861_v61  ;;  %5776 = vmatprep.subr.mxu1 %v5862_v0 }
 0x124   : > { %1232 = vst.msk [vmem:[#allocation3 + $0x390] sm:$0xff] %vm1193_vm15, %v1078_v21  ;;  %3881 = vmatpush1.msra.mxu0 %v3636_v59  ;;  %5808 = vmatpush1.msra.mxu1 %v3636_v59 }
 0x125   : > { %v1072_v12 = vpop.permute.xlu1 %1071  ;;  %1450 = vrot.lane.b32.xlu0 %v1290_v17, %s5864_s29  ;;  %v6872_v17 = vld [vmem:[%s6251_s27 + $0x38] sm:$0xff]  ;;  %3882 = vmatprep.subr.mxu0 %v5862_v0 }
 0x126   : > { %1229 = vst.msk [vmem:[#allocation3 + $0x348] sm:$0xff] %vm1193_vm15, %v1072_v12  ;;  %v6869_v12 = vld [vmem:[%s6244_s24 + $0x38] sm:$0xff]  ;;  %5777 = vmatprep.subr.mxu1 %v5862_v0  ;;  %v625_v42 = vrot.slane %v6872_v17, 5 }
 0x127   : > { %1444 = vrot.lane.b32.xlu1 %v1287_v11, %s5864_s29  ;;  %v1082_v25 = vpop.permute.xlu0 %1081  ;;  %v1302_v11 = vld [vmem:[#allocation2 + $0x362] sm:$0xff] }
 0x128   : > { %1234 = vst.msk [vmem:[#allocation3 + $0x3c0] sm:$0xff] %vm1193_vm15, %v1082_v25  ;;  %v668_v25 = vrot.slane %v6872_v17, 6 }
 0x129   : > { %v1076_v23 = vpop.permute.xlu1 %1075  ;;  %1454 = vrot.lane.b32.xlu0 %v1292_v24, %s5864_s29  ;;  %v6883_v24 = vld [vmem:[#allocation2 + $0x431] sm:$0xff] }
 0x12a   : > { %1231 = vst.msk [vmem:[#allocation3 + $0x378] sm:$0xff] %vm1193_vm15, %v1076_v23  ;;  %v429_v23 = vsub.f32 %v6869_v12, %v6872_v17 }
 0x12b   : > { %1448 = vrot.lane.b32.xlu1 %v1289_v22, %s5864_s29  ;;  %v1086_v36 = vpop.permute.xlu0 %1085  ;;  %v3635_v22 = vld [vmem:[%s9000_s2 + $0x30] sm:$0xff]  ;;  %2146 = vst.msk [vmem:[#allocation3 + $0x518] sm:$0xff] %vm257_vm0, %v6883_v24 }
 0x12c   : > { %1236 = vst.msk [vmem:[#allocation3 + $0x3f0] sm:$0xff] %vm1193_vm15, %v1086_v36  ;;  %3883 = vmatpush1.msra.mxu0 %v3635_v22  ;;  %5809 = vmatpush1.msra.mxu1 %v3635_v22  ;;  %v6963_v22 = vld [vmem:[#allocation2 + $0x422] sm:$0xff] }
 0x12d   : > { %v1080_v7 = vpop.permute.xlu1 %1079  ;;  %1458 = vrot.lane.b32.xlu0 %v1294_v2, %s5864_s29  ;;  %437 = vst.msk [vmem:[#allocation2 + $0x81] sm:$0xff] %vm257_vm0, %v429_v23  ;;  %v684_v2 = vsub.f32 %v6869_v12, %v668_v25  ;;  %3884 = vmatprep.subr.mxu0 %v5862_v0  ;;  %v3660_v23 = vld [vmem:[%s9000_s2 + $0xf8] sm:$0xff] }
 0x12e   : > { %1233 = vst.msk [vmem:[#allocation3 + $0x3a8] sm:$0xff] %vm1193_vm15, %v1080_v7  ;;  %v3634_v7 = vld [vmem:[%s9000_s2 + $0x28] sm:$0xff]  ;;  %5778 = vmatprep.subr.mxu1 %v5862_v0 }
 0x12f   : > { %1452 = vrot.lane.b32.xlu1 %v1291_v34, %s5864_s29  ;;  %v1090_v41 = vpop.permute.xlu0 %1089  ;;  %v1304_v34 = vld [vmem:[#allocation2 + $0x382] sm:$0xff]  ;;  %693 = vst.msk [vmem:[#allocation2 + $0x447] sm:$0x3] %vm259_vm1, %v684_v2  ;;  %3885 = vmatpush1.msra.mxu0 %v3634_v7  ;;  %vm1578_vm1 = vcmask 785920  }
 0x130   : > { %1238 = vst.msk [vmem:[#allocation3 + $0x420] sm:$0xff] %vm1193_vm15, %v1090_v41  ;;  %3886 = vmatprep.subr.mxu0 %v5862_v0  ;;  %v3632_v41 = vld [vmem:[%s9000_s2 + $0x18] sm:$0xff]  ;;  %5810 = vmatpush1.msra.mxu1 %v3634_v7  ;;  %v1314_v7 = vld [vmem:[#allocation2 + $0x462] sm:$0xff] }
 0x131   : > { %v1084_v20 = vpop.permute.xlu1 %1083  ;;  %1462 = vrot.lane.b32.xlu0 %v1296_v18, %s5864_s29  ;;  %702 = vst.msk [vmem:[#allocation2 + $0x43f] sm:$0xfc] %vm694_vm13, %v684_v2  ;;  %3887 = vmatpush1.msra.mxu0 %v3633_v37  ;;  %vm5417_vm13 = vcmask 1044484  }
 0x132   : > { %1235 = vst.msk [vmem:[#allocation3 + $0x3d8] sm:$0xff] %vm1193_vm15, %v1084_v20  ;;  %v1306_v20 = vld [vmem:[#allocation2 + $0x3c2] sm:$0xff]  ;;  %3888 = vmatprep.subr.mxu0 %v5862_v0  ;;  %5779 = vmatprep.subr.mxu1 %v5862_v0 }
 0x133   : > { %1456 = vrot.lane.b32.xlu1 %v1293_v5, %s5864_s29  ;;  %v1094_v43 = vpop.permute.xlu0 %1093  ;;  %3889 = vmatpush1.msra.mxu0 %v3632_v41 }
 0x134   : > { %1240 = vst.msk [vmem:[#allocation3 + $0x450] sm:$0xff] %vm1193_vm15, %v1094_v43  ;;  %v641_v43 = vsub.f32 %v6869_v12, %v625_v42  ;;  %3890 = vmatprep.subr.mxu0 %v5862_v0  ;;  %5811 = vmatpush1.msra.mxu1 %v3633_v37  ;;  %v2028_v37 = vld [vmem:[#allocation2 + $0x11] sm:$0xff] }
 0x135   : > { %v1088_v27 = vpop.permute.xlu1 %1087  ;;  %1466 = vrot.lane.b32.xlu0 %v1298_v28, %s5864_s29  ;;  %v3631_v28 = vld [vmem:[%s9000_s2 + $0x10] sm:$0xff]  ;;  %5780 = vmatprep.subr.mxu1 %v5862_v0  ;;  %2092 = vst.msk [vmem:[#allocation3 + $0x8] sm:$0xff] %vm257_vm0, %v2028_v37  ;;  %v3649_v37 = vld [vmem:[%s9000_s2 + $0xa0] sm:$0xff] }
 0x136   : > { %1237 = vst.msk [vmem:[#allocation3 + $0x408] sm:$0xff] %vm1193_vm15, %v1088_v27  ;;  %v6918_v27 = vld [vmem:[#allocation2 + $0x3e2] sm:$0xff]  ;;  %3891 = vmatpush1.msra.mxu0 %v3631_v28  ;;  %5812 = vmatpush1.msra.mxu1 %v3632_v41 }
 0x137   : > { %1460 = vrot.lane.b32.xlu1 %v1295_v19, %s5864_s29  ;;  %v1098_v55 = vpop.permute.xlu0 %1097  ;;  %651 = vst.msk [vmem:[#allocation2 + $0x3a6] sm:$0x7] %vm643_vm11, %v641_v43  ;;  %3892 = vmatprep.subr.mxu0 %v5862_v0  ;;  %v3657_v41 = vld [vmem:[%s9000_s2 + $0xe0] sm:$0xff]  ;;  %vm5413_vm11 = vcmask 1042434  }
 0x138   : > { %1242 = vst.msk [vmem:[#allocation3 + $0x480] sm:$0xff] %vm1193_vm15, %v1098_v55  ;;  %v6942_v55 = vld [vmem:[#allocation2 + $0x402] sm:$0xff]  ;;  %5781 = vmatprep.subr.mxu1 %v5862_v0 }
 0x139   : > { %v1092_v47 = vpop.permute.xlu1 %1091  ;;  %1470 = vrot.lane.b32.xlu0 %v1300_v50, %s5864_s29  ;;  %660 = vst.msk [vmem:[#allocation2 + $0x39e] sm:$0xf8] %vm652_vm12, %v641_v43  ;;  %v6936_v50 = vld [vmem:[#allocation2 + $0x3d2] sm:$0xff]  ;;  %5813 = vmatpush1.msra.mxu1 %v3631_v28  ;;  %vm5415_vm12 = vcmask 1043459  }
 0x13a   : > { %1239 = vst.msk [vmem:[#allocation3 + $0x438] sm:$0xff] %vm1193_vm15, %v1092_v47  ;;  %v6934_v47 = vld [vmem:[#allocation2 + $0x81] sm:$0xff]  ;;  %5782 = vmatprep.subr.mxu1 %v5862_v0 }
 0x13b   : > { %1464 = vrot.lane.b32.xlu1 %v1297_v45, %s5864_s29  ;;  %v1102_v21 = vpop.permute.xlu0 %1101  ;;  %v3630_v45 = vld [vmem:[%s9000_s2 + $0x8] sm:$0xff]  ;;  %2099 = vst.msk [vmem:[#allocation3 + $0xb0] sm:$0xff] %vm257_vm0, %v6934_v47 }
 0x13c   : > { %1244 = vst.msk [vmem:[#allocation3 + $0x4b0] sm:$0xff] %vm1193_vm15, %v1102_v21  ;;  %3893 = vmatpush1.msra.mxu0 %v3630_v45  ;;  %5814 = vmatpush1.msra.mxu1 %v3630_v45  ;;  %v1317_v45 = vld [vmem:[#allocation2 + $0x492] sm:$0xff] }
 0x13d   : > { %v1096_v10 = vpop.permute.xlu1 %1095  ;;  %1474 = vrot.lane.b32.xlu0 %v1302_v11, %s5864_s29  ;;  %v6956_v11 = vld [vmem:[#allocation2 + $0x3f2] sm:$0xff]  ;;  %3894 = vmatprep.subr.mxu0 %v5862_v0 }
 0x13e   : > { %1241 = vst.msk [vmem:[#allocation3 + $0x468] sm:$0xff] %vm1193_vm15, %v1096_v10  ;;  %v6954_v10 = vld [vmem:[#allocation2 + $0x441] sm:$0xff]  ;;  %5783 = vmatprep.subr.mxu1 %v5862_v0 }
 0x13f   : > { %1468 = vrot.lane.b32.xlu1 %v1299_v8, %s5864_s29  ;;  %v1106_v36 = vpop.permute.xlu0 %1105  ;;  %v3629_v8 = vld [vmem:[%s9000_s2] sm:$0xff]  ;;  %2147 = vst.msk [vmem:[#allocation3 + $0x530] sm:$0xff] %vm257_vm0, %v6954_v10 }
 0x140   : > { %1246 = vst.msk [vmem:[#allocation3 + $0x4e0] sm:$0xff] %vm1193_vm15, %v1106_v36  ;;  %3895 = vmatpush1.msra.mxu0 %v3629_v8  ;;  %5815 = vmatpush1.msra.mxu1 %v3629_v8  ;;  %v3658_v36 = vld [vmem:[%s9000_s2 + $0xe8] sm:$0xff] }
 0x141   : > { %v1100_v31 = vpop.permute.xlu1 %1099  ;;  %1478 = vrot.lane.b32.xlu0 %v1304_v34, %s5864_s29  ;;  %3896 = vmatprep.subr.mxu0 %v5862_v0 }
 0x142   : > { %1243 = vst.msk [vmem:[#allocation3 + $0x498] sm:$0xff] %vm1193_vm15, %v1100_v31  ;;  %v6977_v31 = vld [vmem:[#allocation2 + $0x412] sm:$0xff]  ;;  %3897 = vmatpush2.msra.mxu0 %v3660_v23  ;;  %5784 = vmatprep.subr.mxu1 %v5862_v0 }
 0x143   : > { %1472 = vrot.lane.b32.xlu1 %v1301_v26, %s5864_s29  ;;  %v1110_v18 = vpop.permute.xlu0 %1109  ;;  %v3659_v26 = vld [vmem:[%s9000_s2 + $0xf0] sm:$0xff]  ;;  %3898 = vmatprep.subr.mxu0 %v5862_v0 }
 0x144   : > { %1248 = vst.msk [vmem:[#allocation3 + $0x510] sm:$0xff] %vm1193_vm15, %v1110_v18  ;;  %3899 = vmatpush2.msra.mxu0 %v3659_v26  ;;  %v6997_v18 = vld [vmem:[#allocation2 + $0x482] sm:$0xff]  ;;  %5816 = vmatpush2.msra.mxu1 %v3660_v23 }
 0x145   : > { %v1104_v5 = vpop.permute.xlu1 %1103  ;;  %1482 = vrot.lane.b32.xlu0 %v1306_v20, %s5864_s29  ;;  %3900 = vmatprep.subr.mxu0 %v5862_v0 }
 0x146   : > { %1245 = vst.msk [vmem:[#allocation3 + $0x4c8] sm:$0xff] %vm1193_vm15, %v1104_v5  ;;  %v6992_v5 = vld [vmem:[#allocation2 + $0x432] sm:$0xff]  ;;  %3901 = vmatpush2.msra.mxu0 %v3658_v36  ;;  %5785 = vmatprep.subr.mxu1 %v5862_v0 }
 0x147   : > { %1476 = vrot.lane.b32.xlu1 %v1303_v39, %s5864_s29  ;;  %v1114_v44 = vpop.permute.xlu0 %1113  ;;  %v2076_v39 = vld [vmem:[#allocation2 + $0x3d1] sm:$0xff]  ;;  %3902 = vmatprep.subr.mxu0 %v5862_v0 }
 0x148   : > { %1250 = vst.msk [vmem:[#allocation3 + $0x540] sm:$0xff] %vm1193_vm15, %v1114_v44  ;;  %5817 = vmatpush2.msra.mxu1 %v3659_v26  ;;  %3903 = vmatpush2.msra.mxu0 %v3657_v41  ;;  %v3655_v44 = vld [vmem:[%s9000_s2 + $0xd0] sm:$0xff] }
 0x149   : > { %v1108_v19 = vpop.permute.xlu1 %1107  ;;  %1486 = vrot.lane.b32.xlu0 %v6918_v27, %s5864_s29  ;;  %2140 = vst.msk [vmem:[#allocation3 + $0x488] sm:$0xff] %vm257_vm0, %v2076_v39  ;;  %5786 = vmatprep.subr.mxu1 %v5862_v0 }
 0x14a   : > { %1247 = vst.msk [vmem:[#allocation3 + $0x4f8] sm:$0xff] %vm1193_vm15, %v1108_v19  ;;  %v7011_v19 = vld [vmem:[#allocation2 + $0x472] sm:$0xff]  ;;  %3904 = vmatprep.subr.mxu0 %v5862_v0  ;;  %5818 = vmatpush2.msra.mxu1 %v3658_v36 }
 0x14b   : > { %1480 = vrot.lane.b32.xlu1 %v1305_v1, %s5864_s29  ;;  %v1118_v59 = vpop.permute.xlu0 %1117  ;;  %v3656_v1 = vld [vmem:[%s9000_s2 + $0xd8] sm:$0xff]  ;;  %5787 = vmatprep.subr.mxu1 %v5862_v0 }
 0x14c   : > { %1252 = vst.msk [vmem:[#allocation3 + $0x570] sm:$0xff] %vm1193_vm15, %v1118_v59  ;;  %3905 = vmatpush2.msra.mxu0 %v3656_v1  ;;  %5819 = vmatpush2.msra.mxu1 %v3657_v41  ;;  %v3654_v59 = vld [vmem:[%s9000_s2 + $0xc8] sm:$0xff] }
 0x14d   : > { %v1112_v51 = vpop.permute.xlu1 %1111  ;;  %1490 = vrot.lane.b32.xlu0 %v6942_v55, %s5864_s29  ;;  %3906 = vmatprep.subr.mxu0 %v5862_v0 }
 0x14e   : > { %1249 = vst.msk [vmem:[#allocation3 + $0x528] sm:$0xff] %vm1193_vm15, %v1112_v51  ;;  %3907 = vmatpush2.msra.mxu0 %v3655_v44  ;;  %5788 = vmatprep.subr.mxu1 %v5862_v0 }
 0x14f   : > { %1484 = vrot.lane.b32.xlu1 %v6936_v50, %s5864_s29  ;;  %v1122_v25 = vpop.permute.xlu0 %1121  ;;  %3908 = vmatprep.subr.mxu0 %v5862_v0 }
 0x150   : > { %1254 = vst.msk [vmem:[#allocation3 + $0x5a0] sm:$0xff] %vm1193_vm15, %v1122_v25  ;;  %5820 = vmatpush2.msra.mxu1 %v3656_v1  ;;  %3909 = vmatpush2.msra.mxu0 %v3654_v59  ;;  %v3652_v25 = vld [vmem:[%s9000_s2 + $0xb8] sm:$0xff] }
 0x151   : > { %v1116_v21 = vpop.permute.xlu1 %1115  ;;  %1494 = vrot.lane.b32.xlu0 %v6963_v22, %s5864_s29  ;;  %5789 = vmatprep.subr.mxu1 %v5862_v0 }
 0x152   : > { %1251 = vst.msk [vmem:[#allocation3 + $0x558] sm:$0xff] %vm1193_vm15, %v1116_v21  ;;  %3910 = vmatprep.subr.mxu0 %v5862_v0  ;;  %5821 = vmatpush2.msra.mxu1 %v3655_v44 }
 0x153   : > { %1488 = vrot.lane.b32.xlu1 %v6956_v11, %s5864_s29  ;;  %v1126_v2 = vpop.permute.xlu0 %1125  ;;  %5790 = vmatprep.subr.mxu1 %v5862_v0 }
 0x154   : > { %1256 = vst.msk [vmem:[#allocation3 + $0x5d0] sm:$0xff] %vm1193_vm15, %v1126_v2  ;;  %5822 = vmatpush2.msra.mxu1 %v3654_v59  ;;  %v7159_v59 = vld [vmem:[#allocation2 + $0xe1] sm:$0xff] }
 0x155   : > { %v1120_v34 = vpop.permute.xlu1 %1119  ;;  %1498 = vrot.lane.b32.xlu0 %v1314_v7, %s5864_s29  ;;  %5791 = vmatprep.subr.mxu1 %v5862_v0  ;;  %v7066_v7 = vld [vmem:[#allocation2 + $0xc1] sm:$0xff]  ;;  %2103 = vst.msk [vmem:[#allocation3 + $0x110] sm:$0xff] %vm257_vm0, %v7159_v59 }
 0x156   : > { %1253 = vst.msk [vmem:[#allocation3 + $0x588] sm:$0xff] %vm1193_vm15, %v1120_v34  ;;  %v3651_v34 = vld [vmem:[%s9000_s2 + $0xb0] sm:$0xff] }
 0x157   : > { %1492 = vrot.lane.b32.xlu1 %v6977_v31, %s5864_s29  ;;  %v1387_v42 = vpop.permute.xlu0 %1386  ;;  %2101 = vst.msk [vmem:[#allocation3 + $0xe0] sm:$0xff] %vm257_vm0, %v7066_v7 }
 0x158   : > { %1579 = vst.msk [vmem:[#allocation3] sm:$0xff] %vm1578_vm1, %v1387_v42 }
 0x159   : > { %v1124_v20 = vpop.permute.xlu1 %1123  ;;  %1502 = vrot.lane.b32.xlu0 %v6997_v18, %s5864_s29 }
 0x15a   : > { %1255 = vst.msk [vmem:[#allocation3 + $0x5b8] sm:$0xff] %vm1193_vm15, %v1124_v20 }
 0x15b   : > { %1496 = vrot.lane.b32.xlu1 %v6992_v5, %s5864_s29  ;;  %v1391_v43 = vpop.permute.xlu0 %1390 }
 0x15c   : > { %1581 = vst.msk [vmem:[#allocation3 + $0x30] sm:$0xff] %vm1578_vm1, %v1391_v43 }
 0x15d   : > { %v1128_v28 = vpop.permute.xlu1 %1127  ;;  %2284 = vrot.lane.b32.xlu0 %v6697_v15, %s5863_s28  ;;  %v3653_v15 = vld [vmem:[%s9000_s2 + $0xc0] sm:$0xff] }
 0x15e   : > { %1257 = vst.msk [vmem:[#allocation3 + $0x5e8] sm:$0xff] %vm1193_vm15, %v1128_v28  ;;  %3911 = vmatpush2.msra.mxu0 %v3653_v15  ;;  %5823 = vmatpush2.msra.mxu1 %v3653_v15  ;;  %v3645_v28 = vld [vmem:[%s9000_s2 + $0x80] sm:$0xff] }
 0x15f   : > { %1500 = vrot.lane.b32.xlu1 %v7011_v19, %s5864_s29  ;;  %v1395_v8 = vpop.permute.xlu0 %1394  ;;  %3912 = vmatprep.subr.mxu0 %v5862_v0  ;;  %v5848_v15 = vld [vmem:[#allocation2 + $0x42] sm:$0xff] }
 0x160   : > { %1583 = vst.msk [vmem:[#allocation3 + $0x60] sm:$0xff] %vm1578_vm1, %v1395_v8  ;;  %3913 = vmatpush2.msra.mxu0 %v3652_v25  ;;  %5792 = vmatprep.subr.mxu1 %v5862_v0  ;;  %v7169_v8 = vld [vmem:[#allocation2 + $0x4a1] sm:$0xff] }
 0x161   : > { %v1389_v51 = vpop.permute.xlu1 %1388  ;;  %2669 = vrot.lane.b32.xlu0 %v6375_v60, %s5864_s29  ;;  %3914 = vmatprep.subr.mxu0 %v5862_v0  ;;  %2151 = vst.msk [vmem:[#allocation3 + $0x590] sm:$0xff] %vm257_vm0, %v7169_v8 }
 0x162   : > { %1580 = vst.msk [vmem:[#allocation3 + $0x18] sm:$0xff] %vm1578_vm1, %v1389_v51  ;;  %3915 = vmatpush2.msra.mxu0 %v3651_v34  ;;  %5824 = vmatpush2.msra.mxu1 %v3652_v25 }
 0x163   : > { %1504 = vrot.lane.b32.xlu1 %v1317_v45, %s5864_s29  ;;  %v1399_v23 = vpop.permute.xlu0 %1398  ;;  %3916 = vmatprep.subr.mxu0 %v5862_v0  ;;  %v7137_v45 = vld [vmem:[#allocation2 + $0x491] sm:$0xff] }
 0x164   : > { %1585 = vst.msk [vmem:[#allocation3 + $0x90] sm:$0xff] %vm1578_vm1, %v1399_v23  ;;  %5793 = vmatprep.subr.mxu1 %v5862_v0 }
 0x165   : > { %v1393_v21 = vpop.permute.xlu1 %1392  ;;  %3053 = vrot.lane.b32.xlu0 %v6695_v3, %s5865_s17  ;;  %v3650_v3 = vld [vmem:[%s9000_s2 + $0xa8] sm:$0xff]  ;;  %5825 = vmatpush2.msra.mxu1 %v3651_v34  ;;  %2150 = vst.msk [vmem:[#allocation3 + $0x578] sm:$0xff] %vm257_vm0, %v7137_v45  ;;  %v5849_v34 = vld [vmem:[#allocation2 + $0x52] sm:$0xff] }
 0x166   : > { %1582 = vst.msk [vmem:[#allocation3 + $0x48] sm:$0xff] %vm1578_vm1, %v1393_v21  ;;  %3917 = vmatpush2.msra.mxu0 %v3650_v3  ;;  %5794 = vmatprep.subr.mxu1 %v5862_v0 }
 0x167   : > { %2380 = vrot.lane.b32.xlu1 %v6936_v50, %s5863_s28  ;;  %v1403_v50 = vpop.permute.xlu0 %1402  ;;  %3918 = vmatprep.subr.mxu0 %v5862_v0 }
 0x168   : > { %1587 = vst.msk [vmem:[#allocation3 + $0xc0] sm:$0xff] %vm1578_vm1, %v1403_v50  ;;  %3919 = vmatpush2.msra.mxu0 %v3649_v37  ;;  %5826 = vmatpush2.msra.mxu1 %v3650_v3 }
 0x169   : > { %v1397_v26 = vpop.permute.xlu1 %1396  ;;  %3149 = vrot.lane.b32.xlu0 %v6707_v29, %s5865_s17  ;;  %v7082_v29 = vld [vmem:[#allocation2 + $0x481] sm:$0xff]  ;;  %3920 = vmatprep.subr.mxu0 %v5862_v0 }
 0x16a   : > { %1584 = vst.msk [vmem:[#allocation3 + $0x78] sm:$0xff] %vm1578_vm1, %v1397_v26  ;;  %5795 = vmatprep.subr.mxu1 %v5862_v0  ;;  %v7200_v26 = vld [vmem:[#allocation2 + $0x4b1] sm:$0xff] }
 0x16b   : > { %2765 = vrot.lane.b32.xlu1 %v6629_v52, %s5864_s29  ;;  %v1407_v36 = vpop.permute.xlu0 %1406  ;;  %2149 = vst.msk [vmem:[#allocation3 + $0x560] sm:$0xff] %vm257_vm0, %v7082_v29  ;;  %5827 = vmatpush2.msra.mxu1 %v3649_v37  ;;  %2152 = vst.msk [vmem:[#allocation3 + $0x5a8] sm:$0xff] %vm257_vm0, %v7200_v26  ;;  %v5850_v37 = vld [vmem:[#allocation2 + $0x62] sm:$0xff] }
 0x16c   : > { %1589 = vst.msk [vmem:[#allocation3 + $0xf0] sm:$0xff] %vm1578_vm1, %v1407_v36  ;;  %5796 = vmatprep.subr.mxu1 %v5862_v0  ;;  %v1647_v36 = vld [vmem:[#allocation2 + $0x50] sm:$0xff] }
 0x16d   : > { %v1401_v2 = vpop.permute.xlu1 %1400  ;;  %2286 = vrot.lane.b32.xlu0 %v6690_v6, %s5863_s28  ;;  %v3647_v6 = vld [vmem:[%s9000_s2 + $0x90] sm:$0xff] }
 0x16e   : > { %1586 = vst.msk [vmem:[#allocation3 + $0xa8] sm:$0xff] %vm1578_vm1, %v1401_v2 }
 0x16f   : > { %1771 = vrot.lane.b32.xlu1 %v6403_v16, %s5865_s17  ;;  %v3648_v16 = vld [vmem:[%s9000_s2 + $0x98] sm:$0xff]  ;;  %v1411_v20 = vpop.permute.xlu0 %1410 }
 0x170   : > { %1591 = vst.msk [vmem:[#allocation3 + $0x120] sm:$0xff] %vm1578_vm1, %v1411_v20  ;;  %3921 = vmatpush2.msra.mxu0 %v3648_v16  ;;  %5828 = vmatpush2.msra.mxu1 %v3648_v16  ;;  %v7231_v16 = vld [vmem:[#allocation2 + $0x70] sm:$0xff]  ;;  %v7234_v20 = vld [vmem:[#allocation2 + $0x4c1] sm:$0xff] }
 0x171   : > { %v1405_v39 = vpop.permute.xlu1 %1404  ;;  %2671 = vrot.lane.b32.xlu0 %v6388_v9, %s5864_s29  ;;  %3922 = vmatprep.subr.mxu0 %v5862_v0  ;;  %2153 = vst.msk [vmem:[#allocation3 + $0x5c0] sm:$0xff] %vm257_vm0, %v7234_v20 }
 0x172   : > { %1588 = vst.msk [vmem:[#allocation3 + $0xd8] sm:$0xff] %vm1578_vm1, %v1405_v39  ;;  %3923 = vmatpush2.msra.mxu0 %v3647_v6  ;;  %5797 = vmatprep.subr.mxu1 %v5862_v0 }
 0x173   : > { %1867 = vrot.lane.b32.xlu1 %v6624_v49, %s5865_s17  ;;  %v1415_v42 = vpop.permute.xlu0 %1414  ;;  %v3646_v49 = vld [vmem:[%s9000_s2 + $0x88] sm:$0xff]  ;;  %3924 = vmatprep.subr.mxu0 %v5862_v0 }
 0x174   : > { %1593 = vst.msk [vmem:[#allocation3 + $0x150] sm:$0xff] %vm1578_vm1, %v1415_v42  ;;  %3925 = vmatpush2.msra.mxu0 %v3646_v49  ;;  %5829 = vmatpush2.msra.mxu1 %v3647_v6 }
 0x175   : > { %v1409_v41 = vpop.permute.xlu1 %1408  ;;  %3055 = vrot.lane.b32.xlu0 %v6726_v4, %s5865_s17  ;;  %3926 = vmatprep.subr.mxu0 %v5862_v0  ;;  %v7125_v4 = vld [vmem:[#allocation2 + $0xd1] sm:$0xff] }
 0x176   : > { %1590 = vst.msk [vmem:[#allocation3 + $0x108] sm:$0xff] %vm1578_vm1, %v1409_v41  ;;  %3927 = vmatpush2.msra.mxu0 %v3645_v28  ;;  %5798 = vmatprep.subr.mxu1 %v5862_v0 }
 0x177   : > { %2382 = vrot.lane.b32.xlu1 %v6918_v27, %s5863_s28  ;;  %v1419_v43 = vpop.permute.xlu0 %1418  ;;  %2102 = vst.msk [vmem:[#allocation3 + $0xf8] sm:$0xff] %vm257_vm0, %v7125_v4  ;;  %5830 = vmatpush2.msra.mxu1 %v3646_v49  ;;  %v1648_v49 = vld [vmem:[#allocation2 + $0x60] sm:$0xff] }
 0x178   : > { %1595 = vst.msk [vmem:[#allocation3 + $0x180] sm:$0xff] %vm1578_vm1, %v1419_v43  ;;  %5799 = vmatprep.subr.mxu1 %v5862_v0  ;;  %v7256_v43 = vld [vmem:[#allocation2 + $0x111] sm:$0xff] }
 0x179   : > { %v1413_v1 = vpop.permute.xlu1 %1412  ;;  %3151 = vrot.lane.b32.xlu0 %v6734_v13, %s5865_s17  ;;  %5831 = vmatpush2.msra.mxu1 %v3645_v28  ;;  %2106 = vst.msk [vmem:[#allocation3 + $0x158] sm:$0xff] %vm257_vm0, %v7256_v43 }
 0x17a   : > { %1592 = vst.msk [vmem:[#allocation3 + $0x138] sm:$0xff] %vm1578_vm1, %v1413_v1 }
 0x17b   : > { %2767 = vrot.lane.b32.xlu1 %v6634_v53, %s5864_s29  ;;  %v1423_v44 = vpop.permute.xlu0 %1422 }
 0x17c   : > { %1597 = vst.msk [vmem:[#allocation3 + $0x1b0] sm:$0xff] %vm1578_vm1, %v1423_v44 }
 0x17d   : > { %v1417_v27 = vpop.permute.xlu1 %1416  ;;  %2288 = vrot.lane.b32.xlu0 %v6709_v33, %s5863_s28 }
 0x17e   : > { %1594 = vst.msk [vmem:[#allocation3 + $0x168] sm:$0xff] %vm1578_vm1, %v1417_v27 }
 0x17f   : > { %1773 = vrot.lane.b32.xlu1 %v6375_v60, %s5865_s17  ;;  %v1427_v51 = vpop.permute.xlu0 %1426 }
 0x180   : > { %1599 = vst.msk [vmem:[#allocation3 + $0x1e0] sm:$0xff] %vm1578_vm1, %v1427_v51  ;;  %v7271_v51 = vld [vmem:[#allocation2 + $0x4d1] sm:$0xff] }
 0x181   : > { %v1421_v13 = vpop.permute.xlu1 %1420  ;;  %2673 = vrot.lane.b32.xlu0 %v6453_v48, %s5864_s29  ;;  %2154 = vst.msk [vmem:[#allocation3 + $0x5d8] sm:$0xff] %vm257_vm0, %v7271_v51 }
 0x182   : > { %1596 = vst.msk [vmem:[#allocation3 + $0x198] sm:$0xff] %vm1578_vm1, %v1421_v13 }
 0x183   : > { %1869 = vrot.lane.b32.xlu1 %v6629_v52, %s5865_s17  ;;  %v1431_v60 = vpop.permute.xlu0 %1430 }
 0x184   : > { %1601 = vst.msk [vmem:[#allocation3 + $0x210] sm:$0xff] %vm1578_vm1, %v1431_v60 }
 0x185   : > { %v1425_v0 = vpop.permute.xlu1 %1424  ;;  %3057 = vrot.lane.b32.xlu0 %v6750_v35, %s5865_s17 }
 0x186   : > { %1598 = vst.msk [vmem:[#allocation3 + $0x1c8] sm:$0xff] %vm1578_vm1, %v1425_v0  ;;  %v710_v0 = vrot.slane %v6872_v17, 7 }
 0x187   : > { %2384 = vrot.lane.b32.xlu1 %v6956_v11, %s5863_s28  ;;  %v1435_v52 = vpop.permute.xlu0 %1434 }
 0x188   : > { %1603 = vst.msk [vmem:[#allocation3 + $0x240] sm:$0xff] %vm1578_vm1, %v1435_v52 }
 0x189   : > { %v1429_v33 = vpop.permute.xlu1 %1428  ;;  %3153 = vrot.lane.b32.xlu0 %v6758_v40, %s5865_s17 }
 0x18a   : > { %1600 = vst.msk [vmem:[#allocation3 + $0x1f8] sm:$0xff] %vm1578_vm1, %v1429_v33  ;;  %v726_v33 = vsub.f32 %v6869_v12, %v710_v0 }
 0x18b   : > { %2769 = vrot.lane.b32.xlu1 %v6639_v57, %s5864_s29  ;;  %v1439_v35 = vpop.permute.xlu0 %1438 }
 0x18c   : > { %1605 = vst.msk [vmem:[#allocation3 + $0x270] sm:$0xff] %vm1578_vm1, %v1439_v35 }
 0x18d   : > { %v1433_v11 = vpop.permute.xlu1 %1432  ;;  %2290 = vrot.lane.b32.xlu0 %v5848_v15, %s5863_s28  ;;  %744 = vst.msk [vmem:[#allocation2 + $0x4e0] sm:$0xfe] %vm736_vm14, %v726_v33  ;;  %vm5419_vm14 = vcmask 1045509  }
 0x18e   : > { %1602 = vst.msk [vmem:[#allocation3 + $0x228] sm:$0xff] %vm1578_vm1, %v1433_v11  ;;  %v2163_v11 = vld [vmem:[#allocation2 + $0x82] sm:$0xff] }
 0x18f   : > { %1775 = vrot.lane.b32.xlu1 %v6388_v9, %s5865_s17  ;;  %v1443_v21 = vpop.permute.xlu0 %1442  ;;  %735 = vst.msk [vmem:[#allocation2 + $0x4e8] sm:$0x1] %vm293_vm2, %v726_v33  ;;  %vm1963_vm2 = vcmask 1048320   ;;  %v7369_v33 = vld [vmem:[#allocation2 + $0x171] sm:$0xff] }
 0x190   : > { %1607 = vst.msk [vmem:[#allocation3 + $0x2a0] sm:$0xff] %vm1578_vm1, %v1443_v21  ;;  %v2211_v21 = vld [vmem:[#allocation2 + $0x442] sm:$0xff] }
 0x191   : > { %v1437_v40 = vpop.permute.xlu1 %1436  ;;  %2675 = vrot.lane.b32.xlu0 %v6421_v32, %s5864_s29  ;;  %v7190_v32 = vld [vmem:[#allocation2 + $0xf1] sm:$0xff]  ;;  %2110 = vst.msk [vmem:[#allocation3 + $0x1b8] sm:$0xff] %vm257_vm0, %v7369_v33 }
 0x192   : > { %1604 = vst.msk [vmem:[#allocation3 + $0x258] sm:$0xff] %vm1578_vm1, %v1437_v40  ;;  %v2548_v40 = vld [vmem:[#allocation2 + $0x90] sm:$0xff] }
 0x193   : > { %1871 = vrot.lane.b32.xlu1 %v6634_v53, %s5865_s17  ;;  %v1447_v23 = vpop.permute.xlu0 %1446  ;;  %2104 = vst.msk [vmem:[#allocation3 + $0x128] sm:$0xff] %vm257_vm0, %v7190_v32 }
 0x194   : > { %1609 = vst.msk [vmem:[#allocation3 + $0x2d0] sm:$0xff] %vm1578_vm1, %v1447_v23  ;;  %v2932_v23 = vld [vmem:[#allocation2 + $0x91] sm:$0xff] }
 0x195   : > { %v1441_v9 = vpop.permute.xlu1 %1440  ;;  %3059 = vrot.lane.b32.xlu0 %v6774_v46, %s5865_s17 }
 0x196   : > { %1606 = vst.msk [vmem:[#allocation3 + $0x288] sm:$0xff] %vm1578_vm1, %v1441_v9 }
 0x197   : > { %2386 = vrot.lane.b32.xlu1 %v6942_v55, %s5863_s28  ;;  %v1451_v53 = vpop.permute.xlu0 %1450 }
 0x198   : > { %1611 = vst.msk [vmem:[#allocation3 + $0x300] sm:$0xff] %vm1578_vm1, %v1451_v53  ;;  %v2036_v53 = vld [vmem:[#allocation2 + $0xb1] sm:$0xff] }
 0x199   : > { %v1445_v25 = vpop.permute.xlu1 %1444  ;;  %3155 = vrot.lane.b32.xlu0 %v6782_v56, %s5865_s17  ;;  %2100 = vst.msk [vmem:[#allocation3 + $0xc8] sm:$0xff] %vm257_vm0, %v2036_v53  ;;  %v7406_v53 = vld [vmem:[#allocation2 + $0x4a0] sm:$0xff] }
 0x19a   : > { %1608 = vst.msk [vmem:[#allocation3 + $0x2b8] sm:$0xff] %vm1578_vm1, %v1445_v25 }
 0x19b   : > { %2771 = vrot.lane.b32.xlu1 %v6644_v58, %s5864_s29  ;;  %v1455_v46 = vpop.permute.xlu0 %1454 }
 0x19c   : > { %1613 = vst.msk [vmem:[#allocation3 + $0x330] sm:$0xff] %vm1578_vm1, %v1455_v46  ;;  %v2596_v46 = vld [vmem:[#allocation2 + $0x450] sm:$0xff] }
 0x19d   : > { %v1449_v55 = vpop.permute.xlu1 %1448  ;;  %2292 = vrot.lane.b32.xlu0 %v5849_v34, %s5863_s28 }
 0x19e   : > { %1610 = vst.msk [vmem:[#allocation3 + $0x2e8] sm:$0xff] %vm1578_vm1, %v1449_v55  ;;  %v7309_v55 = vld [vmem:[#allocation2 + $0x4e1] sm:$0xff] }
 0x19f   : > { %1777 = vrot.lane.b32.xlu1 %v6453_v48, %s5865_s17  ;;  %v1459_v50 = vpop.permute.xlu0 %1458  ;;  %2155 = vst.msk [vmem:[#allocation3 + $0x5f0] sm:$0xff] %vm257_vm0, %v7309_v55 }
 0x1a0   : > { %1615 = vst.msk [vmem:[#allocation3 + $0x360] sm:$0xff] %vm1578_vm1, %v1459_v50 }
 0x1a1   : > { %v1453_v56 = vpop.permute.xlu1 %1452  ;;  %2677 = vrot.lane.b32.xlu0 %v6464_v54, %s5864_s29  ;;  %v7221_v54 = vld [vmem:[#allocation2 + $0x101] sm:$0xff] }
 0x1a2   : > { %1612 = vst.msk [vmem:[#allocation3 + $0x318] sm:$0xff] %vm1578_vm1, %v1453_v56  ;;  %v2980_v56 = vld [vmem:[#allocation2 + $0x451] sm:$0xff] }
 0x1a3   : > { %1873 = vrot.lane.b32.xlu1 %v6639_v57, %s5865_s17  ;;  %v1463_v3 = vpop.permute.xlu0 %1462  ;;  %2105 = vst.msk [vmem:[#allocation3 + $0x140] sm:$0xff] %vm257_vm0, %v7221_v54 }
 0x1a4   : > { %1617 = vst.msk [vmem:[#allocation3 + $0x390] sm:$0xff] %vm1578_vm1, %v1463_v3  ;;  %v2164_v3 = vld [vmem:[#allocation2 + $0xb2] sm:$0xff] }
 0x1a5   : > { %v1457_v48 = vpop.permute.xlu1 %1456  ;;  %3061 = vrot.lane.b32.xlu0 %v6801_v30, %s5865_s17 }
 0x1a6   : > { %1614 = vst.msk [vmem:[#allocation3 + $0x348] sm:$0xff] %vm1578_vm1, %v1457_v48 }
 0x1a7   : > { %2388 = vrot.lane.b32.xlu1 %v6977_v31, %s5863_s28  ;;  %v1467_v57 = vpop.permute.xlu0 %1466 }
 0x1a8   : > { %1619 = vst.msk [vmem:[#allocation3 + $0x3c0] sm:$0xff] %vm1578_vm1, %v1467_v57 }
 0x1a9   : > { %v1461_v2 = vpop.permute.xlu1 %1460  ;;  %3157 = vrot.lane.b32.xlu0 %v6818_v38, %s5865_s17 }
 0x1aa   : > { %1616 = vst.msk [vmem:[#allocation3 + $0x378] sm:$0xff] %vm1578_vm1, %v1461_v2 }
 0x1ab   : > { %2773 = vrot.lane.b32.xlu1 %v6649_v62, %s5864_s29  ;;  %v1471_v30 = vpop.permute.xlu0 %1470 }
 0x1ac   : > { %1621 = vst.msk [vmem:[#allocation3 + $0x3f0] sm:$0xff] %vm1578_vm1, %v1471_v30 }
 0x1ad   : > { %v1465_v31 = vpop.permute.xlu1 %1464  ;;  %2294 = vrot.lane.b32.xlu0 %v5850_v37, %s5863_s28 }
 0x1ae   : > { %1618 = vst.msk [vmem:[#allocation3 + $0x3a8] sm:$0xff] %vm1578_vm1, %v1465_v31 }
 0x1af   : > { %1779 = vrot.lane.b32.xlu1 %v1647_v36, %s5865_s17  ;;  %v1475_v38 = vpop.permute.xlu0 %1474  ;;  %v7327_v36 = vld [vmem:[#allocation2 + $0xc0] sm:$0xff] }
 0x1b0   : > { %1623 = vst.msk [vmem:[#allocation3 + $0x420] sm:$0xff] %vm1578_vm1, %v1475_v38 }
 0x1b1   : > { %v1469_v39 = vpop.permute.xlu1 %1468  ;;  %2679 = vrot.lane.b32.xlu0 %v7231_v16, %s5864_s29 }
 0x1b2   : > { %1620 = vst.msk [vmem:[#allocation3 + $0x3d8] sm:$0xff] %vm1578_vm1, %v1469_v39 }
 0x1b3   : > { %1875 = vrot.lane.b32.xlu1 %v6644_v58, %s5865_s17  ;;  %v1479_v41 = vpop.permute.xlu0 %1478 }
 0x1b4   : > { %1625 = vst.msk [vmem:[#allocation3 + $0x450] sm:$0xff] %vm1578_vm1, %v1479_v41 }
 0x1b5   : > { %v1473_v6 = vpop.permute.xlu1 %1472  ;;  %3063 = vrot.lane.b32.xlu0 %v6861_v61, %s5865_s17  ;;  %v453_v61 = vrot.slane %v6872_v17, 1  ;;  %v2595_v17 = vld [vmem:[#allocation2 + $0x440] sm:$0xff] }
 0x1b6   : > { %1622 = vst.msk [vmem:[#allocation3 + $0x408] sm:$0xff] %vm1578_vm1, %v1473_v6 }
 0x1b7   : > { %2390 = vrot.lane.b32.xlu1 %v6963_v22, %s5863_s28  ;;  %v1483_v42 = vpop.permute.xlu0 %1482  ;;  %v2162_v22 = vld [vmem:[#allocation2 + $0x72] sm:$0xff]  ;;  %v469_v13 = vsub.f32 %v6869_v12, %v453_v61 }
 0x1b8   : > { %1627 = vst.msk [vmem:[#allocation3 + $0x480] sm:$0xff] %vm1578_vm1, %v1483_v42 }
 0x1b9   : > { %v1477_v58 = vpop.permute.xlu1 %1476  ;;  %3159 = vrot.lane.b32.xlu0 %v6883_v24, %s5865_s17  ;;  %v7264_v24 = vld [vmem:[#allocation2 + $0x80] sm:$0xff]  ;;  %479 = vst.msk [vmem:[#allocation2 + $0x122] sm:$0x7f] %vm471_vm3, %v469_v13  ;;  %vm5094_vm3 = vcmask 130112  }
 0x1ba   : > { %1624 = vst.msk [vmem:[#allocation3 + $0x438] sm:$0xff] %vm1578_vm1, %v1477_v58  ;;  %v1651_v58 = vld [vmem:[#allocation2 + $0xb0] sm:$0xff] }
 0x1bb   : > { %2775 = vrot.lane.b32.xlu1 %v6654_v63, %s5864_s29  ;;  %v1487_v28 = vpop.permute.xlu0 %1486  ;;  %488 = vst.msk [vmem:[#allocation2 + $0x11a] sm:$0x80] %vm480_vm4, %v469_v13  ;;  %v7365_v13 = vld [vmem:[#allocation2 + $0x490] sm:$0xff]  ;;  %vm5101_vm4 = vcmask 195712  }
 0x1bc   : > { %1629 = vst.msk [vmem:[#allocation3 + $0x4b0] sm:$0xff] %vm1578_vm1, %v1487_v28  ;;  %v7352_v28 = vld [vmem:[#allocation2 + $0x161] sm:$0xff] }
 0x1bd   : > { %v1481_v1 = vpop.permute.xlu1 %1480  ;;  %2296 = vrot.lane.b32.xlu0 %v2162_v22, %s5863_s28  ;;  %v7350_v22 = vld [vmem:[#allocation2 + $0xd0] sm:$0xff]  ;;  %2109 = vst.msk [vmem:[#allocation3 + $0x1a0] sm:$0xff] %vm257_vm0, %v7352_v28 }
 0x1be   : > { %1626 = vst.msk [vmem:[#allocation3 + $0x468] sm:$0xff] %vm1578_vm1, %v1481_v1  ;;  %v1699_v1 = vld [vmem:[#allocation2 + $0x470] sm:$0xff] }
 0x1bf   : > { %1781 = vrot.lane.b32.xlu1 %v1648_v49, %s5865_s17  ;;  %v1491_v44 = vpop.permute.xlu0 %1490  ;;  %v2165_v49 = vld [vmem:[#allocation2 + $0xc2] sm:$0xff] }
 0x1c0   : > { %1631 = vst.msk [vmem:[#allocation3 + $0x4e0] sm:$0xff] %vm1578_vm1, %v1491_v44 }
 0x1c1   : > { %v1485_v27 = vpop.permute.xlu1 %1484  ;;  %2681 = vrot.lane.b32.xlu0 %v7264_v24, %s5864_s29 }
 0x1c2   : > { %1628 = vst.msk [vmem:[#allocation3 + $0x498] sm:$0xff] %vm1578_vm1, %v1485_v27 }
 0x1c3   : > { %1877 = vrot.lane.b32.xlu1 %v6649_v62, %s5865_s17  ;;  %v1495_v62 = vpop.permute.xlu0 %1494 }
 0x1c4   : > { %1633 = vst.msk [vmem:[#allocation3 + $0x510] sm:$0xff] %vm1578_vm1, %v1495_v62 }
 0x1c5   : > { %v1489_v60 = vpop.permute.xlu1 %1488  ;;  %3065 = vrot.lane.b32.xlu0 %v6934_v47, %s5865_s17  ;;  %v7298_v47 = vld [vmem:[#allocation2 + $0x121] sm:$0xff] }
 0x1c6   : > { %1630 = vst.msk [vmem:[#allocation3 + $0x4c8] sm:$0xff] %vm1578_vm1, %v1489_v60 }
 0x1c7   : > { %2392 = vrot.lane.b32.xlu1 %v6992_v5, %s5863_s28  ;;  %v1499_v12 = vpop.permute.xlu0 %1498  ;;  %2107 = vst.msk [vmem:[#allocation3 + $0x170] sm:$0xff] %vm257_vm0, %v7298_v47 }
 0x1c8   : > { %1635 = vst.msk [vmem:[#allocation3 + $0x540] sm:$0xff] %vm1578_vm1, %v1499_v12 }
 0x1c9   : > { %v1493_v52 = vpop.permute.xlu1 %1492  ;;  %3161 = vrot.lane.b32.xlu0 %v6954_v10, %s5865_s17 }
 0x1ca   : > { %1632 = vst.msk [vmem:[#allocation3 + $0x4f8] sm:$0xff] %vm1578_vm1, %v1493_v52  ;;  %v7379_v52 = vld [vmem:[#allocation2 + $0x172] sm:$0xff] }
 0x1cb   : > { %2777 = vrot.lane.b32.xlu1 %v2595_v17, %s5864_s29  ;;  %v1503_v35 = vpop.permute.xlu0 %1502  ;;  %3390 = vst.msk [vmem:[#allocation3 + $0x1a8] sm:$0xff] %vm257_vm0, %v7379_v52 }
 0x1cc   : > { %1637 = vst.msk [vmem:[#allocation3 + $0x570] sm:$0xff] %vm1578_vm1, %v1503_v35  ;;  %v7390_v35 = vld [vmem:[#allocation2 + $0x181] sm:$0xff] }
 0x1cd   : > { %v1497_v5 = vpop.permute.xlu1 %1496  ;;  %2298 = vrot.lane.b32.xlu0 %v2163_v11, %s5863_s28  ;;  %v7388_v11 = vld [vmem:[#allocation2 + $0xe0] sm:$0xff]  ;;  %2111 = vst.msk [vmem:[#allocation3 + $0x1d0] sm:$0xff] %vm257_vm0, %v7390_v35 }
 0x1ce   : > { %1634 = vst.msk [vmem:[#allocation3 + $0x528] sm:$0xff] %vm1578_vm1, %v1497_v5  ;;  %v1700_v5 = vld [vmem:[#allocation2 + $0x480] sm:$0xff] }
 0x1cf   : > { %1783 = vrot.lane.b32.xlu1 %v7231_v16, %s5865_s17  ;;  %v2285_v10 = vpop.permute.xlu0 %2284 }
 0x1d0   : > { %2476 = vst.msk [vmem:[#allocation3 + $0x8] sm:$0xff] %vm1193_vm15, %v2285_v10  ;;  %v2214_v10 = vld [vmem:[#allocation2 + $0x492] sm:$0xff] }
 0x1d1   : > { %v1501_v15 = vpop.permute.xlu1 %1500  ;;  %2683 = vrot.lane.b32.xlu0 %v2548_v40, %s5864_s29 }
 0x1d2   : > { %1636 = vst.msk [vmem:[#allocation3 + $0x558] sm:$0xff] %vm1578_vm1, %v1501_v15 }
 0x1d3   : > { %1879 = vrot.lane.b32.xlu1 %v6654_v63, %s5865_s17  ;;  %v2670_v25 = vpop.permute.xlu0 %2669  ;;  %v2084_v63 = vld [vmem:[#allocation2 + $0x471] sm:$0xff] }
 0x1d4   : > { %2861 = vst.msk [vmem:[#allocation3 + $0x8] sm:$0xff] %vm1578_vm1, %v2670_v25 }
 0x1d5   : > { %v1505_v9 = vpop.permute.xlu1 %1504  ;;  %3067 = vrot.lane.b32.xlu0 %v2932_v23, %s5865_s17  ;;  %2148 = vst.msk [vmem:[#allocation3 + $0x548] sm:$0xff] %vm257_vm0, %v2084_v63 }
 0x1d6   : > { %1638 = vst.msk [vmem:[#allocation3 + $0x588] sm:$0xff] %vm1578_vm1, %v1505_v9  ;;  %v7399_v9 = vld [vmem:[#allocation2 + $0x182] sm:$0xff] }
 0x1d7   : > { %2394 = vrot.lane.b32.xlu1 %v2211_v21, %s5863_s28  ;;  %v3054_v50 = vpop.permute.xlu0 %3053  ;;  %3391 = vst.msk [vmem:[#allocation3 + $0x1c0] sm:$0xff] %vm257_vm0, %v7399_v9 }
 0x1d8   : > { %3245 = vst.msk [vmem:[#allocation3 + $0x8] sm:$0xff] %vm1963_vm2, %v3054_v50 }
 0x1d9   : > { %v2381_v34 = vpop.permute.xlu1 %2380  ;;  %3163 = vrot.lane.b32.xlu0 %v2980_v56, %s5865_s17 }
 0x1da   : > { %2524 = vst.msk [vmem:[#allocation3 + $0x488] sm:$0xff] %vm1193_vm15, %v2381_v34  ;;  %v7410_v34 = vld [vmem:[#allocation2 + $0x191] sm:$0xff] }
 0x1db   : > { %2779 = vrot.lane.b32.xlu1 %v2596_v46, %s5864_s29  ;;  %v3150_v2 = vpop.permute.xlu0 %3149  ;;  %2112 = vst.msk [vmem:[#allocation3 + $0x1e8] sm:$0xff] %vm257_vm0, %v7410_v34 }
 0x1dd   : > { %v2766_v48 = vpop.permute.xlu1 %2765  ;;  %2300 = vrot.lane.b32.xlu0 %v2164_v3, %s5863_s28  ;;  %v7420_v3 = vld [vmem:[#allocation2 + $0x192] sm:$0xff] }
 0x1de   : > { %2909 = vst.msk [vmem:[#allocation3 + $0x488] sm:$0xff] %vm1578_vm1, %v2766_v48  ;;  %v2167_v48 = vld [vmem:[#allocation2 + $0xe2] sm:$0xff] }
 0x1df   : > { %1785 = vrot.lane.b32.xlu1 %v7264_v24, %s5865_s17  ;;  %3293 = vst.msk [vmem:[#allocation3 + $0x488] sm:$0xff] %vm1963_vm2, %v3150_v2  ;;  %v2287_v31 = vpop.permute.xlu0 %2286  ;;  %v3438_v30 = vld [vmem:[#allocation3 + $0x8] sm:$0xff] }
 0x1e0   : > { %2477 = vst.msk [vmem:[#allocation3 + $0x20] sm:$0xff] %vm1193_vm15, %v2287_v31  ;;  %3928 = vmatprep.mubr.f32.mxu0 %v3438_v30 }
 0x1e1   : > { %v1772_v57 = vpop.permute.xlu1 %1771  ;;  %2685 = vrot.lane.b32.xlu0 %v7327_v36, %s5864_s29  ;;  %3392 = vst.msk [vmem:[#allocation3 + $0x1d8] sm:$0xff] %vm257_vm0, %v7420_v3 }
 0x1e2   : > { %1964 = vst.msk [vmem:[#allocation3] sm:$0xff] %vm1963_vm2, %v1772_v57  ;;  %v7429_v57 = vld [vmem:[#allocation2 + $0xf0] sm:$0xff] }
 0x1e3   : > { %1881 = vrot.lane.b32.xlu1 %v2595_v17, %s5865_s17  ;;  %v2672_v39 = vpop.permute.xlu0 %2671  ;;  %v2166_v17 = vld [vmem:[#allocation2 + $0xd2] sm:$0xff] }
 0x1e4   : > { %2862 = vst.msk [vmem:[#allocation3 + $0x20] sm:$0xff] %vm1578_vm1, %v2672_v39 }
 0x1e5   : > { %v1868_v37 = vpop.permute.xlu1 %1867  ;;  %3069 = vrot.lane.b32.xlu0 %v7066_v7, %s5865_s17 }
 0x1e6   : > { %2012 = vst.msk [vmem:[#allocation3 + $0x480] sm:$0xff] %vm1963_vm2, %v1868_v37  ;;  %v3582_v16 = vld [vmem:[#allocation3 + $0x488] sm:$0xff]  ;;  %v7440_v37 = vld [vmem:[%s6251_s27 + $0x38] sm:$0xff] }
 0x1e7   : > { %2396 = vrot.lane.b32.xlu1 %v7011_v19, %s5863_s28  ;;  %4168 = vmatprep.mubr.f32.mxu1 %v3582_v16  ;;  %v3056_v41 = vpop.permute.xlu0 %3055  ;;  %v496_v39 = vrot.slane %v7440_v37, 2  ;;  %v7443_v16 = vld [vmem:[#allocation2 + $0x4a2] sm:$0xff] }
 0x1e8   : > { %3246 = vst.msk [vmem:[#allocation3 + $0x20] sm:$0xff] %vm1963_vm2, %v3056_v41  ;;  %v7450_v41 = vld [vmem:[%s6244_s24 + $0x38] sm:$0xff] }
 0x1e9   : > { %v2383_v38 = vpop.permute.xlu1 %2382  ;;  %v3437_v6 = vld [vmem:[#allocation3] sm:$0xff]  ;;  %3165 = vrot.lane.b32.xlu0 %v7082_v29, %s5865_s17 }
 0x1ea   : > { %2525 = vst.msk [vmem:[#allocation3 + $0x4a0] sm:$0xff] %vm1193_vm15, %v2383_v38  ;;  %3929 = vmatmul.mubr.f32.vlgmr.msra.gmra.mxu0 %v3437_v6  ;;  %v7447_v6 = vld [vmem:[#allocation2 + $0x1a2] sm:$0xff] }
 0x1eb   : > { %2781 = vrot.lane.b32.xlu1 %v6663_v14, %s5864_s29  ;;  %v3152_v7 = vpop.permute.xlu0 %3151  ;;  %3393 = vst.msk [vmem:[#allocation3 + $0x1f0] sm:$0xff] %vm257_vm0, %v7447_v6 }
 0x1ed   : > { %v2768_v19 = vpop.permute.xlu1 %2767  ;;  %v3581_v42 = vld [vmem:[#allocation3 + $0x480] sm:$0xff]  ;;  %2302 = vrot.lane.b32.xlu0 %v2165_v49, %s5863_s28  ;;  %v2600_v49 = vld [vmem:[#allocation2 + $0x4b0] sm:$0xff] }
 0x1ee   : > { %2910 = vst.msk [vmem:[#allocation3 + $0x4a0] sm:$0xff] %vm1578_vm1, %v2768_v19  ;;  %4169 = vmatmul.mubr.f32.vlgmr.msra.gmra.mxu1 %v3581_v42 }
 0x1ef   : > { %1787 = vrot.lane.b32.xlu1 %v1651_v58, %s5865_s17  ;;  %3294 = vst.msk [vmem:[#allocation3 + $0x4a0] sm:$0xff] %vm1963_vm2, %v3152_v7  ;;  %v2289_v29 = vpop.permute.xlu0 %2288  ;;  %v3441_v61 = vld [vmem:[#allocation3 + $0x20] sm:$0xff]  ;;  %v512_v58 = vsub.f32 %v7450_v41, %v496_v39 }
 0x1f0   : > { %2478 = vst.msk [vmem:[#allocation3 + $0x38] sm:$0xff] %vm1193_vm15, %v2289_v29  ;;  %3933 = vmatprep.mubr.f32.mxu0 %v3441_v61  ;;  %v2168_v61 = vld [vmem:[#allocation2 + $0xf2] sm:$0xff] }
 0x1f1   : > { %v1774_v14 = vpop.permute.xlu1 %1773  ;;  %2687 = vrot.lane.b32.xlu0 %v7350_v22, %s5864_s29  ;;  %522 = vst.msk [vmem:[#allocation2 + $0x1c3] sm:$0x3f] %vm514_vm5, %v512_v58  ;;  %vm5108_vm5 = vcmask 261312  }
 0x1f2   : > { %1965 = vst.msk [vmem:[#allocation3 + $0x18] sm:$0xff] %vm1963_vm2, %v1774_v14  ;;  %v7463_v14 = vld [vmem:[#allocation2 + $0x1b1] sm:$0xff] }
 0x1f3   : > { %1883 = vrot.lane.b32.xlu1 %v1699_v1, %s5865_s17  ;;  %v2674_v24 = vpop.permute.xlu0 %2673  ;;  %531 = vst.msk [vmem:[#allocation2 + $0x1bb] sm:$0xc0] %vm523_vm6, %v512_v58  ;;  %vm5115_vm6 = vcmask 326912  }
 0x1f4   : > { %2863 = vst.msk [vmem:[#allocation3 + $0x38] sm:$0xff] %vm1578_vm1, %v2674_v24 }
 0x1f5   : > { %v1870_v27 = vpop.permute.xlu1 %1869  ;;  %3071 = vrot.lane.b32.xlu0 %v7125_v4, %s5865_s17  ;;  %2114 = vst.msk [vmem:[#allocation3 + $0x218] sm:$0xff] %vm257_vm0, %v7463_v14 }
 0x1f6   : > { %2013 = vst.msk [vmem:[#allocation3 + $0x498] sm:$0xff] %vm1963_vm2, %v1870_v27  ;;  %v3585_v44 = vld [vmem:[#allocation3 + $0x4a0] sm:$0xff]  ;;  %v7472_v27 = vld [vmem:[#allocation2 + $0x1b2] sm:$0xff] }
 0x1f7   : > { %2398 = vrot.lane.b32.xlu1 %v6997_v18, %s5863_s28  ;;  %4173 = vmatprep.mubr.f32.mxu1 %v3585_v44  ;;  %v3058_v62 = vpop.permute.xlu0 %3057  ;;  %3394 = vst.msk [vmem:[#allocation3 + $0x208] sm:$0xff] %vm257_vm0, %v7472_v27  ;;  %v7481_v44 = vld [vmem:[#allocation2 + $0x100] sm:$0xff] }
 0x1f8   : > { %3247 = vst.msk [vmem:[#allocation3 + $0x38] sm:$0xff] %vm1963_vm2, %v3058_v62  ;;  %v2216_v62 = vld [vmem:[#allocation2 + $0x4b2] sm:$0xff] }
 0x1f9   : > { %v2385_v0 = vpop.permute.xlu1 %2384  ;;  %v3440_v60 = vld [vmem:[#allocation3 + $0x18] sm:$0xff]  ;;  %3167 = vrot.lane.b32.xlu0 %v7137_v45, %s5865_s17 }
 0x1fa   : > { %2526 = vst.msk [vmem:[#allocation3 + $0x4b8] sm:$0xff] %vm1193_vm15, %v2385_v0  ;;  %3934 = vmatmul.mubr.f32.gmra.mxu0 %v3440_v60 }
 0x1fb   : > { %2783 = vrot.lane.b32.xlu1 %v7365_v13, %s5864_s29  ;;  %v3154_v12 = vpop.permute.xlu0 %3153 }
 0x1fd   : > { %v2770_v18 = vpop.permute.xlu1 %2769  ;;  %v3584_v4 = vld [vmem:[#allocation3 + $0x498] sm:$0xff]  ;;  %2304 = vrot.lane.b32.xlu0 %v2166_v17, %s5863_s28 }
 0x1fe   : > { %2911 = vst.msk [vmem:[#allocation3 + $0x4b8] sm:$0xff] %vm1578_vm1, %v2770_v18  ;;  %4174 = vmatmul.mubr.f32.gmra.mxu1 %v3584_v4  ;;  %v7493_v4 = vld [vmem:[#allocation2 + $0x1c2] sm:$0xff] }
 0x1ff   : > { %1789 = vrot.lane.b32.xlu1 %v7327_v36, %s5865_s17  ;;  %3295 = vst.msk [vmem:[#allocation3 + $0x4b8] sm:$0xff] %vm1963_vm2, %v3154_v12  ;;  %v2291_v15 = vpop.permute.xlu0 %2290  ;;  %v3444_v40 = vld [vmem:[#allocation3 + $0x38] sm:$0xff]  ;;  %v7431_v36 = vld [vmem:[#allocation2 + $0x1a1] sm:$0xff] }
 0x200   : > { %2479 = vst.msk [vmem:[#allocation3 + $0x50] sm:$0xff] %vm1193_vm15, %v2291_v15  ;;  %3938 = vmatprep.mubr.f32.mxu0 %v3444_v40 }
 0x201   : > { %v1776_v45 = vpop.permute.xlu1 %1775  ;;  %2689 = vrot.lane.b32.xlu0 %v7388_v11, %s5864_s29  ;;  %2113 = vst.msk [vmem:[#allocation3 + $0x200] sm:$0xff] %vm257_vm0, %v7431_v36  ;;  %3395 = vst.msk [vmem:[#allocation3 + $0x220] sm:$0xff] %vm257_vm0, %v7493_v4 }
 0x202   : > { %1966 = vst.msk [vmem:[#allocation3 + $0x30] sm:$0xff] %vm1963_vm2, %v1776_v45 }
 0x203   : > { %1885 = vrot.lane.b32.xlu1 %v1700_v5, %s5865_s17  ;;  %v2676_v23 = vpop.permute.xlu0 %2675  ;;  %v7500_v5 = vld [vmem:[#allocation2 + $0x4c0] sm:$0xff] }
 0x204   : > { %2864 = vst.msk [vmem:[#allocation3 + $0x50] sm:$0xff] %vm1578_vm1, %v2676_v23  ;;  %v7515_v23 = vld [vmem:[#allocation2 + $0x4c2] sm:$0xff] }
 0x205   : > { %v1872_v21 = vpop.permute.xlu1 %1871  ;;  %3073 = vrot.lane.b32.xlu0 %v7159_v59, %s5865_s17 }
 0x206   : > { %2014 = vst.msk [vmem:[#allocation3 + $0x4b0] sm:$0xff] %vm1963_vm2, %v1872_v21  ;;  %v3588_v25 = vld [vmem:[#allocation3 + $0x4b8] sm:$0xff] }
 0x207   : > { %2400 = vrot.lane.b32.xlu1 %v2214_v10, %s5863_s28  ;;  %4178 = vmatprep.mubr.f32.mxu1 %v3588_v25  ;;  %v3060_v56 = vpop.permute.xlu0 %3059  ;;  %v7517_v25 = vld [vmem:[#allocation2 + $0x201] sm:$0xff] }
 0x208   : > { %3248 = vst.msk [vmem:[#allocation3 + $0x50] sm:$0xff] %vm1963_vm2, %v3060_v56 }
 0x209   : > { %v2387_v63 = vpop.permute.xlu1 %2386  ;;  %v3443_v46 = vld [vmem:[#allocation3 + $0x30] sm:$0xff]  ;;  %3169 = vrot.lane.b32.xlu0 %v7169_v8, %s5865_s17  ;;  %2117 = vst.msk [vmem:[#allocation3 + $0x260] sm:$0xff] %vm257_vm0, %v7517_v25 }
 0x20a   : > { %2527 = vst.msk [vmem:[#allocation3 + $0x4d0] sm:$0xff] %vm1193_vm15, %v2387_v63  ;;  %3939 = vmatmul.mubr.f32.gmra.mxu0 %v3443_v46  ;;  %v2169_v46 = vld [vmem:[#allocation2 + $0x102] sm:$0xff] }
 0x20b   : > { %2785 = vrot.lane.b32.xlu1 %v7406_v53, %s5864_s29  ;;  %v3156_v2 = vpop.permute.xlu0 %3155 }
 0x20d   : > { %v2772_v59 = vpop.permute.xlu1 %2771  ;;  %v3587_v50 = vld [vmem:[#allocation3 + $0x4b0] sm:$0xff]  ;;  %2306 = vrot.lane.b32.xlu0 %v2167_v48, %s5863_s28 }
 0x20e   : > { %2912 = vst.msk [vmem:[#allocation3 + $0x4d0] sm:$0xff] %vm1578_vm1, %v2772_v59  ;;  %4179 = vmatmul.mubr.f32.gmra.mxu1 %v3587_v50  ;;  %v7527_v59 = vld [vmem:[#allocation2 + $0x4d0] sm:$0xff]  ;;  %v7529_v50 = vld [vmem:[#allocation2 + $0x202] sm:$0xff] }
 0x20f   : > { %1791 = vrot.lane.b32.xlu1 %v7350_v22, %s5865_s17  ;;  %3296 = vst.msk [vmem:[#allocation3 + $0x4d0] sm:$0xff] %vm1963_vm2, %v3156_v2  ;;  %v2293_v31 = vpop.permute.xlu0 %2292  ;;  %v3447_v30 = vld [vmem:[#allocation3 + $0x50] sm:$0xff] }
 0x210   : > { %2480 = vst.msk [vmem:[#allocation3 + $0x68] sm:$0xff] %vm1193_vm15, %v2293_v31  ;;  %3943 = vmatprep.mubr.f32.mxu0 %v3447_v30 }
 0x211   : > { %v1778_v8 = vpop.permute.xlu1 %1777  ;;  %2691 = vrot.lane.b32.xlu0 %v7429_v57, %s5864_s29  ;;  %3397 = vst.msk [vmem:[#allocation3 + $0x250] sm:$0xff] %vm257_vm0, %v7529_v50 }
 0x212   : > { %1967 = vst.msk [vmem:[#allocation3 + $0x48] sm:$0xff] %vm1963_vm2, %v1778_v8 }
 0x213   : > { %1887 = vrot.lane.b32.xlu1 %v7365_v13, %s5865_s17  ;;  %v2678_v19 = vpop.permute.xlu0 %2677  ;;  %v7483_v13 = vld [vmem:[#allocation2 + $0x1c1] sm:$0xff] }
 0x214   : > { %2865 = vst.msk [vmem:[#allocation3 + $0x68] sm:$0xff] %vm1578_vm1, %v2678_v19  ;;  %v2170_v19 = vld [vmem:[#allocation2 + $0x112] sm:$0xff] }
 0x215   : > { %v1874_v38 = vpop.permute.xlu1 %1873  ;;  %3075 = vrot.lane.b32.xlu0 %v7190_v32, %s5865_s17  ;;  %2115 = vst.msk [vmem:[#allocation3 + $0x230] sm:$0xff] %vm257_vm0, %v7483_v13 }
 0x216   : > { %2015 = vst.msk [vmem:[#allocation3 + $0x4c8] sm:$0xff] %vm1963_vm2, %v1874_v38  ;;  %v3591_v42 = vld [vmem:[#allocation3 + $0x4d0] sm:$0xff] }
 0x217   : > { %2402 = vrot.lane.b32.xlu1 %v7443_v16, %s5863_s28  ;;  %4183 = vmatprep.mubr.f32.mxu1 %v3591_v42  ;;  %v3062_v22 = vpop.permute.xlu0 %3061 }
 0x218   : > { %3249 = vst.msk [vmem:[#allocation3 + $0x68] sm:$0xff] %vm1963_vm2, %v3062_v22 }
 0x219   : > { %v2389_v7 = vpop.permute.xlu1 %2388  ;;  %v3446_v1 = vld [vmem:[#allocation3 + $0x48] sm:$0xff]  ;;  %3171 = vrot.lane.b32.xlu0 %v7200_v26, %s5865_s17 }
 0x21a   : > { %2528 = vst.msk [vmem:[#allocation3 + $0x4e8] sm:$0xff] %vm1193_vm15, %v2389_v7  ;;  %3944 = vmatmul.mubr.f32.gmra.mxu0 %v3446_v1  ;;  %v7557_v7 = vld [vmem:[#allocation2 + $0x120] sm:$0xff] }
 0x21b   : > { %2787 = vrot.lane.b32.xlu1 %v2600_v49, %s5864_s29  ;;  %v3158_v24 = vpop.permute.xlu0 %3157  ;;  %v7559_v1 = vld [vmem:[#allocation2 + $0x222] sm:$0xff] }
 0x21c   : > { %3399 = vst.msk [vmem:[#allocation3 + $0x280] sm:$0xff] %vm257_vm0, %v7559_v1 }
 0x21d   : > { %v2774_v29 = vpop.permute.xlu1 %2773  ;;  %v3590_v32 = vld [vmem:[#allocation3 + $0x4c8] sm:$0xff]  ;;  %2308 = vrot.lane.b32.xlu0 %v2168_v61, %s5863_s28 }
 0x21e   : > { %2913 = vst.msk [vmem:[#allocation3 + $0x4e8] sm:$0xff] %vm1578_vm1, %v2774_v29  ;;  %4184 = vmatmul.mubr.f32.gmra.mxu1 %v3590_v32  ;;  %v7567_v29 = vld [vmem:[#allocation2 + $0x4d2] sm:$0xff] }
 0x21f   : > { %1793 = vrot.lane.b32.xlu1 %v7388_v11, %s5865_s17  ;;  %3297 = vst.msk [vmem:[#allocation3 + $0x4e8] sm:$0xff] %vm1963_vm2, %v3158_v24  ;;  %v2295_v0 = vpop.permute.xlu0 %2294  ;;  %v3450_v60 = vld [vmem:[#allocation3 + $0x68] sm:$0xff] }
 0x220   : > { %2481 = vst.msk [vmem:[#allocation3 + $0x80] sm:$0xff] %vm1193_vm15, %v2295_v0  ;;  %3948 = vmatprep.mubr.f32.mxu0 %v3450_v60  ;;  %v7579_v60 = vld [vmem:[#allocation2 + $0x232] sm:$0xff] }
 0x221   : > { %v1780_v26 = vpop.permute.xlu1 %1779  ;;  %2693 = vrot.lane.b32.xlu0 %v7481_v44, %s5864_s29  ;;  %3400 = vst.msk [vmem:[#allocation3 + $0x298] sm:$0xff] %vm257_vm0, %v7579_v60 }
 0x222   : > { %1968 = vst.msk [vmem:[#allocation3 + $0x60] sm:$0xff] %vm1963_vm2, %v1780_v26  ;;  %v7575_v26 = vld [vmem:[#allocation2 + $0x4e0] sm:$0xff] }
 0x223   : > { %1889 = vrot.lane.b32.xlu1 %v7406_v53, %s5865_s17  ;;  %v2680_v17 = vpop.permute.xlu0 %2679 }
 0x224   : > { %2866 = vst.msk [vmem:[#allocation3 + $0x80] sm:$0xff] %vm1578_vm1, %v2680_v17 }
 0x225   : > { %v1876_v18 = vpop.permute.xlu1 %1875  ;;  %3077 = vrot.lane.b32.xlu0 %v7221_v54, %s5865_s17 }
 0x226   : > { %2016 = vst.msk [vmem:[#allocation3 + $0x4e0] sm:$0xff] %vm1963_vm2, %v1876_v18  ;;  %v3594_v12 = vld [vmem:[#allocation3 + $0x4e8] sm:$0xff] }
 0x227   : > { %2404 = vrot.lane.b32.xlu1 %v2216_v62, %s5863_s28  ;;  %4188 = vmatprep.mubr.f32.mxu1 %v3594_v12  ;;  %v3064_v15 = vpop.permute.xlu0 %3063  ;;  %v539_v12 = vrot.slane %v7440_v37, 3 }
 0x228   : > { %3250 = vst.msk [vmem:[#allocation3 + $0x80] sm:$0xff] %vm1963_vm2, %v3064_v15 }
 0x229   : > { %v2391_v45 = vpop.permute.xlu1 %2390  ;;  %v3449_v11 = vld [vmem:[#allocation3 + $0x60] sm:$0xff]  ;;  %1795 = vrot.lane.b32.xlu0 %v7429_v57, %s5865_s17  ;;  %v555_v15 = vsub.f32 %v7450_v41, %v539_v12 }
 0x22a   : > { %2529 = vst.msk [vmem:[#allocation3 + $0x500] sm:$0xff] %vm1193_vm15, %v2391_v45  ;;  %3949 = vmatmul.mubr.f32.gmra.mxu0 %v3449_v11  ;;  %v2219_v45 = vld [vmem:[#allocation2 + $0x4e2] sm:$0xff] }
 0x22b   : > { %2789 = vrot.lane.b32.xlu1 %v7500_v5, %s5864_s29  ;;  %v3160_v54 = vpop.permute.xlu0 %3159  ;;  %v7595_v11 = vld [vmem:[#allocation2 + $0x242] sm:$0xff]  ;;  %565 = vst.msk [vmem:[#allocation2 + $0x264] sm:$0x1f] %vm557_vm7, %v555_v15  ;;  %vm5122_vm7 = vcmask 392512  }
 0x22c   : > { %3401 = vst.msk [vmem:[#allocation3 + $0x2b0] sm:$0xff] %vm257_vm0, %v7595_v11 }
 0x22d   : > { %v2776_v40 = vpop.permute.xlu1 %2775  ;;  %v3593_v10 = vld [vmem:[#allocation3 + $0x4e0] sm:$0xff]  ;;  %1891 = vrot.lane.b32.xlu0 %v2600_v49, %s5865_s17  ;;  %574 = vst.msk [vmem:[#allocation2 + $0x25c] sm:$0xe0] %vm566_vm8, %v555_v15  ;;  %vm5129_vm8 = vcmask 458112  }
 0x22e   : > { %2914 = vst.msk [vmem:[#allocation3 + $0x500] sm:$0xff] %vm1578_vm1, %v2776_v40  ;;  %4189 = vmatmul.mubr.f32.gmra.mxu1 %v3593_v10 }
 0x22f   : > { %1506 = vrot.lane.b32.xlu1 %v7443_v16, %s5864_s29  ;;  %3298 = vst.msk [vmem:[#allocation3 + $0x500] sm:$0xff] %vm1963_vm2, %v3160_v54  ;;  %v2297_v53 = vpop.permute.xlu0 %2296  ;;  %v3453_v63 = vld [vmem:[#allocation3 + $0x80] sm:$0xff]  ;;  %v7542_v16 = vld [vmem:[#allocation2 + $0x212] sm:$0xff] }
 0x230   : > { %2482 = vst.msk [vmem:[#allocation3 + $0x98] sm:$0xff] %vm1193_vm15, %v2297_v53  ;;  %3953 = vmatprep.mubr.f32.mxu0 %v3453_v63  ;;  %v2171_v54 = vld [vmem:[#allocation2 + $0x122] sm:$0xff]  ;;  %v2604_v53 = vld [vmem:[#allocation2 + $0x4f0] sm:$0xff] }
 0x231   : > { %v1782_v21 = vpop.permute.xlu1 %1781  ;;  %2406 = vrot.lane.b32.xlu0 %v7515_v23, %s5863_s28  ;;  %3398 = vst.msk [vmem:[#allocation3 + $0x268] sm:$0xff] %vm257_vm0, %v7542_v16 }
 0x232   : > { %1969 = vst.msk [vmem:[#allocation3 + $0x78] sm:$0xff] %vm1963_vm2, %v1782_v21 }
 0x233   : > { %3173 = vrot.lane.b32.xlu1 %v7234_v20, %s5865_s17  ;;  %v2682_v48 = vpop.permute.xlu0 %2681  ;;  %v2554_v20 = vld [vmem:[#allocation2 + $0x110] sm:$0xff] }
 0x234   : > { %2867 = vst.msk [vmem:[#allocation3 + $0x98] sm:$0xff] %vm1578_vm1, %v2682_v48 }
 0x235   : > { %v1878_v56 = vpop.permute.xlu1 %1877  ;;  %2791 = vrot.lane.b32.xlu0 %v7527_v59, %s5864_s29 }
 0x236   : > { %2017 = vst.msk [vmem:[#allocation3 + $0x4f8] sm:$0xff] %vm1963_vm2, %v1878_v56  ;;  %v3597_v2 = vld [vmem:[#allocation3 + $0x500] sm:$0xff] }
 0x237   : > { %2310 = vrot.lane.b32.xlu1 %v2169_v46, %s5863_s28  ;;  %4193 = vmatprep.mubr.f32.mxu1 %v3597_v2  ;;  %v3066_v31 = vpop.permute.xlu0 %3065  ;;  %v2044_v2 = vld [vmem:[#allocation2 + $0x151] sm:$0xff] }
 0x238   : > { %3251 = vst.msk [vmem:[#allocation3 + $0x98] sm:$0xff] %vm1963_vm2, %v3066_v31  ;;  %v2988_v31 = vld [vmem:[#allocation2 + $0x4f1] sm:$0xff] }
 0x239   : > { %v2393_v8 = vpop.permute.xlu1 %2392  ;;  %v3452_v57 = vld [vmem:[#allocation3 + $0x78] sm:$0xff]  ;;  %1508 = vrot.lane.b32.xlu0 %v2216_v62, %s5864_s29  ;;  %2108 = vst.msk [vmem:[#allocation3 + $0x188] sm:$0xff] %vm257_vm0, %v2044_v2 }
 0x23a   : > { %2530 = vst.msk [vmem:[#allocation3 + $0x518] sm:$0xff] %vm1193_vm15, %v2393_v8  ;;  %3954 = vmatmul.mubr.f32.gmra.mxu0 %v3452_v57  ;;  %v3309_v8 = vld [vmem:[#allocation2 + $0x22] sm:$0xff] }
 0x23b   : > { %2695 = vrot.lane.b32.xlu1 %v2554_v20, %s5864_s29  ;;  %v3162_v38 = vpop.permute.xlu0 %3161  ;;  %3373 = vst.msk [vmem:[#allocation3 + $0x10] sm:$0xff] %vm257_vm0, %v3309_v8 }
 0x23d   : > { %v2778_v30 = vpop.permute.xlu1 %2777  ;;  %v3596_v39 = vld [vmem:[#allocation3 + $0x4f8] sm:$0xff]  ;;  %3175 = vrot.lane.b32.xlu0 %v7271_v51, %s5865_s17 }
 0x23e   : > { %2915 = vst.msk [vmem:[#allocation3 + $0x518] sm:$0xff] %vm1578_vm1, %v2778_v30  ;;  %4194 = vmatmul.mubr.f32.gmra.mxu1 %v3596_v39  ;;  %v3664_v30 = vld [vmem:[%s9000_s2 + $0x118] sm:$0xff] }
 0x23f   : > { %3079 = vrot.lane.b32.xlu1 %v7256_v43, %s5865_s17  ;;  %3299 = vst.msk [vmem:[#allocation3 + $0x518] sm:$0xff] %vm1963_vm2, %v3162_v38  ;;  %v2299_v42 = vpop.permute.xlu0 %2298  ;;  %v3456_v49 = vld [vmem:[#allocation3 + $0x98] sm:$0xff]  ;;  %5664 = vmatprep.subr.mxu1 %v3664_v30 }
 0x240   : > { %2483 = vst.msk [vmem:[#allocation3 + $0xb0] sm:$0xff] %vm1193_vm15, %v2299_v42  ;;  %3958 = vmatprep.mubr.f32.mxu0 %v3456_v49  ;;  %v3310_v39 = vld [vmem:[#allocation2 + $0x32] sm:$0xff]  ;;  %5665 = vmatpush3.msra.mxu1 %v3664_v30  ;;  %v3311_v49 = vld [vmem:[#allocation2 + $0x42] sm:$0xff] }
 0x241   : > { %v1784_v58 = vpop.permute.xlu1 %1783  ;;  %2312 = vrot.lane.b32.xlu0 %v2170_v19, %s5863_s28  ;;  %3374 = vst.msk [vmem:[#allocation3 + $0x28] sm:$0xff] %vm257_vm0, %v3310_v39  ;;  %v3663_v19 = vld [vmem:[%s9000_s2 + $0x110] sm:$0xff]  ;;  %3375 = vst.msk [vmem:[#allocation3 + $0x40] sm:$0xff] %vm257_vm0, %v3311_v49  ;;  %v2559_v30 = vld [vmem:[#allocation2 + $0x180] sm:$0xff] }
 0x242   : > { %1970 = vst.msk [vmem:[#allocation3 + $0x90] sm:$0xff] %vm1963_vm2, %v1784_v58  ;;  %v2172_v42 = vld [vmem:[#allocation2 + $0x152] sm:$0xff]  ;;  %5666 = vmatprep.subr.mxu1 %v3663_v19 }
 0x243   : > { %1797 = vrot.lane.b32.xlu1 %v7481_v44, %s5865_s17  ;;  %v2684_v51 = vpop.permute.xlu0 %2683  ;;  %5667 = vmatpush3.msra.mxu1 %v3663_v19 }
 0x244   : > { %2868 = vst.msk [vmem:[#allocation3 + $0xb0] sm:$0xff] %vm1578_vm1, %v2684_v51  ;;  %v3662_v51 = vld [vmem:[%s9000_s2 + $0x108] sm:$0xff] }
 0x245   : > { %v1880_v43 = vpop.permute.xlu1 %1879  ;;  %2697 = vrot.lane.b32.xlu0 %v7557_v7, %s5864_s29  ;;  %5668 = vmatprep.subr.mxu1 %v3662_v51 }
 0x246   : > { %2018 = vst.msk [vmem:[#allocation3 + $0x510] sm:$0xff] %vm1963_vm2, %v1880_v43  ;;  %v3600_v22 = vld [vmem:[#allocation3 + $0x518] sm:$0xff]  ;;  %5669 = vmatpush3.msra.mxu1 %v3662_v51 }
 0x247   : > { %1893 = vrot.lane.b32.xlu1 %v7500_v5, %s5865_s17  ;;  %4198 = vmatprep.mubr.f32.mxu1 %v3600_v22  ;;  %v3068_v24 = vpop.permute.xlu0 %3067  ;;  %v7636_v22 = vld [vmem:[#allocation2 + $0x262] sm:$0xff] }
 0x248   : > { %3252 = vst.msk [vmem:[#allocation3 + $0xb0] sm:$0xff] %vm1963_vm2, %v3068_v24  ;;  %v3661_v24 = vld [vmem:[%s9000_s2 + $0x100] sm:$0xff] }
 0x249   : > { %v2395_v32 = vpop.permute.xlu1 %2394  ;;  %v3455_v61 = vld [vmem:[#allocation3 + $0x90] sm:$0xff]  ;;  %3081 = vrot.lane.b32.xlu0 %v7298_v47, %s5865_s17  ;;  %3403 = vst.msk [vmem:[#allocation3 + $0x2e0] sm:$0xff] %vm257_vm0, %v7636_v22  ;;  %5670 = vmatprep.subr.mxu1 %v3661_v24 }
 0x24a   : > { %2531 = vst.msk [vmem:[#allocation3 + $0x530] sm:$0xff] %vm1193_vm15, %v2395_v32  ;;  %3959 = vmatmul.mubr.f32.gmra.mxu0 %v3455_v61  ;;  %5671 = vmatpush3.msra.mxu1 %v3661_v24 }
 0x24b   : > { %2408 = vrot.lane.b32.xlu1 %v7567_v29, %s5863_s28  ;;  %v3164_v62 = vpop.permute.xlu0 %3163 }
 0x24d   : > { %v2780_v44 = vpop.permute.xlu1 %2779  ;;  %v3599_v0 = vld [vmem:[#allocation3 + $0x510] sm:$0xff]  ;;  %1799 = vrot.lane.b32.xlu0 %v2554_v20, %s5865_s17 }
 0x24e   : > { %2916 = vst.msk [vmem:[#allocation3 + $0x530] sm:$0xff] %vm1578_vm1, %v2780_v44  ;;  %4199 = vmatmul.mubr.f32.gmra.mxu1 %v3599_v0  ;;  %v2940_v20 = vld [vmem:[#allocation2 + $0x131] sm:$0xff]  ;;  %v3313_v44 = vld [vmem:[#allocation2 + $0x62] sm:$0xff] }
 0x24f   : > { %2793 = vrot.lane.b32.xlu1 %v7575_v26, %s5864_s29  ;;  %3300 = vst.msk [vmem:[#allocation3 + $0x530] sm:$0xff] %vm1963_vm2, %v3164_v62  ;;  %v2301_v47 = vpop.permute.xlu0 %2300  ;;  %v3459_v17 = vld [vmem:[#allocation3 + $0xb0] sm:$0xff] }
 0x250   : > { %2484 = vst.msk [vmem:[#allocation3 + $0xc8] sm:$0xff] %vm1193_vm15, %v2301_v47  ;;  %3963 = vmatprep.mubr.f32.mxu0 %v3459_v17  ;;  %v2557_v47 = vld [vmem:[#allocation2 + $0x160] sm:$0xff] }
 0x251   : > { %v1786_v18 = vpop.permute.xlu1 %1785  ;;  %1895 = vrot.lane.b32.xlu0 %v7527_v59, %s5865_s17  ;;  %v7611_v59 = vld [vmem:[#allocation2 + $0x252] sm:$0xff]  ;;  %3377 = vst.msk [vmem:[#allocation3 + $0x70] sm:$0xff] %vm257_vm0, %v3313_v44  ;;  %v3315_v17 = vld [vmem:[#allocation2 + $0x82] sm:$0xff] }
 0x252   : > { %1971 = vst.msk [vmem:[#allocation3 + $0xa8] sm:$0xff] %vm1963_vm2, %v1786_v18  ;;  %v3314_v18 = vld [vmem:[#allocation2 + $0x72] sm:$0xff] }
 0x253   : > { %1510 = vrot.lane.b32.xlu1 %v7515_v23, %s5864_s29  ;;  %v2686_v40 = vpop.permute.xlu0 %2685  ;;  %3402 = vst.msk [vmem:[#allocation3 + $0x2c8] sm:$0xff] %vm257_vm0, %v7611_v59  ;;  %3378 = vst.msk [vmem:[#allocation3 + $0x88] sm:$0xff] %vm257_vm0, %v3314_v18 }
 0x254   : > { %2869 = vst.msk [vmem:[#allocation3 + $0xc8] sm:$0xff] %vm1578_vm1, %v2686_v40  ;;  %v1659_v40 = vld [vmem:[#allocation2 + $0x150] sm:$0xff] }
 0x255   : > { %v1882_v5 = vpop.permute.xlu1 %1881  ;;  %2410 = vrot.lane.b32.xlu0 %v2219_v45, %s5863_s28  ;;  %v2173_v45 = vld [vmem:[#allocation2 + $0x162] sm:$0xff]  ;;  %3379 = vst.msk [vmem:[#allocation3 + $0xa0] sm:$0xff] %vm257_vm0, %v3315_v17  ;;  %v3332_v17 = vld [vmem:[#allocation2 + $0x1d2] sm:$0xff] }
 0x256   : > { %2019 = vst.msk [vmem:[#allocation3 + $0x528] sm:$0xff] %vm1963_vm2, %v1882_v5  ;;  %v3603_v10 = vld [vmem:[#allocation3 + $0x530] sm:$0xff] }
 0x257   : > { %3177 = vrot.lane.b32.xlu1 %v7309_v55, %s5865_s17  ;;  %4203 = vmatprep.mubr.f32.mxu1 %v3603_v10  ;;  %v3070_v63 = vpop.permute.xlu0 %3069  ;;  %v2556_v55 = vld [vmem:[#allocation2 + $0x130] sm:$0xff]  ;;  %3396 = vst.msk [vmem:[#allocation3 + $0x238] sm:$0xff] %vm257_vm0, %v3332_v17  ;;  %v7816_v17 = vld [vmem:[#allocation2 + $0x362] sm:$0xff] }
 0x258   : > { %3253 = vst.msk [vmem:[#allocation3 + $0xc8] sm:$0xff] %vm1963_vm2, %v3070_v63  ;;  %v3319_v63 = vld [vmem:[#allocation2 + $0xe2] sm:$0xff] }
 0x259   : > { %v2397_v21 = vpop.permute.xlu1 %2396  ;;  %v3458_v23 = vld [vmem:[#allocation3 + $0xa8] sm:$0xff]  ;;  %2795 = vrot.lane.b32.xlu0 %v2604_v53, %s5864_s29  ;;  %v2558_v53 = vld [vmem:[#allocation2 + $0x170] sm:$0xff]  ;;  %3383 = vst.msk [vmem:[#allocation3 + $0x100] sm:$0xff] %vm257_vm0, %v3319_v63  ;;  %3415 = vst.msk [vmem:[#allocation3 + $0x400] sm:$0xff] %vm257_vm0, %v7816_v17 }
 0x25a   : > { %2532 = vst.msk [vmem:[#allocation3 + $0x548] sm:$0xff] %vm1193_vm15, %v2397_v21  ;;  %3964 = vmatmul.mubr.f32.gmra.mxu0 %v3458_v23 }
 0x25b   : > { %2314 = vrot.lane.b32.xlu1 %v2171_v54, %s5863_s28  ;;  %v3166_v48 = vpop.permute.xlu0 %3165  ;;  %v3318_v54 = vld [vmem:[#allocation2 + $0xd2] sm:$0xff] }
 0x25c   : > { %3382 = vst.msk [vmem:[#allocation3 + $0xe8] sm:$0xff] %vm257_vm0, %v3318_v54 }
 0x25d   : > { %v2782_v46 = vpop.permute.xlu1 %2781  ;;  %v3602_v56 = vld [vmem:[#allocation3 + $0x528] sm:$0xff]  ;;  %1512 = vrot.lane.b32.xlu0 %v7567_v29, %s5864_s29  ;;  %v3312_v29 = vld [vmem:[#allocation2 + $0x52] sm:$0xff] }
 0x25e   : > { %2917 = vst.msk [vmem:[#allocation3 + $0x548] sm:$0xff] %vm1578_vm1, %v2782_v46  ;;  %4204 = vmatmul.mubr.f32.gmra.mxu1 %v3602_v56  ;;  %v7671_v46 = vld [vmem:[#allocation2 + $0x2a2] sm:$0xff]  ;;  %v3320_v56 = vld [vmem:[#allocation2 + $0xf2] sm:$0xff] }
 0x25f   : > { %2699 = vrot.lane.b32.xlu1 %v2556_v55, %s5864_s29  ;;  %3301 = vst.msk [vmem:[#allocation3 + $0x548] sm:$0xff] %vm1963_vm2, %v3166_v48  ;;  %v2303_v38 = vpop.permute.xlu0 %2302  ;;  %v3462_v58 = vld [vmem:[#allocation3 + $0xc8] sm:$0xff] }
 0x260   : > { %2485 = vst.msk [vmem:[#allocation3 + $0xe0] sm:$0xff] %vm1193_vm15, %v2303_v38  ;;  %3968 = vmatprep.mubr.f32.mxu0 %v3462_v58  ;;  %v7689_v58 = vld [vmem:[#allocation2 + $0x2b2] sm:$0xff] }
 0x261   : > { %v1788_v57 = vpop.permute.xlu1 %1787  ;;  %3179 = vrot.lane.b32.xlu0 %v2988_v31, %s5865_s17  ;;  %3376 = vst.msk [vmem:[#allocation3 + $0x58] sm:$0xff] %vm257_vm0, %v3312_v29  ;;  %3384 = vst.msk [vmem:[#allocation3 + $0x118] sm:$0xff] %vm257_vm0, %v3320_v56  ;;  %v3322_v31 = vld [vmem:[#allocation2 + $0x112] sm:$0xff] }
 0x262   : > { %1972 = vst.msk [vmem:[#allocation3 + $0xc0] sm:$0xff] %vm1963_vm2, %v1788_v57  ;;  %v2560_v29 = vld [vmem:[#allocation2 + $0x190] sm:$0xff] }
 0x263   : > { %3083 = vrot.lane.b32.xlu1 %v2940_v20, %s5865_s17  ;;  %v2688_v32 = vpop.permute.xlu0 %2687  ;;  %3405 = vst.msk [vmem:[#allocation3 + $0x310] sm:$0xff] %vm257_vm0, %v7671_v46  ;;  %3386 = vst.msk [vmem:[#allocation3 + $0x148] sm:$0xff] %vm257_vm0, %v3322_v31  ;;  %v2052_v56 = vld [vmem:[#allocation2 + $0x1f1] sm:$0xff] }
 0x264   : > { %2870 = vst.msk [vmem:[#allocation3 + $0xe0] sm:$0xff] %vm1578_vm1, %v2688_v32 }
 0x265   : > { %v1884_v43 = vpop.permute.xlu1 %1883  ;;  %2316 = vrot.lane.b32.xlu0 %v2172_v42, %s5863_s28  ;;  %v3324_v42 = vld [vmem:[#allocation2 + $0x132] sm:$0xff]  ;;  %3406 = vst.msk [vmem:[#allocation3 + $0x328] sm:$0xff] %vm257_vm0, %v7689_v58  ;;  %2116 = vst.msk [vmem:[#allocation3 + $0x248] sm:$0xff] %vm257_vm0, %v2052_v56 }
 0x266   : > { %2020 = vst.msk [vmem:[#allocation3 + $0x540] sm:$0xff] %vm1963_vm2, %v1884_v43  ;;  %v3606_v61 = vld [vmem:[#allocation3 + $0x548] sm:$0xff]  ;;  %v3356_v56 = vld [vmem:[#allocation2 + $0x3b2] sm:$0xff] }
 0x267   : > { %1801 = vrot.lane.b32.xlu1 %v7557_v7, %s5865_s17  ;;  %4208 = vmatprep.mubr.f32.mxu1 %v3606_v61  ;;  %v3072_v7 = vpop.permute.xlu0 %3071  ;;  %3388 = vst.msk [vmem:[#allocation3 + $0x178] sm:$0xff] %vm257_vm0, %v3324_v42  ;;  %v7706_v61 = vld [vmem:[#allocation2 + $0x2c2] sm:$0xff]  ;;  %3420 = vst.msk [vmem:[#allocation3 + $0x478] sm:$0xff] %vm257_vm0, %v3356_v56  ;;  %v2954_v56 = vld [vmem:[#allocation2 + $0x251] sm:$0xff] }
 0x268   : > { %3254 = vst.msk [vmem:[#allocation3 + $0xe0] sm:$0xff] %vm1963_vm2, %v3072_v7 }
 0x269   : > { %v2399_v0 = vpop.permute.xlu1 %2398  ;;  %v3461_v62 = vld [vmem:[#allocation3 + $0xc0] sm:$0xff]  ;;  %3085 = vrot.lane.b32.xlu0 %v7352_v28, %s5865_s17  ;;  %3407 = vst.msk [vmem:[#allocation3 + $0x340] sm:$0xff] %vm257_vm0, %v7706_v61 }
 0x26a   : > { %2533 = vst.msk [vmem:[#allocation3 + $0x560] sm:$0xff] %vm1193_vm15, %v2399_v0  ;;  %3969 = vmatmul.mubr.f32.gmra.mxu0 %v3461_v62  ;;  %v3317_v28 = vld [vmem:[#allocation2 + $0xc2] sm:$0xff] }
 0x26b   : > { %1897 = vrot.lane.b32.xlu1 %v7575_v26, %s5865_s17  ;;  %v3168_v15 = vpop.permute.xlu0 %3167  ;;  %v3316_v26 = vld [vmem:[#allocation2 + $0x92] sm:$0xff]  ;;  %3381 = vst.msk [vmem:[#allocation3 + $0xd0] sm:$0xff] %vm257_vm0, %v3317_v28  ;;  %v2561_v62 = vld [vmem:[#allocation2 + $0x1a0] sm:$0xff] }
 0x26c   : > { %3380 = vst.msk [vmem:[#allocation3 + $0xb8] sm:$0xff] %vm257_vm0, %v3316_v26 }
 0x26d   : > { %v2784_v12 = vpop.permute.xlu1 %2783  ;;  %v3605_v5 = vld [vmem:[#allocation3 + $0x540] sm:$0xff]  ;;  %2318 = vrot.lane.b32.xlu0 %v2173_v45, %s5863_s28  ;;  %v582_v45 = vrot.slane %v7440_v37, 4 }
 0x26e   : > { %2918 = vst.msk [vmem:[#allocation3 + $0x560] sm:$0xff] %vm1578_vm1, %v2784_v12  ;;  %4209 = vmatmul.mubr.f32.gmra.mxu1 %v3605_v5 }
 0x26f   : > { %2701 = vrot.lane.b32.xlu1 %v2557_v47, %s5864_s29  ;;  %3302 = vst.msk [vmem:[#allocation3 + $0x560] sm:$0xff] %vm1963_vm2, %v3168_v15  ;;  %v2305_v21 = vpop.permute.xlu0 %2304  ;;  %v3465_v23 = vld [vmem:[#allocation3 + $0xe0] sm:$0xff]  ;;  %v2562_v15 = vld [vmem:[#allocation2 + $0x1b0] sm:$0xff] }
 0x270   : > { %2486 = vst.msk [vmem:[#allocation3 + $0xf8] sm:$0xff] %vm1193_vm15, %v2305_v21  ;;  %3973 = vmatprep.mubr.f32.mxu0 %v3465_v23  ;;  %v2563_v21 = vld [vmem:[#allocation2 + $0x1c0] sm:$0xff] }
 0x271   : > { %v1790_v10 = vpop.permute.xlu1 %1789  ;;  %3087 = vrot.lane.b32.xlu0 %v7369_v33, %s5865_s17  ;;  %v3321_v33 = vld [vmem:[#allocation2 + $0x102] sm:$0xff] }
 0x272   : > { %1973 = vst.msk [vmem:[#allocation3 + $0xd8] sm:$0xff] %vm1963_vm2, %v1790_v10 }
 0x273   : > { %1803 = vrot.lane.b32.xlu1 %v1659_v40, %s5865_s17  ;;  %v2690_v48 = vpop.permute.xlu0 %2689  ;;  %3385 = vst.msk [vmem:[#allocation3 + $0x130] sm:$0xff] %vm257_vm0, %v3321_v33  ;;  %v7736_v40 = vld [vmem:[#allocation2 + $0x2e2] sm:$0xff] }
 0x274   : > { %2871 = vst.msk [vmem:[#allocation3 + $0xf8] sm:$0xff] %vm1578_vm1, %v2690_v48  ;;  %v2948_v48 = vld [vmem:[#allocation2 + $0x1d1] sm:$0xff] }
 0x275   : > { %v1886_v55 = vpop.permute.xlu1 %1885  ;;  %2320 = vrot.lane.b32.xlu0 %v7379_v52, %s5863_s28  ;;  %v3323_v52 = vld [vmem:[#allocation2 + $0x122] sm:$0xff]  ;;  %3409 = vst.msk [vmem:[#allocation3 + $0x370] sm:$0xff] %vm257_vm0, %v7736_v40 }
 0x276   : > { %2021 = vst.msk [vmem:[#allocation3 + $0x558] sm:$0xff] %vm1963_vm2, %v1886_v55  ;;  %v3609_v2 = vld [vmem:[#allocation3 + $0x560] sm:$0xff]  ;;  %v3340_v55 = vld [vmem:[#allocation2 + $0x272] sm:$0xff] }
 0x277   : > { %2703 = vrot.lane.b32.xlu1 %v2558_v53, %s5864_s29  ;;  %4213 = vmatprep.mubr.f32.mxu1 %v3609_v2  ;;  %v3074_v57 = vpop.permute.xlu0 %3073  ;;  %3387 = vst.msk [vmem:[#allocation3 + $0x160] sm:$0xff] %vm257_vm0, %v3323_v52  ;;  %3404 = vst.msk [vmem:[#allocation3 + $0x2f8] sm:$0xff] %vm257_vm0, %v3340_v55 }
 0x278   : > { %3255 = vst.msk [vmem:[#allocation3 + $0xf8] sm:$0xff] %vm1963_vm2, %v3074_v57  ;;  %v2180_v57 = vld [vmem:[#allocation2 + $0x1f2] sm:$0xff] }
 0x279   : > { %v2401_v20 = vpop.permute.xlu1 %2400  ;;  %v3464_v8 = vld [vmem:[#allocation3 + $0xd8] sm:$0xff]  ;;  %3089 = vrot.lane.b32.xlu0 %v7390_v35, %s5865_s17  ;;  %v3325_v35 = vld [vmem:[#allocation2 + $0x162] sm:$0xff] }
 0x27a   : > { %2534 = vst.msk [vmem:[#allocation3 + $0x578] sm:$0xff] %vm1193_vm15, %v2401_v20  ;;  %3974 = vmatmul.mubr.f32.gmra.mxu0 %v3464_v8  ;;  %v2564_v8 = vld [vmem:[#allocation2 + $0x1d0] sm:$0xff] }
 0x27b   : > { %1805 = vrot.lane.b32.xlu1 %v2557_v47, %s5865_s17  ;;  %v3170_v19 = vpop.permute.xlu0 %3169  ;;  %3389 = vst.msk [vmem:[#allocation3 + $0x190] sm:$0xff] %vm257_vm0, %v3325_v35  ;;  %v7720_v47 = vld [vmem:[#allocation2 + $0x2d2] sm:$0xff]  ;;  %v2565_v35 = vld [vmem:[#allocation2 + $0x200] sm:$0xff] }
 0x27c   : > { %3408 = vst.msk [vmem:[#allocation3 + $0x358] sm:$0xff] %vm257_vm0, %v7720_v47 }
 0x27d   : > { %v2786_v39 = vpop.permute.xlu1 %2785  ;;  %v3608_v38 = vld [vmem:[#allocation3 + $0x558] sm:$0xff]  ;;  %2322 = vrot.lane.b32.xlu0 %v7399_v9, %s5863_s28 }
 0x27e   : > { %2919 = vst.msk [vmem:[#allocation3 + $0x578] sm:$0xff] %vm1578_vm1, %v2786_v39  ;;  %4214 = vmatmul.mubr.f32.gmra.mxu1 %v3608_v38 }
 0x27f   : > { %2705 = vrot.lane.b32.xlu1 %v2559_v30, %s5864_s29  ;;  %3303 = vst.msk [vmem:[#allocation3 + $0x578] sm:$0xff] %vm1963_vm2, %v3170_v19  ;;  %v2307_v43 = vpop.permute.xlu0 %2306  ;;  %v3468_v51 = vld [vmem:[#allocation3 + $0xf8] sm:$0xff] }
 0x280   : > { %2487 = vst.msk [vmem:[#allocation3 + $0x110] sm:$0xff] %vm1193_vm15, %v2307_v43  ;;  %3978 = vmatprep.mubr.f32.mxu0 %v3468_v51 }
 0x281   : > { %v1792_v49 = vpop.permute.xlu1 %1791  ;;  %3091 = vrot.lane.b32.xlu0 %v7410_v34, %s5865_s17 }
 0x282   : > { %1974 = vst.msk [vmem:[#allocation3 + $0xf0] sm:$0xff] %vm1963_vm2, %v1792_v49 }
 0x283   : > { %1807 = vrot.lane.b32.xlu1 %v2558_v53, %s5865_s17  ;;  %v2692_v9 = vpop.permute.xlu0 %2691  ;;  %v7757_v53 = vld [vmem:[#allocation2 + $0x2f2] sm:$0xff] }
 0x284   : > { %2872 = vst.msk [vmem:[#allocation3 + $0x110] sm:$0xff] %vm1578_vm1, %v2692_v9  ;;  %v3348_v9 = vld [vmem:[#allocation2 + $0x312] sm:$0xff] }
 0x285   : > { %v1888_v32 = vpop.permute.xlu1 %1887  ;;  %2324 = vrot.lane.b32.xlu0 %v7420_v3, %s5863_s28  ;;  %3410 = vst.msk [vmem:[#allocation3 + $0x388] sm:$0xff] %vm257_vm0, %v7757_v53  ;;  %3412 = vst.msk [vmem:[#allocation3 + $0x3b8] sm:$0xff] %vm257_vm0, %v3348_v9  ;;  %v3361_v9 = vld [vmem:[#allocation2 + $0x422] sm:$0xff] }
 0x286   : > { %2022 = vst.msk [vmem:[#allocation3 + $0x570] sm:$0xff] %vm1963_vm2, %v1888_v32  ;;  %v3612_v24 = vld [vmem:[#allocation3 + $0x578] sm:$0xff] }
 0x287   : > { %2707 = vrot.lane.b32.xlu1 %v2560_v29, %s5864_s29  ;;  %4218 = vmatprep.mubr.f32.mxu1 %v3612_v24  ;;  %v3076_v0 = vpop.permute.xlu0 %3075  ;;  %v2054_v24 = vld [vmem:[#allocation2 + $0x211] sm:$0xff]  ;;  %3425 = vst.msk [vmem:[#allocation3 + $0x4f0] sm:$0xff] %vm257_vm0, %v3361_v9  ;;  %v3371_v9 = vld [vmem:[#allocation2 + $0x4e2] sm:$0xff] }
 0x288   : > { %3256 = vst.msk [vmem:[#allocation3 + $0x110] sm:$0xff] %vm1963_vm2, %v3076_v0 }
 0x289   : > { %v2403_v44 = vpop.permute.xlu1 %2402  ;;  %v3467_v34 = vld [vmem:[#allocation3 + $0xf0] sm:$0xff]  ;;  %3093 = vrot.lane.b32.xlu0 %v7431_v36, %s5865_s17  ;;  %2118 = vst.msk [vmem:[#allocation3 + $0x278] sm:$0xff] %vm257_vm0, %v2054_v24  ;;  %3435 = vst.msk [vmem:[#allocation3 + $0x5e0] sm:$0xff] %vm257_vm0, %v3371_v9 }
 0x28a   : > { %2535 = vst.msk [vmem:[#allocation3 + $0x590] sm:$0xff] %vm1193_vm15, %v2403_v44  ;;  %3979 = vmatmul.mubr.f32.gmra.mxu0 %v3467_v34  ;;  %v1667_v34 = vld [vmem:[#allocation2 + $0x1f0] sm:$0xff] }
 0x28b   : > { %1809 = vrot.lane.b32.xlu1 %v2559_v30, %s5865_s17  ;;  %v3172_v3 = vpop.permute.xlu0 %3171 }
 0x28d   : > { %v2788_v7 = vpop.permute.xlu1 %2787  ;;  %v3611_v18 = vld [vmem:[#allocation3 + $0x570] sm:$0xff]  ;;  %2326 = vrot.lane.b32.xlu0 %v7447_v6, %s5863_s28  ;;  %v598_v6 = vsub.f32 %v7450_v41, %v582_v45  ;;  %v2055_v45 = vld [vmem:[#allocation2 + $0x221] sm:$0xff] }
 0x28e   : > { %2920 = vst.msk [vmem:[#allocation3 + $0x590] sm:$0xff] %vm1578_vm1, %v2788_v7  ;;  %4219 = vmatmul.mubr.f32.gmra.mxu1 %v3611_v18  ;;  %v7802_v7 = vld [vmem:[#allocation2 + $0x341] sm:$0xff]  ;;  %v7806_v18 = vld [vmem:[#allocation2 + $0x352] sm:$0xff] }
 0x28f   : > { %2709 = vrot.lane.b32.xlu1 %v2561_v62, %s5864_s29  ;;  %3304 = vst.msk [vmem:[#allocation3 + $0x590] sm:$0xff] %vm1963_vm2, %v3172_v3  ;;  %v2309_v12 = vpop.permute.xlu0 %2308  ;;  %v3471_v5 = vld [vmem:[#allocation3 + $0x110] sm:$0xff] }
 0x290   : > { %2488 = vst.msk [vmem:[#allocation3 + $0x128] sm:$0xff] %vm1193_vm15, %v2309_v12  ;;  %3983 = vmatprep.mubr.f32.mxu0 %v3471_v5  ;;  %v7820_v12 = vld [vmem:[#allocation2 + $0x372] sm:$0xff] }
 0x291   : > { %v1794_v36 = vpop.permute.xlu1 %1793  ;;  %3095 = vrot.lane.b32.xlu0 %v7463_v14, %s5865_s17  ;;  %608 = vst.msk [vmem:[#allocation2 + $0x305] sm:$0xf] %vm600_vm9, %v598_v6  ;;  %v7748_v14 = vld [vmem:[#allocation2 + $0x2f1] sm:$0xff]  ;;  %vm5136_vm9 = vcmask 523712  }
 0x292   : > { %1975 = vst.msk [vmem:[#allocation3 + $0x108] sm:$0xff] %vm1963_vm2, %v1794_v36 }
 0x293   : > { %1811 = vrot.lane.b32.xlu1 %v2560_v29, %s5865_s17  ;;  %v2694_v28 = vpop.permute.xlu0 %2693  ;;  %617 = vst.msk [vmem:[#allocation2 + $0x2fd] sm:$0xf0] %vm609_vm10, %v598_v6  ;;  %vm5411_vm10 = vcmask 1041409  }
 0x294   : > { %2873 = vst.msk [vmem:[#allocation3 + $0x128] sm:$0xff] %vm1578_vm1, %v2694_v28  ;;  %v2951_v28 = vld [vmem:[#allocation2 + $0x221] sm:$0xff] }
 0x295   : > { %v1890_v26 = vpop.permute.xlu1 %1889  ;;  %2328 = vrot.lane.b32.xlu0 %v7472_v27, %s5863_s28  ;;  %2130 = vst.msk [vmem:[#allocation3 + $0x398] sm:$0xff] %vm257_vm0, %v7748_v14  ;;  %3414 = vst.msk [vmem:[#allocation3 + $0x3e8] sm:$0xff] %vm257_vm0, %v7806_v18 }
 0x296   : > { %2023 = vst.msk [vmem:[#allocation3 + $0x588] sm:$0xff] %vm1963_vm2, %v1890_v26  ;;  %v3615_v10 = vld [vmem:[#allocation3 + $0x590] sm:$0xff] }
 0x297   : > { %2711 = vrot.lane.b32.xlu1 %v2562_v15, %s5864_s29  ;;  %4223 = vmatprep.mubr.f32.mxu1 %v3615_v10  ;;  %v3078_v54 = vpop.permute.xlu0 %3077  ;;  %2133 = vst.msk [vmem:[#allocation3 + $0x3e0] sm:$0xff] %vm257_vm0, %v7802_v7  ;;  %3416 = vst.msk [vmem:[#allocation3 + $0x418] sm:$0xff] %vm257_vm0, %v7820_v12  ;;  %v7832_v10 = vld [vmem:[#allocation2 + $0x351] sm:$0xff] }
 0x298   : > { %3257 = vst.msk [vmem:[#allocation3 + $0x128] sm:$0xff] %vm1963_vm2, %v3078_v54 }
 0x299   : > { %v2405_v37 = vpop.permute.xlu1 %2404  ;;  %v3470_v41 = vld [vmem:[#allocation3 + $0x108] sm:$0xff]  ;;  %3097 = vrot.lane.b32.xlu0 %v7483_v13, %s5865_s17  ;;  %2119 = vst.msk [vmem:[#allocation3 + $0x290] sm:$0xff] %vm257_vm0, %v2055_v45  ;;  %2134 = vst.msk [vmem:[#allocation3 + $0x3f8] sm:$0xff] %vm257_vm0, %v7832_v10 }
 0x29a   : > { %2536 = vst.msk [vmem:[#allocation3 + $0x5a8] sm:$0xff] %vm1193_vm15, %v2405_v37  ;;  %3984 = vmatmul.mubr.f32.gmra.mxu0 %v3470_v41  ;;  %v7768_v2 = vld [vmem:[#allocation2 + $0x301] sm:$0xff] }
 0x29b   : > { %1813 = vrot.lane.b32.xlu1 %v2561_v62, %s5865_s17  ;;  %v1796_v63 = vpop.permute.xlu0 %1795  ;;  %2131 = vst.msk [vmem:[#allocation3 + $0x3b0] sm:$0xff] %vm257_vm0, %v7768_v2  ;;  %v7776_v31 = vld [vmem:[#allocation2 + $0x302] sm:$0xff]  ;;  %v2950_v62 = vld [vmem:[#allocation2 + $0x211] sm:$0xff] }
 0x29c   : > { %1976 = vst.msk [vmem:[#allocation3 + $0x120] sm:$0xff] %vm1963_vm2, %v1796_v63 }
 0x29d   : > { %v2790_v27 = vpop.permute.xlu1 %2789  ;;  %v3614_v23 = vld [vmem:[#allocation3 + $0x588] sm:$0xff]  ;;  %2330 = vrot.lane.b32.xlu0 %v7493_v4, %s5863_s28  ;;  %3411 = vst.msk [vmem:[#allocation3 + $0x3a0] sm:$0xff] %vm257_vm0, %v7776_v31 }
 0x29e   : > { %2921 = vst.msk [vmem:[#allocation3 + $0x5a8] sm:$0xff] %vm1578_vm1, %v2790_v27  ;;  %4224 = vmatmul.mubr.f32.gmra.mxu1 %v3614_v23  ;;  %v2567_v27 = vld [vmem:[#allocation2 + $0x220] sm:$0xff] }
 0x29f   : > { %2713 = vrot.lane.b32.xlu1 %v2563_v21, %s5864_s29  ;;  %v1892_v33 = vpop.permute.xlu0 %1891  ;;  %v3474_v20 = vld [vmem:[#allocation3 + $0x128] sm:$0xff] }
 0x2a0   : > { %3988 = vmatprep.mubr.f32.mxu0 %v3474_v20  ;;  %v7848_v23 = vld [vmem:[#allocation2 + $0x3a2] sm:$0xff] }
 0x2a1   : > { %v1507_v13 = vpop.permute.xlu1 %1506  ;;  %3099 = vrot.lane.b32.xlu0 %v2948_v48, %s5865_s17  ;;  %3419 = vst.msk [vmem:[#allocation3 + $0x460] sm:$0xff] %vm257_vm0, %v7848_v23 }
 0x2a2   : > { %1639 = vst.msk [vmem:[#allocation3 + $0x5a0] sm:$0xff] %vm1578_vm1, %v1507_v13 }
 0x2a3   : > { %1815 = vrot.lane.b32.xlu1 %v2562_v15, %s5865_s17  ;;  %2024 = vst.msk [vmem:[#allocation3 + $0x5a0] sm:$0xff] %vm1963_vm2, %v1892_v33  ;;  %v2407_v30 = vpop.permute.xlu0 %2406  ;;  %v3473_v52 = vld [vmem:[#allocation3 + $0x120] sm:$0xff]  ;;  %v2056_v33 = vld [vmem:[#allocation2 + $0x231] sm:$0xff] }
 0x2a4   : > { %2537 = vst.msk [vmem:[#allocation3 + $0x5c0] sm:$0xff] %vm1193_vm15, %v2407_v30  ;;  %3989 = vmatmul.mubr.f32.gmra.mxu0 %v3473_v52  ;;  %v7830_v15 = vld [vmem:[#allocation2 + $0x382] sm:$0xff] }
 0x2a5   : > { %v3174_v4 = vpop.permute.xlu1 %3173  ;;  %2332 = vrot.lane.b32.xlu0 %v2180_v57, %s5863_s28  ;;  %3417 = vst.msk [vmem:[#allocation3 + $0x430] sm:$0xff] %vm257_vm0, %v7830_v15  ;;  %2120 = vst.msk [vmem:[#allocation3 + $0x2a8] sm:$0xff] %vm257_vm0, %v2056_v33  ;;  %v7861_v52 = vld [vmem:[#allocation2 + $0x361] sm:$0xff] }
 0x2a6   : > { %3305 = vst.msk [vmem:[#allocation3 + $0x5a8] sm:$0xff] %vm1963_vm2, %v3174_v4  ;;  %v3357_v4 = vld [vmem:[#allocation2 + $0x3e2] sm:$0xff] }
 0x2a7   : > { %2715 = vrot.lane.b32.xlu1 %v2564_v8, %s5864_s29  ;;  %v2792_v19 = vpop.permute.xlu0 %2791  ;;  %v2952_v8 = vld [vmem:[#allocation2 + $0x231] sm:$0xff]  ;;  %3421 = vst.msk [vmem:[#allocation3 + $0x490] sm:$0xff] %vm257_vm0, %v3357_v4  ;;  %2135 = vst.msk [vmem:[#allocation3 + $0x410] sm:$0xff] %vm257_vm0, %v7861_v52 }
 0x2a8   : > { %2922 = vst.msk [vmem:[#allocation3 + $0x5c0] sm:$0xff] %vm1578_vm1, %v2792_v19 }
 0x2a9   : > { %v2311_v39 = vpop.permute.xlu1 %2310  ;;  %3101 = vrot.lane.b32.xlu0 %v7517_v25, %s5865_s17  ;;  %v7800_v25 = vld [vmem:[#allocation2 + $0x342] sm:$0xff] }
 0x2aa   : > { %2489 = vst.msk [vmem:[#allocation3 + $0x140] sm:$0xff] %vm1193_vm15, %v2311_v39  ;;  %v7785_v38 = vpop.f32.mrf.mxu0  ;;  %v3617_v49 = vld [vmem:[#allocation3 + $0x5a0] sm:$0xff]  ;;  %v3358_v39 = vld [vmem:[#allocation2 + $0x3f2] sm:$0xff] }
 0x2ab   : > { %1817 = vrot.lane.b32.xlu1 %v2563_v21, %s5865_s17  ;;  %v1509_v32 = vpop.permute.xlu0 %1508  ;;  %3413 = vst.msk [vmem:[#allocation3 + $0x3d0] sm:$0xff] %vm257_vm0, %v7800_v25  ;;  %3422 = vst.msk [vmem:[#allocation3 + $0x4a8] sm:$0xff] %vm257_vm0, %v3358_v39  ;;  %v2059_v39 = vld [vmem:[#allocation2 + $0x261] sm:$0xff] }
 0x2ac   : > { %v3932_v42 = vpop.f32.mrf.mxu0  ;;  %1640 = vst.msk [vmem:[#allocation3 + $0x5b8] sm:$0xff] %vm1578_vm1, %v1509_v32  ;;  %v2057_v32 = vld [vmem:[#allocation2 + $0x241] sm:$0xff] }
 0x2ad   : > { %v2696_v43 = vpop.permute.xlu1 %2695  ;;  %v3618_v51 = vld [vmem:[#allocation3 + $0x5a8] sm:$0xff]  ;;  %2334 = vrot.lane.b32.xlu0 %v7529_v50, %s5863_s28  ;;  %v2566_v50 = vld [vmem:[#allocation2 + $0x210] sm:$0xff]  ;;  %2121 = vst.msk [vmem:[#allocation3 + $0x2c0] sm:$0xff] %vm257_vm0, %v2057_v32  ;;  %2123 = vst.msk [vmem:[#allocation3 + $0x2f0] sm:$0xff] %vm257_vm0, %v2059_v39 }
 0x2ae   : > { %2874 = vst.msk [vmem:[#allocation3 + $0x140] sm:$0xff] %vm1578_vm1, %v2696_v43  ;;  %v7792_v29 = vpop.f32.mrf.mxu1  ;;  %4228 = vmatprep.mubr.f32.mxu1 %v3618_v51  ;;  %v3359_v42 = vld [vmem:[#allocation2 + $0x402] sm:$0xff] }
 0x2af   : > { %2717 = vrot.lane.b32.xlu1 %v2565_v35, %s5864_s29  ;;  %4229 = vmatmul.mubr.f32.gmra.mxu1 %v3617_v49  ;;  %v3176_v3 = vpop.permute.xlu0 %3175  ;;  %3423 = vst.msk [vmem:[#allocation3 + $0x4c0] sm:$0xff] %vm257_vm0, %v3359_v42  ;;  %v3360_v49 = vld [vmem:[#allocation2 + $0x412] sm:$0xff]  ;;  %v2955_v42 = vld [vmem:[#allocation2 + $0x261] sm:$0xff] }
 0x2b0   : > { %v4172_v44 = vpop.f32.mrf.mxu1  ;;  %3306 = vst.msk [vmem:[#allocation3 + $0x5c0] sm:$0xff] %vm1963_vm2, %v3176_v3  ;;  %v2571_v32 = vld [vmem:[#allocation2 + $0x260] sm:$0xff] }
 0x2b1   : > { %v3080_v0 = vpop.permute.xlu1 %3079  ;;  %3103 = vrot.lane.b32.xlu0 %v2950_v62, %s5865_s17  ;;  %3424 = vst.msk [vmem:[#allocation3 + $0x4d8] sm:$0xff] %vm257_vm0, %v3360_v49  ;;  %v2953_v44 = vld [vmem:[#allocation2 + $0x241] sm:$0xff]  ;;  %v3370_v49 = vld [vmem:[#allocation2 + $0x4d2] sm:$0xff] }
 0x2b2   : > { %3258 = vst.msk [vmem:[#allocation3 + $0x140] sm:$0xff] %vm1963_vm2, %v3080_v0  ;;  %v3362_v0 = vld [vmem:[#allocation2 + $0x432] sm:$0xff] }
 0x2b3   : > { %1819 = vrot.lane.b32.xlu1 %v1667_v34, %s5865_s17  ;;  %v2313_v5 = vpop.permute.xlu0 %2312  ;;  %v7879_v34 = vld [vmem:[#allocation2 + $0x371] sm:$0xff]  ;;  %3426 = vst.msk [vmem:[#allocation3 + $0x508] sm:$0xff] %vm257_vm0, %v3362_v0  ;;  %3434 = vst.msk [vmem:[#allocation3 + $0x5c8] sm:$0xff] %vm257_vm0, %v3370_v49 }
 0x2b4   : > { %2490 = vst.msk [vmem:[#allocation3 + $0x158] sm:$0xff] %vm1193_vm15, %v2313_v5  ;;  %v3363_v5 = vld [vmem:[#allocation2 + $0x442] sm:$0xff]  ;;  %v3372_v0 = vld [vmem:[#allocation2 + $0x4f2] sm:$0xff] }
 0x2b5   : > { %v1798_v36 = vpop.permute.xlu1 %1797  ;;  %2336 = vrot.lane.b32.xlu0 %v7542_v16, %s5863_s28  ;;  %v7839_v16 = vld [vmem:[#allocation2 + $0x392] sm:$0xff]  ;;  %2136 = vst.msk [vmem:[#allocation3 + $0x428] sm:$0xff] %vm257_vm0, %v7879_v34  ;;  %3427 = vst.msk [vmem:[#allocation3 + $0x520] sm:$0xff] %vm257_vm0, %v3363_v5 }
 0x2b6   : > { %1977 = vst.msk [vmem:[#allocation3 + $0x138] sm:$0xff] %vm1963_vm2, %v1798_v36  ;;  %v2569_v36 = vld [vmem:[#allocation2 + $0x240] sm:$0xff]  ;;  %v3451_v49 = vld [vmem:[#allocation3 + $0x70] sm:$0xff] }
 0x2b7   : > { %2719 = vrot.lane.b32.xlu1 %v2566_v50, %s5864_s29  ;;  %v2698_v41 = vpop.permute.xlu0 %2697  ;;  %v3621_v54 = vld [vmem:[#allocation3 + $0x5c0] sm:$0xff]  ;;  %3418 = vst.msk [vmem:[#allocation3 + $0x448] sm:$0xff] %vm257_vm0, %v7839_v16  ;;  %3436 = vst.msk [vmem:[#allocation3 + $0x5f8] sm:$0xff] %vm257_vm0, %v3372_v0 }
 0x2b8   : > { %2875 = vst.msk [vmem:[#allocation3 + $0x158] sm:$0xff] %vm1578_vm1, %v2698_v41  ;;  %4233 = vmatprep.mubr.f32.mxu1 %v3621_v54  ;;  %v2058_v41 = vld [vmem:[#allocation2 + $0x251] sm:$0xff] }
 0x2b9   : > { %v1894_v26 = vpop.permute.xlu1 %1893  ;;  %v3477_v6 = vld [vmem:[#allocation3 + $0x140] sm:$0xff]  ;;  %3105 = vrot.lane.b32.xlu0 %v2951_v28, %s5865_s17  ;;  %2122 = vst.msk [vmem:[#allocation3 + $0x2d8] sm:$0xff] %vm257_vm0, %v2058_v41 }
 0x2ba   : > { %2025 = vst.msk [vmem:[#allocation3 + $0x5b8] sm:$0xff] %vm1963_vm2, %v1894_v26  ;;  %v7837_v37 = vpop.f32.mrf.mxu0  ;;  %3993 = vmatprep.mubr.f32.mxu0 %v3477_v6  ;;  %v3364_v26 = vld [vmem:[#allocation2 + $0x452] sm:$0xff]  ;;  %v7940_v41 = vld [vmem:[#allocation2 + $0x3a1] sm:$0xff] }
 0x2bb   : > { %1821 = vrot.lane.b32.xlu1 %v2565_v35, %s5865_s17  ;;  %v3082_v48 = vpop.permute.xlu0 %3081  ;;  %3428 = vst.msk [vmem:[#allocation3 + $0x538] sm:$0xff] %vm257_vm0, %v3364_v26  ;;  %2139 = vst.msk [vmem:[#allocation3 + $0x470] sm:$0xff] %vm257_vm0, %v7940_v41 }
 0x2bc   : > { %v3937_v21 = vpop.f32.mrf.mxu0  ;;  %3259 = vst.msk [vmem:[#allocation3 + $0x158] sm:$0xff] %vm1963_vm2, %v3082_v48  ;;  %v7901_v48 = vld [vmem:[#allocation2 + $0x381] sm:$0xff] }
 0x2bd   : > { %v2409_v63 = vpop.permute.xlu1 %2408  ;;  %v3476_v55 = vld [vmem:[#allocation3 + $0x138] sm:$0xff]  ;;  %2338 = vrot.lane.b32.xlu0 %v7559_v1, %s5863_s28  ;;  %v2568_v1 = vld [vmem:[#allocation2 + $0x230] sm:$0xff]  ;;  %2137 = vst.msk [vmem:[#allocation3 + $0x440] sm:$0xff] %vm257_vm0, %v7901_v48 }
 0x2be   : > { %2538 = vst.msk [vmem:[#allocation3 + $0x5d8] sm:$0xff] %vm1193_vm15, %v2409_v63  ;;  %v7853_v13 = vpop.f32.mrf.mxu1  ;;  %3994 = vmatmul.mubr.f32.gmra.mxu0 %v3476_v55 }
 0x2bf   : > { %2721 = vrot.lane.b32.xlu1 %v2567_v27, %s5864_s29  ;;  %v1800_v19 = vpop.permute.xlu0 %1799 }
 0x2c0   : > { %v4177_v20 = vpop.f32.mrf.mxu1  ;;  %1978 = vst.msk [vmem:[#allocation3 + $0x150] sm:$0xff] %vm1963_vm2, %v1800_v19  ;;  %v3369_v19 = vld [vmem:[#allocation2 + $0x4c2] sm:$0xff] }
 0x2c1   : > { %v2794_v57 = vpop.permute.xlu1 %2793  ;;  %v3620_v30 = vld [vmem:[#allocation3 + $0x5b8] sm:$0xff]  ;;  %3107 = vrot.lane.b32.xlu0 %v2952_v8, %s5865_s17  ;;  %v3367_v8 = vld [vmem:[#allocation2 + $0x4a2] sm:$0xff]  ;;  %3433 = vst.msk [vmem:[#allocation3 + $0x5b0] sm:$0xff] %vm257_vm0, %v3369_v19 }
 0x2c2   : > { %2923 = vst.msk [vmem:[#allocation3 + $0x5d8] sm:$0xff] %vm1578_vm1, %v2794_v57  ;;  %4234 = vmatmul.mubr.f32.gmra.mxu1 %v3620_v30  ;;  %v3366_v20 = vld [vmem:[#allocation2 + $0x492] sm:$0xff] }
 0x2c3   : > { %1823 = vrot.lane.b32.xlu1 %v2566_v50, %s5865_s17  ;;  %v1896_v43 = vpop.permute.xlu0 %1895  ;;  %v3480_v51 = vld [vmem:[#allocation3 + $0x158] sm:$0xff]  ;;  %3430 = vst.msk [vmem:[#allocation3 + $0x568] sm:$0xff] %vm257_vm0, %v3366_v20  ;;  %3431 = vst.msk [vmem:[#allocation3 + $0x580] sm:$0xff] %vm257_vm0, %v3367_v8  ;;  %v2061_v20 = vld [vmem:[#allocation2 + $0x2a1] sm:$0xff] }
 0x2c4   : > { %3998 = vmatprep.mubr.f32.mxu0 %v3480_v51  ;;  %v3368_v57 = vld [vmem:[#allocation2 + $0x4b2] sm:$0xff]  ;;  %2125 = vst.msk [vmem:[#allocation3 + $0x320] sm:$0xff] %vm257_vm0, %v2061_v20  ;;  %v3445_v8 = vld [vmem:[#allocation3 + $0x40] sm:$0xff] }
 0x2c5   : > { %v1511_v35 = vpop.permute.xlu1 %1510  ;;  %2340 = vrot.lane.b32.xlu0 %v7579_v60, %s5863_s28  ;;  %3432 = vst.msk [vmem:[#allocation3 + $0x598] sm:$0xff] %vm257_vm0, %v3368_v57  ;;  %v3448_v19 = vld [vmem:[#allocation3 + $0x58] sm:$0xff]  ;;  %v2959_v20 = vld [vmem:[#allocation2 + $0x2c1] sm:$0xff] }
 0x2c6   : > { %1641 = vst.msk [vmem:[#allocation3 + $0x5d0] sm:$0xff] %vm1578_vm1, %v1511_v35  ;;  %v7919_v35 = vld [vmem:[#allocation2 + $0x391] sm:$0xff] }
 0x2c7   : > { %2723 = vrot.lane.b32.xlu1 %v2568_v1, %s5864_s29  ;;  %2026 = vst.msk [vmem:[#allocation3 + $0x5d0] sm:$0xff] %vm1963_vm2, %v1896_v43  ;;  %v3479_v3 = vld [vmem:[#allocation3 + $0x150] sm:$0xff]  ;;  %v2411_v50 = vpop.permute.xlu0 %2410 }
 0x2c8   : > { %3999 = vmatmul.mubr.f32.gmra.mxu0 %v3479_v3  ;;  %2539 = vst.msk [vmem:[#allocation3 + $0x5f0] sm:$0xff] %vm1193_vm15, %v2411_v50 }
 0x2c9   : > { %v3178_v24 = vpop.permute.xlu1 %3177  ;;  %3109 = vrot.lane.b32.xlu0 %v2953_v44, %s5865_s17  ;;  %2138 = vst.msk [vmem:[#allocation3 + $0x458] sm:$0xff] %vm257_vm0, %v7919_v35 }
 0x2ca   : > { %3307 = vst.msk [vmem:[#allocation3 + $0x5d8] sm:$0xff] %vm1963_vm2, %v3178_v24  ;;  %v7883_v62 = vpop.f32.mrf.mxu0 }
 0x2cb   : > { %1825 = vrot.lane.b32.xlu1 %v2567_v27, %s5865_s17  ;;  %v2796_v28 = vpop.permute.xlu0 %2795  ;;  %v3365_v27 = vld [vmem:[#allocation2 + $0x482] sm:$0xff] }
 0x2cc   : > { %v3942_v60 = vpop.f32.mrf.mxu0  ;;  %2924 = vst.msk [vmem:[#allocation3 + $0x5f0] sm:$0xff] %vm1578_vm1, %v2796_v28  ;;  %v2956_v28 = vld [vmem:[#allocation2 + $0x271] sm:$0xff] }
 0x2cd   : > { %v2315_v45 = vpop.permute.xlu1 %2314  ;;  %2342 = vrot.lane.b32.xlu0 %v7595_v11, %s5863_s28  ;;  %3429 = vst.msk [vmem:[#allocation3 + $0x550] sm:$0xff] %vm257_vm0, %v3365_v27  ;;  %v2570_v11 = vld [vmem:[#allocation2 + $0x250] sm:$0xff] }
 0x2ce   : > { %2491 = vst.msk [vmem:[#allocation3 + $0x170] sm:$0xff] %vm1193_vm15, %v2315_v45  ;;  %v7893_v6 = vpop.f32.mrf.mxu1  ;;  %v3623_v21 = vld [vmem:[#allocation3 + $0x5d0] sm:$0xff] }
 0x2cf   : > { %2725 = vrot.lane.b32.xlu1 %v2569_v36, %s5864_s29  ;;  %v1513_v33 = vpop.permute.xlu0 %1512 }
 0x2d0   : > { %v4182_v54 = vpop.f32.mrf.mxu1  ;;  %1642 = vst.msk [vmem:[#allocation3 + $0x5e8] sm:$0xff] %vm1578_vm1, %v1513_v33  ;;  %v3442_v33 = vld [vmem:[#allocation3 + $0x28] sm:$0xff] }
 0x2d1   : > { %v2700_v63 = vpop.permute.xlu1 %2699  ;;  %v3624_v55 = vld [vmem:[#allocation3 + $0x5d8] sm:$0xff]  ;;  %3111 = vrot.lane.b32.xlu0 %v2954_v56, %s5865_s17 }
 0x2d2   : > { %2876 = vst.msk [vmem:[#allocation3 + $0x170] sm:$0xff] %vm1578_vm1, %v2700_v63  ;;  %4238 = vmatprep.mubr.f32.mxu1 %v3624_v55  ;;  %v2188_v55 = vld [vmem:[#allocation2 + $0x292] sm:$0xff] }
 0x2d3   : > { %1827 = vrot.lane.b32.xlu1 %v2568_v1, %s5865_s17  ;;  %4239 = vmatmul.mubr.f32.gmra.mxu1 %v3623_v21  ;;  %v3180_v30 = vpop.permute.xlu0 %3179  ;;  %v3439_v21 = vld [vmem:[#allocation3 + $0x10] sm:$0xff] }
 0x2d4   : > { %3308 = vst.msk [vmem:[#allocation3 + $0x5f0] sm:$0xff] %vm1963_vm2, %v3180_v30 }
 0x2d5   : > { %v3084_v4 = vpop.permute.xlu1 %3083  ;;  %2344 = vrot.lane.b32.xlu0 %v7611_v59, %s5863_s28 }
 0x2d6   : > { %3260 = vst.msk [vmem:[#allocation3 + $0x170] sm:$0xff] %vm1963_vm2, %v3084_v4  ;;  %v2957_v4 = vld [vmem:[#allocation2 + $0x2a1] sm:$0xff] }
 0x2d7   : > { %2727 = vrot.lane.b32.xlu1 %v2570_v11, %s5864_s29  ;;  %v2317_v51 = vpop.permute.xlu0 %2316 }
 0x2d8   : > { %2492 = vst.msk [vmem:[#allocation3 + $0x188] sm:$0xff] %vm1193_vm15, %v2317_v51 }
 0x2d9   : > { %v1802_v1 = vpop.permute.xlu1 %1801  ;;  %3113 = vrot.lane.b32.xlu0 %v2955_v42, %s5865_s17  ;;  %v2573_v42 = vld [vmem:[#allocation2 + $0x2a0] sm:$0xff] }
 0x2da   : > { %1979 = vst.msk [vmem:[#allocation3 + $0x168] sm:$0xff] %vm1963_vm2, %v1802_v1  ;;  %v7923_v43 = vpop.f32.mrf.mxu0 }
 0x2db   : > { %1829 = vrot.lane.b32.xlu1 %v2569_v36, %s5865_s17  ;;  %v3086_v50 = vpop.permute.xlu0 %3085  ;;  %v3627_v60 = vld [vmem:[#allocation3 + $0x5f0] sm:$0xff] }
 0x2dc   : > { %v3947_v59 = vpop.f32.mrf.mxu0  ;;  %4243 = vmatprep.mubr.f32.mxu1 %v3627_v60  ;;  %v2060_v36 = vld [vmem:[#allocation2 + $0x291] sm:$0xff] }
 0x2dd   : > { %v1898_v24 = vpop.permute.xlu1 %1897  ;;  %v3483_v44 = vld [vmem:[#allocation3 + $0x170] sm:$0xff]  ;;  %2346 = vrot.lane.b32.xlu0 %v7636_v22, %s5863_s28  ;;  %2124 = vst.msk [vmem:[#allocation3 + $0x308] sm:$0xff] %vm257_vm0, %v2060_v36  ;;  %v3457_v36 = vld [vmem:[#allocation3 + $0xa0] sm:$0xff] }
 0x2de   : > { %2027 = vst.msk [vmem:[#allocation3 + $0x5e8] sm:$0xff] %vm1963_vm2, %v1898_v24  ;;  %v7933_v3 = vpop.f32.mrf.mxu1  ;;  %4003 = vmatprep.mubr.f32.mxu0 %v3483_v44  ;;  %v2572_v22 = vld [vmem:[#allocation2 + $0x270] sm:$0xff]  ;;  %v3454_v24 = vld [vmem:[#allocation3 + $0x88] sm:$0xff] }
 0x2df   : > { %2729 = vrot.lane.b32.xlu1 %v2571_v32, %s5864_s29  ;;  %v2319_v54 = vpop.permute.xlu0 %2318  ;;  %v2062_v44 = vld [vmem:[#allocation2 + $0x2b1] sm:$0xff] }
 0x2e0   : > { %v4187_v5 = vpop.f32.mrf.mxu1  ;;  %2493 = vst.msk [vmem:[#allocation3 + $0x1a0] sm:$0xff] %vm1193_vm15, %v2319_v54  ;;  %v3463_v54 = vld [vmem:[#allocation3 + $0xd0] sm:$0xff] }
 0x2e1   : > { %v2702_v45 = vpop.permute.xlu1 %2701  ;;  %v3482_v26 = vld [vmem:[#allocation3 + $0x168] sm:$0xff]  ;;  %3115 = vrot.lane.b32.xlu0 %v2956_v28, %s5865_s17  ;;  %2126 = vst.msk [vmem:[#allocation3 + $0x338] sm:$0xff] %vm257_vm0, %v2062_v44  ;;  %v2958_v5 = vld [vmem:[#allocation2 + $0x2b1] sm:$0xff] }
 0x2e2   : > { %2877 = vst.msk [vmem:[#allocation3 + $0x188] sm:$0xff] %vm1578_vm1, %v2702_v45  ;;  %4004 = vmatmul.mubr.f32.gmra.mxu0 %v3482_v26  ;;  %v3460_v28 = vld [vmem:[#allocation3 + $0xb8] sm:$0xff] }
 0x2e3   : > { %1831 = vrot.lane.b32.xlu1 %v2570_v11, %s5865_s17  ;;  %3261 = vst.msk [vmem:[#allocation3 + $0x188] sm:$0xff] %vm1963_vm2, %v3086_v50  ;;  %v3088_v56 = vpop.permute.xlu0 %3087  ;;  %v1675_v50 = vld [vmem:[#allocation2 + $0x290] sm:$0xff] }
 0x2e5   : > { %v1804_v27 = vpop.permute.xlu1 %1803  ;;  %v3626_v63 = vld [vmem:[#allocation3 + $0x5e8] sm:$0xff]  ;;  %2348 = vrot.lane.b32.xlu0 %v2188_v55, %s5863_s28 }
 0x2e6   : > { %1980 = vst.msk [vmem:[#allocation3 + $0x180] sm:$0xff] %vm1963_vm2, %v1804_v27  ;;  %4244 = vmatmul.mubr.f32.gmra.mxu1 %v3626_v63  ;;  %v2063_v63 = vld [vmem:[#allocation2 + $0x2c1] sm:$0xff] }
 0x2e7   : > { %2731 = vrot.lane.b32.xlu1 %v2572_v22, %s5864_s29  ;;  %5672 = vmatprep.mubr.msk.f32.mxu1 %vm257_vm0, %v3439_v21  ;;  %v2321_v39 = vpop.permute.xlu0 %2320  ;;  %v3466_v55 = vld [vmem:[#allocation3 + $0xe8] sm:$0xff]  ;;  %2127 = vst.msk [vmem:[#allocation3 + $0x350] sm:$0xff] %vm257_vm0, %v2063_v63 }
 0x2e8   : > { %2494 = vst.msk [vmem:[#allocation3 + $0x1b8] sm:$0xff] %vm1193_vm15, %v2321_v39  ;;  %v2575_v39 = vld [vmem:[#allocation2 + $0x2c0] sm:$0xff] }
 0x2e9   : > { %v2704_v11 = vpop.permute.xlu1 %2703  ;;  %3117 = vrot.lane.b32.xlu0 %v2957_v4, %s5865_s17  ;;  %v2961_v63 = vld [vmem:[#allocation2 + $0x2e1] sm:$0xff] }
 0x2ea   : > { %2878 = vst.msk [vmem:[#allocation3 + $0x1a0] sm:$0xff] %vm1578_vm1, %v2704_v11  ;;  %v7955_v57 = vpop.f32.mrf.mxu0  ;;  %5673 = vmatmul.mubr.msk.f32.vlgmr.msra.gmra.mxu1 %vm257_vm0, %v3442_v33  ;;  %v3486_v30 = vld [vmem:[#allocation3 + $0x188] sm:$0xff]  ;;  %v3469_v33 = vld [vmem:[#allocation3 + $0x100] sm:$0xff] }
 0x2eb   : > { %1833 = vrot.lane.b32.xlu1 %v2571_v32, %s5865_s17  ;;  %3262 = vst.msk [vmem:[#allocation3 + $0x1a0] sm:$0xff] %vm1963_vm2, %v3088_v56  ;;  %4008 = vmatprep.mubr.f32.mxu0 %v3486_v30  ;;  %v3090_v32 = vpop.permute.xlu0 %3089  ;;  %v3472_v30 = vld [vmem:[#allocation3 + $0x118] sm:$0xff] }
 0x2ec   : > { %v3952_v1 = vpop.f32.mrf.mxu0  ;;  %5675 = vmatprep.mubr.msk.f32.mxu1 %vm257_vm0, %v3445_v8 }
 0x2ed   : > { %v1806_v51 = vpop.permute.xlu1 %1805  ;;  %v3485_v59 = vld [vmem:[#allocation3 + $0x180] sm:$0xff]  ;;  %2350 = vrot.lane.b32.xlu0 %v7671_v46, %s5863_s28  ;;  %v2574_v46 = vld [vmem:[#allocation2 + $0x2b0] sm:$0xff] }
 0x2ee   : > { %1981 = vst.msk [vmem:[#allocation3 + $0x198] sm:$0xff] %vm1963_vm2, %v1806_v51  ;;  %v7964_v9 = vpop.f32.mrf.mxu1  ;;  %4009 = vmatmul.mubr.f32.gmra.mxu0 %v3485_v59  ;;  %5676 = vmatmul.mubr.msk.f32.gmra.mxu1 %vm257_vm0, %v3448_v19  ;;  %v3475_v19 = vld [vmem:[#allocation3 + $0x130] sm:$0xff]  ;;  %v3478_v59 = vld [vmem:[#allocation3 + $0x148] sm:$0xff] }
 0x2ef   : > { %2733 = vrot.lane.b32.xlu1 %v2573_v42, %s5864_s29  ;;  %5678 = vmatprep.mubr.msk.f32.mxu1 %vm257_vm0, %v3451_v49  ;;  %v2323_v26 = vpop.permute.xlu0 %2322 }
 0x2f0   : > { %v4192_v0 = vpop.f32.mrf.mxu1  ;;  %2495 = vst.msk [vmem:[#allocation3 + $0x1d0] sm:$0xff] %vm1193_vm15, %v2323_v26 }
 0x2f1   : > { %v2706_v60 = vpop.permute.xlu1 %2705  ;;  %3119 = vrot.lane.b32.xlu0 %v2958_v5, %s5865_s17  ;;  %v3481_v0 = vld [vmem:[#allocation3 + $0x160] sm:$0xff]  ;;  %v3484_v5 = vld [vmem:[#allocation3 + $0x178] sm:$0xff] }
 0x2f2   : > { %2879 = vst.msk [vmem:[#allocation3 + $0x1b8] sm:$0xff] %vm1578_vm1, %v2706_v60  ;;  %5679 = vmatmul.mubr.msk.f32.gmra.mxu1 %vm257_vm0, %v3454_v24  ;;  %v3489_v45 = vld [vmem:[#allocation3 + $0x1a0] sm:$0xff] }
 0x2f3   : > { %1835 = vrot.lane.b32.xlu1 %v1675_v50, %s5865_s17  ;;  %3263 = vst.msk [vmem:[#allocation3 + $0x1b8] sm:$0xff] %vm1963_vm2, %v3090_v32  ;;  %4013 = vmatprep.mubr.f32.mxu0 %v3489_v45  ;;  %v3092_v27 = vpop.permute.xlu0 %3091  ;;  %v2064_v32 = vld [vmem:[#allocation2 + $0x2d1] sm:$0xff] }
 0x2f4   : > { %5681 = vmatprep.mubr.msk.f32.mxu1 %vm257_vm0, %v3457_v36  ;;  %2128 = vst.msk [vmem:[#allocation3 + $0x368] sm:$0xff] %vm257_vm0, %v2064_v32  ;;  %v2960_v50 = vld [vmem:[#allocation2 + $0x2d1] sm:$0xff] }
 0x2f5   : > { %v1808_v22 = vpop.permute.xlu1 %1807  ;;  %v3488_v21 = vld [vmem:[#allocation3 + $0x198] sm:$0xff]  ;;  %2352 = vrot.lane.b32.xlu0 %v7689_v58, %s5863_s28  ;;  %v3487_v45 = vld [vmem:[#allocation3 + $0x190] sm:$0xff] }
 0x2f6   : > { %1982 = vst.msk [vmem:[#allocation3 + $0x1b0] sm:$0xff] %vm1963_vm2, %v1808_v22  ;;  %4014 = vmatmul.mubr.f32.gmra.mxu0 %v3488_v21  ;;  %5682 = vmatmul.mubr.msk.f32.gmra.mxu1 %vm257_vm0, %v3460_v28  ;;  %v3490_v22 = vld [vmem:[#allocation3 + $0x1a8] sm:$0xff] }
 0x2f7   : > { %2735 = vrot.lane.b32.xlu1 %v2574_v46, %s5864_s29  ;;  %5684 = vmatprep.mubr.msk.f32.mxu1 %vm257_vm0, %v3463_v54  ;;  %v2325_v4 = vpop.permute.xlu0 %2324  ;;  %v2065_v54 = vld [vmem:[#allocation2 + $0x2e1] sm:$0xff] }
 0x2f8   : > { %2496 = vst.msk [vmem:[#allocation3 + $0x1e8] sm:$0xff] %vm1193_vm15, %v2325_v4  ;;  %v3499_v4 = vld [vmem:[#allocation3 + $0x1f0] sm:$0xff] }
 0x2f9   : > { %v2708_v56 = vpop.permute.xlu1 %2707  ;;  %3121 = vrot.lane.b32.xlu0 %v2959_v20, %s5865_s17  ;;  %2129 = vst.msk [vmem:[#allocation3 + $0x380] sm:$0xff] %vm257_vm0, %v2065_v54  ;;  %v3496_v20 = vld [vmem:[#allocation3 + $0x1d8] sm:$0xff] }
 0x2fa   : > { %2880 = vst.msk [vmem:[#allocation3 + $0x1d0] sm:$0xff] %vm1578_vm1, %v2708_v56  ;;  %v7987_v11 = vpop.f32.mrf.mxu0  ;;  %5685 = vmatmul.mubr.msk.f32.gmra.mxu1 %vm257_vm0, %v3466_v55  ;;  %v3492_v8 = vld [vmem:[#allocation3 + $0x1b8] sm:$0xff] }
 0x2fb   : > { %1837 = vrot.lane.b32.xlu1 %v2573_v42, %s5865_s17  ;;  %3264 = vst.msk [vmem:[#allocation3 + $0x1d0] sm:$0xff] %vm1963_vm2, %v3092_v27  ;;  %4018 = vmatprep.mubr.f32.mxu0 %v3492_v8  ;;  %v3094_v42 = vpop.permute.xlu0 %3093  ;;  %v3493_v27 = vld [vmem:[#allocation3 + $0x1c0] sm:$0xff] }
 0x2fc   : > { %v3957_v58 = vpop.f32.mrf.mxu0  ;;  %5687 = vmatprep.mubr.msk.f32.mxu1 %vm257_vm0, %v3469_v33  ;;  %v2577_v8 = vld [vmem:[#allocation2 + $0x2e0] sm:$0xff] }
 0x2fd   : > { %v1810_v1 = vpop.permute.xlu1 %1809  ;;  %v3491_v49 = vld [vmem:[#allocation3 + $0x1b0] sm:$0xff]  ;;  %2354 = vrot.lane.b32.xlu0 %v7706_v61, %s5863_s28 }
 0x2fe   : > { %1983 = vst.msk [vmem:[#allocation3 + $0x1c8] sm:$0xff] %vm1963_vm2, %v1810_v1  ;;  %v7996_v51 = vpop.f32.mrf.mxu1  ;;  %4019 = vmatmul.mubr.f32.gmra.mxu0 %v3491_v49  ;;  %5688 = vmatmul.mubr.msk.f32.gmra.mxu1 %vm257_vm0, %v3472_v30  ;;  %v2576_v61 = vld [vmem:[#allocation2 + $0x2d0] sm:$0xff]  ;;  %v3502_v1 = vld [vmem:[#allocation3 + $0x208] sm:$0xff] }
 0x2ff   : > { %2737 = vrot.lane.b32.xlu1 %v2575_v39, %s5864_s29  ;;  %5690 = vmatprep.mubr.msk.f32.mxu1 %vm257_vm0, %v3475_v19  ;;  %v2327_v36 = vpop.permute.xlu0 %2326 }
 0x300   : > { %v4197_v24 = vpop.f32.mrf.mxu1  ;;  %2497 = vst.msk [vmem:[#allocation3 + $0x200] sm:$0xff] %vm1193_vm15, %v2327_v36 }
 0x301   : > { %v2710_v44 = vpop.permute.xlu1 %2709  ;;  %3123 = vrot.lane.b32.xlu0 %v2960_v50, %s5865_s17 }
 0x302   : > { %2881 = vst.msk [vmem:[#allocation3 + $0x1e8] sm:$0xff] %vm1578_vm1, %v2710_v44  ;;  %5691 = vmatmul.mubr.msk.f32.gmra.mxu1 %vm257_vm0, %v3478_v59  ;;  %v3495_v60 = vld [vmem:[#allocation3 + $0x1d0] sm:$0xff]  ;;  %v3505_v59 = vld [vmem:[#allocation3 + $0x220] sm:$0xff]  ;;  %v3508_v44 = vld [vmem:[#allocation3 + $0x238] sm:$0xff] }
 0x303   : > { %1839 = vrot.lane.b32.xlu1 %v2574_v46, %s5865_s17  ;;  %3265 = vst.msk [vmem:[#allocation3 + $0x1e8] sm:$0xff] %vm1963_vm2, %v3094_v42  ;;  %4023 = vmatprep.mubr.f32.mxu0 %v3495_v60  ;;  %v3096_v46 = vpop.permute.xlu0 %3095 }
 0x304   : > { %5693 = vmatprep.mubr.msk.f32.mxu1 %vm257_vm0, %v3481_v0  ;;  %v2578_v0 = vld [vmem:[#allocation2 + $0x2f0] sm:$0xff] }
 0x305   : > { %v1812_v26 = vpop.permute.xlu1 %1811  ;;  %v3494_v28 = vld [vmem:[#allocation3 + $0x1c8] sm:$0xff]  ;;  %2356 = vrot.lane.b32.xlu0 %v7720_v47, %s5863_s28 }
 0x306   : > { %1984 = vst.msk [vmem:[#allocation3 + $0x1e0] sm:$0xff] %vm1963_vm2, %v1812_v26  ;;  %4024 = vmatmul.mubr.f32.gmra.mxu0 %v3494_v28  ;;  %5694 = vmatmul.mubr.msk.f32.gmra.mxu1 %vm257_vm0, %v3484_v5  ;;  %v3514_v5 = vld [vmem:[#allocation3 + $0x268] sm:$0xff] }
 0x307   : > { %2739 = vrot.lane.b32.xlu1 %v2576_v61, %s5864_s29  ;;  %5696 = vmatprep.mubr.msk.f32.mxu1 %vm257_vm0, %v3487_v45  ;;  %v2329_v33 = vpop.permute.xlu0 %2328  ;;  %v3517_v45 = vld [vmem:[#allocation3 + $0x280] sm:$0xff] }
 0x308   : > { %2498 = vst.msk [vmem:[#allocation3 + $0x218] sm:$0xff] %vm1193_vm15, %v2329_v33  ;;  %v2068_v33 = vld [vmem:[#allocation2 + $0x331] sm:$0xff] }
 0x309   : > { %v2712_v21 = vpop.permute.xlu1 %2711  ;;  %3125 = vrot.lane.b32.xlu0 %v2961_v63, %s5865_s17  ;;  %2132 = vst.msk [vmem:[#allocation3 + $0x3c8] sm:$0xff] %vm257_vm0, %v2068_v33 }
 0x30a   : > { %2882 = vst.msk [vmem:[#allocation3 + $0x200] sm:$0xff] %vm1578_vm1, %v2712_v21  ;;  %v8019_v55 = vpop.f32.mrf.mxu0  ;;  %5697 = vmatmul.mubr.msk.f32.gmra.mxu1 %vm257_vm0, %v3490_v22  ;;  %v3498_v56 = vld [vmem:[#allocation3 + $0x1e8] sm:$0xff]  ;;  %v3523_v22 = vld [vmem:[#allocation3 + $0x2b0] sm:$0xff] }
 0x30b   : > { %1841 = vrot.lane.b32.xlu1 %v2575_v39, %s5865_s17  ;;  %3266 = vst.msk [vmem:[#allocation3 + $0x200] sm:$0xff] %vm1963_vm2, %v3096_v46  ;;  %4028 = vmatprep.mubr.f32.mxu0 %v3498_v56  ;;  %v3098_v39 = vpop.permute.xlu0 %3097  ;;  %v3520_v46 = vld [vmem:[#allocation3 + $0x298] sm:$0xff] }
 0x30c   : > { %v3962_v47 = vpop.f32.mrf.mxu0  ;;  %5699 = vmatprep.mubr.msk.f32.mxu1 %vm257_vm0, %v3493_v27 }
 0x30d   : > { %v1814_v30 = vpop.permute.xlu1 %1813  ;;  %v3497_v58 = vld [vmem:[#allocation3 + $0x1e0] sm:$0xff]  ;;  %2358 = vrot.lane.b32.xlu0 %v7736_v40, %s5863_s28  ;;  %v3511_v40 = vld [vmem:[#allocation3 + $0x250] sm:$0xff] }
 0x30e   : > { %1985 = vst.msk [vmem:[#allocation3 + $0x1f8] sm:$0xff] %vm1963_vm2, %v1814_v30  ;;  %v8028_v19 = vpop.f32.mrf.mxu1  ;;  %4029 = vmatmul.mubr.f32.gmra.mxu0 %v3497_v58  ;;  %5700 = vmatmul.mubr.msk.f32.gmra.mxu1 %vm257_vm0, %v3496_v20  ;;  %v3526_v20 = vld [vmem:[#allocation3 + $0x2c8] sm:$0xff] }
 0x30f   : > { %9005 = vst [vmem:[#allocation4_spill] sm:$0xff] %v8028_v19  ;;  %2741 = vrot.lane.b32.xlu1 %v2577_v8, %s5864_s29  ;;  %5702 = vmatprep.mubr.msk.f32.mxu1 %vm257_vm0, %v3499_v4  ;;  %v2331_v24 = vpop.permute.xlu0 %2330  ;;  %v2964_v4 = vld [vmem:[#allocation2 + $0x311] sm:$0xff] }
 0x310   : > { %v4202_v49 = vpop.f32.mrf.mxu1  ;;  %2499 = vst.msk [vmem:[#allocation3 + $0x230] sm:$0xff] %vm1193_vm15, %v2331_v24  ;;  %v3538_v24 = vld [vmem:[#allocation3 + $0x328] sm:$0xff] }
 0x311   : > { %v2714_v42 = vpop.permute.xlu1 %2713  ;;  %3127 = vrot.lane.b32.xlu0 %v7748_v14, %s5865_s17 }
 0x312   : > { %2883 = vst.msk [vmem:[#allocation3 + $0x218] sm:$0xff] %vm1578_vm1, %v2714_v42  ;;  %5703 = vmatmul.mubr.msk.f32.gmra.mxu1 %vm257_vm0, %v3502_v1  ;;  %v3501_v32 = vld [vmem:[#allocation3 + $0x200] sm:$0xff]  ;;  %v3535_v1 = vld [vmem:[#allocation3 + $0x310] sm:$0xff] }
 0x313   : > { %1843 = vrot.lane.b32.xlu1 %v2576_v61, %s5865_s17  ;;  %3267 = vst.msk [vmem:[#allocation3 + $0x218] sm:$0xff] %vm1963_vm2, %v3098_v39  ;;  %4033 = vmatprep.mubr.f32.mxu0 %v3501_v32  ;;  %v3100_v36 = vpop.permute.xlu0 %3099  ;;  %v3532_v39 = vld [vmem:[#allocation3 + $0x2f8] sm:$0xff] }
 0x314   : > { %5705 = vmatprep.mubr.msk.f32.mxu1 %vm257_vm0, %v3505_v59  ;;  %v2196_v59 = vld [vmem:[#allocation2 + $0x332] sm:$0xff] }
 0x315   : > { %v1816_v50 = vpop.permute.xlu1 %1815  ;;  %v3500_v60 = vld [vmem:[#allocation3 + $0x1f8] sm:$0xff]  ;;  %2360 = vrot.lane.b32.xlu0 %v7757_v53, %s5863_s28  ;;  %v2579_v53 = vld [vmem:[#allocation2 + $0x300] sm:$0xff] }
 0x316   : > { %1986 = vst.msk [vmem:[#allocation3 + $0x210] sm:$0xff] %vm1963_vm2, %v1816_v50  ;;  %4034 = vmatmul.mubr.f32.gmra.mxu0 %v3500_v60  ;;  %5706 = vmatmul.mubr.msk.f32.gmra.mxu1 %vm257_vm0, %v3508_v44 }
 0x317   : > { %2743 = vrot.lane.b32.xlu1 %v2578_v0, %s5864_s29  ;;  %5708 = vmatprep.mubr.msk.f32.mxu1 %vm257_vm0, %v3511_v40  ;;  %v2333_v28 = vpop.permute.xlu0 %2332 }
 0x318   : > { %2500 = vst.msk [vmem:[#allocation3 + $0x248] sm:$0xff] %vm1193_vm15, %v2333_v28 }
 0x319   : > { %v2716_v61 = vpop.permute.xlu1 %2715  ;;  %3129 = vrot.lane.b32.xlu0 %v7768_v2, %s5865_s17 }
 0x31a   : > { %2884 = vst.msk [vmem:[#allocation3 + $0x230] sm:$0xff] %vm1578_vm1, %v2716_v61  ;;  %v8050_v14 = vpop.f32.mrf.mxu0  ;;  %5709 = vmatmul.mubr.msk.f32.gmra.mxu1 %vm257_vm0, %v3514_v5  ;;  %v3504_v26 = vld [vmem:[#allocation3 + $0x218] sm:$0xff]  ;;  %v2581_v61 = vld [vmem:[#allocation2 + $0x340] sm:$0xff] }
 0x31b   : > { %1845 = vrot.lane.b32.xlu1 %v2577_v8, %s5865_s17  ;;  %3268 = vst.msk [vmem:[#allocation3 + $0x230] sm:$0xff] %vm1963_vm2, %v3100_v36  ;;  %4038 = vmatprep.mubr.f32.mxu0 %v3504_v26  ;;  %v3102_v56 = vpop.permute.xlu0 %3101  ;;  %v3529_v8 = vld [vmem:[#allocation3 + $0x2e0] sm:$0xff]  ;;  %v3544_v36 = vld [vmem:[#allocation3 + $0x358] sm:$0xff] }
 0x31c   : > { %v3967_v54 = vpop.f32.mrf.mxu0  ;;  %5711 = vmatprep.mubr.msk.f32.mxu1 %vm257_vm0, %v3517_v45  ;;  %v3547_v45 = vld [vmem:[#allocation3 + $0x370] sm:$0xff] }
 0x31d   : > { %v1818_v21 = vpop.permute.xlu1 %1817  ;;  %v3503_v27 = vld [vmem:[#allocation3 + $0x210] sm:$0xff]  ;;  %2362 = vrot.lane.b32.xlu0 %v7776_v31, %s5863_s28 }
 0x31e   : > { %1987 = vst.msk [vmem:[#allocation3 + $0x228] sm:$0xff] %vm1963_vm2, %v1818_v21  ;;  %v8060_v63 = vpop.f32.mrf.mxu1  ;;  %4039 = vmatmul.mubr.f32.gmra.mxu0 %v3503_v27  ;;  %5712 = vmatmul.mubr.msk.f32.gmra.mxu1 %vm257_vm0, %v3520_v46  ;;  %v2580_v31 = vld [vmem:[#allocation2 + $0x310] sm:$0xff]  ;;  %v3553_v27 = vld [vmem:[#allocation3 + $0x3a0] sm:$0xff] }
 0x31f   : > { %9006 = vst [vmem:[#allocation5_spill] sm:$0xff] %v8060_v63  ;;  %2745 = vrot.lane.b32.xlu1 %v2579_v53, %s5864_s29  ;;  %5714 = vmatprep.mubr.msk.f32.mxu1 %vm257_vm0, %v3523_v22  ;;  %v2335_v58 = vpop.permute.xlu0 %2334  ;;  %v1683_v21 = vld [vmem:[#allocation2 + $0x330] sm:$0xff] }
 0x320   : > { %v4207_v47 = vpop.f32.mrf.mxu1  ;;  %2501 = vst.msk [vmem:[#allocation3 + $0x260] sm:$0xff] %vm1193_vm15, %v2335_v58 }
 0x321   : > { %v2718_v2 = vpop.permute.xlu1 %2717  ;;  %3131 = vrot.lane.b32.xlu0 %v2964_v4, %s5865_s17  ;;  %v2582_v47 = vld [vmem:[#allocation2 + $0x350] sm:$0xff] }
 0x322   : > { %2885 = vst.msk [vmem:[#allocation3 + $0x248] sm:$0xff] %vm1578_vm1, %v2718_v2  ;;  %5715 = vmatmul.mubr.msk.f32.gmra.mxu1 %vm257_vm0, %v3526_v20  ;;  %v3507_v30 = vld [vmem:[#allocation3 + $0x230] sm:$0xff]  ;;  %v3556_v20 = vld [vmem:[#allocation3 + $0x3b8] sm:$0xff] }
 0x323   : > { %1847 = vrot.lane.b32.xlu1 %v2578_v0, %s5865_s17  ;;  %3269 = vst.msk [vmem:[#allocation3 + $0x248] sm:$0xff] %vm1963_vm2, %v3102_v56  ;;  %4043 = vmatprep.mubr.f32.mxu0 %v3507_v30  ;;  %v3104_v32 = vpop.permute.xlu0 %3103  ;;  %v3541_v0 = vld [vmem:[#allocation3 + $0x340] sm:$0xff]  ;;  %v3562_v30 = vld [vmem:[#allocation3 + $0x3e8] sm:$0xff] }
 0x324   : > { %5717 = vmatprep.mubr.msk.f32.mxu1 %vm257_vm0, %v3529_v8 }
 0x325   : > { %v1820_v49 = vpop.permute.xlu1 %1819  ;;  %v3506_v42 = vld [vmem:[#allocation3 + $0x228] sm:$0xff]  ;;  %2364 = vrot.lane.b32.xlu0 %v2196_v59, %s5863_s28  ;;  %v3571_v59 = vld [vmem:[#allocation3 + $0x430] sm:$0xff] }
 0x326   : > { %1988 = vst.msk [vmem:[#allocation3 + $0x240] sm:$0xff] %vm1963_vm2, %v1820_v49  ;;  %4044 = vmatmul.mubr.f32.gmra.mxu0 %v3506_v42  ;;  %5718 = vmatmul.mubr.msk.f32.gmra.mxu1 %vm257_vm0, %v3532_v39  ;;  %v3565_v39 = vld [vmem:[#allocation3 + $0x400] sm:$0xff]  ;;  %v3568_v49 = vld [vmem:[#allocation3 + $0x418] sm:$0xff] }
 0x327   : > { %2747 = vrot.lane.b32.xlu1 %v2580_v31, %s5864_s29  ;;  %5720 = vmatprep.mubr.msk.f32.mxu1 %vm257_vm0, %v3535_v1  ;;  %v2337_v60 = vpop.permute.xlu0 %2336 }
 0x328   : > { %2502 = vst.msk [vmem:[#allocation3 + $0x278] sm:$0xff] %vm1193_vm15, %v2337_v60 }
 0x329   : > { %v2720_v44 = vpop.permute.xlu1 %2719  ;;  %3133 = vrot.lane.b32.xlu0 %v7802_v7, %s5865_s17 }
 0x32a   : > { %2886 = vst.msk [vmem:[#allocation3 + $0x260] sm:$0xff] %vm1578_vm1, %v2720_v44  ;;  %v8081_v40 = vpop.f32.mrf.mxu0  ;;  %5721 = vmatmul.mubr.msk.f32.gmra.mxu1 %vm257_vm0, %v3538_v24  ;;  %v3510_v50 = vld [vmem:[#allocation3 + $0x248] sm:$0xff] }
 0x32b   : > { %1849 = vrot.lane.b32.xlu1 %v2579_v53, %s5865_s17  ;;  %3270 = vst.msk [vmem:[#allocation3 + $0x260] sm:$0xff] %vm1963_vm2, %v3104_v32  ;;  %4048 = vmatprep.mubr.f32.mxu0 %v3510_v50  ;;  %v3106_v54 = vpop.permute.xlu0 %3105  ;;  %v3550_v53 = vld [vmem:[#allocation3 + $0x388] sm:$0xff] }
 0x32c   : > { %v3972_v5 = vpop.f32.mrf.mxu0  ;;  %5723 = vmatprep.mubr.msk.f32.mxu1 %vm257_vm0, %v3541_v0  ;;  %v3574_v50 = vld [vmem:[#allocation3 + $0x448] sm:$0xff] }
 0x32d   : > { %v1822_v26 = vpop.permute.xlu1 %1821  ;;  %v3509_v28 = vld [vmem:[#allocation3 + $0x240] sm:$0xff]  ;;  %2366 = vrot.lane.b32.xlu0 %v7800_v25, %s5863_s28  ;;  %v3559_v25 = vld [vmem:[#allocation3 + $0x3d0] sm:$0xff] }
 0x32e   : > { %1989 = vst.msk [vmem:[#allocation3 + $0x258] sm:$0xff] %vm1963_vm2, %v1822_v26  ;;  %v8091_v46 = vpop.f32.mrf.mxu1  ;;  %5724 = vmatmul.mubr.msk.f32.gmra.mxu1 %vm257_vm0, %v3544_v36  ;;  %4049 = vmatmul.mubr.f32.gmra.mxu0 %v3509_v28  ;;  %v3577_v36 = vld [vmem:[#allocation3 + $0x460] sm:$0xff]  ;;  %v2584_v26 = vld [vmem:[#allocation2 + $0x370] sm:$0xff] }
 0x32f   : > { %2749 = vrot.lane.b32.xlu1 %v2581_v61, %s5864_s29  ;;  %5726 = vmatprep.mubr.msk.f32.mxu1 %vm257_vm0, %v3547_v45  ;;  %v2339_v33 = vpop.permute.xlu0 %2338  ;;  %v3580_v45 = vld [vmem:[#allocation3 + $0x478] sm:$0xff] }
 0x330   : > { %v4212_v22 = vpop.f32.mrf.mxu1  ;;  %2503 = vst.msk [vmem:[#allocation3 + $0x290] sm:$0xff] %vm1193_vm15, %v2339_v33  ;;  %v3592_v33 = vld [vmem:[#allocation3 + $0x4d8] sm:$0xff] }
 0x331   : > { %v2722_v7 = vpop.permute.xlu1 %2721  ;;  %3135 = vrot.lane.b32.xlu0 %v7832_v10, %s5865_s17  ;;  %v3586_v22 = vld [vmem:[#allocation3 + $0x4a8] sm:$0xff] }
 0x332   : > { %2887 = vst.msk [vmem:[#allocation3 + $0x278] sm:$0xff] %vm1578_vm1, %v2722_v7  ;;  %5727 = vmatmul.mubr.msk.f32.gmra.mxu1 %vm257_vm0, %v3550_v53  ;;  %v3513_v56 = vld [vmem:[#allocation3 + $0x260] sm:$0xff] }
 0x333   : > { %1851 = vrot.lane.b32.xlu1 %v1683_v21, %s5865_s17  ;;  %3271 = vst.msk [vmem:[#allocation3 + $0x278] sm:$0xff] %vm1963_vm2, %v3106_v54  ;;  %4053 = vmatprep.mubr.f32.mxu0 %v3513_v56  ;;  %v3108_v4 = vpop.permute.xlu0 %3107  ;;  %v3589_v7 = vld [vmem:[#allocation3 + $0x4c0] sm:$0xff] }
 0x334   : > { %5729 = vmatprep.mubr.msk.f32.mxu1 %vm257_vm0, %v3553_v27 }
 0x335   : > { %v1824_v2 = vpop.permute.xlu1 %1823  ;;  %v3512_v8 = vld [vmem:[#allocation3 + $0x258] sm:$0xff]  ;;  %2368 = vrot.lane.b32.xlu0 %v7806_v18, %s5863_s28  ;;  %v2583_v18 = vld [vmem:[#allocation2 + $0x360] sm:$0xff] }
 0x336   : > { %1990 = vst.msk [vmem:[#allocation3 + $0x270] sm:$0xff] %vm1963_vm2, %v1824_v2  ;;  %5730 = vmatmul.mubr.msk.f32.gmra.mxu1 %vm257_vm0, %v3556_v20  ;;  %4054 = vmatmul.mubr.f32.gmra.mxu0 %v3512_v8 }
 0x337   : > { %2751 = vrot.lane.b32.xlu1 %v2582_v47, %s5864_s29  ;;  %5732 = vmatprep.mubr.msk.f32.mxu1 %vm257_vm0, %v3559_v25  ;;  %v2341_v1 = vpop.permute.xlu0 %2340 }
 0x338   : > { %2504 = vst.msk [vmem:[#allocation3 + $0x2a8] sm:$0xff] %vm1193_vm15, %v2341_v1 }
 0x339   : > { %v2724_v58 = vpop.permute.xlu1 %2723  ;;  %3137 = vrot.lane.b32.xlu0 %v7861_v52, %s5865_s17 }
 0x33a   : > { %2888 = vst.msk [vmem:[#allocation3 + $0x290] sm:$0xff] %vm1578_vm1, %v2724_v58  ;;  %5733 = vmatmul.mubr.msk.f32.gmra.mxu1 %vm257_vm0, %v3562_v30  ;;  %v8114_v10 = vpop.f32.mrf.mxu0  ;;  %v3516_v31 = vld [vmem:[#allocation3 + $0x278] sm:$0xff]  ;;  %v3598_v30 = vld [vmem:[#allocation3 + $0x508] sm:$0xff] }
 0x33b   : > { %1853 = vrot.lane.b32.xlu1 %v2581_v61, %s5865_s17  ;;  %3272 = vst.msk [vmem:[#allocation3 + $0x290] sm:$0xff] %vm1963_vm2, %v3108_v4  ;;  %4058 = vmatprep.mubr.f32.mxu0 %v3516_v31  ;;  %v3110_v0 = vpop.permute.xlu0 %3109 }
 0x33c   : > { %v3977_v42 = vpop.f32.mrf.mxu0  ;;  %5735 = vmatprep.mubr.msk.f32.mxu1 %vm257_vm0, %v3565_v39  ;;  %v3601_v39 = vld [vmem:[#allocation3 + $0x520] sm:$0xff] }
 0x33d   : > { %v1826_v32 = vpop.permute.xlu1 %1825  ;;  %v3515_v24 = vld [vmem:[#allocation3 + $0x270] sm:$0xff]  ;;  %2370 = vrot.lane.b32.xlu0 %v7816_v17, %s5863_s28 }
 0x33e   : > { %1991 = vst.msk [vmem:[#allocation3 + $0x288] sm:$0xff] %vm1963_vm2, %v1826_v32  ;;  %v8123_v44 = vpop.f32.mrf.mxu1  ;;  %5736 = vmatmul.mubr.msk.f32.gmra.mxu1 %vm257_vm0, %v3568_v49  ;;  %4059 = vmatmul.mubr.f32.gmra.mxu0 %v3515_v24  ;;  %v3583_v17 = vld [vmem:[#allocation3 + $0x490] sm:$0xff]  ;;  %v3604_v49 = vld [vmem:[#allocation3 + $0x538] sm:$0xff]  ;;  %v3610_v24 = vld [vmem:[#allocation3 + $0x568] sm:$0xff] }
 0x33f   : > { %2753 = vrot.lane.b32.xlu1 %v2583_v18, %s5864_s29  ;;  %5738 = vmatprep.mubr.msk.f32.mxu1 %vm257_vm0, %v3571_v59  ;;  %v2343_v61 = vpop.permute.xlu0 %2342  ;;  %v2586_v42 = vld [vmem:[#allocation2 + $0x390] sm:$0xff] }
 0x340   : > { %v4217_v60 = vpop.f32.mrf.mxu1  ;;  %2505 = vst.msk [vmem:[#allocation3 + $0x2c0] sm:$0xff] %vm1193_vm15, %v2343_v61  ;;  %v3619_v61 = vld [vmem:[#allocation3 + $0x5b0] sm:$0xff] }
 0x341   : > { %v2726_v52 = vpop.permute.xlu1 %2725  ;;  %3139 = vrot.lane.b32.xlu0 %v7879_v34, %s5865_s17 }
 0x342   : > { %2889 = vst.msk [vmem:[#allocation3 + $0x2a8] sm:$0xff] %vm1578_vm1, %v2726_v52  ;;  %5739 = vmatmul.mubr.msk.f32.gmra.mxu1 %vm257_vm0, %v3574_v50  ;;  %v3519_v5 = vld [vmem:[#allocation3 + $0x290] sm:$0xff]  ;;  %v3613_v50 = vld [vmem:[#allocation3 + $0x580] sm:$0xff] }
 0x343   : > { %1855 = vrot.lane.b32.xlu1 %v2582_v47, %s5865_s17  ;;  %3273 = vst.msk [vmem:[#allocation3 + $0x2a8] sm:$0xff] %vm1963_vm2, %v3110_v0  ;;  %4063 = vmatprep.mubr.f32.mxu0 %v3519_v5  ;;  %v3112_v53 = vpop.permute.xlu0 %3111  ;;  %v3595_v47 = vld [vmem:[#allocation3 + $0x4f0] sm:$0xff] }
 0x344   : > { %5741 = vmatprep.mubr.msk.f32.mxu1 %vm257_vm0, %v3577_v36  ;;  %v3616_v36 = vld [vmem:[#allocation3 + $0x598] sm:$0xff] }
 0x345   : > { %v1828_v28 = vpop.permute.xlu1 %1827  ;;  %v3518_v54 = vld [vmem:[#allocation3 + $0x288] sm:$0xff]  ;;  %2372 = vrot.lane.b32.xlu0 %v7820_v12, %s5863_s28  ;;  %v2585_v12 = vld [vmem:[#allocation2 + $0x380] sm:$0xff] }
 0x346   : > { %1992 = vst.msk [vmem:[#allocation3 + $0x2a0] sm:$0xff] %vm1963_vm2, %v1828_v28  ;;  %5742 = vmatmul.mubr.msk.f32.gmra.mxu1 %vm257_vm0, %v3580_v45  ;;  %4064 = vmatmul.mubr.f32.gmra.mxu0 %v3518_v54  ;;  %v3622_v54 = vld [vmem:[#allocation3 + $0x5c8] sm:$0xff] }
 0x347   : > { %2755 = vrot.lane.b32.xlu1 %v2584_v26, %s5864_s29  ;;  %5744 = vmatprep.mubr.msk.f32.mxu1 %vm257_vm0, %v3583_v17  ;;  %v2345_v56 = vpop.permute.xlu0 %2344 }
 0x348   : > { %2506 = vst.msk [vmem:[#allocation3 + $0x2d8] sm:$0xff] %vm1193_vm15, %v2345_v56  ;;  %v3628_v56 = vld [vmem:[#allocation3 + $0x5f8] sm:$0xff] }
 0x349   : > { %v2728_v21 = vpop.permute.xlu1 %2727  ;;  %3141 = vrot.lane.b32.xlu0 %v7901_v48, %s5865_s17 }
 0x34a   : > { %2890 = vst.msk [vmem:[#allocation3 + $0x2c0] sm:$0xff] %vm1578_vm1, %v2728_v21  ;;  %5745 = vmatmul.mubr.msk.f32.gmra.mxu1 %vm257_vm0, %v3586_v22  ;;  %v8146_v34 = vpop.f32.mrf.mxu0  ;;  %v3522_v27 = vld [vmem:[#allocation3 + $0x2a8] sm:$0xff]  ;;  %v3625_v22 = vld [vmem:[#allocation3 + $0x5e0] sm:$0xff]  ;;  %v2972_v21 = vld [vmem:[#allocation2 + $0x3b1] sm:$0xff] }
 0x34b   : > { %1857 = vrot.lane.b32.xlu1 %v2583_v18, %s5865_s17  ;;  %3274 = vst.msk [vmem:[#allocation3 + $0x2c0] sm:$0xff] %vm1963_vm2, %v3112_v53  ;;  %4068 = vmatprep.mubr.f32.mxu0 %v3522_v27  ;;  %v3114_v4 = vpop.permute.xlu0 %3113 }
 0x34c   : > { %v3982_v20 = vpop.f32.mrf.mxu0  ;;  %5747 = vmatprep.mubr.msk.f32.mxu1 %vm257_vm0, %v3589_v7 }
 0x34d   : > { %v1830_v25 = vpop.permute.xlu1 %1829  ;;  %v3521_v2 = vld [vmem:[#allocation3 + $0x2a0] sm:$0xff]  ;;  %2374 = vrot.lane.b32.xlu0 %v7830_v15, %s5863_s28  ;;  %v3607_v15 = vld [vmem:[#allocation3 + $0x550] sm:$0xff] }
 0x34e   : > { %1993 = vst.msk [vmem:[#allocation3 + $0x2b8] sm:$0xff] %vm1963_vm2, %v1830_v25  ;;  %v8155_v8 = vpop.f32.mrf.mxu1  ;;  %5748 = vmatmul.mubr.msk.f32.gmra.mxu1 %vm257_vm0, %v3592_v33  ;;  %4069 = vmatmul.mubr.f32.gmra.mxu0 %v3521_v2 }
 0x34f   : > { %2757 = vrot.lane.b32.xlu1 %v2585_v12, %s5864_s29  ;;  %5750 = vmatprep.mubr.msk.f32.mxu1 %vm257_vm0, %v3595_v47  ;;  %v2347_v1 = vpop.permute.xlu0 %2346 }
 0x350   : > { %v4222_v58 = vpop.f32.mrf.mxu1  ;;  %2507 = vst.msk [vmem:[#allocation3 + $0x2f0] sm:$0xff] %vm1193_vm15, %v2347_v1 }
 0x351   : > { %v2730_v48 = vpop.permute.xlu1 %2729  ;;  %3143 = vrot.lane.b32.xlu0 %v7919_v35, %s5865_s17 }
 0x352   : > { %2891 = vst.msk [vmem:[#allocation3 + $0x2d8] sm:$0xff] %vm1578_vm1, %v2730_v48  ;;  %5751 = vmatmul.mubr.msk.f32.gmra.mxu1 %vm257_vm0, %v3598_v30  ;;  %v3525_v31 = vld [vmem:[#allocation3 + $0x2c0] sm:$0xff] }
 0x353   : > { %1859 = vrot.lane.b32.xlu1 %v2584_v26, %s5865_s17  ;;  %3275 = vst.msk [vmem:[#allocation3 + $0x2d8] sm:$0xff] %vm1963_vm2, %v3114_v4  ;;  %4073 = vmatprep.mubr.f32.mxu0 %v3525_v31  ;;  %v3116_v32 = vpop.permute.xlu0 %3115 }
 0x354   : > { %5753 = vmatprep.mubr.msk.f32.mxu1 %vm257_vm0, %v3601_v39 }
 0x355   : > { %v1832_v18 = vpop.permute.xlu1 %1831  ;;  %v3524_v59 = vld [vmem:[#allocation3 + $0x2b8] sm:$0xff]  ;;  %2376 = vrot.lane.b32.xlu0 %v7839_v16, %s5863_s28  ;;  %v2587_v16 = vld [vmem:[#allocation2 + $0x3a0] sm:$0xff] }
 0x356   : > { %1994 = vst.msk [vmem:[#allocation3 + $0x2d0] sm:$0xff] %vm1963_vm2, %v1832_v18  ;;  %5754 = vmatmul.mubr.msk.f32.gmra.mxu1 %vm257_vm0, %v3604_v49  ;;  %4074 = vmatmul.mubr.f32.gmra.mxu0 %v3524_v59 }
 0x357   : > { %2759 = vrot.lane.b32.xlu1 %v2586_v42, %s5864_s29  ;;  %5756 = vmatprep.mubr.msk.f32.mxu1 %vm257_vm0, %v3607_v15  ;;  %v2349_v52 = vpop.permute.xlu0 %2348 }
 0x358   : > { %2508 = vst.msk [vmem:[#allocation3 + $0x308] sm:$0xff] %vm1193_vm15, %v2349_v52 }
 0x359   : > { %v2732_v0 = vpop.permute.xlu1 %2731  ;;  %3145 = vrot.lane.b32.xlu0 %v7940_v41, %s5865_s17 }
 0x35a   : > { %2892 = vst.msk [vmem:[#allocation3 + $0x2f0] sm:$0xff] %vm1578_vm1, %v2732_v0  ;;  %5757 = vmatmul.mubr.msk.f32.gmra.mxu1 %vm257_vm0, %v3610_v24  ;;  %v8178_v35 = vpop.f32.mrf.mxu0  ;;  %v3528_v60 = vld [vmem:[#allocation3 + $0x2d8] sm:$0xff] }
 0x35b   : > { %1861 = vrot.lane.b32.xlu1 %v2585_v12, %s5865_s17  ;;  %3276 = vst.msk [vmem:[#allocation3 + $0x2f0] sm:$0xff] %vm1963_vm2, %v3116_v32  ;;  %4078 = vmatprep.mubr.f32.mxu0 %v3528_v60  ;;  %v3118_v28 = vpop.permute.xlu0 %3117 }
 0x35c   : > { %v3987_v5 = vpop.f32.mrf.mxu0  ;;  %5759 = vmatprep.mubr.msk.f32.mxu1 %vm257_vm0, %v3613_v50 }
 0x35d   : > { %v1834_v45 = vpop.permute.xlu1 %1833  ;;  %v3527_v26 = vld [vmem:[#allocation3 + $0x2d0] sm:$0xff]  ;;  %2378 = vrot.lane.b32.xlu0 %v7848_v23, %s5863_s28 }
 0x35e   : > { %1995 = vst.msk [vmem:[#allocation3 + $0x2e8] sm:$0xff] %vm1963_vm2, %v1834_v45  ;;  %v8187_v17 = vpop.f32.mrf.mxu1  ;;  %5760 = vmatmul.mubr.msk.f32.gmra.mxu1 %vm257_vm0, %v3616_v36  ;;  %4079 = vmatmul.mubr.f32.gmra.mxu0 %v3527_v26  ;;  %v2588_v23 = vld [vmem:[#allocation2 + $0x3b0] sm:$0xff] }
 0x35f   : > { %2761 = vrot.lane.b32.xlu1 %v2587_v16, %s5864_s29  ;;  %5762 = vmatprep.mubr.msk.f32.mxu1 %vm257_vm0, %v3619_v61  ;;  %v2351_v27 = vpop.permute.xlu0 %2350 }
 0x360   : > { %v4227_v53 = vpop.f32.mrf.mxu1  ;;  %2509 = vst.msk [vmem:[#allocation3 + $0x320] sm:$0xff] %vm1193_vm15, %v2351_v27 }
 0x361   : > { %v2734_v41 = vpop.permute.xlu1 %2733  ;;  %3147 = vrot.lane.b32.xlu0 %v2972_v21, %s5865_s17 }
 0x362   : > { %2893 = vst.msk [vmem:[#allocation3 + $0x308] sm:$0xff] %vm1578_vm1, %v2734_v41  ;;  %5763 = vmatmul.mubr.msk.f32.gmra.mxu1 %vm257_vm0, %v3622_v54  ;;  %v3531_v7 = vld [vmem:[#allocation3 + $0x2f0] sm:$0xff] }
 0x363   : > { %1863 = vrot.lane.b32.xlu1 %v2586_v42, %s5865_s17  ;;  %3277 = vst.msk [vmem:[#allocation3 + $0x308] sm:$0xff] %vm1963_vm2, %v3118_v28  ;;  %4083 = vmatprep.mubr.f32.mxu0 %v3531_v7  ;;  %v3120_v12 = vpop.permute.xlu0 %3119 }
 0x364   : > { %5765 = vmatprep.mubr.msk.f32.mxu1 %vm257_vm0, %v3625_v22  ;;  %v8204_v47 = vpop.f32.mrf.mxu0 }
 0x365   : > { %v1836_v33 = vpop.permute.xlu1 %1835  ;;  %v3530_v20 = vld [vmem:[#allocation3 + $0x2e8] sm:$0xff] }
 0x366   : > { %1996 = vst.msk [vmem:[#allocation3 + $0x300] sm:$0xff] %vm1963_vm2, %v1836_v33  ;;  %5766 = vmatmul.mubr.msk.f32.gmra.mxu1 %vm257_vm0, %v3628_v56  ;;  %4084 = vmatmul.mubr.f32.gmra.mxu0 %v3530_v20  ;;  %v3992_v2 = vpop.f32.mrf.mxu0  ;;  %vm4826_vm0 = vcmask 130048  }
 0x367   : > { %2763 = vrot.lane.b32.xlu1 %v2588_v23, %s5864_s29  ;;  %v2353_v30 = vpop.permute.xlu0 %2352 }
 0x368   : > { %2510 = vst.msk [vmem:[#allocation3 + $0x338] sm:$0xff] %vm1193_vm15, %v2353_v30 }
 0x369   : > { %v2736_v25 = vpop.permute.xlu1 %2735 }
 0x36a   : > { %2894 = vst.msk [vmem:[#allocation3 + $0x320] sm:$0xff] %vm1578_vm1, %v2736_v25  ;;  %v3534_v4 = vld [vmem:[#allocation3 + $0x308] sm:$0xff] }
 0x36b   : > { %1865 = vrot.lane.b32.xlu1 %v2587_v16, %s5865_s17  ;;  %3278 = vst.msk [vmem:[#allocation3 + $0x320] sm:$0xff] %vm1963_vm2, %v3120_v12  ;;  %4088 = vmatprep.mubr.f32.mxu0 %v3534_v4  ;;  %v3122_v39 = vpop.permute.xlu0 %3121 }
 0x36d   : > { %v1838_v58 = vpop.permute.xlu1 %1837  ;;  %v3533_v48 = vld [vmem:[#allocation3 + $0x300] sm:$0xff] }
 0x36e   : > { %1997 = vst.msk [vmem:[#allocation3 + $0x318] sm:$0xff] %vm1963_vm2, %v1838_v58  ;;  %4089 = vmatmul.mubr.f32.gmra.mxu0 %v3533_v48 }
 0x36f   : > { %v8211_v31 = vpop.f32.mrf.mxu1  ;;  %v2355_v15 = vpop.permute.xlu0 %2354 }
 0x370   : > { %9007 = vst [vmem:[#allocation6_spill] sm:$0xff] %v8211_v31  ;;  %2511 = vst.msk [vmem:[#allocation3 + $0x350] sm:$0xff] %vm1193_vm15, %v2355_v15 }
 0x371   : > { %v2738_v1 = vpop.permute.xlu1 %2737  ;;  %v4232_v49 = vpop.f32.mrf.mxu1 }
 0x372   : > { %2895 = vst.msk [vmem:[#allocation3 + $0x338] sm:$0xff] %vm1578_vm1, %v2738_v1  ;;  %v3537_v42 = vld [vmem:[#allocation3 + $0x320] sm:$0xff] }
 0x373   : > { %3279 = vst.msk [vmem:[#allocation3 + $0x338] sm:$0xff] %vm1963_vm2, %v3122_v39  ;;  %4093 = vmatprep.mubr.f32.mxu0 %v3537_v42  ;;  %v3124_v32 = vpop.permute.xlu0 %3123 }
 0x375   : > { %v1840_v18 = vpop.permute.xlu1 %1839  ;;  %v3536_v59 = vld [vmem:[#allocation3 + $0x318] sm:$0xff] }
 0x376   : > { %1998 = vst.msk [vmem:[#allocation3 + $0x330] sm:$0xff] %vm1963_vm2, %v1840_v18  ;;  %4094 = vmatmul.mubr.f32.gmra.mxu0 %v3536_v59 }
 0x377   : > { %v2357_v50 = vpop.permute.xlu0 %2356 }
 0x378   : > { %2512 = vst.msk [vmem:[#allocation3 + $0x368] sm:$0xff] %vm1193_vm15, %v2357_v50 }
 0x379   : > { %v2740_v24 = vpop.permute.xlu1 %2739 }
 0x37a   : > { %2896 = vst.msk [vmem:[#allocation3 + $0x350] sm:$0xff] %vm1578_vm1, %v2740_v24  ;;  %v3540_v0 = vld [vmem:[#allocation3 + $0x338] sm:$0xff] }
 0x37b   : > { %3280 = vst.msk [vmem:[#allocation3 + $0x350] sm:$0xff] %vm1963_vm2, %v3124_v32  ;;  %4098 = vmatprep.mubr.f32.mxu0 %v3540_v0  ;;  %v3126_v5 = vpop.permute.xlu0 %3125 }
 0x37d   : > { %v1842_v60 = vpop.permute.xlu1 %1841  ;;  %v3539_v52 = vld [vmem:[#allocation3 + $0x330] sm:$0xff] }
 0x37e   : > { %1999 = vst.msk [vmem:[#allocation3 + $0x348] sm:$0xff] %vm1963_vm2, %v1842_v60  ;;  %v8221_v36 = vpop.f32.mrf.mxu0  ;;  %4099 = vmatmul.mubr.f32.gmra.mxu0 %v3539_v52 }
 0x37f   : > { %v2359_v28 = vpop.permute.xlu0 %2358 }
 0x380   : > { %v3997_v16 = vpop.f32.mrf.mxu0  ;;  %2513 = vst.msk [vmem:[#allocation3 + $0x380] sm:$0xff] %vm1193_vm15, %v2359_v28  ;;  %v8256_v28 = vld [vmem:[%s9001_s3] ss:$0 sm:$0xff] }
 0x381   : > { %v2742_v61 = vpop.permute.xlu1 %2741 }
 0x382   : > { %2897 = vst.msk [vmem:[#allocation3 + $0x368] sm:$0xff] %vm1578_vm1, %v2742_v61  ;;  %v8224_v45 = vpop.f32.mrf.mxu1  ;;  %v3543_v26 = vld [vmem:[#allocation3 + $0x350] sm:$0xff] }
 0x383   : > { %9008 = vst [vmem:[#allocation7_spill] sm:$0xff] %v8224_v45  ;;  %3281 = vst.msk [vmem:[#allocation3 + $0x368] sm:$0xff] %vm1963_vm2, %v3126_v5  ;;  %4103 = vmatprep.mubr.f32.mxu0 %v3543_v26  ;;  %v3128_v22 = vpop.permute.xlu0 %3127 }
 0x384   : > { %v4237_v54 = vpop.f32.mrf.mxu1 }
 0x385   : > { %v1844_v53 = vpop.permute.xlu1 %1843  ;;  %v3542_v41 = vld [vmem:[#allocation3 + $0x348] sm:$0xff] }
 0x386   : > { %2000 = vst.msk [vmem:[#allocation3 + $0x360] sm:$0xff] %vm1963_vm2, %v1844_v53  ;;  %4104 = vmatmul.mubr.f32.gmra.mxu0 %v3542_v41  ;;  %v3936_v53 = vadd.f32 %v8256_v28, %v7837_v37 }
 0x387   : > { %v2361_v27 = vpop.permute.xlu0 %2360 }
 0x388   : > { %v8231_v56 = vpop.f32.mrf.mxu0  ;;  %2514 = vst.msk [vmem:[#allocation3 + $0x398] sm:$0xff] %vm1193_vm15, %v2361_v27  ;;  %v3931_v27 = vadd.f32 %v8256_v28, %v7785_v38 }
 0x389   : > { %v2744_v21 = vpop.permute.xlu1 %2743 }
 0x38a   : > { %2898 = vst.msk [vmem:[#allocation3 + $0x380] sm:$0xff] %vm1578_vm1, %v2744_v21  ;;  %v3546_v7 = vld [vmem:[#allocation3 + $0x368] sm:$0xff]  ;;  %v4002_v20 = vpop.f32.mrf.mxu0 }
 0x38b   : > { %3282 = vst.msk [vmem:[#allocation3 + $0x380] sm:$0xff] %vm1963_vm2, %v3128_v22  ;;  %4108 = vmatprep.mubr.f32.mxu0 %v3546_v7  ;;  %v3130_v12 = vpop.permute.xlu0 %3129 }
 0x38d   : > { %v1846_v23 = vpop.permute.xlu1 %1845  ;;  %v3545_v33 = vld [vmem:[#allocation3 + $0x360] sm:$0xff] }
 0x38e   : > { %2001 = vst.msk [vmem:[#allocation3 + $0x378] sm:$0xff] %vm1963_vm2, %v1846_v23  ;;  %4109 = vmatmul.mubr.f32.gmra.mxu0 %v3545_v33  ;;  %v4699_v33 = vld [vmem:[%s9002_s4 + $0x8] sm:$0xff] }
 0x38f   : > { %v2363_v4 = vpop.permute.xlu0 %2362 }
 0x390   : > { %2515 = vst.msk [vmem:[#allocation3 + $0x3b0] sm:$0xff] %vm1193_vm15, %v2363_v4  ;;  %v4698_v4 = vld [vmem:[%s9002_s4] sm:$0xff] }
 0x391   : > { %v2746_v25 = vpop.permute.xlu1 %2745 }
 0x392   : > { %2899 = vst.msk [vmem:[#allocation3 + $0x398] sm:$0xff] %vm1578_vm1, %v2746_v25  ;;  %v3549_v2 = vld [vmem:[#allocation3 + $0x380] sm:$0xff] }
 0x393   : > { %v8236_v30 = vpop.f32.mrf.mxu1  ;;  %3283 = vst.msk [vmem:[#allocation3 + $0x398] sm:$0xff] %vm1963_vm2, %v3130_v12  ;;  %4113 = vmatprep.mubr.f32.mxu0 %v3549_v2  ;;  %v3132_v1 = vpop.permute.xlu0 %3131 }
 0x394   : > { %9009 = vst [vmem:[#allocation8_spill] sm:$0xff] %v8236_v30 }
 0x395   : > { %v1848_v58 = vpop.permute.xlu1 %1847  ;;  %v4242_v48 = vpop.f32.mrf.mxu1  ;;  %v3548_v39 = vld [vmem:[#allocation3 + $0x378] sm:$0xff] }
 0x396   : > { %2002 = vst.msk [vmem:[#allocation3 + $0x390] sm:$0xff] %vm1963_vm2, %v1848_v58  ;;  %4114 = vmatmul.mubr.f32.gmra.mxu0 %v3548_v39  ;;  %v3941_v48 = vadd.f32 %v8256_v28, %v7883_v62 }
 0x397   : > { %v2365_v15 = vpop.permute.xlu0 %2364 }
 0x398   : > { %2516 = vst.msk [vmem:[#allocation3 + $0x3c8] sm:$0xff] %vm1193_vm15, %v2365_v15 }
 0x399   : > { %v2748_v49 = vpop.permute.xlu1 %2747 }
 0x39a   : > { %2900 = vst.msk [vmem:[#allocation3 + $0x3b0] sm:$0xff] %vm1578_vm1, %v2748_v49  ;;  %v3552_v42 = vld [vmem:[#allocation3 + $0x398] sm:$0xff] }
 0x39b   : > { %3284 = vst.msk [vmem:[#allocation3 + $0x3b0] sm:$0xff] %vm1963_vm2, %v3132_v1  ;;  %4118 = vmatprep.mubr.f32.mxu0 %v3552_v42  ;;  %v3134_v32 = vpop.permute.xlu0 %3133 }
 0x39d   : > { %v1850_v18 = vpop.permute.xlu1 %1849  ;;  %v3551_v59 = vld [vmem:[#allocation3 + $0x390] sm:$0xff] }
 0x39e   : > { %2003 = vst.msk [vmem:[#allocation3 + $0x3a8] sm:$0xff] %vm1963_vm2, %v1850_v18  ;;  %4119 = vmatmul.mubr.f32.gmra.mxu0 %v3551_v59  ;;  %v3956_v18 = vadd.f32 %v8256_v28, %v7987_v11 }
 0x39f   : > { %v2367_v60 = vpop.permute.xlu0 %2366 }
 0x3a0   : > { %2517 = vst.msk [vmem:[#allocation3 + $0x3e0] sm:$0xff] %vm1193_vm15, %v2367_v60  ;;  %v4700_v60 = vld [vmem:[%s9002_s4 + $0x10] sm:$0xff] }
 0x3a1   : > { %v2750_v24 = vpop.permute.xlu1 %2749 }
 0x3a2   : > { %2901 = vst.msk [vmem:[#allocation3 + $0x3c8] sm:$0xff] %vm1578_vm1, %v2750_v24  ;;  %v8246_v0 = vpop.f32.mrf.mxu0  ;;  %v3555_v50 = vld [vmem:[#allocation3 + $0x3b0] sm:$0xff] }
 0x3a3   : > { %3285 = vst.msk [vmem:[#allocation3 + $0x3c8] sm:$0xff] %vm1963_vm2, %v3134_v32  ;;  %4123 = vmatprep.mubr.f32.mxu0 %v3555_v50  ;;  %v3136_v26 = vpop.permute.xlu0 %3135 }
 0x3a4   : > { %v4007_v52 = vpop.f32.mrf.mxu0 }
 0x3a5   : > { %v1852_v5 = vpop.permute.xlu1 %1851  ;;  %v3554_v16 = vld [vmem:[#allocation3 + $0x3a8] sm:$0xff] }
 0x3a6   : > { %2004 = vst.msk [vmem:[#allocation3 + $0x3c0] sm:$0xff] %vm1963_vm2, %v1852_v5  ;;  %4124 = vmatmul.mubr.f32.gmra.mxu0 %v3554_v16  ;;  %v8251_v61 = vpop.f32.mrf.mxu1  ;;  %v3951_v5 = vadd.f32 %v8256_v28, %v7955_v57 }
 0x3a7   : > { %9010 = vst [vmem:[#allocation9_spill] sm:$0xff] %v8251_v61  ;;  %v2369_v7 = vpop.permute.xlu0 %2368 }
 0x3a8   : > { %v4247_v54 = vpop.f32.mrf.mxu1  ;;  %2518 = vst.msk [vmem:[#allocation3 + $0x3f8] sm:$0xff] %vm1193_vm15, %v2369_v7 }
 0x3a9   : > { %v2752_v41 = vpop.permute.xlu1 %2751 }
 0x3aa   : > { %2902 = vst.msk [vmem:[#allocation3 + $0x3e0] sm:$0xff] %vm1578_vm1, %v2752_v41  ;;  %v5674_v22 = vpop.f32.mrf.mxu1  ;;  %v3558_v21 = vld [vmem:[#allocation3 + $0x3c8] sm:$0xff]  ;;  %v3966_v41 = vadd.f32 %v8256_v28, %v8050_v14 }
 0x3ab   : > { %v4321_v23 = vadd.f32 %v5674_v22, %v3936_v53  ;;  %3286 = vst.msk [vmem:[#allocation3 + $0x3e0] sm:$0xff] %vm1963_vm2, %v3136_v26  ;;  %4128 = vmatprep.mubr.f32.mxu0 %v3558_v21  ;;  %v3138_v49 = vpop.permute.xlu0 %3137 }
 0x3ac   : > { %v4315_v37 = vpop.f32.mrf.mxu1 }
 0x3ad   : > { %v4635_v20 = vmax.f32 %v4321_v23, 0.0  ;;  %v4316_v12 = vadd.f32 %v4315_v37, %v3931_v27  ;;  %v1854_v25 = vpop.permute.xlu1 %1853  ;;  %v3557_v2 = vld [vmem:[#allocation3 + $0x3c0] sm:$0xff] }
 0x3ae   : > { %2005 = vst.msk [vmem:[#allocation3 + $0x3d8] sm:$0xff] %vm1963_vm2, %v1854_v25  ;;  %v8272_v38 = vpop.f32.mrf.mxu0  ;;  %4129 = vmatmul.mubr.f32.gmra.mxu0 %v3557_v2  ;;  %v8274_v58 = vpop.f32.mrf.mxu1  ;;  %v3976_v2 = vadd.f32 %v8256_v28, %v8114_v10 }
 0x3af   : > { %v4763_v39 = vmul.f32 %v4699_v33, %v4635_v20  ;;  %v4634_v1 = vmax.f32 %v4316_v12, 0.0  ;;  %v2371_v54 = vpop.permute.xlu0 %2370  ;;  %v3961_v33 = vadd.f32 %v8256_v28, %v8019_v55  ;;  %v3971_v55 = vadd.f32 %v8256_v28, %v8081_v40 }
 0x3b0   : > { %v4325_v42 = vpop.f32.mrf.mxu1  ;;  %v4012_v15 = vpop.f32.mrf.mxu0  ;;  %2519 = vst.msk [vmem:[#allocation3 + $0x410] sm:$0xff] %vm1193_vm15, %v2371_v54  ;;  %v3996_v54 = vadd.f32 %v8256_v28, %v8221_v36  ;;  %v4708_v36 = vld [vmem:[%s9002_s4 + $0x50] sm:$0xff] }
 0x3b1   : > { %v4762_v59 = vmul.f32 %v4698_v4, %v4634_v1  ;;  %v4326_v32 = vadd.f32 %v4325_v42, %v3941_v48  ;;  %v2754_v24 = vpop.permute.xlu1 %2753  ;;  %v4830_v50 = vsel %vm4826_vm0, %v4763_v39, 0.0 }
 0x3b2   : > { %2903 = vst.msk [vmem:[#allocation3 + $0x3f8] sm:$0xff] %vm1578_vm1, %v2754_v24  ;;  %v5680_v62 = vpop.f32.mrf.mxu1  ;;  %4831 = vadd.xlane.f32.xlu1 %v4830_v50  ;;  %v3561_v52 = vld [vmem:[#allocation3 + $0x3e0] sm:$0xff]  ;;  %v3981_v50 = vadd.f32 %v8256_v28, %v8146_v34 }
 0x3b3   : > { %v4636_v16 = vmax.f32 %v4326_v32, 0.0  ;;  %v8287_v26 = vadd.f32 %v5680_v62, %v3956_v18  ;;  %v4827_v11 = vsel %vm4826_vm0, %v4762_v59, 0.0  ;;  %3287 = vst.msk [vmem:[#allocation3 + $0x3f8] sm:$0xff] %vm1963_vm2, %v3138_v49  ;;  %4133 = vmatprep.mubr.f32.mxu0 %v3561_v52  ;;  %v3140_v20 = vpop.permute.xlu0 %3139  ;;  %v4706_v32 = vld [vmem:[%s9002_s4 + $0x40] sm:$0xff] }
 0x3b4   : > { %v4335_v53 = vpop.f32.mrf.mxu1  ;;  %4828 = vadd.xlane.f32.xlu0 %v4827_v11 }
 0x3b5   : > { %v4764_v22 = vmul.f32 %v4700_v60, %v4636_v16  ;;  %v8294_v21 = vadd.f32 %v4335_v53, %v3951_v5  ;;  %v1856_v57 = vpop.permute.xlu1 %1855  ;;  %v3560_v7 = vld [vmem:[#allocation3 + $0x3d8] sm:$0xff]  ;;  %v4707_v5 = vld [vmem:[%s9002_s4 + $0x48] sm:$0xff] }
 0x3b6   : > { %2006 = vst.msk [vmem:[#allocation3 + $0x3f0] sm:$0xff] %vm1963_vm2, %v1856_v57  ;;  %v8297_v27 = vpop.f32.mrf.mxu0  ;;  %4134 = vmatmul.mubr.f32.gmra.mxu0 %v3560_v7  ;;  %v5683_v23 = vpop.f32.mrf.mxu1 }
 0x3b7   : > { %v8301_v37 = vadd.f32 %v5683_v23, %v3966_v41  ;;  %v4833_v14 = vsel %vm4826_vm0, %v4764_v22, 0.0  ;;  %v2373_v42 = vpop.permute.xlu0 %2372 }
 0x3b8   : > { %v4345_v12 = vpop.f32.mrf.mxu1  ;;  %v4017_v25 = vpop.f32.mrf.mxu0  ;;  %4834 = vadd.xlane.f32.xlu1 %v4833_v14  ;;  %2520 = vst.msk [vmem:[#allocation3 + $0x428] sm:$0xff] %vm1193_vm15, %v2373_v42  ;;  %v4006_v14 = vadd.f32 %v8256_v28, %v8246_v0 }
 0x3b9   : > { %v8306_v4 = vadd.f32 %v4345_v12, %v3961_v33  ;;  %v2756_v48 = vpop.permute.xlu1 %2755 }
 0x3ba   : > { %2904 = vst.msk [vmem:[#allocation3 + $0x410] sm:$0xff] %vm1578_vm1, %v2756_v48  ;;  %v5686_v39 = vpop.f32.mrf.mxu1  ;;  %v3564_v1 = vld [vmem:[#allocation3 + $0x3f8] sm:$0xff] }
 0x3bb   : > { %v4361_v49 = vadd.f32 %v5686_v39, %v3976_v2  ;;  %3288 = vst.msk [vmem:[#allocation3 + $0x410] sm:$0xff] %vm1963_vm2, %v3140_v20  ;;  %4138 = vmatprep.mubr.f32.mxu0 %v3564_v1  ;;  %v3142_v52 = vpop.permute.xlu0 %3141  ;;  %v3986_v39 = vadd.f32 %v8256_v28, %v8178_v35  ;;  %v3946_v35 = vadd.f32 %v8256_v28, %v7923_v43 }
 0x3bc   : > { %v4355_v15 = vpop.f32.mrf.mxu1 }
 0x3bd   : > { %v4356_v10 = vadd.f32 %v4355_v15, %v3971_v55  ;;  %v1858_v18 = vpop.permute.xlu1 %1857  ;;  %v3563_v59 = vld [vmem:[#allocation3 + $0x3f0] sm:$0xff]  ;;  %v4643_v60 = vmax.f32 %v4361_v49, 0.0  ;;  %v4001_v49 = vadd.f32 %v8256_v28, %v8231_v56 }
 0x3be   : > { %2007 = vst.msk [vmem:[#allocation3 + $0x408] sm:$0xff] %vm1963_vm2, %v1858_v18  ;;  %v8317_v24 = vpop.f32.mrf.mxu0  ;;  %4139 = vmatmul.mubr.f32.gmra.mxu0 %v3563_v59  ;;  %v5689_v40 = vpop.f32.mrf.mxu1 }
 0x3bf   : > { %v4642_v62 = vmax.f32 %v4356_v10, 0.0  ;;  %v4771_v34 = vmul.f32 %v4707_v5, %v4643_v60  ;;  %v2375_v12 = vpop.permute.xlu0 %2374  ;;  %v4011_v5 = vadd.f32 %v8256_v28, %v8272_v38 }
 0x3c0   : > { %v4365_v16 = vpop.f32.mrf.mxu1  ;;  %v4022_v11 = vpop.f32.mrf.mxu0  ;;  %2521 = vst.msk [vmem:[#allocation3 + $0x440] sm:$0xff] %vm1193_vm15, %v2375_v12  ;;  %v4021_v12 = vadd.f32 %v8256_v28, %v8317_v24 }
 0x3c1   : > { %v4770_v53 = vmul.f32 %v4706_v32, %v4642_v62  ;;  %v4366_v41 = vadd.f32 %v4365_v16, %v3981_v50  ;;  %v2758_v22 = vpop.permute.xlu1 %2757  ;;  %v4854_v10 = vsel %vm4826_vm0, %v4771_v34, 0.0  ;;  %v4016_v32 = vadd.f32 %v8256_v28, %v8297_v27 }
 0x3c2   : > { %2905 = vst.msk [vmem:[#allocation3 + $0x428] sm:$0xff] %vm1578_vm1, %v2758_v22  ;;  %v5692_v57 = vpop.f32.mrf.mxu1  ;;  %v3567_v7 = vld [vmem:[#allocation3 + $0x410] sm:$0xff]  ;;  %v4371_v50 = vadd.f32 %v5689_v40, %v3986_v39  ;;  %v4331_v16 = vadd.f32 %v8274_v58, %v3946_v35  ;;  %v4715_v40 = vld [vmem:[%s9002_s4 + $0x88] sm:$0xff] }
 0x3c3   : > { %v4644_v23 = vmax.f32 %v4366_v41, 0.0  ;;  %v8327_v33 = vadd.f32 %v5692_v57, %v3996_v54  ;;  %3289 = vst.msk [vmem:[#allocation3 + $0x428] sm:$0xff] %vm1963_vm2, %v3142_v52  ;;  %v4851_v20 = vsel %vm4826_vm0, %v4770_v53, 0.0  ;;  %4143 = vmatprep.mubr.f32.mxu0 %v3567_v7  ;;  %v3144_v0 = vpop.permute.xlu0 %3143  ;;  %v4709_v57 = vld [vmem:[%s9002_s4 + $0x58] sm:$0xff]  ;;  %v4714_v7 = vld [vmem:[%s9002_s4 + $0x80] sm:$0xff] }
 0x3c4   : > { %v8334_v25 = vpop.f32.mrf.mxu1  ;;  %4852 = vadd.xlane.f32.xlu0 %v4851_v20  ;;  %v4645_v53 = vmax.f32 %v4371_v50, 0.0  ;;  %v4637_v20 = vmax.f32 %v4331_v16, 0.0 }
 0x3c5   : > { %v1860_v2 = vpop.permute.xlu1 %1859  ;;  %v3566_v48 = vld [vmem:[#allocation3 + $0x408] sm:$0xff]  ;;  %v4772_v42 = vmul.f32 %v4708_v36, %v4644_v23 }
 0x3c6   : > { %2008 = vst.msk [vmem:[#allocation3 + $0x420] sm:$0xff] %vm1963_vm2, %v1860_v2  ;;  %v8342_v1 = vpop.f32.mrf.mxu0  ;;  %4144 = vmatmul.mubr.f32.gmra.mxu0 %v3566_v48  ;;  %v5695_v55 = vpop.f32.mrf.mxu1  ;;  %v4701_v48 = vld [vmem:[%s9002_s4 + $0x18] sm:$0xff] }
 0x3c7   : > { %v8346_v15 = vadd.f32 %v5695_v55, %v4006_v14  ;;  %v4857_v43 = vsel %vm4826_vm0, %v4772_v42, 0.0  ;;  %v2377_v27 = vpop.permute.xlu0 %2376  ;;  %v4765_v35 = vmul.f32 %v4701_v48, %v4637_v20 }
 0x3c8   : > { %v4385_v18 = vpop.f32.mrf.mxu1  ;;  %v4027_v59 = vpop.f32.mrf.mxu0  ;;  %4855 = vadd.xlane.f32.xlu0 %v4854_v10  ;;  %2522 = vst.msk [vmem:[#allocation3 + $0x458] sm:$0xff] %vm1193_vm15, %v2377_v27 }
 0x3c9   : > { %v8353_v60 = vadd.f32 %v4385_v18, %v4001_v49  ;;  %v2760_v62 = vpop.permute.xlu1 %2759  ;;  %v4773_v49 = vmul.f32 %v4709_v57, %v4645_v53 }
 0x3ca   : > { %2906 = vst.msk [vmem:[#allocation3 + $0x440] sm:$0xff] %vm1578_vm1, %v2760_v62  ;;  %v5698_v56 = vpop.f32.mrf.mxu1  ;;  %v3570_v52 = vld [vmem:[#allocation3 + $0x428] sm:$0xff] }
 0x3cb   : > { %v4401_v11 = vadd.f32 %v5698_v56, %v4016_v32  ;;  %3290 = vst.msk [vmem:[#allocation3 + $0x440] sm:$0xff] %vm1963_vm2, %v3144_v0  ;;  %4148 = vmatprep.mubr.f32.mxu0 %v3570_v52  ;;  %v3146_v2 = vpop.permute.xlu0 %3145  ;;  %v4716_v52 = vld [vmem:[%s9002_s4 + $0x90] sm:$0xff]  ;;  %v4860_v27 = vsel %vm4826_vm0, %v4773_v49, 0.0 }
 0x3cc   : > { %v4395_v54 = vpop.f32.mrf.mxu1  ;;  %4858 = vadd.xlane.f32.xlu0 %v4857_v43 }
 0x3cd   : > { %v4651_v41 = vmax.f32 %v4401_v11, 0.0  ;;  %v4396_v38 = vadd.f32 %v4395_v54, %v4011_v5  ;;  %v1862_v22 = vpop.permute.xlu1 %1861  ;;  %v3569_v58 = vld [vmem:[#allocation3 + $0x420] sm:$0xff] }
 0x3ce   : > { %2009 = vst.msk [vmem:[#allocation3 + $0x438] sm:$0xff] %vm1963_vm2, %v1862_v22  ;;  %v4030_v34 = vpop.f32.mrf.mxu0  ;;  %4149 = vmatmul.mubr.f32.gmra.mxu0 %v3569_v58  ;;  %v8372_v23 = vpop.f32.mrf.mxu1 }
 0x3cf   : > { %v4779_v36 = vmul.f32 %v4715_v40, %v4651_v41  ;;  %v4650_v14 = vmax.f32 %v4396_v38, 0.0  ;;  %v4031_v32 = vadd.f32 %v8256_v28, %v4030_v34  ;;  %v2379_v56 = vpop.permute.xlu0 %2378  ;;  %v4836_v41 = vsel %vm4826_vm0, %v4765_v35, 0.0 }
 0x3d0   : > { %v4405_v39 = vpop.f32.mrf.mxu1  ;;  %v4032_v55 = vpop.f32.mrf.mxu0  ;;  %2523 = vst.msk [vmem:[#allocation3 + $0x470] sm:$0xff] %vm1193_vm15, %v2379_v56  ;;  %v4026_v56 = vadd.f32 %v8256_v28, %v8342_v1  ;;  %vm5421_vm15 = vcmask 1046534  }
 0x3d1   : > { %v4778_v42 = vmul.f32 %v4714_v7, %v4650_v14  ;;  %v4406_v10 = vadd.f32 %v4405_v39, %v4021_v12  ;;  %v2762_v0 = vpop.permute.xlu1 %2761  ;;  %v4878_v18 = vsel %vm4826_vm0, %v4779_v36, 0.0 }
 0x3d2   : > { %2907 = vst.msk [vmem:[#allocation3 + $0x458] sm:$0xff] %vm1578_vm1, %v2762_v0  ;;  %v5704_v59 = vpop.f32.mrf.mxu1  ;;  %4879 = vadd.xlane.f32.xlu0 %v4878_v18  ;;  %v3573_v24 = vld [vmem:[#allocation3 + $0x440] sm:$0xff] }
 0x3d3   : > { %v4652_v50 = vmax.f32 %v4406_v10, 0.0  ;;  %3291 = vst.msk [vmem:[#allocation3 + $0x458] sm:$0xff] %vm1963_vm2, %v3146_v2  ;;  %v4875_v62 = vsel %vm4826_vm0, %v4778_v42, 0.0  ;;  %4153 = vmatprep.mubr.f32.mxu0 %v3573_v24  ;;  %v3148_v22 = vpop.permute.xlu0 %3147 }
 0x3d4   : > { %v4415_v5 = vpop.f32.mrf.mxu1  ;;  %4876 = vadd.xlane.f32.xlu1 %v4875_v62 }
 0x3d5   : > { %v8388_v16 = vadd.f32 %v4415_v5, %v4031_v32  ;;  %v1864_v11 = vpop.permute.xlu1 %1863  ;;  %v3572_v43 = vld [vmem:[#allocation3 + $0x438] sm:$0xff]  ;;  %v4780_v54 = vmul.f32 %v4716_v52, %v4652_v50  ;;  %v4638_v5 = vmax.f32 %v8294_v21, 0.0 }
 0x3d6   : > { %2010 = vst.msk [vmem:[#allocation3 + $0x450] sm:$0xff] %vm1963_vm2, %v1864_v11  ;;  %v4035_v40 = vpop.f32.mrf.mxu0  ;;  %4154 = vmatmul.mubr.f32.gmra.mxu0 %v3572_v43  ;;  %4861 = vadd.xlane.f32.xlu0 %v4860_v27  ;;  %v5707_v20 = vpop.f32.mrf.mxu1  ;;  %v4722_v11 = vld [vmem:[%s9002_s4 + $0xc0] sm:$0xff]  ;;  %v4411_v27 = vadd.f32 %v8372_v23, %v4026_v56 }
 0x3d7   : > { %v4036_v53 = vadd.f32 %v8256_v28, %v4035_v40  ;;  %v4881_v34 = vsel %vm4826_vm0, %v4780_v54, 0.0  ;;  %v4702_v43 = vld [vmem:[%s9002_s4 + $0x20] sm:$0xff]  ;;  %v3991_v54 = vadd.f32 %v8256_v28, %v8204_v47  ;;  %v4723_v47 = vld [vmem:[%s9002_s4 + $0xc8] sm:$0xff] }
 0x3d8   : > { %v4037_v38 = vpop.f32.mrf.mxu0  ;;  %4837 = vadd.xlane.f32.xlu1 %v4836_v41  ;;  %v4425_v48 = vpop.f32.mrf.mxu1  ;;  %v4766_v41 = vmul.f32 %v4702_v43, %v4638_v5  ;;  %v4653_v21 = vmax.f32 %v4411_v27, 0.0 }
 0x3d9   : > { %v8394_v58 = vadd.f32 %v5704_v59, %v4036_v53  ;;  %v2764_v57 = vpop.permute.xlu1 %2763  ;;  %v4376_v38 = vadd.f32 %v8334_v25, %v3991_v54 }
 0x3da   : > { %2908 = vst.msk [vmem:[#allocation3 + $0x470] sm:$0xff] %vm1578_vm1, %v2764_v57  ;;  %v3576_v7 = vld [vmem:[#allocation3 + $0x458] sm:$0xff]  ;;  %v5710_v24 = vpop.f32.mrf.mxu1  ;;  %v4839_v25 = vsel %vm4826_vm0, %v4766_v41, 0.0  ;;  %vm5423_vm1 = vcmask 1047559  }
 0x3db   : > { %3292 = vst.msk [vmem:[#allocation3 + $0x470] sm:$0xff] %vm1963_vm2, %v3148_v22  ;;  %4158 = vmatprep.mubr.f32.mxu0 %v3576_v7  ;;  %v4717_v7 = vld [vmem:[%s9002_s4 + $0x98] sm:$0xff] }
 0x3dc   : > { %4882 = vadd.xlane.f32.xlu1 %v4881_v34  ;;  %v4435_v50 = vpop.f32.mrf.mxu1 }
 0x3dd   : > { %v1866_v12 = vpop.permute.xlu1 %1865  ;;  %v3575_v36 = vld [vmem:[#allocation3 + $0x450] sm:$0xff] }
 0x3de   : > { %2011 = vst.msk [vmem:[#allocation3 + $0x468] sm:$0xff] %vm1963_vm2, %v1866_v12  ;;  %v4040_v14 = vpop.f32.mrf.mxu0  ;;  %4159 = vmatmul.mubr.f32.gmra.mxu0 %v3575_v36  ;;  %v4781_v12 = vmul.f32 %v4717_v7, %v4653_v21  ;;  %vm5426_vm2 = vcmask 523264  }
 0x3df   : > { %v4041_v2 = vadd.f32 %v8256_v28, %v4040_v14  ;;  %v4710_v14 = vld [vmem:[%s9002_s4 + $0x60] sm:$0xff] }
 0x3e0   : > { %v4042_v39 = vpop.f32.mrf.mxu0 }
 0x3e1   : > { %v8401_v55 = vadd.f32 %v4425_v48, %v4041_v2  ;;  %v8432_v2 = vpop.f32.mrf.mxu1 }
 0x3e2   : > { %v3579_v49 = vld [vmem:[#allocation3 + $0x470] sm:$0xff] }
 0x3e3   : > { %4163 = vmatprep.mubr.f32.mxu0 %v3579_v49 }
 0x3e5   : > { %v3578_v42 = vld [vmem:[#allocation3 + $0x468] sm:$0xff] }
 0x3e6   : > { %v4045_v10 = vpop.f32.mrf.mxu0  ;;  %4164 = vmatmul.mubr.f32.gmra.mxu0 %v3578_v42 }
 0x3e7   : > { %v4046_v0 = vadd.f32 %v8256_v28, %v4045_v10  ;;  %v4884_v10 = vsel %vm4826_vm0, %v4781_v12, 0.0 }
 0x3e8   : > { %v4047_v18 = vpop.f32.mrf.mxu0 }
 0x3e9   : > { %v8404_v59 = vadd.f32 %v5707_v20, %v4046_v0  ;;  %v4646_v20 = vmax.f32 %v4376_v38, 0.0  ;;  %v4445_v18 = vpop.f32.mrf.mxu1 }
 0x3eb   : > { %v4774_v49 = vmul.f32 %v4710_v14, %v4646_v20  ;;  %v5716_v43 = vpop.f32.mrf.mxu1 }
 0x3ed   : > { %v4455_v54 = vpop.f32.mrf.mxu1 }
 0x3ee   : > { %v4050_v35 = vpop.f32.mrf.mxu0 }
 0x3ef   : > { %v4051_v32 = vadd.f32 %v8256_v28, %v4050_v35 }
 0x3f0   : > { %v4052_v62 = vpop.f32.mrf.mxu0 }
 0x3f1   : > { %v4436_v52 = vadd.f32 %v4435_v50, %v4051_v32  ;;  %v4724_v32 = vld [vmem:[%s9002_s4 + $0xd0] sm:$0xff]  ;;  %v4863_v62 = vsel %vm4826_vm0, %v4774_v49, 0.0 }
 0x3f3   : > { %v4658_v40 = vmax.f32 %v4436_v52, 0.0 }
 0x3f5   : > { %v4786_v53 = vmul.f32 %v4722_v11, %v4658_v40 }
 0x3f6   : > { %v4055_v1 = vpop.f32.mrf.mxu0 }
 0x3f7   : > { %v4056_v22 = vadd.f32 %v8256_v28, %v4055_v1  ;;  %v4899_v57 = vsel %vm4826_vm0, %v4786_v53, 0.0 }
 0x3f8   : > { %v4057_v34 = vpop.f32.mrf.mxu0  ;;  %4900 = vadd.xlane.f32.xlu0 %v4899_v57  ;;  %v8448_v57 = vpop.f32.mrf.mxu1 }
 0x3f9   : > { %v4441_v23 = vadd.f32 %v5710_v24, %v4056_v22 }
 0x3fb   : > { %v4659_v36 = vmax.f32 %v4441_v23, 0.0  ;;  %v4465_v23 = vpop.f32.mrf.mxu1 }
 0x3fc   : > { %4840 = vadd.xlane.f32.xlu0 %v4839_v25 }
 0x3fd   : > { %v4787_v48 = vmul.f32 %v4723_v47, %v4659_v36  ;;  %v5722_v25 = vpop.f32.mrf.mxu1 }
 0x3fe   : > { %v4060_v39 = vpop.f32.mrf.mxu0 }
 0x3ff   : > { %v4061_v42 = vadd.f32 %v8256_v28, %v4060_v39  ;;  %v4902_v0 = vsel %vm4826_vm0, %v4787_v48, 0.0  ;;  %v5083_v48 = vlaneseq  ;;  %v4475_v39 = vpop.f32.mrf.mxu1 }
 0x400   : > { %v4062_v24 = vpop.f32.mrf.mxu0  ;;  %4885 = vadd.xlane.f32.xlu0 %v4884_v10  ;;  %4903 = vadd.xlane.f32.xlu1 %v4902_v0  ;;  %v4639_v0 = vmax.f32 %v8287_v26, 0.0 }
 0x401   : > { %v4446_v35 = vadd.f32 %v4445_v18, %v4061_v42  ;;  %v4730_v18 = vld [vmem:[%s9002_s4 + $0x100] sm:$0xff]  ;;  %v8460_v24 = vand.u32 127, %v5083_v48 }
 0x403   : > { %v4660_v50 = vmax.f32 %v4446_v35, 0.0  ;;  %v4703_v35 = vld [vmem:[%s9002_s4 + $0x28] sm:$0xff]  ;;  %v5089_v26 = vadd.s32 4294967288, %v8460_v24 }
 0x404   : > { %4864 = vadd.xlane.f32.xlu1 %v4863_v62 }
 0x405   : > { %v4788_v56 = vmul.f32 %v4724_v32, %v4660_v50  ;;  %v8465_v32 = vpop.f32.mrf.mxu1 }
 0x406   : > { %v4065_v52 = vpop.f32.mrf.mxu0 }
 0x407   : > { %v4905_v5 = vsel %vm4826_vm0, %v4788_v56, 0.0  ;;  %v4767_v56 = vmul.f32 %v4703_v35, %v4639_v0 }
 0x408   : > { %v4067_v11 = vpop.f32.mrf.mxu0  ;;  %4906 = vadd.xlane.f32.xlu1 %v4905_v5 }
 0x409   : > { %v8467_v11 = vshrl.u32 %v5083_v48, 7 }
 0x40e   : > { %v4070_v27 = vpop.f32.mrf.mxu0 }
 0x40f   : > { %v4071_v40 = vadd.f32 %v8256_v28, %v4070_v27  ;;  %v4485_v27 = vpop.f32.mrf.mxu1 }
 0x410   : > { %v4072_v53 = vpop.f32.mrf.mxu0 }
 0x411   : > { %v8443_v41 = vadd.f32 %v4455_v54, %v4071_v40  ;;  %v4066_v40 = vadd.f32 %v8256_v28, %v4065_v52  ;;  %v4731_v52 = vld [vmem:[%s9002_s4 + $0x108] sm:$0xff] }
 0x416   : > { %v4075_v1 = vpop.f32.mrf.mxu0 }
 0x417   : > { %v4076_v38 = vadd.f32 %v8256_v28, %v4075_v1  ;;  %v4718_v1 = vld [vmem:[%s9002_s4 + $0xa0] sm:$0xff] }
 0x418   : > { %v4077_v21 = vpop.f32.mrf.mxu0 }
 0x419   : > { %v8446_v22 = vadd.f32 %v5716_v43, %v4076_v38  ;;  %v4654_v43 = vmax.f32 %v8388_v16, 0.0  ;;  %v8483_v16 = vsub.s32 %v8460_v24, %v8467_v11 }
 0x41e   : > { %v4080_v7 = vpop.f32.mrf.mxu0 }
 0x41f   : > { %v4081_v34 = vadd.f32 %v8256_v28, %v4080_v7  ;;  %v4647_v7 = vmax.f32 %v8327_v33, 0.0  ;;  %v4451_v33 = vadd.f32 %v8432_v2, %v4066_v40 }
 0x420   : > { %v4082_v47 = vpop.f32.mrf.mxu0 }
 0x421   : > { %v8451_v20 = vadd.f32 %v4465_v23, %v4081_v34  ;;  %v8479_v34 = vsub.s32 %v5089_v26, %v8467_v11  ;;  %v5096_v23 = vadd.s32 4294967280, %v8460_v24  ;;  %v4711_v47 = vld [vmem:[%s9002_s4 + $0x68] sm:$0xff]  ;;  %v4661_v2 = vmax.f32 %v4451_v33, 0.0 }
 0x426   : > { %v8453_v12 = vpop.f32.mrf.mxu0 }
 0x428   : > { %v4087_v36 = vpop.f32.mrf.mxu0 }
 0x429   : > { %v4782_v36 = vmul.f32 %v4718_v1, %v4654_v43 }
 0x42e   : > { %v4090_v14 = vpop.f32.mrf.mxu0 }
 0x42f   : > { %v4091_v49 = vadd.f32 %v8256_v28, %v4090_v14 }
 0x430   : > { %v4092_v42 = vpop.f32.mrf.mxu0 }
 0x431   : > { %v4476_v10 = vadd.f32 %v4475_v39, %v4091_v49  ;;  %v4842_v39 = vsel %vm4826_vm0, %v4767_v56, 0.0  ;;  %v4887_v56 = vsel %vm4826_vm0, %v4782_v36, 0.0 }
 0x433   : > { %v4666_v50 = vmax.f32 %v4476_v10, 0.0  ;;  %v4775_v10 = vmul.f32 %v4711_v47, %v4647_v7 }
 0x435   : > { %v4794_v62 = vmul.f32 %v4730_v18, %v4666_v50  ;;  %v8499_v50 = vsub.s32 %v5096_v23, %v8467_v11  ;;  %v4866_v23 = vsel %vm4826_vm0, %v4775_v10, 0.0 }
 0x436   : > { %v4095_v5 = vpop.f32.mrf.mxu0 }
 0x437   : > { %v4096_v54 = vadd.f32 %v8256_v28, %v4095_v5  ;;  %v4923_v53 = vsel %vm4826_vm0, %v4794_v62, 0.0 }
 0x438   : > { %v4097_v38 = vpop.f32.mrf.mxu0  ;;  %4924 = vadd.xlane.f32.xlu0 %v4923_v53 }
 0x439   : > { %v4481_v21 = vadd.f32 %v5722_v25, %v4096_v54  ;;  %v8492_v25 = vpop.f32.mrf.mxu1  ;;  %v4725_v54 = vld [vmem:[%s9002_s4 + $0xd8] sm:$0xff]  ;;  %v4732_v38 = vld [vmem:[%s9002_s4 + $0x110] sm:$0xff] }
 0x43a   : > { %v4789_v47 = vmul.f32 %v4725_v54, %v4661_v2 }
 0x43b   : > { %v4667_v14 = vmax.f32 %v4481_v21, 0.0  ;;  %v4832_v48 = vpop.xlane.xlu1 %4831  ;;  %v8501_v62 = vpop.f32.mrf.mxu1 }
 0x43c   : > { %4843 = vadd.xlane.f32.xlu0 %v4842_v39  ;;  %v5093_v0 = vrot.slane %v4832_v48, %v8479_v34  ;;  %v4908_v39 = vsel %vm4826_vm0, %v4789_v47, 0.0 }
 0x43d   : > { %v4829_v49 = vpop.xlane.xlu0 %4828  ;;  %v4795_v42 = vmul.f32 %v4731_v52, %v4667_v14  ;;  %v8513_v21 = vpop.f32.mrf.mxu1 }
 0x43e   : > { %v5088_v18 = vrot.slane %v4829_v49, %v8483_v16  ;;  %v4100_v35 = vpop.f32.mrf.mxu0 }
 0x43f   : > { %v4101_v5 = vadd.f32 %v8256_v28, %v4100_v35  ;;  %v4926_v26 = vsel %vm4826_vm0, %v4795_v42, 0.0 }
 0x440   : > { %v5095_v43 = vsel %vm5094_vm3, %v5093_v0, %v5088_v18  ;;  %v4102_v40 = vpop.f32.mrf.mxu0  ;;  %4888 = vadd.xlane.f32.xlu0 %v4887_v56  ;;  %4927 = vadd.xlane.f32.xlu1 %v4926_v26 }
 0x441   : > { %v4486_v53 = vadd.f32 %v4485_v27, %v4101_v5  ;;  %v4835_v1 = vpop.xlane.xlu1 %4834  ;;  %v8518_v27 = vpop.f32.mrf.mxu1 }
 0x442   : > { %v5100_v52 = vrot.slane %v4835_v1, %v8499_v50 }
 0x443   : > { %v4668_v7 = vmax.f32 %v4486_v53, 0.0  ;;  %v8522_v42 = vpop.f32.mrf.mxu1 }
 0x444   : > { %4867 = vadd.xlane.f32.xlu1 %v4866_v23  ;;  %v5102_v36 = vsel %vm5101_vm4, %v5100_v52, %v5095_v43  ;;  %v5103_v52 = vadd.s32 4294967272, %v8460_v24 }
 0x445   : > { %v4796_v33 = vmul.f32 %v4732_v38, %v4668_v7  ;;  %v4515_v10 = vpop.f32.mrf.mxu1 }
 0x446   : > { %v4105_v14 = vpop.f32.mrf.mxu0 }
 0x447   : > { %v4929_v48 = vsel %vm4826_vm0, %v4796_v33, 0.0  ;;  %v8528_v26 = vpop.f32.mrf.mxu1  ;;  %v8541_v33 = vsub.s32 %v5103_v52, %v8467_v11  ;;  %v4106_v45 = vadd.f32 %v8256_v28, %v4105_v14  ;;  %v4171_v14 = vadd.f32 %v8256_v28, %v7792_v29 }
 0x448   : > { %v4107_v49 = vpop.f32.mrf.mxu0  ;;  %4930 = vadd.xlane.f32.xlu0 %v4929_v48  ;;  %4909 = vadd.xlane.f32.xlu1 %v4908_v39 }
 0x449   : > { %v8534_v1 = vpop.f32.mrf.mxu1  ;;  %v4491_v31 = vadd.f32 %v8465_v32, %v4106_v45  ;;  %v4739_v45 = vld [vmem:[%s9002_s4 + $0x148] sm:$0xff] }
 0x44b   : > { %v8538_v23 = vpop.f32.mrf.mxu1 }
 0x44d   : > { %v4853_v0 = vpop.xlane.xlu0 %4852 }
 0x44e   : > { %v8524_v18 = vpop.f32.mrf.mxu0  ;;  %v5141_v5 = vrot.slane %v4853_v0, %v8483_v16 }
 0x450   : > { %v4112_v35 = vpop.f32.mrf.mxu0 }
 0x451   : > { %v4856_v2 = vpop.xlane.xlu0 %4855  ;;  %v8547_v35 = vpop.f32.mrf.mxu1 }
 0x452   : > { %v5145_v56 = vrot.slane %v4856_v2, %v8479_v34 }
 0x453   : > { %v8555_v52 = vpop.f32.mrf.mxu1 }
 0x454   : > { %v5146_v43 = vsel %vm5094_vm3, %v5145_v56, %v5141_v5  ;;  %9011 = vst [vmem:[#allocation10_spill] sm:$0xff] %v8555_v52 }
 0x455   : > { %v4859_v40 = vpop.xlane.xlu0 %4858 }
 0x456   : > { %v5150_v54 = vrot.slane %v4859_v40, %v8499_v50  ;;  %v8532_v53 = vpop.f32.mrf.mxu0 }
 0x458   : > { %v5151_v38 = vsel %vm5101_vm4, %v5150_v54, %v5146_v43  ;;  %v4117_v7 = vpop.f32.mrf.mxu0 }
 0x45b   : > { %v4880_v47 = vpop.xlane.xlu0 %4879 }
 0x45c   : > { %v5184_v39 = vrot.slane %v4880_v47, %v8479_v34 }
 0x45d   : > { %v4877_v48 = vpop.xlane.xlu1 %4876 }
 0x45e   : > { %v5180_v49 = vrot.slane %v4877_v48, %v8483_v16  ;;  %v8545_v0 = vpop.f32.mrf.mxu0 }
 0x45f   : > { %v4862_v2 = vpop.xlane.xlu0 %4861 }
 0x460   : > { %v5185_v5 = vsel %vm5094_vm3, %v5184_v39, %v5180_v49  ;;  %v5155_v56 = vrot.slane %v4862_v2, %v8541_v33  ;;  %v4122_v43 = vpop.f32.mrf.mxu0  ;;  %v8563_v39 = vpop.f32.mrf.mxu1 }
 0x461   : > { %v4838_v40 = vpop.xlane.xlu1 %4837 }
 0x462   : > { %v8552_v54 = vsel %vm5108_vm5, %v5155_v56, %v5151_v38  ;;  %v5107_v7 = vrot.slane %v4838_v40, %v8541_v33  ;;  %v5746_v38 = vpop.f32.mrf.mxu1 }
 0x464   : > { %v8558_v47 = vsel %vm5108_vm5, %v5107_v7, %v5102_v36  ;;  %v4555_v43 = vpop.f32.mrf.mxu1  ;;  %v4738_v36 = vld [vmem:[%s9002_s4 + $0x140] sm:$0xff]  ;;  %v4640_v7 = vmax.f32 %v8306_v4, 0.0 }
 0x465   : > { %v4883_v48 = vpop.xlane.xlu1 %4882 }
 0x466   : > { %v5189_v61 = vrot.slane %v4883_v48, %v8499_v50  ;;  %v8561_v63 = vpop.f32.mrf.mxu0  ;;  %v8573_v48 = vpop.f32.mrf.mxu1 }
 0x468   : > { %v8566_v49 = vsel %vm5101_vm4, %v5189_v61, %v5185_v5  ;;  %v4127_v2 = vpop.f32.mrf.mxu0  ;;  %v4704_v5 = vld [vmem:[%s9002_s4 + $0x30] sm:$0xff] }
 0x46e   : > { %v4130_v56 = vpop.f32.mrf.mxu0 }
 0x46f   : > { %v4131_v40 = vadd.f32 %v8256_v28, %v4130_v56  ;;  %v4655_v56 = vmax.f32 %v8394_v58, 0.0 }
 0x470   : > { %v4132_v30 = vpop.f32.mrf.mxu0 }
 0x471   : > { %v4516_v19 = vadd.f32 %v4515_v10, %v4131_v40  ;;  %v4768_v10 = vmul.f32 %v4704_v5, %v4640_v7  ;;  %v8580_v40 = vpop.f32.mrf.mxu1  ;;  %v4648_v7 = vmax.f32 %v8353_v60, 0.0  ;;  %v4712_v5 = vld [vmem:[%s9002_s4 + $0x70] sm:$0xff]  ;;  %v4733_v60 = vld [vmem:[%s9002_s4 + $0x118] sm:$0xff] }
 0x473   : > { %v4674_v61 = vmax.f32 %v4516_v19, 0.0  ;;  %v4719_v19 = vld [vmem:[%s9002_s4 + $0xa8] sm:$0xff] }
 0x474   : > { %v4783_v32 = vmul.f32 %v4719_v19, %v4655_v56  ;;  %v5110_v19 = vadd.s32 4294967264, %v8460_v24 }
 0x475   : > { %v4802_v2 = vmul.f32 %v4738_v36, %v4674_v61  ;;  %v4556_v61 = vadd.f32 %v4555_v43, %v4171_v14  ;;  %v4776_v43 = vmul.f32 %v4712_v5, %v4648_v7  ;;  %v4176_v7 = vadd.f32 %v8256_v28, %v7853_v13 }
 0x476   : > { %v4135_v30 = vpop.f32.mrf.mxu0  ;;  %v4890_v56 = vsel %vm4826_vm0, %v4783_v32, 0.0  ;;  %v4726_v32 = vld [vmem:[%s9002_s4 + $0xe0] sm:$0xff]  ;;  %v4641_v5 = vmax.f32 %v8301_v37, 0.0 }
 0x477   : > { %v4136_v4 = vadd.f32 %v8256_v28, %v4135_v30  ;;  %v4947_v52 = vsel %vm4826_vm0, %v4802_v2, 0.0  ;;  %v8598_v2 = vpop.f32.mrf.mxu1  ;;  %v4669_v30 = vmax.f32 %v4491_v31, 0.0  ;;  %v4746_v31 = vld [vmem:[%s9002_s4 + $0x180] sm:$0xff]  ;;  %v4869_v13 = vsel %vm4826_vm0, %v4776_v43, 0.0 }
 0x478   : > { %v4137_v36 = vpop.f32.mrf.mxu0  ;;  %4948 = vadd.xlane.f32.xlu1 %v4947_v52  ;;  %v4845_v52 = vsel %vm4826_vm0, %v4768_v10, 0.0 }
 0x479   : > { %v4521_v58 = vadd.f32 %v8522_v42, %v4136_v4  ;;  %v4682_v4 = vmax.f32 %v4556_v61, 0.0  ;;  %v4662_v36 = vmax.f32 %v8443_v41, 0.0  ;;  %v8610_v10 = vpop.f32.mrf.mxu1 }
 0x47b   : > { %v4675_v29 = vmax.f32 %v4521_v58, 0.0 }
 0x47c   : > { %4846 = vadd.xlane.f32.xlu1 %v4845_v52 }
 0x47d   : > { %v4803_v42 = vmul.f32 %v4739_v45, %v4675_v29  ;;  %v4797_v45 = vmul.f32 %v4733_v60, %v4669_v30  ;;  %v4561_v30 = vadd.f32 %v5746_v38, %v4176_v7  ;;  %v4810_v60 = vmul.f32 %v4746_v31, %v4682_v4  ;;  %v4740_v38 = vld [vmem:[%s9002_s4 + $0x150] sm:$0xff] }
 0x47e   : > { %v4140_v14 = vpop.f32.mrf.mxu0  ;;  %v4656_v31 = vmax.f32 %v8401_v55, 0.0 }
 0x47f   : > { %v4141_v58 = vadd.f32 %v8256_v28, %v4140_v14  ;;  %v4950_v52 = vsel %vm4826_vm0, %v4803_v42, 0.0  ;;  %v4705_v42 = vld [vmem:[%s9002_s4 + $0x38] sm:$0xff]  ;;  %v8626_v14 = vsub.s32 %v5110_v19, %v8467_v11  ;;  %v4181_v19 = vadd.f32 %v8256_v28, %v7893_v6  ;;  %v4747_v6 = vld [vmem:[%s9002_s4 + $0x188] sm:$0xff] }
 0x480   : > { %4951 = vadd.xlane.f32.xlu0 %v4950_v52  ;;  %4891 = vadd.xlane.f32.xlu1 %v4890_v56  ;;  %v4142_v61 = vpop.f32.mrf.mxu0  ;;  %v8628_v56 = vpop.f32.mrf.mxu1  ;;  %v4111_v52 = vadd.f32 %v8256_v28, %v8524_v18  ;;  %v4769_v4 = vmul.f32 %v4705_v42, %v4641_v5  ;;  %v4683_v7 = vmax.f32 %v4561_v30, 0.0  ;;  %v4720_v42 = vld [vmem:[%s9002_s4 + $0xb0] sm:$0xff] }
 0x481   : > { %v4526_v41 = vadd.f32 %v8534_v1, %v4141_v58  ;;  %v4901_v29 = vpop.xlane.xlu0 %4900  ;;  %v4932_v1 = vsel %vm4826_vm0, %v4797_v45, 0.0  ;;  %v4790_v58 = vmul.f32 %v4726_v32, %v4662_v36  ;;  %v4566_v30 = vadd.f32 %v8580_v40, %v4181_v19  ;;  %v8667_v40 = vld [vmem:[%s9001_s3] ss:$0 sm:$0xff] }
 0x482   : > { %v8640_v45 = vpop.f32.mrf.mxu1  ;;  %v4496_v36 = vadd.f32 %v8501_v62, %v4111_v52  ;;  %v4649_v62 = vmax.f32 %v8346_v15, 0.0  ;;  %v4848_v52 = vsel %vm4826_vm0, %v4769_v4, 0.0  ;;  %v4216_v19 = vadd.f32 %v8667_v40, %v8123_v44 }
 0x483   : > { %v4676_v37 = vmax.f32 %v4526_v41, 0.0  ;;  %v4911_v32 = vsel %vm4826_vm0, %v4790_v58, 0.0  ;;  %v4971_v41 = vsel %vm4826_vm0, %v4810_v60, 0.0  ;;  %v4663_v44 = vmax.f32 %v8446_v22, 0.0 }
 0x484   : > { %4870 = vadd.xlane.f32.xlu0 %v4869_v13  ;;  %4933 = vadd.xlane.f32.xlu1 %v4932_v1  ;;  %v4670_v15 = vmax.f32 %v4496_v36, 0.0  ;;  %v4734_v36 = vld [vmem:[%s9002_s4 + $0x120] sm:$0xff] }
 0x485   : > { %v4841_v43 = vpop.xlane.xlu0 %4840  ;;  %v4804_v5 = vmul.f32 %v4740_v38, %v4676_v37  ;;  %v5219_v37 = vrot.slane %v4901_v29, %v8483_v16  ;;  %v4784_v38 = vmul.f32 %v4720_v42, %v4656_v31 }
 0x486   : > { %v5114_v18 = vrot.slane %v4841_v43, %v8626_v14  ;;  %v4145_v61 = vpop.f32.mrf.mxu0  ;;  %v4811_v43 = vmul.f32 %v4747_v6, %v4683_v7 }
 0x487   : > { %v4146_v4 = vadd.f32 %v8667_v40, %v4145_v61  ;;  %v4953_v29 = vsel %vm4826_vm0, %v4804_v5, 0.0  ;;  %v4748_v5 = vld [vmem:[%s9002_s4 + $0x190] sm:$0xff] }
 0x488   : > { %v8653_v28 = vsel %vm5115_vm6, %v5114_v18, %v8558_v47  ;;  %4912 = vadd.xlane.f32.xlu0 %v4911_v32  ;;  %4972 = vadd.xlane.f32.xlu1 %v4971_v41  ;;  %v4147_v55 = vpop.f32.mrf.mxu0  ;;  %v4713_v47 = vld [vmem:[%s9002_s4 + $0x78] sm:$0xff]  ;;  %v5758_v18 = vpop.f32.mrf.mxu1  ;;  %v4684_v32 = vmax.f32 %v4566_v30, 0.0  ;;  %v4798_v30 = vmul.f32 %v4734_v36, %v4670_v15  ;;  %v4755_v15 = vld [vmem:[%s9002_s4 + $0x1c8] sm:$0xff] }
 0x489   : > { %v4886_v60 = vpop.xlane.xlu0 %4885  ;;  %v4904_v13 = vpop.xlane.xlu1 %4903  ;;  %v4777_v61 = vmul.f32 %v4713_v47, %v4649_v62  ;;  %v4601_v42 = vadd.f32 %v5758_v18, %v4216_v19  ;;  %v4727_v62 = vld [vmem:[%s9002_s4 + $0xe8] sm:$0xff] }
 0x48a   : > { %v5194_v1 = vrot.slane %v4886_v60, %v8541_v33  ;;  %v5223_v58 = vrot.slane %v4904_v13, %v8479_v34  ;;  %v4595_v55 = vpop.f32.mrf.mxu1  ;;  %v4531_v60 = vadd.f32 %v8528_v26, %v4146_v4  ;;  %v4974_v13 = vsel %vm4826_vm0, %v4811_v43, 0.0 }
 0x48b   : > { %v4812_v26 = vmul.f32 %v4748_v5, %v4684_v32  ;;  %v4691_v47 = vmax.f32 %v4601_v42, 0.0  ;;  %v4791_v18 = vmul.f32 %v4727_v62, %v4663_v44  ;;  %v4935_v19 = vsel %vm4826_vm0, %v4798_v30, 0.0  ;;  %v4741_v32 = vld [vmem:[%s9002_s4 + $0x158] sm:$0xff]  ;;  %v4728_v62 = vld [vmem:[%s9002_s4 + $0xf0] sm:$0xff] }
 0x48c   : > { %v8675_v31 = vsel %vm5108_vm5, %v5194_v1, %v8566_v49  ;;  %v5224_v7 = vsel %vm5094_vm3, %v5223_v58, %v5219_v37  ;;  %4954 = vadd.xlane.f32.xlu0 %v4953_v29  ;;  %4849 = vadd.xlane.f32.xlu1 %v4848_v52  ;;  %v4893_v52 = vsel %vm4826_vm0, %v4784_v38, 0.0  ;;  %v4211_v37 = vadd.f32 %v8667_v40, %v8091_v46  ;;  %v8702_v4 = vpop.f32.mrf.mxu1 }
 0x48d   : > { %v4865_v41 = vpop.xlane.xlu1 %4864  ;;  %v4677_v46 = vmax.f32 %v4531_v60, 0.0  ;;  %v4872_v29 = vsel %vm4826_vm0, %v4777_v61, 0.0  ;;  %v4914_v42 = vsel %vm4826_vm0, %v4791_v18, 0.0  ;;  %v4754_v61 = vld [vmem:[%s9002_s4 + $0x1c0] sm:$0xff] }
 0x48e   : > { %v5160_v49 = vrot.slane %v4865_v41, %v8626_v14  ;;  %v4150_v6 = vpop.f32.mrf.mxu0  ;;  %v4596_v43 = vadd.f32 %v4595_v55, %v4211_v37  ;;  %v4819_v41 = vmul.f32 %v4755_v15, %v4691_v47  ;;  %v4116_v55 = vadd.f32 %v8667_v40, %v8532_v53 }
 0x48f   : > { %v4657_v37 = vmax.f32 %v8404_v59, 0.0  ;;  %v4086_v15 = vadd.f32 %v8667_v40, %v8453_v12  ;;  %v4735_v12 = vld [vmem:[%s9002_s4 + $0x128] sm:$0xff] }
 0x490   : > { %v8696_v22 = vsel %vm5115_vm6, %v5160_v49, %v8552_v54  ;;  %4975 = vadd.xlane.f32.xlu0 %v4974_v13  ;;  %4894 = vadd.xlane.f32.xlu1 %v4893_v52  ;;  %v4152_v1 = vpop.f32.mrf.mxu0  ;;  %v4151_v54 = vadd.f32 %v8667_v40, %v4150_v6  ;;  %v4690_v5 = vmax.f32 %v4596_v43, 0.0  ;;  %v4977_v49 = vsel %vm4826_vm0, %v4812_v26, 0.0  ;;  %v4605_v6 = vpop.f32.mrf.mxu1 }
 0x491   : > { %v4907_v58 = vpop.xlane.xlu1 %4906  ;;  %v4805_v13 = vmul.f32 %v4741_v32, %v4677_v46  ;;  %v4221_v52 = vadd.f32 %v8667_v40, %v8155_v8  ;;  %v4998_v26 = vsel %vm4826_vm0, %v4819_v41, 0.0  ;;  %v4721_v8 = vld [vmem:[%s9002_s4 + $0xb8] sm:$0xff] }
 0x492   : > { %v5228_v38 = vrot.slane %v4907_v58, %v8499_v50  ;;  %v4536_v60 = vadd.f32 %v8547_v35, %v4151_v54  ;;  %v4818_v1 = vmul.f32 %v4754_v61, %v4690_v5  ;;  %v4121_v35 = vadd.f32 %v8667_v40, %v8545_v0  ;;  %v4756_v54 = vld [vmem:[%s9002_s4 + $0x1d0] sm:$0xff] }
 0x493   : > { %v4606_v53 = vadd.f32 %v4605_v6, %v4221_v52  ;;  %v4501_v58 = vadd.f32 %v8492_v25, %v4116_v55  ;;  %v4956_v43 = vsel %vm4826_vm0, %v4805_v13, 0.0  ;;  %v4785_v0 = vmul.f32 %v4721_v8, %v4657_v37 }
 0x494   : > { %v8708_v36 = vsel %vm5101_vm4, %v5228_v38, %v5224_v7  ;;  %4873 = vadd.xlane.f32.xlu0 %v4872_v29  ;;  %4936 = vadd.xlane.f32.xlu1 %v4935_v19  ;;  %v4664_v7 = vmax.f32 %v8451_v20, 0.0  ;;  %v4186_v20 = vadd.f32 %v8667_v40, %v7933_v3  ;;  %v4678_v47 = vmax.f32 %v4536_v60, 0.0  ;;  %v4742_v3 = vld [vmem:[%s9002_s4 + $0x160] sm:$0xff] }
 0x495   : > { %v4692_v18 = vmax.f32 %v4606_v53, 0.0  ;;  %v4506_v46 = vadd.f32 %v8518_v27, %v4121_v35  ;;  %v4671_v29 = vmax.f32 %v4501_v58, 0.0  ;;  %v4995_v19 = vsel %vm4826_vm0, %v4818_v1, 0.0  ;;  %v5764_v58 = vpop.f32.mrf.mxu1 }
 0x496   : > { %v4155_v44 = vpop.f32.mrf.mxu0  ;;  %v4792_v38 = vmul.f32 %v4728_v62, %v4664_v7  ;;  %v4571_v59 = vadd.f32 %v8573_v48, %v4186_v20  ;;  %v4806_v41 = vmul.f32 %v4742_v3, %v4678_v47  ;;  %v4191_v48 = vadd.f32 %v8667_v40, %v7964_v9 }
 0x497   : > { %v4820_v7 = vmul.f32 %v4756_v54, %v4692_v18  ;;  %v4471_v6 = vadd.f32 %v8448_v57, %v4086_v15  ;;  %v4672_v9 = vmax.f32 %v4506_v46, 0.0  ;;  %v4126_v55 = vadd.f32 %v8667_v40, %v8561_v63  ;;  %v4750_v63 = vld [vmem:[%s9002_s4 + $0x1a0] sm:$0xff]  ;;  %v4615_v46 = vpop.f32.mrf.mxu1 }
 0x498   : > { %4915 = vadd.xlane.f32.xlu0 %v4914_v42  ;;  %4978 = vadd.xlane.f32.xlu1 %v4977_v49  ;;  %v4157_v30 = vpop.f32.mrf.mxu0  ;;  %v4917_v32 = vsel %vm4826_vm0, %v4792_v38, 0.0  ;;  %v4685_v27 = vmax.f32 %v4571_v59, 0.0  ;;  %v4896_v42 = vsel %vm4826_vm0, %v4785_v0, 0.0  ;;  %v4749_v49 = vld [vmem:[%s9002_s4 + $0x198] sm:$0xff]  ;;  %v4576_v61 = vadd.f32 %v8610_v10, %v4191_v48 }
 0x499   : > { %v4156_v60 = vadd.f32 %v8667_v40, %v4155_v44  ;;  %v4959_v13 = vsel %vm4826_vm0, %v4806_v41, 0.0  ;;  %v4799_v52 = vmul.f32 %v4735_v12, %v4671_v29  ;;  %v4736_v30 = vld [vmem:[%s9002_s4 + $0x130] sm:$0xff]  ;;  %v4196_v10 = vadd.f32 %v8667_v40, %v7996_v51  ;;  %v4729_v51 = vld [vmem:[%s9002_s4 + $0xf8] sm:$0xff] }
 0x49a   : > { %v4813_v62 = vmul.f32 %v4749_v49, %v4685_v27  ;;  %v4686_v57 = vmax.f32 %v4576_v61, 0.0  ;;  %v4665_v20 = vmax.f32 %v4471_v6, 0.0  ;;  %v4800_v1 = vmul.f32 %v4736_v30, %v4672_v9  ;;  %v4757_v41 = vld [vmem:[%s9002_s4 + $0x1d8] sm:$0xff]  ;;  %v9013_v49 = vld [vmem:[#allocation6_spill] sm:$0xff]  ;;  %v5767_v9 = vpop.f32.mrf.mxu1 }
 0x49b   : > { %v4511_v44 = vadd.f32 %v8513_v21, %v4126_v55  ;;  %v4541_v53 = vadd.f32 %v8538_v23, %v4156_v60  ;;  %v4938_v35 = vsel %vm4826_vm0, %v4799_v52, 0.0  ;;  %v4226_v8 = vadd.f32 %v8667_v40, %v8187_v17 }
 0x49c   : > { %4957 = vadd.xlane.f32.xlu0 %v4956_v43  ;;  %4999 = vadd.xlane.f32.xlu1 %v4998_v26  ;;  %v5001_v26 = vsel %vm4826_vm0, %v4820_v7, 0.0  ;;  %v4581_v43 = vadd.f32 %v8598_v2, %v4196_v10  ;;  %v4980_v21 = vsel %vm4826_vm0, %v4813_v62, 0.0  ;;  %v4814_v23 = vmul.f32 %v4750_v63, %v4686_v57  ;;  %v4743_v2 = vld [vmem:[%s9002_s4 + $0x168] sm:$0xff]  ;;  %v9014_v7 = vld [vmem:[#allocation7_spill] sm:$0xff]  ;;  %v9015_v57 = vld [vmem:[#allocation4_spill] sm:$0xff] }
 0x49d   : > { %v4611_v38 = vadd.f32 %v8702_v4, %v4226_v8  ;;  %v4941_v3 = vsel %vm4826_vm0, %v4800_v1, 0.0  ;;  %v4793_v59 = vmul.f32 %v4729_v51, %v4665_v20  ;;  %v4673_v0 = vmax.f32 %v4511_v44, 0.0  ;;  %v4737_v4 = vld [vmem:[%s9002_s4 + $0x138] sm:$0xff]  ;;  %v4744_v1 = vld [vmem:[%s9002_s4 + $0x170] sm:$0xff]  ;;  %v9016_v44 = vld [vmem:[#allocation8_spill] sm:$0xff] }
 0x49e   : > { %v4160_v25 = vpop.f32.mrf.mxu0  ;;  %v4679_v18 = vmax.f32 %v4541_v53, 0.0  ;;  %v4687_v54 = vmax.f32 %v4581_v43, 0.0  ;;  %v4231_v61 = vadd.f32 %v8667_v40, %v9013_v49  ;;  %v4236_v6 = vadd.f32 %v8667_v40, %v9014_v7  ;;  %v4745_v63 = vld [vmem:[%s9002_s4 + $0x178] sm:$0xff] }
 0x49f   : > { %v4161_v15 = vadd.f32 %v8667_v40, %v4160_v25  ;;  %v4693_v29 = vmax.f32 %v4611_v38, 0.0  ;;  %v4751_v25 = vld [vmem:[%s9002_s4 + $0x1a8] sm:$0xff]  ;;  %v4201_v20 = vadd.f32 %v8667_v40, %v9015_v57  ;;  %v4241_v53 = vadd.f32 %v8667_v40, %v9016_v44 }
 0x4a0   : > { %4996 = vadd.xlane.f32.xlu0 %v4995_v19  ;;  %4918 = vadd.xlane.f32.xlu1 %v4917_v32  ;;  %v4162_v5 = vpop.f32.mrf.mxu0  ;;  %v4920_v19 = vsel %vm4826_vm0, %v4793_v59, 0.0  ;;  %v4983_v32 = vsel %vm4826_vm0, %v4814_v23, 0.0  ;;  %v4807_v27 = vmul.f32 %v4743_v2, %v4679_v18  ;;  %v4815_v55 = vmul.f32 %v4751_v25, %v4687_v54  ;;  %v9017_v38 = vld [vmem:[#allocation5_spill] sm:$0xff]  ;;  %v4760_v54 = vld [vmem:[%s9002_s4 + $0x1f0] sm:$0xff] }
 0x4a1   : > { %v4546_v48 = vadd.f32 %v8563_v39, %v4161_v15  ;;  %v9012_v5 = vld [vmem:[#allocation10_spill] sm:$0xff]  ;;  %v4821_v60 = vmul.f32 %v4757_v41, %v4693_v29  ;;  %v4616_v52 = vadd.f32 %v4615_v46, %v4231_v61  ;;  %v9018_v29 = vld [vmem:[#allocation9_spill] sm:$0xff]  ;;  %v5117_v25 = vadd.s32 4294967256, %v8460_v24 }
 0x4a2   : > { %v4962_v39 = vsel %vm4826_vm0, %v4807_v27, 0.0  ;;  %v4986_v8 = vsel %vm4826_vm0, %v4815_v55, 0.0  ;;  %v4752_v15 = vld [vmem:[%s9002_s4 + $0x1b0] sm:$0xff]  ;;  %v4753_v27 = vld [vmem:[%s9002_s4 + $0x1b8] sm:$0xff] }
 0x4a3   : > { %v4680_v30 = vmax.f32 %v4546_v48, 0.0  ;;  %v5004_v51 = vsel %vm4826_vm0, %v4821_v60, 0.0  ;;  %v8849_v49 = vsub.s32 %v5117_v25, %v8467_v11 }
 0x4a4   : > { %4897 = vadd.xlane.f32.xlu0 %v4896_v42  ;;  %4960 = vadd.xlane.f32.xlu1 %v4959_v13  ;;  %v4801_v42 = vmul.f32 %v4737_v4, %v4673_v0  ;;  %v4621_v13 = vadd.f32 %v5764_v58, %v4236_v6  ;;  %v4759_v58 = vld [vmem:[%s9002_s4 + $0x1e8] sm:$0xff] }
 0x4a6   : > { %v4165_v37 = vpop.f32.mrf.mxu0  ;;  %v4944_v10 = vsel %vm4826_vm0, %v4801_v42, 0.0 }
 0x4a7   : > { %v4166_v17 = vadd.f32 %v8667_v40, %v4165_v37  ;;  %v4625_v37 = vpop.f32.mrf.mxu1 }
 0x4a8   : > { %4939 = vadd.xlane.f32.xlu0 %v4938_v35  ;;  %5002 = vadd.xlane.f32.xlu1 %v5001_v26  ;;  %v4167_v47 = vpop.f32.mrf.mxu0  ;;  %v4586_v35 = vadd.f32 %v8640_v45, %v4201_v20  ;;  %v4695_v26 = vmax.f32 %v4621_v13, 0.0  ;;  %v4626_v43 = vadd.f32 %v4625_v37, %v4241_v53  ;;  %v4758_v45 = vld [vmem:[%s9002_s4 + $0x1e0] sm:$0xff] }
 0x4a9   : > { %v4551_v12 = vadd.f32 %v9012_v5, %v4166_v17  ;;  %v4694_v47 = vmax.f32 %v4616_v52, 0.0 }
 0x4aa   : > { %v4688_v0 = vmax.f32 %v4586_v35, 0.0  ;;  %v4823_v18 = vmul.f32 %v4759_v58, %v4695_v26  ;;  %v4696_v46 = vmax.f32 %v4626_v43, 0.0 }
 0x4ab   : > { %v4681_v62 = vmax.f32 %v4551_v12, 0.0  ;;  %v4822_v17 = vmul.f32 %v4758_v45, %v4694_v47  ;;  %v5124_v47 = vadd.s32 4294967248, %v8460_v24 }
 0x4ac   : > { %4981 = vadd.xlane.f32.xlu0 %v4980_v21  ;;  %4942 = vadd.xlane.f32.xlu1 %v4941_v3  ;;  %v4808_v21 = vmul.f32 %v4744_v1, %v4680_v30  ;;  %v4206_v3 = vadd.f32 %v8667_v40, %v9017_v38  ;;  %v4824_v48 = vmul.f32 %v4760_v54, %v4696_v46  ;;  %v5010_v12 = vsel %vm4826_vm0, %v4823_v18, 0.0 }
 0x4ad   : > { %v4809_v23 = vmul.f32 %v4745_v63, %v4681_v62  ;;  %v5007_v5 = vsel %vm4826_vm0, %v4822_v17, 0.0  ;;  %v5131_v54 = vadd.s32 4294967240, %v8460_v24 }
 0x4ae   : > { %v4591_v59 = vadd.f32 %v8628_v56, %v4206_v3  ;;  %v4965_v2 = vsel %vm4826_vm0, %v4808_v21, 0.0  ;;  %v4246_v56 = vadd.f32 %v8667_v40, %v9018_v29  ;;  %v5013_v6 = vsel %vm4826_vm0, %v4824_v48, 0.0 }
 0x4af   : > { %v4968_v4 = vsel %vm4826_vm0, %v4809_v23, 0.0  ;;  %v8879_v21 = vsub.s32 %v5124_v47, %v8467_v11 }
 0x4b0   : > { %4921 = vadd.xlane.f32.xlu0 %v4920_v19  ;;  %4984 = vadd.xlane.f32.xlu1 %v4983_v32  ;;  %v4689_v19 = vmax.f32 %v4591_v59, 0.0  ;;  %v4816_v32 = vmul.f32 %v4752_v15, %v4688_v0  ;;  %v4631_v41 = vadd.f32 %v5767_v9, %v4246_v56  ;;  %v4761_v9 = vld [vmem:[%s9002_s4 + $0x1f8] sm:$0xff] }
 0x4b2   : > { %v4817_v40 = vmul.f32 %v4753_v27, %v4689_v19  ;;  %v4697_v61 = vmax.f32 %v4631_v41, 0.0  ;;  %v4989_v7 = vsel %vm4826_vm0, %v4816_v32, 0.0  ;;  %v8896_v19 = vsub.s32 %v5131_v54, %v8467_v11 }
 0x4b4   : > { %4963 = vadd.xlane.f32.xlu0 %v4962_v39  ;;  %4945 = vadd.xlane.f32.xlu1 %v4944_v10  ;;  %v4825_v13 = vmul.f32 %v4761_v9, %v4697_v61  ;;  %v4992_v52 = vsel %vm4826_vm0, %v4817_v40, 0.0 }
 0x4b6   : > { %v5016_v37 = vsel %vm4826_vm0, %v4825_v13, 0.0  ;;  %vm5457_vm0 = vcmask 0  }
 0x4b8   : > { %5005 = vadd.xlane.f32.xlu0 %v5004_v51  ;;  %4987 = vadd.xlane.f32.xlu1 %v4986_v8 }
 0x4bc   : > { %4966 = vadd.xlane.f32.xlu0 %v4965_v2  ;;  %4969 = vadd.xlane.f32.xlu1 %v4968_v4 }
 0x4c0   : > { %5008 = vadd.xlane.f32.xlu0 %v5007_v5  ;;  %5011 = vadd.xlane.f32.xlu1 %v5010_v12 }
 0x4c1   : > { %v4925_v42 = vpop.xlane.xlu0 %4924 }
 0x4c2   : > { %v5258_v10 = vrot.slane %v4925_v42, %v8483_v16 }
 0x4c4   : > { %4990 = vadd.xlane.f32.xlu0 %v4989_v7  ;;  %5014 = vadd.xlane.f32.xlu1 %v5013_v6 }
 0x4c5   : > { %v4844_v55 = vpop.xlane.xlu0 %4843 }
 0x4c6   : > { %v5121_v60 = vrot.slane %v4844_v55, %v8849_v49 }
 0x4c8   : > { %v5123_v30 = vsel %vm5122_vm7, %v5121_v60, %v8653_v28  ;;  %4993 = vadd.xlane.f32.xlu0 %v4992_v52 }
 0x4c9   : > { %v4889_v62 = vpop.xlane.xlu0 %4888  ;;  %v4928_v39 = vpop.xlane.xlu1 %4927 }
 0x4ca   : > { %v5199_v57 = vrot.slane %v4889_v62, %v8626_v14  ;;  %v5262_v20 = vrot.slane %v4928_v39, %v8479_v34 }
 0x4cc   : > { %v5200_v1 = vsel %vm5115_vm6, %v5199_v57, %v8675_v31  ;;  %v5263_v63 = vsel %vm5094_vm3, %v5262_v20, %v5258_v10  ;;  %5017 = vadd.xlane.f32.xlu0 %v5016_v37 }
 0x4cd   : > { %v4868_v44 = vpop.xlane.xlu1 %4867 }
 0x4ce   : > { %v5165_v28 = vrot.slane %v4868_v44, %v8849_v49 }
 0x4d0   : > { %v5166_v53 = vsel %vm5122_vm7, %v5165_v28, %v8696_v22 }
 0x4d1   : > { %v4931_v35 = vpop.xlane.xlu0 %4930  ;;  %v4910_v26 = vpop.xlane.xlu1 %4909 }
 0x4d2   : > { %v5267_v51 = vrot.slane %v4931_v35, %v8499_v50  ;;  %v5233_v8 = vrot.slane %v4910_v26, %v8541_v33 }
 0x4d4   : > { %v8873_v58 = vsel %vm5101_vm4, %v5267_v51, %v5263_v63  ;;  %v5234_v31 = vsel %vm5108_vm5, %v5233_v8, %v8708_v36 }
 0x501   : > { %v4949_v43 = vpop.xlane.xlu1 %4948 }
 0x502   : > { %v5297_v59 = vrot.slane %v4949_v43, %v8483_v16 }
 0x505   : > { %v4847_v22 = vpop.xlane.xlu1 %4846 }
 0x506   : > { %v5128_v23 = vrot.slane %v4847_v22, %v8879_v21 }
 0x508   : > { %v5130_v38 = vsel %vm5129_vm8, %v5128_v23, %v5123_v30 }
 0x509   : > { %v4952_v3 = vpop.xlane.xlu0 %4951  ;;  %v4892_v45 = vpop.xlane.xlu1 %4891 }
 0x50a   : > { %v5301_v0 = vrot.slane %v4952_v3, %v8479_v34  ;;  %v5204_v60 = vrot.slane %v4892_v45, %v8849_v49 }
 0x50c   : > { %v8886_v36 = vsel %vm5094_vm3, %v5301_v0, %v5297_v59  ;;  %v5205_v62 = vsel %vm5122_vm7, %v5204_v60, %v5200_v1 }
 0x50d   : > { %v4871_v18 = vpop.xlane.xlu0 %4870  ;;  %v4934_v15 = vpop.xlane.xlu1 %4933 }
 0x50e   : > { %v5170_v17 = vrot.slane %v4871_v18, %v8879_v21  ;;  %v5272_v26 = vrot.slane %v4934_v15, %v8541_v33 }
 0x510   : > { %v5171_v46 = vsel %vm5129_vm8, %v5170_v17, %v5166_v53  ;;  %v5273_v59 = vsel %vm5108_vm5, %v5272_v26, %v8873_v58 }
 0x511   : > { %v4913_v2 = vpop.xlane.xlu0 %4912  ;;  %v8890_v4 = vpop.xlane.xlu1 %4972 }
 0x512   : > { %v5238_v44 = vrot.slane %v4913_v2, %v8626_v14 }
 0x514   : > { %v5239_v51 = vsel %vm5115_vm6, %v5238_v44, %v5234_v31 }
 0x515   : > { %v8893_v29 = vpop.xlane.xlu0 %4954  ;;  %v4850_v56 = vpop.xlane.xlu1 %4849 }
 0x516   : > { %v5135_v41 = vrot.slane %v4850_v56, %v8896_v19  ;;  %v5306_v56 = vrot.slane %v8893_v29, %v8499_v50 }
 0x518   : > { %v5137_v27 = vsel %vm5136_vm9, %v5135_v41, %v5130_v38 }
 0x519   : > { %v8898_v32 = vpop.xlane.xlu0 %4975  ;;  %v4895_v25 = vpop.xlane.xlu1 %4894 }
 0x51a   : > { %v5209_v13 = vrot.slane %v4895_v25, %v8879_v21 }
 0x51c   : > { %v5210_v10 = vsel %vm5129_vm8, %v5209_v13, %v5205_v62 }
 0x51d   : > { %v4874_v48 = vpop.xlane.xlu0 %4873  ;;  %v4937_v5 = vpop.xlane.xlu1 %4936 }
 0x51e   : > { %v5175_v12 = vrot.slane %v4874_v48, %v8896_v19  ;;  %v5277_v8 = vrot.slane %v4937_v5, %v8626_v14 }
 0x520   : > { %v5176_v24 = vsel %vm5136_vm9, %v5175_v12, %v5171_v46  ;;  %v5278_v0 = vsel %vm5115_vm6, %v5277_v8, %v5273_v59 }
 0x521   : > { %v5412_v42 = vsel %vm5411_vm10, %v5176_v24, %v5137_v27  ;;  %v4916_v40 = vpop.xlane.xlu0 %4915  ;;  %v8904_v61 = vpop.xlane.xlu1 %4978  ;;  %v5307_v24 = vsel %vm5101_vm4, %v5306_v56, %v8886_v36 }
 0x522   : > { %v5243_v35 = vrot.slane %v4916_v40, %v8849_v49 }
 0x524   : > { %v5244_v22 = vsel %vm5122_vm7, %v5243_v35, %v5239_v51 }
 0x525   : > { %v4958_v7 = vpop.xlane.xlu0 %4957  ;;  %v8906_v6 = vpop.xlane.xlu1 %4999 }
 0x526   : > { %v5311_v58 = vrot.slane %v4958_v7, %v8541_v33 }
 0x529   : > { %v8908_v9 = vpop.xlane.xlu0 %4996  ;;  %v4919_v55 = vpop.xlane.xlu1 %4918 }
 0x52a   : > { %v5248_v1 = vrot.slane %v4919_v55, %v8879_v21 }
 0x52c   : > { %v5249_v3 = vsel %vm5129_vm8, %v5248_v1, %v5244_v22  ;;  %v5379_v1 = vrot.slane %v8906_v6, %v8479_v34 }
 0x52d   : > { %v4898_v52 = vpop.xlane.xlu0 %4897  ;;  %v4961_v30 = vpop.xlane.xlu1 %4960 }
 0x52e   : > { %v5214_v39 = vrot.slane %v4898_v52, %v8896_v19  ;;  %v5316_v12 = vrot.slane %v4961_v30, %v8626_v14 }
 0x530   : > { %v5215_v57 = vsel %vm5136_vm9, %v5214_v39, %v5210_v10  ;;  %v5340_v10 = vrot.slane %v8898_v32, %v8479_v34 }
 0x531   : > { %v5414_v20 = vsel %vm5413_vm11, %v5215_v57, %v5412_v42  ;;  %v4940_v37 = vpop.xlane.xlu0 %4939  ;;  %v8916_v63 = vpop.xlane.xlu1 %5002  ;;  %v5312_v42 = vsel %vm5108_vm5, %v5311_v58, %v5307_v24  ;;  %v5345_v57 = vrot.slane %v8904_v61, %v8499_v50 }
 0x532   : > { %v5282_v23 = vrot.slane %v4940_v37, %v8849_v49  ;;  %v5317_v29 = vsel %vm5115_vm6, %v5316_v12, %v5312_v42  ;;  %v5336_v37 = vrot.slane %v8890_v4, %v8483_v16  ;;  %v5384_v44 = vrot.slane %v8916_v63, %v8499_v50 }
 0x534   : > { %v5283_v46 = vsel %vm5122_vm7, %v5282_v23, %v5278_v0  ;;  %v5341_v26 = vsel %vm5094_vm3, %v5340_v10, %v5336_v37 }
 0x535   : > { %v8919_v28 = vpop.xlane.xlu0 %4981  ;;  %v4943_v53 = vpop.xlane.xlu1 %4942  ;;  %v5346_v4 = vsel %vm5101_vm4, %v5345_v57, %v5341_v26 }
 0x536   : > { %v5287_v45 = vrot.slane %v4943_v53, %v8879_v21  ;;  %v5350_v53 = vrot.slane %v8919_v28, %v8541_v33 }
 0x538   : > { %v5288_v54 = vsel %vm5129_vm8, %v5287_v45, %v5283_v46  ;;  %v5351_v34 = vsel %vm5108_vm5, %v5350_v53, %v5346_v4 }
 0x539   : > { %v4922_v47 = vpop.xlane.xlu0 %4921  ;;  %v4985_v43 = vpop.xlane.xlu1 %4984 }
 0x53a   : > { %v5253_v38 = vrot.slane %v4922_v47, %v8896_v19  ;;  %v5355_v32 = vrot.slane %v4985_v43, %v8626_v14 }
 0x53c   : > { %v5254_v31 = vsel %vm5136_vm9, %v5253_v38, %v5249_v3 }
 0x53d   : > { %v5416_v18 = vsel %vm5415_vm12, %v5254_v31, %v5414_v20  ;;  %v4964_v15 = vpop.xlane.xlu0 %4963  ;;  %v4946_v17 = vpop.xlane.xlu1 %4945  ;;  %v5375_v20 = vrot.slane %v8908_v9, %v8483_v16 }
 0x53e   : > { %v5292_v2 = vrot.slane %v4946_v17, %v8896_v19  ;;  %v5321_v27 = vrot.slane %v4964_v15, %v8849_v49 }
 0x53f   : > { %v5380_v50 = vsel %vm5094_vm3, %v5379_v1, %v5375_v20 }
 0x540   : > { %v5293_v25 = vsel %vm5136_vm9, %v5292_v2, %v5288_v54  ;;  %v5322_v13 = vsel %vm5122_vm7, %v5321_v27, %v5317_v29  ;;  %v5385_v51 = vsel %vm5101_vm4, %v5384_v44, %v5380_v50 }
 0x541   : > { %v5418_v41 = vsel %vm5417_vm13, %v5293_v25, %v5416_v18  ;;  %v5006_v48 = vpop.xlane.xlu0 %5005  ;;  %v4988_v5 = vpop.xlane.xlu1 %4987 }
 0x542   : > { %v5389_v61 = vrot.slane %v5006_v48, %v8541_v33  ;;  %v5360_v9 = vrot.slane %v4988_v5, %v8849_v49  ;;  %v5356_v33 = vsel %vm5115_vm6, %v5355_v32, %v5351_v34 }
 0x544   : > { %v5390_v8 = vsel %vm5108_vm5, %v5389_v61, %v5385_v51  ;;  %v5361_v43 = vsel %vm5122_vm7, %v5360_v9, %v5356_v33 }
 0x545   : > { %v4967_v40 = vpop.xlane.xlu0 %4966  ;;  %v4970_v55 = vpop.xlane.xlu1 %4969 }
 0x546   : > { %v5326_v60 = vrot.slane %v4967_v40, %v8879_v21  ;;  %v5331_v7 = vrot.slane %v4970_v55, %v8896_v19 }
 0x548   : > { %v5327_v52 = vsel %vm5129_vm8, %v5326_v60, %v5322_v13 }
 0x549   : > { %v5332_v30 = vsel %vm5136_vm9, %v5331_v7, %v5327_v52  ;;  %v5009_v62 = vpop.xlane.xlu0 %5008  ;;  %v5012_v39 = vpop.xlane.xlu1 %5011 }
 0x54a   : > { %v5420_v36 = vsel %vm5419_vm14, %v5332_v30, %v5418_v41  ;;  %v5394_v16 = vrot.slane %v5009_v62, %v8626_v14  ;;  %v5399_v47 = vrot.slane %v5012_v39, %v8849_v49 }
 0x54c   : > { %v5395_v22 = vsel %vm5115_vm6, %v5394_v16, %v5390_v8 }
 0x54d   : > { %v4991_v35 = vpop.xlane.xlu0 %4990  ;;  %v5015_v28 = vpop.xlane.xlu1 %5014  ;;  %v5400_v59 = vsel %vm5122_vm7, %v5399_v47, %v5395_v22 }
 0x54e   : > { %v5365_v63 = vrot.slane %v4991_v35, %v8879_v21  ;;  %v5404_v23 = vrot.slane %v5015_v28, %v8879_v21 }
 0x550   : > { %v5366_v38 = vsel %vm5129_vm8, %v5365_v63, %v5361_v43  ;;  %v5405_v49 = vsel %vm5129_vm8, %v5404_v23, %v5400_v59 }
 0x551   : > { %v4994_v6 = vpop.xlane.xlu0 %4993 }
 0x552   : > { %v5370_v14 = vrot.slane %v4994_v6, %v8896_v19 }
 0x554   : > { %v5371_v3 = vsel %vm5136_vm9, %v5370_v14, %v5366_v38 }
 0x555   : > { %v5018_v45 = vpop.xlane.xlu0 %5017  ;;  %v5422_v18 = vsel %vm5421_vm15, %v5371_v3, %v5420_v36 }
 0x556   : > { %v5409_v31 = vrot.slane %v5018_v45, %v8896_v19  ;;  %v5447_v19 = vcvt.s32.f32 %v8467_v11 }
 0x558   : > { %v5410_v0 = vsel %vm5136_vm9, %v5409_v31, %v5405_v49 }
 0x559   : > { %v5424_v15 = vsel %vm5423_vm1, %v5410_v0, %v5422_v18 }
 0x55a   : > { %v5427_v17 = vsel %vm5426_vm2, %v5424_v15, 0.0 }
 0x55b   : > { %5428 = vadd.xlane.f32.xlu1 %v5427_v17 }
 0x5e4   : > { %v5429_v21 = vpop.xlane.xlu1 %5428 }
 0x5e5   : > { %v5430_v46 = vrot.slane %v5429_v21, 4 }
 0x5e7   : > { %v5431_v2 = vmax.f32 %v5429_v21, %v5430_v46 }
 0x5e9   : > { %v5432_v54 = vrot.slane %v5431_v2, 2 }
 0x5eb   : > { %v5433_v56 = vmax.f32 %v5431_v2, %v5432_v54 }
 0x5ed   : > { %v5434_v25 = vrot.slane %v5433_v56, 1 }
 0x5ef   : > { %v5435_v58 = vmax.f32 %v5433_v56, %v5434_v25 }
 0x5f1   : > { %v5436_v41 = vsub.f32 %v5429_v21, %v5435_v58 }
 0x5f3   : > { %v5437_v48 = vmul.f32 1.442695, %v5436_v41 }
 0x5f5   : > { %5844 = vpow2.f32 %v5437_v48 }
 0x602   : > { %v5845_v5 = vpop.eup %5844 }
 0x603   : > { %v5439_v12 = vrot.slane %v5845_v5, 4  ;;  %v5448_v27 = vmul.f32 %v5845_v5, %v5447_v19 }
 0x605   : > { %v5440_v24 = vadd.f32 %v5845_v5, %v5439_v12  ;;  %v5449_v40 = vrot.slane %v5448_v27, 4 }
 0x607   : > { %v5441_v42 = vrot.slane %v5440_v24, 2  ;;  %v5450_v60 = vadd.f32 %v5449_v40, %v5448_v27 }
 0x609   : > { %v5442_v55 = vadd.f32 %v5441_v42, %v5440_v24  ;;  %v5451_v13 = vrot.slane %v5450_v60, 2 }
 0x60b   : > { %v5443_v29 = vrot.slane %v5442_v55, 1  ;;  %v5452_v52 = vadd.f32 %v5451_v13, %v5450_v60 }
 0x60d   : > { %v5444_v7 = vadd.f32 %v5443_v29, %v5442_v55  ;;  %v5453_v30 = vrot.slane %v5452_v52, 1 }
 0x60f   : > { %5846 = vrcp.f32 %v5444_v7  ;;  %v5454_v62 = vadd.f32 %v5453_v30, %v5452_v52 }
 0x61c   : > { %v5847_v39 = vpop.eup %5846 }
 0x61d   : > { %v5456_v11 = vmul.f32 %v5847_v39, %v5454_v62 }
 0x61f   : > { %5458 = vst.msk [vmem:[%s240_s15] sm:$0x1] %vm5457_vm0, %v5456_v11 }
 0x620 PF: > { %s15_s18 = sadd.s32 1, %s5860_s18  }
 0x621   : > { %p12_p4 = scmp.ge.s32.totalorder %s15_s18, 4  }
 0x623   :  { %14 = sbr.rel (!%p12_p4) target bundleno = 1 (0x1), region = 83 }

</bundles_post_ra>
